<compile_context>
chip_gen: v7x
topology: tpu7x:2x2x1
jax: 0.10.0
libtpu: 0.0.40
codegen_flags: <defaults>
</compile_context>

<pallas_src>
import jax
import jax.numpy as jnp
from jax.experimental import pallas as pl
from jax.experimental.pallas import tpu as pltpu


N_POS = 4800      # spatial positions after the three stride-2 pools (60 x 80)
TILE_P = 1600     # spatial tile; multiple of 64, 4800 / 1600 = 3 steps per batch
N_RES = 16        # torch view(B,128,300,16).max(dim=2): 16 residues


def _leaky(x, slope=0.1):
    return jnp.where(x > 0, x, slope * x)


# ----------------------------------------------------------------------------
# Fused kernel: folded conv1-4 + conv5/conv6 (pointwise matmuls), running
# group-of-16 max across spatial tiles, FC head on the last tile.
# grid = (B, P // TILE_P); batch axis "parallel", spatial axis "arbitrary".
# ----------------------------------------------------------------------------
def fused_pnp_kernel(x_ref,
                     wf_ref, bf_ref, w5_ref, b5_ref, w6_ref, b6_ref,
                     wf1_ref, bf1_ref, wf2_ref, bf2_ref, wq_ref, bq_ref,
                     out_ref, mx_ref):
    bf16 = jnp.bfloat16
    f32 = jnp.float32
    k = pl.program_id(1)

    @pl.when(k == 0)
    def _():
        mx_ref[...] = jnp.full((N_RES, 128), -jnp.inf, f32)

    # ---- conv1..conv4 folded into one (TILE_P, nIn_pad)x(nIn_pad, 128) matmul
    # (f32, tiny K), leaky applied afterwards == act(conv4(conv3(conv2(conv1)))).
    h = x_ref[0]                                                   # (TILE_P, nIn_pad)
    h = _leaky(jnp.dot(h, wf_ref[...], preferred_element_type=f32) + bf_ref[...])

    # ---- conv5 (leaky) / conv6 (no act): bf16 MXU, f32 accumulate -----------
    h = _leaky(jnp.dot(h.astype(bf16), w5_ref[...], preferred_element_type=f32)
               + b5_ref[...])
    h = jnp.dot(h.astype(bf16), w6_ref[...], preferred_element_type=f32) + b6_ref[...]

    # ---- group-of-16 max within this tile (two-stage tree) ------------------
    # Row index p = s*16 + t; both reshapes only split the sublane axis on
    # (8,128)-tile boundaries, so they are layout-free.
    part = jnp.max(h.reshape(TILE_P // 64, 64, 128), axis=0)       # (64, 128)
    tile_max = jnp.max(part.reshape(4, N_RES, 128), axis=0)        # (16, 128) [t, c]
    mx_ref[...] = jnp.maximum(mx_ref[...], tile_max)

    # ---- FC head: fc1 / fc2 / fc_qt, only after the last spatial tile -------
    @pl.when(k == pl.num_programs(1) - 1)
    def _():
        m = mx_ref[...].astype(bf16)                               # (16, 128), cast once
        # torch feature index is c*16 + t, i.e. m[t, c]; wf1_ref[t] is fc1's
        # (128, 512) slab for residue t.  16 independent matmuls, tree-summed.
        parts = [jnp.dot(m[t:t + 1, :], wf1_ref[t], preferred_element_type=f32)
                 for t in range(N_RES)]
        while len(parts) > 1:
            parts = [parts[i] + parts[i + 1] for i in range(0, len(parts), 2)]
        g = _leaky(parts[0] + bf1_ref[...])                        # (1, 512)
        g = _leaky(jnp.dot(g.astype(bf16), wf2_ref[...], preferred_element_type=f32)
                   + bf2_ref[...])                                 # (1, 256)
        q = jnp.dot(g.astype(bf16), wq_ref[...], preferred_element_type=f32) \
            + bq_ref[...]                                          # (1, 128); 7 valid
        out_ref[0] = q


def simple_pnp_forward(x, p, batch_size):
    B, nIn, H, W = x.shape
    assert B == batch_size
    f32 = jnp.float32
    bf16 = jnp.bfloat16

    # MaxPool2d(k=1, s=2) three times interleaved with 1x1 convs == a ::8
    # subsample, which commutes in front of the pointwise convs.
    xs = x[:, :, ::8, ::8]
    P = xs.shape[2] * xs.shape[3]
    assert P == N_POS, "forward hard-codes 4800 spatial positions after pooling"
    assert P % TILE_P == 0 and TILE_P % 64 == 0

    # Kernel input: (B, P, nIn_pad) f32, channel dim zero-padded to a multiple
    # of 8 so the folded matmul's K dim is sublane-aligned.  ~77 KB/batch HBM.
    nIn_pad = max(8, ((nIn + 7) // 8) * 8)
    xs = jnp.transpose(xs.reshape(B, nIn, P), (0, 2, 1))            # (B, P, nIn)
    x_in = jnp.zeros((B, P, nIn_pad), f32).at[:, :, :nIn].set(xs)

    # Fold conv1..conv4 (affine chain; leaky is applied in-kernel afterwards).
    w_fold = p["w4"] @ p["w3"] @ p["w2"] @ p["w1"]                  # (128, nIn)
    b_fold = (p["w4"] @ (p["w3"] @ (p["w2"] @ p["b1"] + p["b2"]) + p["b3"])
              + p["b4"])                                            # (128,)
    wf = jnp.zeros((nIn_pad, 128), f32).at[:nIn, :].set(w_fold.T)

    # fc1 weight regrouped: wf1[t, c, o] = fc1_w[o, c*16 + t].
    wf1 = p["fc1_w"].reshape(512, 128, N_RES).transpose(2, 1, 0).astype(bf16)

    # fc_qt padded to 128 output lanes (lane-dense store; sliced to 7 below).
    wq_pad = jnp.zeros((256, 128), f32).at[:, :7].set(p["fcqt_w"].T)
    bq_pad = jnp.zeros((1, 128), f32).at[:, :7].set(p["fcqt_b"])

    weight_args = [
        wf, b_fold.reshape(1, 128),
        jnp.transpose(p["w5"]).astype(bf16), p["b5"].reshape(1, 128),
        jnp.transpose(p["w6"]).astype(bf16), p["b6"].reshape(1, 128),
        wf1, p["fc1_b"].reshape(1, 512),
        jnp.transpose(p["fc2_w"]).astype(bf16), p["fc2_b"].reshape(1, 256),
        wq_pad.astype(bf16), bq_pad,
    ]

    def build(use_pipeline_mode):
        def wspec(a):
            nd = a.ndim
            if use_pipeline_mode:
                # Constant index map -> weights never change; single-buffer them.
                return pl.BlockSpec(a.shape, lambda *_: (0,) * nd,
                                    pipeline_mode=pl.Buffered(1))
            return pl.BlockSpec(a.shape, lambda *_: (0,) * nd)

        if use_pipeline_mode:
            x_spec = pl.BlockSpec((1, TILE_P, nIn_pad), lambda b, k: (b, k, 0),
                                  pipeline_mode=pl.Buffered(3))
        else:
            x_spec = pl.BlockSpec((1, TILE_P, nIn_pad), lambda b, k: (b, k, 0))

        return pl.pallas_call(
            fused_pnp_kernel,
            out_shape=jax.ShapeDtypeStruct((B, 1, 128), jnp.float32),
            grid_spec=pltpu.PrefetchScalarGridSpec(
                num_scalar_prefetch=0,
                grid=(B, P // TILE_P),
                in_specs=[x_spec] + [wspec(a) for a in weight_args],
                out_specs=pl.BlockSpec((1, 1, 128), lambda b, k: (b, 0, 0)),
                scratch_shapes=[pltpu.VMEM((N_RES, 128), jnp.float32)]),
            compiler_params=pltpu.CompilerParams(
                dimension_semantics=("parallel", "arbitrary"),
                vmem_limit_bytes=32 * 1024 * 1024),
        )

    try:
        out = build(True)(x_in, *weight_args)
        out = jax.block_until_ready(out)
    except Exception:
        # Fallback for Pallas builds without BlockSpec(pipeline_mode=...):
        # identical semantics, default double buffering.
        out = build(False)(x_in, *weight_args)

    return out.reshape(B, 128)[:, :7]


# ----------------------------------------------------------------------------
# Deterministic parameter init (same shapes as the torch module; PyTorch-style
# uniform(-1/sqrt(fan_in), 1/sqrt(fan_in)); (out, in) weight convention).
# ----------------------------------------------------------------------------
def init_params(key, nIn):
    ks = jax.random.split(key, 9)

    def lin(k, fan_in, fan_out):
        kw, kb = jax.random.split(k)
        bound = 1.0 / float(fan_in) ** 0.5
        w = jax.random.uniform(kw, (fan_out, fan_in), jnp.float32, -bound, bound)
        b = jax.random.uniform(kb, (fan_out,), jnp.float32, -bound, bound)
        return w, b

    p = {}
    p["w1"], p["b1"] = lin(ks[0], nIn, 128)
    p["w2"], p["b2"] = lin(ks[1], 128, 128)
    p["w3"], p["b3"] = lin(ks[2], 128, 128)
    p["w4"], p["b4"] = lin(ks[3], 128, 128)
    p["w5"], p["b5"] = lin(ks[4], 128, 128)
    p["w6"], p["b6"] = lin(ks[5], 128, 128)
    p["fc1_w"], p["fc1_b"] = lin(ks[6], 2048, 512)
    p["fc2_w"], p["fc2_b"] = lin(ks[7], 512, 256)
    p["fcqt_w"], p["fcqt_b"] = lin(ks[8], 256, 7)
    return p


# ----------------------------------------------------------------------------
# Pure-JAX reference (follows the torch forward literally, incl. full-res convs
# and explicit MaxPool2d(k=1, s=2) subsampling) for a correctness check.
# ----------------------------------------------------------------------------
def reference_forward(x, p):
    B = x.shape[0]
    hp = jax.lax.Precision.HIGHEST

    def conv1x1(h, w, b):
        y = jnp.einsum("oc,bc...->bo...", w, h, precision=hp)
        return y + b.reshape((1, -1) + (1,) * (h.ndim - 2))

    def lk(v):
        return jnp.where(v > 0, v, 0.1 * v)

    h = conv1x1(x, p["w1"], p["b1"])[:, :, ::2, ::2]
    h = conv1x1(h, p["w2"], p["b2"])[:, :, ::2, ::2]
    h = conv1x1(h, p["w3"], p["b3"])[:, :, ::2, ::2]
    h = h.reshape(B, 128, 4800)
    h = lk(conv1x1(h, p["w4"], p["b4"]))
    h = lk(conv1x1(h, p["w5"], p["b5"]))
    h = conv1x1(h, p["w6"], p["b6"])
    h = h.reshape(B, 128, 300, 16).max(axis=2).reshape(B, 2048)
    h = lk(jnp.einsum("bi,oi->bo", h, p["fc1_w"], precision=hp) + p["fc1_b"])
    h = lk(jnp.einsum("bi,oi->bo", h, p["fc2_w"], precision=hp) + p["fc2_b"])
    return jnp.einsum("bi,oi->bo", h, p["fcqt_w"], precision=hp) + p["fcqt_b"]


if __name__ == "__main__":
    B, nIn, H, W = 2, 4, 480, 640  # 480x640 forced by the hard-coded 4800/2048
    key = jax.random.PRNGKey(0)
    kx, kp = jax.random.split(key)
    x = jax.random.normal(kx, (B, nIn, H, W), dtype=jnp.float32)
    params = init_params(kp, nIn)

    qt = simple_pnp_forward(x, params, batch_size=B)
    qt = jax.block_until_ready(qt)
    assert qt.shape == (B, 7)

    ref = reference_forward(x, params)
    err = float(jnp.max(jnp.abs(qt - ref)))
    assert err < 5e-2, f"mismatch vs reference: {err}"

    print("KERNEL_OK")
</pallas_src>

<mosaic_0001>
module attributes {stable_mosaic.version = 11 : i64} {
  func.func @fused_pnp_kernel(%arg0: i32, %arg1: i32, %arg2: memref<1x1600x8xf32, #tpu.memory_space<vmem>>, %arg3: memref<8x128xf32, #tpu.memory_space<vmem>>, %arg4: memref<1x128xf32, #tpu.memory_space<vmem>>, %arg5: memref<128x128xbf16, #tpu.memory_space<vmem>>, %arg6: memref<1x128xf32, #tpu.memory_space<vmem>>, %arg7: memref<128x128xbf16, #tpu.memory_space<vmem>>, %arg8: memref<1x128xf32, #tpu.memory_space<vmem>>, %arg9: memref<16x128x512xbf16, #tpu.memory_space<vmem>>, %arg10: memref<1x512xf32, #tpu.memory_space<vmem>>, %arg11: memref<512x256xbf16, #tpu.memory_space<vmem>>, %arg12: memref<1x256xf32, #tpu.memory_space<vmem>>, %arg13: memref<256x128xbf16, #tpu.memory_space<vmem>>, %arg14: memref<1x128xf32, #tpu.memory_space<vmem>>, %arg15: memref<1x1x128xf32, #tpu.memory_space<vmem>>, %arg16: memref<16x128xf32, #tpu.memory_space<vmem>>) attributes {dimension_semantics = [#tpu.dimension_semantics<parallel>, #tpu.dimension_semantics<arbitrary>], iteration_bounds = array<i64: 2, 3>, scalar_prefetch = 0 : i64, scratch_operands = 1 : i64, tpu.core_type = #tpu.core_type<tc>, window_params = [{transform_indices = @transform_0, window_bounds = array<i64: 1, 1600, 8>}, {pipeline_mode = #tpu.pipeline_mode<synchronous>, transform_indices = @transform_1, window_bounds = array<i64: 8, 128>}, {pipeline_mode = #tpu.pipeline_mode<synchronous>, transform_indices = @transform_2, window_bounds = array<i64: 1, 128>}, {pipeline_mode = #tpu.pipeline_mode<synchronous>, transform_indices = @transform_3, window_bounds = array<i64: 128, 128>}, {pipeline_mode = #tpu.pipeline_mode<synchronous>, transform_indices = @transform_4, window_bounds = array<i64: 1, 128>}, {pipeline_mode = #tpu.pipeline_mode<synchronous>, transform_indices = @transform_5, window_bounds = array<i64: 128, 128>}, {pipeline_mode = #tpu.pipeline_mode<synchronous>, transform_indices = @transform_6, window_bounds = array<i64: 1, 128>}, {pipeline_mode = #tpu.pipeline_mode<synchronous>, transform_indices = @transform_7, window_bounds = array<i64: 16, 128, 512>}, {pipeline_mode = #tpu.pipeline_mode<synchronous>, transform_indices = @transform_8, window_bounds = array<i64: 1, 512>}, {pipeline_mode = #tpu.pipeline_mode<synchronous>, transform_indices = @transform_9, window_bounds = array<i64: 512, 256>}, {pipeline_mode = #tpu.pipeline_mode<synchronous>, transform_indices = @transform_10, window_bounds = array<i64: 1, 256>}, {pipeline_mode = #tpu.pipeline_mode<synchronous>, transform_indices = @transform_11, window_bounds = array<i64: 256, 128>}, {pipeline_mode = #tpu.pipeline_mode<synchronous>, transform_indices = @transform_12, window_bounds = array<i64: 1, 128>}, {transform_indices = @transform_13, window_bounds = array<i64: 1, 1, 128>}]} {
    %c0_i32 = arith.constant 0 : i32
    %0 = arith.cmpi eq, %arg1, %c0_i32 : i32
    %1 = arith.extui %0 : i1 to i32
    %c0_i32_0 = arith.constant 0 : i32
    %2 = arith.cmpi ne, %1, %c0_i32_0 : i32
    scf.if %2 {
      %cst_28 = arith.constant 0xFF800000 : f32
      %42 = vector.broadcast %cst_28 : f32 to vector<16x128xf32>
      %c0_29 = arith.constant 0 : index
      %c0_30 = arith.constant 0 : index
      %43 = vector.load %arg16[%c0_29, %c0_30] : memref<16x128xf32, #tpu.memory_space<vmem>>, vector<16x128xf32>
      tpu.vector_store %arg16[%c0_29, %c0_30], %42 {strides = array<i32>} : memref<16x128xf32, #tpu.memory_space<vmem>>, vector<16x128xf32>,
    } else {
    }
    %c0 = arith.constant 0 : index
    %c0_1 = arith.constant 0 : index
    %c0_2 = arith.constant 0 : index
    %3 = vector.load %arg2[%c0, %c0_1, %c0_2] : memref<1x1600x8xf32, #tpu.memory_space<vmem>>, vector<1x1600x8xf32>
    %4 = vector.shape_cast %3 : vector<1x1600x8xf32> to vector<1600x8xf32>
    %c0_3 = arith.constant 0 : index
    %c0_4 = arith.constant 0 : index
    %5 = vector.load %arg3[%c0_3, %c0_4] : memref<8x128xf32, #tpu.memory_space<vmem>>, vector<8x128xf32>
    %cst = arith.constant dense<0.000000e+00> : vector<1600x128xf32>
    %6 = tpu.matmul %4, %5, %cst {dimension_numbers = #tpu.dot_dimension_numbers<[1], [0], [0], [1], [0, 0, 1, 1], [], []>} : vector<1600x8xf32>, vector<8x128xf32>, vector<1600x128xf32> -> vector<1600x128xf32>
    %c0_5 = arith.constant 0 : index
    %c0_6 = arith.constant 0 : index
    %7 = vector.load %arg4[%c0_5, %c0_6] : memref<1x128xf32, #tpu.memory_space<vmem>>, vector<1x128xf32>
    %8 = vector.broadcast %7 : vector<1x128xf32> to vector<1600x128xf32>
    %9 = arith.addf %6, %8 : vector<1600x128xf32>
    %cst_7 = arith.constant 0.000000e+00 : f32
    %10 = vector.broadcast %cst_7 : f32 to vector<1600x128xf32>
    %11 = arith.cmpf ogt, %9, %10 : vector<1600x128xf32>
    %cst_8 = arith.constant 1.000000e-01 : f32
    %12 = vector.broadcast %cst_8 : f32 to vector<1600x128xf32>
    %13 = arith.mulf %12, %9 : vector<1600x128xf32>
    %14 = arith.select %11, %9, %13 : vector<1600x128xi1>, vector<1600x128xf32>
    %15 = arith.truncf %14 : vector<1600x128xf32> to vector<1600x128xbf16>
    %c0_9 = arith.constant 0 : index
    %c0_10 = arith.constant 0 : index
    %16 = vector.load %arg5[%c0_9, %c0_10] : memref<128x128xbf16, #tpu.memory_space<vmem>>, vector<128x128xbf16>
    %cst_11 = arith.constant dense<0.000000e+00> : vector<1600x128xf32>
    %17 = tpu.matmul %15, %16, %cst_11 {dimension_numbers = #tpu.dot_dimension_numbers<[1], [0], [0], [1], [0, 0, 1, 1], [], []>} : vector<1600x128xbf16>, vector<128x128xbf16>, vector<1600x128xf32> -> vector<1600x128xf32>
    %c0_12 = arith.constant 0 : index
    %c0_13 = arith.constant 0 : index
    %18 = vector.load %arg6[%c0_12, %c0_13] : memref<1x128xf32, #tpu.memory_space<vmem>>, vector<1x128xf32>
    %19 = vector.broadcast %18 : vector<1x128xf32> to vector<1600x128xf32>
    %20 = arith.addf %17, %19 : vector<1600x128xf32>
    %cst_14 = arith.constant 0.000000e+00 : f32
    %21 = vector.broadcast %cst_14 : f32 to vector<1600x128xf32>
    %22 = arith.cmpf ogt, %20, %21 : vector<1600x128xf32>
    %cst_15 = arith.constant 1.000000e-01 : f32
    %23 = vector.broadcast %cst_15 : f32 to vector<1600x128xf32>
    %24 = arith.mulf %23, %20 : vector<1600x128xf32>
    %25 = arith.select %22, %20, %24 : vector<1600x128xi1>, vector<1600x128xf32>
    %26 = arith.truncf %25 : vector<1600x128xf32> to vector<1600x128xbf16>
    %c0_16 = arith.constant 0 : index
    %c0_17 = arith.constant 0 : index
    %27 = vector.load %arg7[%c0_16, %c0_17] : memref<128x128xbf16, #tpu.memory_space<vmem>>, vector<128x128xbf16>
    %cst_18 = arith.constant dense<0.000000e+00> : vector<1600x128xf32>
    %28 = tpu.matmul %26, %27, %cst_18 {dimension_numbers = #tpu.dot_dimension_numbers<[1], [0], [0], [1], [0, 0, 1, 1], [], []>} : vector<1600x128xbf16>, vector<128x128xbf16>, vector<1600x128xf32> -> vector<1600x128xf32>
    %c0_19 = arith.constant 0 : index
    %c0_20 = arith.constant 0 : index
    %29 = vector.load %arg8[%c0_19, %c0_20] : memref<1x128xf32, #tpu.memory_space<vmem>>, vector<1x128xf32>
    %30 = vector.broadcast %29 : vector<1x128xf32> to vector<1600x128xf32>
    %31 = arith.addf %28, %30 : vector<1600x128xf32>
    %32 = vector.shape_cast %31 : vector<1600x128xf32> to vector<25x64x128xf32>
    %cst_21 = arith.constant dense<0xFF800000> : vector<64x128xf32>
    %33 = vector.multi_reduction <maximumf>, %32, %cst_21 [0] : vector<25x64x128xf32> to vector<64x128xf32>
    %34 = vector.shape_cast %33 : vector<64x128xf32> to vector<4x16x128xf32>
    %cst_22 = arith.constant dense<0xFF800000> : vector<16x128xf32>
    %35 = vector.multi_reduction <maximumf>, %34, %cst_22 [0] : vector<4x16x128xf32> to vector<16x128xf32>
    %c0_23 = arith.constant 0 : index
    %c0_24 = arith.constant 0 : index
    %36 = vector.load %arg16[%c0_23, %c0_24] : memref<16x128xf32, #tpu.memory_space<vmem>>, vector<16x128xf32>
    %37 = arith.maximumf %36, %35 : vector<16x128xf32>
    %c0_25 = arith.constant 0 : index
    %c0_26 = arith.constant 0 : index
    %38 = vector.load %arg16[%c0_25, %c0_26] : memref<16x128xf32, #tpu.memory_space<vmem>>, vector<16x128xf32>
    tpu.vector_store %arg16[%c0_25, %c0_26], %37 {strides = array<i32>} : memref<16x128xf32, #tpu.memory_space<vmem>>, vector<16x128xf32>,
    %c2_i32 = arith.constant 2 : i32
    %39 = arith.cmpi eq, %arg1, %c2_i32 : i32
    %40 = arith.extui %39 : i1 to i32
    %c0_i32_27 = arith.constant 0 : i32
    %41 = arith.cmpi ne, %40, %c0_i32_27 : i32
    scf.if %41 {
      %c0_28 = arith.constant 0 : index
      %c0_29 = arith.constant 0 : index
      %42 = vector.load %arg16[%c0_28, %c0_29] : memref<16x128xf32, #tpu.memory_space<vmem>>, vector<16x128xf32>
      %43 = arith.truncf %42 : vector<16x128xf32> to vector<16x128xbf16>
      %44 = vector.extract_strided_slice %43 {offsets = [0, 0], sizes = [1, 128], strides = [1, 1]} : vector<16x128xbf16> to vector<1x128xbf16>
      %c0_30 = arith.constant 0 : index
      %c0_31 = arith.constant 0 : index
      %c0_32 = arith.constant 0 : index
      %45 = vector.load %arg9[%c0_30, %c0_31, %c0_32] : memref<16x128x512xbf16, #tpu.memory_space<vmem>>, vector<1x128x512xbf16>
      %46 = vector.shape_cast %45 : vector<1x128x512xbf16> to vector<128x512xbf16>
      %cst_33 = arith.constant dense<0.000000e+00> : vector<1x512xf32>
      %47 = tpu.matmul %44, %46, %cst_33 {dimension_numbers = #tpu.dot_dimension_numbers<[1], [0], [0], [1], [0, 0, 1, 1], [], []>} : vector<1x128xbf16>, vector<128x512xbf16>, vector<1x512xf32> -> vector<1x512xf32>
      %48 = vector.extract_strided_slice %43 {offsets = [1, 0], sizes = [1, 128], strides = [1, 1]} : vector<16x128xbf16> to vector<1x128xbf16>
      %c1 = arith.constant 1 : index
      %c0_34 = arith.constant 0 : index
      %c0_35 = arith.constant 0 : index
      %49 = vector.load %arg9[%c1, %c0_34, %c0_35] : memref<16x128x512xbf16, #tpu.memory_space<vmem>>, vector<1x128x512xbf16>
      %50 = vector.shape_cast %49 : vector<1x128x512xbf16> to vector<128x512xbf16>
      %cst_36 = arith.constant dense<0.000000e+00> : vector<1x512xf32>
      %51 = tpu.matmul %48, %50, %cst_36 {dimension_numbers = #tpu.dot_dimension_numbers<[1], [0], [0], [1], [0, 0, 1, 1], [], []>} : vector<1x128xbf16>, vector<128x512xbf16>, vector<1x512xf32> -> vector<1x512xf32>
      %52 = vector.extract_strided_slice %43 {offsets = [2, 0], sizes = [1, 128], strides = [1, 1]} : vector<16x128xbf16> to vector<1x128xbf16>
      %c2 = arith.constant 2 : index
      %c0_37 = arith.constant 0 : index
      %c0_38 = arith.constant 0 : index
      %53 = vector.load %arg9[%c2, %c0_37, %c0_38] : memref<16x128x512xbf16, #tpu.memory_space<vmem>>, vector<1x128x512xbf16>
      %54 = vector.shape_cast %53 : vector<1x128x512xbf16> to vector<128x512xbf16>
      %cst_39 = arith.constant dense<0.000000e+00> : vector<1x512xf32>
      %55 = tpu.matmul %52, %54, %cst_39 {dimension_numbers = #tpu.dot_dimension_numbers<[1], [0], [0], [1], [0, 0, 1, 1], [], []>} : vector<1x128xbf16>, vector<128x512xbf16>, vector<1x512xf32> -> vector<1x512xf32>
      %56 = vector.extract_strided_slice %43 {offsets = [3, 0], sizes = [1, 128], strides = [1, 1]} : vector<16x128xbf16> to vector<1x128xbf16>
      %c3 = arith.constant 3 : index
      %c0_40 = arith.constant 0 : index
      %c0_41 = arith.constant 0 : index
      %57 = vector.load %arg9[%c3, %c0_40, %c0_41] : memref<16x128x512xbf16, #tpu.memory_space<vmem>>, vector<1x128x512xbf16>
      %58 = vector.shape_cast %57 : vector<1x128x512xbf16> to vector<128x512xbf16>
      %cst_42 = arith.constant dense<0.000000e+00> : vector<1x512xf32>
      %59 = tpu.matmul %56, %58, %cst_42 {dimension_numbers = #tpu.dot_dimension_numbers<[1], [0], [0], [1], [0, 0, 1, 1], [], []>} : vector<1x128xbf16>, vector<128x512xbf16>, vector<1x512xf32> -> vector<1x512xf32>
      %60 = vector.extract_strided_slice %43 {offsets = [4, 0], sizes = [1, 128], strides = [1, 1]} : vector<16x128xbf16> to vector<1x128xbf16>
      %c4 = arith.constant 4 : index
      %c0_43 = arith.constant 0 : index
      %c0_44 = arith.constant 0 : index
      %61 = vector.load %arg9[%c4, %c0_43, %c0_44] : memref<16x128x512xbf16, #tpu.memory_space<vmem>>, vector<1x128x512xbf16>
      %62 = vector.shape_cast %61 : vector<1x128x512xbf16> to vector<128x512xbf16>
      %cst_45 = arith.constant dense<0.000000e+00> : vector<1x512xf32>
      %63 = tpu.matmul %60, %62, %cst_45 {dimension_numbers = #tpu.dot_dimension_numbers<[1], [0], [0], [1], [0, 0, 1, 1], [], []>} : vector<1x128xbf16>, vector<128x512xbf16>, vector<1x512xf32> -> vector<1x512xf32>
      %64 = vector.extract_strided_slice %43 {offsets = [5, 0], sizes = [1, 128], strides = [1, 1]} : vector<16x128xbf16> to vector<1x128xbf16>
      %c5 = arith.constant 5 : index
      %c0_46 = arith.constant 0 : index
      %c0_47 = arith.constant 0 : index
      %65 = vector.load %arg9[%c5, %c0_46, %c0_47] : memref<16x128x512xbf16, #tpu.memory_space<vmem>>, vector<1x128x512xbf16>
      %66 = vector.shape_cast %65 : vector<1x128x512xbf16> to vector<128x512xbf16>
      %cst_48 = arith.constant dense<0.000000e+00> : vector<1x512xf32>
      %67 = tpu.matmul %64, %66, %cst_48 {dimension_numbers = #tpu.dot_dimension_numbers<[1], [0], [0], [1], [0, 0, 1, 1], [], []>} : vector<1x128xbf16>, vector<128x512xbf16>, vector<1x512xf32> -> vector<1x512xf32>
      %68 = vector.extract_strided_slice %43 {offsets = [6, 0], sizes = [1, 128], strides = [1, 1]} : vector<16x128xbf16> to vector<1x128xbf16>
      %c6 = arith.constant 6 : index
      %c0_49 = arith.constant 0 : index
      %c0_50 = arith.constant 0 : index
      %69 = vector.load %arg9[%c6, %c0_49, %c0_50] : memref<16x128x512xbf16, #tpu.memory_space<vmem>>, vector<1x128x512xbf16>
      %70 = vector.shape_cast %69 : vector<1x128x512xbf16> to vector<128x512xbf16>
      %cst_51 = arith.constant dense<0.000000e+00> : vector<1x512xf32>
      %71 = tpu.matmul %68, %70, %cst_51 {dimension_numbers = #tpu.dot_dimension_numbers<[1], [0], [0], [1], [0, 0, 1, 1], [], []>} : vector<1x128xbf16>, vector<128x512xbf16>, vector<1x512xf32> -> vector<1x512xf32>
      %72 = vector.extract_strided_slice %43 {offsets = [7, 0], sizes = [1, 128], strides = [1, 1]} : vector<16x128xbf16> to vector<1x128xbf16>
      %c7 = arith.constant 7 : index
      %c0_52 = arith.constant 0 : index
      %c0_53 = arith.constant 0 : index
      %73 = vector.load %arg9[%c7, %c0_52, %c0_53] : memref<16x128x512xbf16, #tpu.memory_space<vmem>>, vector<1x128x512xbf16>
      %74 = vector.shape_cast %73 : vector<1x128x512xbf16> to vector<128x512xbf16>
      %cst_54 = arith.constant dense<0.000000e+00> : vector<1x512xf32>
      %75 = tpu.matmul %72, %74, %cst_54 {dimension_numbers = #tpu.dot_dimension_numbers<[1], [0], [0], [1], [0, 0, 1, 1], [], []>} : vector<1x128xbf16>, vector<128x512xbf16>, vector<1x512xf32> -> vector<1x512xf32>
      %76 = vector.extract_strided_slice %43 {offsets = [8, 0], sizes = [1, 128], strides = [1, 1]} : vector<16x128xbf16> to vector<1x128xbf16>
      %c8 = arith.constant 8 : index
      %c0_55 = arith.constant 0 : index
      %c0_56 = arith.constant 0 : index
      %77 = vector.load %arg9[%c8, %c0_55, %c0_56] : memref<16x128x512xbf16, #tpu.memory_space<vmem>>, vector<1x128x512xbf16>
      %78 = vector.shape_cast %77 : vector<1x128x512xbf16> to vector<128x512xbf16>
      %cst_57 = arith.constant dense<0.000000e+00> : vector<1x512xf32>
      %79 = tpu.matmul %76, %78, %cst_57 {dimension_numbers = #tpu.dot_dimension_numbers<[1], [0], [0], [1], [0, 0, 1, 1], [], []>} : vector<1x128xbf16>, vector<128x512xbf16>, vector<1x512xf32> -> vector<1x512xf32>
      %80 = vector.extract_strided_slice %43 {offsets = [9, 0], sizes = [1, 128], strides = [1, 1]} : vector<16x128xbf16> to vector<1x128xbf16>
      %c9 = arith.constant 9 : index
      %c0_58 = arith.constant 0 : index
      %c0_59 = arith.constant 0 : index
      %81 = vector.load %arg9[%c9, %c0_58, %c0_59] : memref<16x128x512xbf16, #tpu.memory_space<vmem>>, vector<1x128x512xbf16>
      %82 = vector.shape_cast %81 : vector<1x128x512xbf16> to vector<128x512xbf16>
      %cst_60 = arith.constant dense<0.000000e+00> : vector<1x512xf32>
      %83 = tpu.matmul %80, %82, %cst_60 {dimension_numbers = #tpu.dot_dimension_numbers<[1], [0], [0], [1], [0, 0, 1, 1], [], []>} : vector<1x128xbf16>, vector<128x512xbf16>, vector<1x512xf32> -> vector<1x512xf32>
      %84 = vector.extract_strided_slice %43 {offsets = [10, 0], sizes = [1, 128], strides = [1, 1]} : vector<16x128xbf16> to vector<1x128xbf16>
      %c10 = arith.constant 10 : index
      %c0_61 = arith.constant 0 : index
      %c0_62 = arith.constant 0 : index
      %85 = vector.load %arg9[%c10, %c0_61, %c0_62] : memref<16x128x512xbf16, #tpu.memory_space<vmem>>, vector<1x128x512xbf16>
      %86 = vector.shape_cast %85 : vector<1x128x512xbf16> to vector<128x512xbf16>
      %cst_63 = arith.constant dense<0.000000e+00> : vector<1x512xf32>
      %87 = tpu.matmul %84, %86, %cst_63 {dimension_numbers = #tpu.dot_dimension_numbers<[1], [0], [0], [1], [0, 0, 1, 1], [], []>} : vector<1x128xbf16>, vector<128x512xbf16>, vector<1x512xf32> -> vector<1x512xf32>
      %88 = vector.extract_strided_slice %43 {offsets = [11, 0], sizes = [1, 128], strides = [1, 1]} : vector<16x128xbf16> to vector<1x128xbf16>
      %c11 = arith.constant 11 : index
      %c0_64 = arith.constant 0 : index
      %c0_65 = arith.constant 0 : index
      %89 = vector.load %arg9[%c11, %c0_64, %c0_65] : memref<16x128x512xbf16, #tpu.memory_space<vmem>>, vector<1x128x512xbf16>
      %90 = vector.shape_cast %89 : vector<1x128x512xbf16> to vector<128x512xbf16>
      %cst_66 = arith.constant dense<0.000000e+00> : vector<1x512xf32>
      %91 = tpu.matmul %88, %90, %cst_66 {dimension_numbers = #tpu.dot_dimension_numbers<[1], [0], [0], [1], [0, 0, 1, 1], [], []>} : vector<1x128xbf16>, vector<128x512xbf16>, vector<1x512xf32> -> vector<1x512xf32>
      %92 = vector.extract_strided_slice %43 {offsets = [12, 0], sizes = [1, 128], strides = [1, 1]} : vector<16x128xbf16> to vector<1x128xbf16>
      %c12 = arith.constant 12 : index
      %c0_67 = arith.constant 0 : index
      %c0_68 = arith.constant 0 : index
      %93 = vector.load %arg9[%c12, %c0_67, %c0_68] : memref<16x128x512xbf16, #tpu.memory_space<vmem>>, vector<1x128x512xbf16>
      %94 = vector.shape_cast %93 : vector<1x128x512xbf16> to vector<128x512xbf16>
      %cst_69 = arith.constant dense<0.000000e+00> : vector<1x512xf32>
      %95 = tpu.matmul %92, %94, %cst_69 {dimension_numbers = #tpu.dot_dimension_numbers<[1], [0], [0], [1], [0, 0, 1, 1], [], []>} : vector<1x128xbf16>, vector<128x512xbf16>, vector<1x512xf32> -> vector<1x512xf32>
      %96 = vector.extract_strided_slice %43 {offsets = [13, 0], sizes = [1, 128], strides = [1, 1]} : vector<16x128xbf16> to vector<1x128xbf16>
      %c13 = arith.constant 13 : index
      %c0_70 = arith.constant 0 : index
      %c0_71 = arith.constant 0 : index
      %97 = vector.load %arg9[%c13, %c0_70, %c0_71] : memref<16x128x512xbf16, #tpu.memory_space<vmem>>, vector<1x128x512xbf16>
      %98 = vector.shape_cast %97 : vector<1x128x512xbf16> to vector<128x512xbf16>
      %cst_72 = arith.constant dense<0.000000e+00> : vector<1x512xf32>
      %99 = tpu.matmul %96, %98, %cst_72 {dimension_numbers = #tpu.dot_dimension_numbers<[1], [0], [0], [1], [0, 0, 1, 1], [], []>} : vector<1x128xbf16>, vector<128x512xbf16>, vector<1x512xf32> -> vector<1x512xf32>
      %100 = vector.extract_strided_slice %43 {offsets = [14, 0], sizes = [1, 128], strides = [1, 1]} : vector<16x128xbf16> to vector<1x128xbf16>
      %c14 = arith.constant 14 : index
      %c0_73 = arith.constant 0 : index
      %c0_74 = arith.constant 0 : index
      %101 = vector.load %arg9[%c14, %c0_73, %c0_74] : memref<16x128x512xbf16, #tpu.memory_space<vmem>>, vector<1x128x512xbf16>
      %102 = vector.shape_cast %101 : vector<1x128x512xbf16> to vector<128x512xbf16>
      %cst_75 = arith.constant dense<0.000000e+00> : vector<1x512xf32>
      %103 = tpu.matmul %100, %102, %cst_75 {dimension_numbers = #tpu.dot_dimension_numbers<[1], [0], [0], [1], [0, 0, 1, 1], [], []>} : vector<1x128xbf16>, vector<128x512xbf16>, vector<1x512xf32> -> vector<1x512xf32>
      %104 = vector.extract_strided_slice %43 {offsets = [15, 0], sizes = [1, 128], strides = [1, 1]} : vector<16x128xbf16> to vector<1x128xbf16>
      %c15 = arith.constant 15 : index
      %c0_76 = arith.constant 0 : index
      %c0_77 = arith.constant 0 : index
      %105 = vector.load %arg9[%c15, %c0_76, %c0_77] : memref<16x128x512xbf16, #tpu.memory_space<vmem>>, vector<1x128x512xbf16>
      %106 = vector.shape_cast %105 : vector<1x128x512xbf16> to vector<128x512xbf16>
      %cst_78 = arith.constant dense<0.000000e+00> : vector<1x512xf32>
      %107 = tpu.matmul %104, %106, %cst_78 {dimension_numbers = #tpu.dot_dimension_numbers<[1], [0], [0], [1], [0, 0, 1, 1], [], []>} : vector<1x128xbf16>, vector<128x512xbf16>, vector<1x512xf32> -> vector<1x512xf32>
      %108 = arith.addf %47, %51 : vector<1x512xf32>
      %109 = arith.addf %55, %59 : vector<1x512xf32>
      %110 = arith.addf %63, %67 : vector<1x512xf32>
      %111 = arith.addf %71, %75 : vector<1x512xf32>
      %112 = arith.addf %79, %83 : vector<1x512xf32>
      %113 = arith.addf %87, %91 : vector<1x512xf32>
      %114 = arith.addf %95, %99 : vector<1x512xf32>
      %115 = arith.addf %103, %107 : vector<1x512xf32>
      %116 = arith.addf %108, %109 : vector<1x512xf32>
      %117 = arith.addf %110, %111 : vector<1x512xf32>
      %118 = arith.addf %112, %113 : vector<1x512xf32>
      %119 = arith.addf %114, %115 : vector<1x512xf32>
      %120 = arith.addf %116, %117 : vector<1x512xf32>
      %121 = arith.addf %118, %119 : vector<1x512xf32>
      %122 = arith.addf %120, %121 : vector<1x512xf32>
      %c0_79 = arith.constant 0 : index
      %c0_80 = arith.constant 0 : index
      %123 = vector.load %arg10[%c0_79, %c0_80] : memref<1x512xf32, #tpu.memory_space<vmem>>, vector<1x512xf32>
      %124 = arith.addf %122, %123 : vector<1x512xf32>
      %cst_81 = arith.constant 0.000000e+00 : f32
      %125 = vector.broadcast %cst_81 : f32 to vector<1x512xf32>
      %126 = arith.cmpf ogt, %124, %125 : vector<1x512xf32>
      %cst_82 = arith.constant 1.000000e-01 : f32
      %127 = vector.broadcast %cst_82 : f32 to vector<1x512xf32>
      %128 = arith.mulf %127, %124 : vector<1x512xf32>
      %129 = arith.select %126, %124, %128 : vector<1x512xi1>, vector<1x512xf32>
      %130 = arith.truncf %129 : vector<1x512xf32> to vector<1x512xbf16>
      %c0_83 = arith.constant 0 : index
      %c0_84 = arith.constant 0 : index
      %131 = vector.load %arg11[%c0_83, %c0_84] : memref<512x256xbf16, #tpu.memory_space<vmem>>, vector<512x256xbf16>
      %cst_85 = arith.constant dense<0.000000e+00> : vector<1x256xf32>
      %132 = tpu.matmul %130, %131, %cst_85 {dimension_numbers = #tpu.dot_dimension_numbers<[1], [0], [0], [1], [0, 0, 1, 1], [], []>} : vector<1x512xbf16>, vector<512x256xbf16>, vector<1x256xf32> -> vector<1x256xf32>
      %c0_86 = arith.constant 0 : index
      %c0_87 = arith.constant 0 : index
      %133 = vector.load %arg12[%c0_86, %c0_87] : memref<1x256xf32, #tpu.memory_space<vmem>>, vector<1x256xf32>
      %134 = arith.addf %132, %133 : vector<1x256xf32>
      %cst_88 = arith.constant 0.000000e+00 : f32
      %135 = vector.broadcast %cst_88 : f32 to vector<1x256xf32>
      %136 = arith.cmpf ogt, %134, %135 : vector<1x256xf32>
      %cst_89 = arith.constant 1.000000e-01 : f32
      %137 = vector.broadcast %cst_89 : f32 to vector<1x256xf32>
      %138 = arith.mulf %137, %134 : vector<1x256xf32>
      %139 = arith.select %136, %134, %138 : vector<1x256xi1>, vector<1x256xf32>
      %140 = arith.truncf %139 : vector<1x256xf32> to vector<1x256xbf16>
      %c0_90 = arith.constant 0 : index
      %c0_91 = arith.constant 0 : index
      %141 = vector.load %arg13[%c0_90, %c0_91] : memref<256x128xbf16, #tpu.memory_space<vmem>>, vector<256x128xbf16>
      %cst_92 = arith.constant dense<0.000000e+00> : vector<1x128xf32>
      %142 = tpu.matmul %140, %141, %cst_92 {dimension_numbers = #tpu.dot_dimension_numbers<[1], [0], [0], [1], [0, 0, 1, 1], [], []>} : vector<1x256xbf16>, vector<256x128xbf16>, vector<1x128xf32> -> vector<1x128xf32>
      %c0_93 = arith.constant 0 : index
      %c0_94 = arith.constant 0 : index
      %143 = vector.load %arg14[%c0_93, %c0_94] : memref<1x128xf32, #tpu.memory_space<vmem>>, vector<1x128xf32>
      %144 = arith.addf %142, %143 : vector<1x128xf32>
      %c0_95 = arith.constant 0 : index
      %c0_96 = arith.constant 0 : index
      %c0_97 = arith.constant 0 : index
      %145 = vector.load %arg15[%c0_95, %c0_96, %c0_97] : memref<1x1x128xf32, #tpu.memory_space<vmem>>, vector<1x1x128xf32>
      %146 = vector.shape_cast %145 : vector<1x1x128xf32> to vector<1x128xf32>
      %147 = vector.shape_cast %144 : vector<1x128xf32> to vector<1x1x128xf32>
      tpu.vector_store %arg15[%c0_95, %c0_96, %c0_97], %147 {strides = array<i32>} : memref<1x1x128xf32, #tpu.memory_space<vmem>>, vector<1x1x128xf32>,
    } else {
    }
    return
  }
  func.func @transform_0(%arg0: i32, %arg1: i32) -> (i32, i32, i32) {
    %c0_i32 = arith.constant 0 : i32
    %c0_i32_0 = arith.constant 0 : i32
    return %arg0, %arg1, %c0_i32 : i32, i32, i32
  }
  func.func @transform_1(%arg0: i32, %arg1: i32) -> (i32, i32) {
    %c0_i32 = arith.constant 0 : i32
    %c0_i32_0 = arith.constant 0 : i32
    %c0_i32_1 = arith.constant 0 : i32
    return %c0_i32, %c0_i32_0 : i32, i32
  }
  func.func @transform_2(%arg0: i32, %arg1: i32) -> (i32, i32) {
    %c0_i32 = arith.constant 0 : i32
    %c0_i32_0 = arith.constant 0 : i32
    %c0_i32_1 = arith.constant 0 : i32
    return %c0_i32, %c0_i32_0 : i32, i32
  }
  func.func @transform_3(%arg0: i32, %arg1: i32) -> (i32, i32) {
    %c0_i32 = arith.constant 0 : i32
    %c0_i32_0 = arith.constant 0 : i32
    %c0_i32_1 = arith.constant 0 : i32
    return %c0_i32, %c0_i32_0 : i32, i32
  }
  func.func @transform_4(%arg0: i32, %arg1: i32) -> (i32, i32) {
    %c0_i32 = arith.constant 0 : i32
    %c0_i32_0 = arith.constant 0 : i32
    %c0_i32_1 = arith.constant 0 : i32
    return %c0_i32, %c0_i32_0 : i32, i32
  }
  func.func @transform_5(%arg0: i32, %arg1: i32) -> (i32, i32) {
    %c0_i32 = arith.constant 0 : i32
    %c0_i32_0 = arith.constant 0 : i32
    %c0_i32_1 = arith.constant 0 : i32
    return %c0_i32, %c0_i32_0 : i32, i32
  }
  func.func @transform_6(%arg0: i32, %arg1: i32) -> (i32, i32) {
    %c0_i32 = arith.constant 0 : i32
    %c0_i32_0 = arith.constant 0 : i32
    %c0_i32_1 = arith.constant 0 : i32
    return %c0_i32, %c0_i32_0 : i32, i32
  }
  func.func @transform_7(%arg0: i32, %arg1: i32) -> (i32, i32, i32) {
    %c0_i32 = arith.constant 0 : i32
    %c0_i32_0 = arith.constant 0 : i32
    %c0_i32_1 = arith.constant 0 : i32
    %c0_i32_2 = arith.constant 0 : i32
    return %c0_i32, %c0_i32_0, %c0_i32_1 : i32, i32, i32
  }
  func.func @transform_8(%arg0: i32, %arg1: i32) -> (i32, i32) {
    %c0_i32 = arith.constant 0 : i32
    %c0_i32_0 = arith.constant 0 : i32
    %c0_i32_1 = arith.constant 0 : i32
    return %c0_i32, %c0_i32_0 : i32, i32
  }
  func.func @transform_9(%arg0: i32, %arg1: i32) -> (i32, i32) {
    %c0_i32 = arith.constant 0 : i32
    %c0_i32_0 = arith.constant 0 : i32
    %c0_i32_1 = arith.constant 0 : i32
    return %c0_i32, %c0_i32_0 : i32, i32
  }
  func.func @transform_10(%arg0: i32, %arg1: i32) -> (i32, i32) {
    %c0_i32 = arith.constant 0 : i32
    %c0_i32_0 = arith.constant 0 : i32
    %c0_i32_1 = arith.constant 0 : i32
    return %c0_i32, %c0_i32_0 : i32, i32
  }
  func.func @transform_11(%arg0: i32, %arg1: i32) -> (i32, i32) {
    %c0_i32 = arith.constant 0 : i32
    %c0_i32_0 = arith.constant 0 : i32
    %c0_i32_1 = arith.constant 0 : i32
    return %c0_i32, %c0_i32_0 : i32, i32
  }
  func.func @transform_12(%arg0: i32, %arg1: i32) -> (i32, i32) {
    %c0_i32 = arith.constant 0 : i32
    %c0_i32_0 = arith.constant 0 : i32
    %c0_i32_1 = arith.constant 0 : i32
    return %c0_i32, %c0_i32_0 : i32, i32
  }
  func.func @transform_13(%arg0: i32, %arg1: i32) -> (i32, i32, i32) {
    %c0_i32 = arith.constant 0 : i32
    %c0_i32_0 = arith.constant 0 : i32
    %c0_i32_1 = arith.constant 0 : i32
    return %arg0, %c0_i32, %c0_i32_0 : i32, i32, i32
  }
}

</mosaic_0001>

<bundles_post_ra>
// kernel: tpu_custom_call.1
= control target key start
LH: loop header
LB: loop body
LE: loop exit
PB: predicated region body
PF: predicated region fallthrough
CT: control target
= control target key end

     0   :  { %18 = vsyncpa [#allocation4], 0  ;;  %s19174_s0 = inlined_call_operand.vmem [shape: f32[2,4800,8], index: 0, kind: input, shape index: {}]   ;;  %s19175_s1 = inlined_call_operand.vmem [shape: f32[8,128], index: 1, kind: input, shape index: {}]   ;;  %s19176_s2 = inlined_call_operand.vmem [shape: f32[1,128], index: 2, kind: input, shape index: {}]   ;;  %s19177_s3 = inlined_call_operand.vmem [shape: bf16[128,128], index: 3, kind: input, shape index: {}]   ;;  %s19178_s4 = inlined_call_operand.vmem [shape: f32[1,128], index: 4, kind: input, shape index: {}]   ;;  %s19179_s5 = inlined_call_operand.vmem [shape: bf16[128,128], index: 5, kind: input, shape index: {}]   ;;  %s19180_s6 = inlined_call_operand.vmem [shape: f32[1,128], index: 6, kind: input, shape index: {}]   ;;  %s19181_s7 = inlined_call_operand.vmem [shape: bf16[16,128,512], index: 7, kind: input, shape index: {}]   ;;  %s19182_s8 = inlined_call_operand.vmem [shape: f32[1,512], index: 8, kind: input, shape index: {}]   ;;  %s19183_s9 = inlined_call_operand.vmem [shape: bf16[512,256], index: 9, kind: input, shape index: {}]   ;;  %s19184_s10 = inlined_call_operand.vmem [shape: f32[1,256], index: 10, kind: input, shape index: {}]   ;;  %s19185_s11 = inlined_call_operand.vmem [shape: bf16[256,128], index: 11, kind: input, shape index: {}]   ;;  %s19186_s12 = inlined_call_operand.vmem [shape: f32[1,128], index: 12, kind: input, shape index: {}]   ;;  %s19187_s13 = inlined_call_operand.hbm [shape: f32[2,1,128], index: 13, kind: output, shape index: {}]  }
   0x1   :  { %20 = vsyncpa [#allocation4 + $0x1], 0  ;;  %s14637_s25 = smov 0   ;;  %s14639_s26 = smov 0  }
   0x2   :  { %s14641_s27 = smov 0   ;;  %s14643_s28 = smov 0  }
   0x3   :  { %s14645_s29 = smov 0   ;;  %s14647_s30 = smov 0  }
   0x4   :  { %s14649_s14 = smov 0   ;;  %s14651_s15 = smov 0  }
   0x5 LB: > { %19288 = sst [smem:[#allocation6_spill]] %s14534_s25  ;;  %s11009_s16 = sadd.s32 4294967295, %s14562_s15   ;;  %s14562_s15 = sphi %s14651_s15, %s26_s15   ;;  %s14558_s14 = sphi %s14649_s14, %s19599_s14   ;;  %s14554_s30 = sphi %s14647_s30, %s19602_s30   ;;  %s14550_s29 = sphi %s14645_s29, %s19597_s29   ;;  %s14546_s28 = sphi %s14643_s28, %s19596_s28   ;;  %s14542_s27 = sphi %s14641_s27, %s19595_s27   ;;  %s14538_s26 = sphi %s14639_s26, %s19601_s26   ;;  %s14534_s25 = sphi %s14637_s25, %s19600_s25  }
   0x6   : > { %19289 = sst [smem:[#allocation7_spill]] %s14542_s27  ;;  %s11010_s17 = sadd.s32 4294967294, %s14562_s15  }
   0x7   : > { %19290 = sst [smem:[#allocation8_spill]] %s14554_s30  ;;  %s35_s18 = sadd.s32 1, %s14554_s30 }
   0x8   : > { %19291 = sst [smem:[#allocation9_spill]] %s14558_s14  ;;  %p36_p0 = scmp.ge.s32.totalorder %s35_s18, 3 }
   0x9   : > { %s38_s19 = sadd.s32 1, %s14558_s14  ;;  %p335_p1 = scmp.ne.s32.totalorder %s14542_s27, %s14538_s26 }
   0xa   : > { %p336_p2 = scmp.eq.s32.totalorder %s11009_s16, 5  ;;  %s19604_s18 = smov (%p36_p0, %s35_s18), 0 }
   0xb   : > { %19292 = sst [smem:[#allocation10_spill]] %s19604_s18  ;;  %s19606_s19 = smov (!%p36_p0, %s38_s19), %s14558_s14 }
   0xc   : > { %p14686_p3 = por %p336_p2, %p335_p1  ;;  %p341_p4 = scmp.ne.s32.totalorder %s14538_s26, %s14534_s25 }
   0xd   : > { %p40_p5 = scmp.ge.s32.totalorder %s19606_s19, 2  ;;  %p342_p6 = scmp.eq.s32.totalorder %s11010_s17, 5 }
   0xe   : > { %p11013_p7 = scmp.ge.s32.totalorder %s14562_s15, 1  ;;  %p409_p8 = scmp.lt.s32.totalorder %s14562_s15, 7 }
   0xf   : > { %s19608_s19 = smov (%p40_p5, %s19606_s19), 0  ;;  %p14696_p9 = por %p342_p6, %p341_p4 }
  0x10   : > { %19294 = sst [smem:[#allocation11_spill]] %s19608_s19  ;;  %p410_p10 = pnand %p11013_p7, %p409_p8 }
  0x11   : > { %s19295_s21 = scalar_select %p14696_p9, 1, 0 }
  0x12   : > { %s322_s22 = ssub.s32 %s14558_s14, %s19608_s19  ;;  %s325_s23 = sadd.s32 1, %s14542_s27 }
  0x13   : > { %19296 = sst [smem:[#allocation12_spill]] %s19295_s21  ;;  %p323_p11 = scmp.eq.s32.totalorder %s322_s22, 0 }
  0x14   : > { %413 = sbr.rel (%p410_p10) target bundleno = 2327 (0x917), region = 72 }
  0x15   : > { %s14704_s24 = scalar_select %p323_p11, %s14542_s27, %s325_s23  }
  0x17   : > { %19297 = sst [smem:[#allocation13_spill]] %s14704_s24 }
  0x1b   : > { %s454_s16 = sand.u32 1, %s14538_s26   ;;  %s456_s17 = smul.u32 200, %s14546_s28 }
  0x1c   : > { %p457_p12 = scmp.lt.s32.totalorder %s14550_s29, 1  ;;  %s14717_s23 = scalar_lea.vmem [#allocation3], %s454_s16 }
  0x1d   : > { %p459_p13 = scmp.lt.s32.totalorder %s456_s17, 599  ;;  %p11015_p0 = scmp.ne.s32.totalorder %s14546_s28, 0 }
  0x1e   : > { %s458_s18 = scalar_select %p457_p12, %s14550_s29, 1 }
  0x1f   : > { %s19610_s17 = smov (!%p459_p13, %s456_s17), 599  ;;  %470 = sbr.rel (%p11015_p0) target bundleno = 38 (0x26), region = 76 }
  0x20   : > { %s13492_s30 = smul.u32 600, %s458_s18  ;;  %v14564_v0 = vmov (!%p11015_p0), -inf  }
  0x21   : > { %471 = vst [vmem:[#allocation2] sm:$0xff] (!%p11015_p0), %v14564_v0  ;;  %472 = vst [vmem:[#allocation2 + $0x8] sm:$0xff] (!%p11015_p0), %v14564_v0 }
  0x22   : > { %s462_s21 = sadd.s32 %s13492_s30, %s19610_s17 }
  0x23   : > { %s11014_s25 = sshll.u32 %s462_s21, 3 }
  0x24   : > { %s14713_s22 = scalar_lea.vmem %s19174_s0, %s11014_s25 }
  0x26 PF: > { %v673_v1 = vld [vmem:[%s19175_s1] sm:$0xff]  ;;  %vm681_vm0 = vcmask 64512   ;;  %v474_v3 = vld [vmem:[%s14713_s22 + $0x8] sm:$0xff]  ;;  %v475_v4 = vld [vmem:[%s14713_s22 + $0x10] sm:$0xff]  ;;  %p11235_p1 = scmp.ne.s32.totalorder %s14546_s28, 2 }
  0x27   : > { %v473_v2 = vld [vmem:[%s14713_s22] sm:$0xff]  ;;  %12750 = vmatprep.subr.mxu0 %v673_v1  ;;  %13484 = vmatprep.subr.mxu1 %v673_v1  ;;  %v476_v5 = vld [vmem:[%s14713_s22 + $0x18] sm:$0xff]  ;;  %v574_v7 = vld [vmem:[%s14713_s22 + $0x328] sm:$0xff] }
  0x28   : > { %12752 = vmatprep.mubr.msk.f32.mxu0 %vm681_vm0, %v473_v2  ;;  %12751 = vmatpush3.msra.mxu0 %v673_v1  ;;  %v573_v6 = vld [vmem:[%s14713_s22 + $0x320] sm:$0xff]  ;;  %v575_v10 = vld [vmem:[%s14713_s22 + $0x330] sm:$0xff]  ;;  %v576_v11 = vld [vmem:[%s14713_s22 + $0x338] sm:$0xff] }
  0x29   : > { %12753 = vmatmul.mubr.msk.f32.vlgmr.msra.gmra.mrb[0].mxu0 %vm681_vm0, %v474_v3  ;;  %13485 = vmatpush3.msra.mxu1 %v673_v1  ;;  %v477_v8 = vld [vmem:[%s14713_s22 + $0x20] sm:$0xff]  ;;  %v478_v12 = vld [vmem:[%s14713_s22 + $0x28] sm:$0xff]  ;;  %v479_v14 = vld [vmem:[%s14713_s22 + $0x30] sm:$0xff] }
  0x2a   : > { %12755 = vmatprep.mubr.msk.f32.mxu0 %vm681_vm0, %v475_v4  ;;  %12902 = vmatprep.mubr.msk.f32.mxu1 %vm681_vm0, %v573_v6  ;;  %v13566_v9 = vld [vmem:[%s19177_s3] sm:$0xff]   ;;  %v578_v15 = vld [vmem:[%s14713_s22 + $0x348] sm:$0xff]  ;;  %v480_v16 = vld [vmem:[%s14713_s22 + $0x38] sm:$0xff] }
  0x2b   : > { %12903 = vmatmul.mubr.msk.f32.vlgmr.msra.gmra.mrb[0].mxu1 %vm681_vm0, %v574_v7  ;;  %13052 = vmatprep.subr.bf16.mxu1 %v13566_v9  ;;  %v577_v13 = vld [vmem:[%s14713_s22 + $0x340] sm:$0xff]  ;;  %v579_v17 = vld [vmem:[%s14713_s22 + $0x350] sm:$0xff]  ;;  %v580_v19 = vld [vmem:[%s14713_s22 + $0x358] sm:$0xff] }
  0x2c   : > { %12905 = vmatprep.mubr.msk.f32.mxu1 %vm681_vm0, %v575_v10  ;;  %13053 = vmatpush3.bf16.msra.mxu1 %v13566_v9  ;;  %v481_v18 = vld [vmem:[%s14713_s22 + $0x40] sm:$0xff]  ;;  %v13567_v20 = vld [vmem:[%s19177_s3 + $0x8] sm:$0xff]   ;;  %v483_v23 = vld [vmem:[%s14713_s22 + $0x50] sm:$0xff] }
  0x2d   : > { %12756 = vmatmul.mubr.msk.f32.gmra.mrb[2].mxu0 %vm681_vm0, %v476_v5  ;;  %v482_v21 = vld [vmem:[%s14713_s22 + $0x48] sm:$0xff]  ;;  %v581_v22 = vld [vmem:[%s14713_s22 + $0x360] sm:$0xff]  ;;  %13054 = vmatprep.subr.bf16.mxu1 %v13567_v20  ;;  %v484_v25 = vld [vmem:[%s14713_s22 + $0x58] sm:$0xff] }
  0x2e   : > { %12758 = vmatprep.mubr.msk.f32.mxu0 %vm681_vm0, %v477_v8  ;;  %v582_v24 = vld [vmem:[%s14713_s22 + $0x368] sm:$0xff]  ;;  %v583_v26 = vld [vmem:[%s14713_s22 + $0x370] sm:$0xff]  ;;  %v485_v27 = vld [vmem:[%s14713_s22 + $0x60] sm:$0xff] }
  0x2f   : > { %12906 = vmatmul.mubr.msk.f32.gmra.mrb[2].mxu1 %vm681_vm0, %v576_v11  ;;  %v486_v28 = vld [vmem:[%s14713_s22 + $0x68] sm:$0xff]  ;;  %v584_v29 = vld [vmem:[%s14713_s22 + $0x378] sm:$0xff]  ;;  %v585_v30 = vld [vmem:[%s14713_s22 + $0x380] sm:$0xff] }
  0x30   : > { %12908 = vmatprep.mubr.msk.f32.mxu1 %vm681_vm0, %v577_v13  ;;  %13055 = vmatpush3.bf16.msra.mxu1 %v13567_v20  ;;  %v487_v31 = vld [vmem:[%s14713_s22 + $0x70] sm:$0xff]  ;;  %v586_v33 = vld [vmem:[%s14713_s22 + $0x388] sm:$0xff]  ;;  %v488_v34 = vld [vmem:[%s14713_s22 + $0x78] sm:$0xff] }
  0x31   : > { %12759 = vmatmul.mubr.msk.f32.gmra.mrb[4].mxu0 %vm681_vm0, %v478_v12  ;;  %v13568_v32 = vld [vmem:[%s19177_s3 + $0x10] sm:$0xff]   ;;  %v489_v36 = vld [vmem:[%s14713_s22 + $0x80] sm:$0xff]  ;;  %v588_v37 = vld [vmem:[%s14713_s22 + $0x398] sm:$0xff] }
  0x32   : > { %12761 = vmatprep.mubr.msk.f32.mxu0 %vm681_vm0, %v479_v14  ;;  %v587_v35 = vld [vmem:[%s14713_s22 + $0x390] sm:$0xff]  ;;  %13056 = vmatprep.subr.bf16.mxu1 %v13568_v32  ;;  %v490_v38 = vld [vmem:[%s14713_s22 + $0x88] sm:$0xff]  ;;  %v589_v39 = vld [vmem:[%s14713_s22 + $0x3a0] sm:$0xff] }
  0x33   : > { %12909 = vmatmul.mubr.msk.f32.gmra.mrb[4].mxu1 %vm681_vm0, %v578_v15  ;;  %v491_v40 = vld [vmem:[%s14713_s22 + $0x90] sm:$0xff]  ;;  %v13569_v41 = vld [vmem:[%s19177_s3 + $0x18] sm:$0xff]   ;;  %v590_v42 = vld [vmem:[%s14713_s22 + $0x3a8] sm:$0xff] }
  0x34   : > { %12911 = vmatprep.mubr.msk.f32.mxu1 %vm681_vm0, %v579_v17  ;;  %13057 = vmatpush3.bf16.msra.mxu1 %v13568_v32  ;;  %v492_v43 = vld [vmem:[%s14713_s22 + $0x98] sm:$0xff]  ;;  %v591_v44 = vld [vmem:[%s14713_s22 + $0x3b0] sm:$0xff]  ;;  %v493_v45 = vld [vmem:[%s14713_s22 + $0xa0] sm:$0xff] }
  0x35   : > { %12762 = vmatmul.mubr.msk.f32.gmra.mrb[6].mxu0 %vm681_vm0, %v480_v16  ;;  %13058 = vmatprep.subr.bf16.mxu1 %v13569_v41  ;;  %v592_v46 = vld [vmem:[%s14713_s22 + $0x3b8] sm:$0xff]  ;;  %v494_v47 = vld [vmem:[%s14713_s22 + $0xa8] sm:$0xff]  ;;  %v593_v48 = vld [vmem:[%s14713_s22 + $0x3c0] sm:$0xff] }
  0x36   : > { %12764 = vmatprep.mubr.msk.f32.mxu0 %vm681_vm0, %v481_v18  ;;  %v495_v49 = vld [vmem:[%s14713_s22 + $0xb0] sm:$0xff]  ;;  %v594_v50 = vld [vmem:[%s14713_s22 + $0x3c8] sm:$0xff]  ;;  %v13570_v51 = vld [vmem:[%s19177_s3 + $0x20] sm:$0xff]  }
  0x37   : > { %12912 = vmatmul.mubr.msk.f32.gmra.mrb[6].mxu1 %vm681_vm0, %v580_v19  ;;  %v496_v52 = vld [vmem:[%s14713_s22 + $0xb8] sm:$0xff]  ;;  %v595_v53 = vld [vmem:[%s14713_s22 + $0x3d0] sm:$0xff]  ;;  %v497_v54 = vld [vmem:[%s14713_s22 + $0xc0] sm:$0xff] }
  0x38   : > { %12914 = vmatprep.mubr.msk.f32.mxu1 %vm681_vm0, %v581_v22  ;;  %13059 = vmatpush3.bf16.msra.mxu1 %v13569_v41  ;;  %v596_v55 = vld [vmem:[%s14713_s22 + $0x3d8] sm:$0xff]  ;;  %v498_v56 = vld [vmem:[%s14713_s22 + $0xc8] sm:$0xff]  ;;  %v597_v57 = vld [vmem:[%s14713_s22 + $0x3e0] sm:$0xff] }
  0x39   : > { %12765 = vmatmul.mubr.msk.f32.gmra.mrb[8].mxu0 %vm681_vm0, %v482_v21  ;;  %13060 = vmatprep.subr.bf16.mxu1 %v13570_v51  ;;  %v499_v58 = vld [vmem:[%s14713_s22 + $0xd0] sm:$0xff]  ;;  %v500_v59 = vld [vmem:[%s14713_s22 + $0xd8] sm:$0xff]  ;;  %v598_v60 = vld [vmem:[%s14713_s22 + $0x3e8] sm:$0xff] }
  0x3a   : > { %12767 = vmatprep.mubr.msk.f32.mxu0 %vm681_vm0, %v483_v23  ;;  %v599_v61 = vld [vmem:[%s14713_s22 + $0x3f0] sm:$0xff]  ;;  %v501_v62 = vld [vmem:[%s14713_s22 + $0xe0] sm:$0xff]  ;;  %v13571_v63 = vld [vmem:[%s19177_s3 + $0x28] sm:$0xff]  }
  0x3b   : > { %12915 = vmatmul.mubr.msk.f32.gmra.mrb[8].mxu1 %vm681_vm0, %v582_v24  ;;  %v600_v0 = vld [vmem:[%s14713_s22 + $0x3f8] sm:$0xff]  ;;  %v502_v1 = vld [vmem:[%s14713_s22 + $0xe8] sm:$0xff]  ;;  %v601_v2 = vld [vmem:[%s14713_s22 + $0x400] sm:$0xff] }
  0x3c   : > { %12917 = vmatprep.mubr.msk.f32.mxu1 %vm681_vm0, %v583_v26  ;;  %13061 = vmatpush3.bf16.msra.mxu1 %v13570_v51  ;;  %v503_v3 = vld [vmem:[%s14713_s22 + $0xf0] sm:$0xff]  ;;  %v602_v4 = vld [vmem:[%s14713_s22 + $0x408] sm:$0xff]  ;;  %v504_v5 = vld [vmem:[%s14713_s22 + $0xf8] sm:$0xff] }
  0x3d   : > { %12768 = vmatmul.mubr.msk.f32.gmra.mrb[10].mxu0 %vm681_vm0, %v484_v25  ;;  %13062 = vmatprep.subr.bf16.mxu1 %v13571_v63  ;;  %v603_v6 = vld [vmem:[%s14713_s22 + $0x410] sm:$0xff]  ;;  %v505_v7 = vld [vmem:[%s14713_s22 + $0x100] sm:$0xff]  ;;  %v604_v9 = vld [vmem:[%s14713_s22 + $0x418] sm:$0xff] }
  0x3e   : > { %12770 = vmatprep.mubr.msk.f32.mxu0 %vm681_vm0, %v485_v27  ;;  %v13572_v8 = vld [vmem:[%s19177_s3 + $0x30] sm:$0xff]   ;;  %v506_v10 = vld [vmem:[%s14713_s22 + $0x108] sm:$0xff]  ;;  %v605_v11 = vld [vmem:[%s14713_s22 + $0x420] sm:$0xff] }
  0x3f   : > { %12918 = vmatmul.mubr.msk.f32.gmra.mrb[10].mxu1 %vm681_vm0, %v584_v29  ;;  %v507_v12 = vld [vmem:[%s14713_s22 + $0x110] sm:$0xff]  ;;  %v606_v13 = vld [vmem:[%s14713_s22 + $0x428] sm:$0xff]  ;;  %v508_v14 = vld [vmem:[%s14713_s22 + $0x118] sm:$0xff] }
  0x40   : > { %12920 = vmatprep.mubr.msk.f32.mxu1 %vm681_vm0, %v585_v30  ;;  %13063 = vmatpush3.bf16.msra.mxu1 %v13571_v63  ;;  %v607_v15 = vld [vmem:[%s14713_s22 + $0x430] sm:$0xff]  ;;  %v509_v16 = vld [vmem:[%s14713_s22 + $0x120] sm:$0xff]  ;;  %v608_v17 = vld [vmem:[%s14713_s22 + $0x438] sm:$0xff] }
  0x41   : > { %12771 = vmatmul.mubr.msk.f32.gmra.mrb[12].mxu0 %vm681_vm0, %v486_v28  ;;  %13064 = vmatprep.subr.bf16.mxu1 %v13572_v8  ;;  %v13573_v18 = vld [vmem:[%s19177_s3 + $0x38] sm:$0xff]   ;;  %v510_v19 = vld [vmem:[%s14713_s22 + $0x128] sm:$0xff]  ;;  %v609_v20 = vld [vmem:[%s14713_s22 + $0x440] sm:$0xff] }
  0x42   : > { %12773 = vmatprep.mubr.msk.f32.mxu0 %vm681_vm0, %v487_v31  ;;  %v511_v21 = vld [vmem:[%s14713_s22 + $0x130] sm:$0xff]  ;;  %v610_v22 = vld [vmem:[%s14713_s22 + $0x448] sm:$0xff]  ;;  %v512_v23 = vld [vmem:[%s14713_s22 + $0x138] sm:$0xff] }
  0x43   : > { %12921 = vmatmul.mubr.msk.f32.gmra.mrb[12].mxu1 %vm681_vm0, %v586_v33  ;;  %v611_v24 = vld [vmem:[%s14713_s22 + $0x450] sm:$0xff]  ;;  %v513_v25 = vld [vmem:[%s14713_s22 + $0x140] sm:$0xff]  ;;  %v612_v26 = vld [vmem:[%s14713_s22 + $0x458] sm:$0xff] }
  0x44   : > { %12923 = vmatprep.mubr.msk.f32.mxu1 %vm681_vm0, %v587_v35  ;;  %13065 = vmatpush3.bf16.msra.mxu1 %v13572_v8  ;;  %v514_v27 = vld [vmem:[%s14713_s22 + $0x148] sm:$0xff]  ;;  %v613_v28 = vld [vmem:[%s14713_s22 + $0x460] sm:$0xff]  ;;  %v515_v29 = vld [vmem:[%s14713_s22 + $0x150] sm:$0xff] }
  0x45   : > { %12774 = vmatmul.mubr.msk.f32.gmra.mrb[14].mxu0 %vm681_vm0, %v488_v34  ;;  %13066 = vmatprep.subr.bf16.mxu1 %v13573_v18  ;;  %v614_v30 = vld [vmem:[%s14713_s22 + $0x468] sm:$0xff]  ;;  %v516_v31 = vld [vmem:[%s14713_s22 + $0x158] sm:$0xff]  ;;  %v615_v32 = vld [vmem:[%s14713_s22 + $0x470] sm:$0xff] }
  0x46   : > { %12776 = vmatprep.mubr.msk.f32.mxu0 %vm681_vm0, %v489_v36  ;;  %v517_v33 = vld [vmem:[%s14713_s22 + $0x160] sm:$0xff]  ;;  %v616_v34 = vld [vmem:[%s14713_s22 + $0x478] sm:$0xff]  ;;  %v518_v35 = vld [vmem:[%s14713_s22 + $0x168] sm:$0xff] }
  0x47   : > { %12924 = vmatmul.mubr.msk.f32.gmra.mrb[14].mxu1 %vm681_vm0, %v588_v37  ;;  %v617_v36 = vld [vmem:[%s14713_s22 + $0x480] sm:$0xff]  ;;  %v519_v37 = vld [vmem:[%s14713_s22 + $0x170] sm:$0xff]  ;;  %v526_v51 = vld [vmem:[%s14713_s22 + $0x1a8] sm:$0xff] }
  0x48   : > { %12926 = vmatprep.mubr.msk.f32.mxu1 %vm681_vm0, %v589_v39  ;;  %13067 = vmatpush3.bf16.msra.mxu1 %v13573_v18  ;;  %v520_v39 = vld [vmem:[%s14713_s22 + $0x178] sm:$0xff]  ;;  %v521_v41 = vld [vmem:[%s14713_s22 + $0x180] sm:$0xff] }
  0x49   : > { %12777 = vmatmul.mubr.msk.f32.gmra.mrb[16].mxu0 %vm681_vm0, %v490_v38  ;;  %v618_v38 = vld [vmem:[%s14713_s22 + $0x488] sm:$0xff]  ;;  %v532_v63 = vld [vmem:[%s14713_s22 + $0x1d8] sm:$0xff]  ;;  %v541_v18 = vld [vmem:[%s14713_s22 + $0x220] sm:$0xff] }
  0x4a   : > { %12779 = vmatprep.mubr.msk.f32.mxu0 %vm681_vm0, %v491_v40  ;;  %v619_v40 = vld [vmem:[%s14713_s22 + $0x490] sm:$0xff]  ;;  %v536_v8 = vld [vmem:[%s14713_s22 + $0x1f8] sm:$0xff] }
  0x4b   : > { %12927 = vmatmul.mubr.msk.f32.gmra.mrb[16].mxu1 %vm681_vm0, %v590_v42  ;;  %v620_v42 = vld [vmem:[%s14713_s22 + $0x498] sm:$0xff] }
  0x4c   : > { %12929 = vmatprep.mubr.msk.f32.mxu1 %vm681_vm0, %v591_v44  ;;  %v621_v44 = vld [vmem:[%s14713_s22 + $0x4a0] sm:$0xff] }
  0x4d   : > { %12780 = vmatmul.mubr.msk.f32.gmra.mrb[18].mxu0 %vm681_vm0, %v492_v43  ;;  %v522_v43 = vld [vmem:[%s14713_s22 + $0x188] sm:$0xff] }
  0x4e   : > { %12782 = vmatprep.mubr.msk.f32.mxu0 %vm681_vm0, %v493_v45  ;;  %v523_v45 = vld [vmem:[%s14713_s22 + $0x190] sm:$0xff] }
  0x4f   : > { %12930 = vmatmul.mubr.msk.f32.gmra.mrb[18].mxu1 %vm681_vm0, %v592_v46  ;;  %v622_v46 = vld [vmem:[%s14713_s22 + $0x4a8] sm:$0xff] }
  0x50   : > { %12932 = vmatprep.mubr.msk.f32.mxu1 %vm681_vm0, %v593_v48  ;;  %v623_v48 = vld [vmem:[%s14713_s22 + $0x4b0] sm:$0xff] }
  0x51   : > { %12783 = vmatmul.mubr.msk.f32.gmra.mrb[20].mxu0 %vm681_vm0, %v494_v47  ;;  %v524_v47 = vld [vmem:[%s14713_s22 + $0x198] sm:$0xff] }
  0x52   : > { %12785 = vmatprep.mubr.msk.f32.mxu0 %vm681_vm0, %v495_v49  ;;  %v525_v49 = vld [vmem:[%s14713_s22 + $0x1a0] sm:$0xff] }
  0x53   : > { %12933 = vmatmul.mubr.msk.f32.gmra.mrb[20].mxu1 %vm681_vm0, %v594_v50  ;;  %v624_v50 = vld [vmem:[%s14713_s22 + $0x4b8] sm:$0xff] }
  0x54   : > { %12935 = vmatprep.mubr.msk.f32.mxu1 %vm681_vm0, %v595_v53  ;;  %v527_v53 = vld [vmem:[%s14713_s22 + $0x1b0] sm:$0xff] }
  0x55   : > { %12786 = vmatmul.mubr.msk.f32.gmra.mrb[22].mxu0 %vm681_vm0, %v496_v52  ;;  %v625_v52 = vld [vmem:[%s14713_s22 + $0x4c0] sm:$0xff] }
  0x56   : > { %12788 = vmatprep.mubr.msk.f32.mxu0 %vm681_vm0, %v497_v54  ;;  %v626_v54 = vld [vmem:[%s14713_s22 + $0x4c8] sm:$0xff] }
  0x57   : > { %12936 = vmatmul.mubr.msk.f32.gmra.mrb[22].mxu1 %vm681_vm0, %v596_v55  ;;  %v528_v55 = vld [vmem:[%s14713_s22 + $0x1b8] sm:$0xff] }
  0x58   : > { %12938 = vmatprep.mubr.msk.f32.mxu1 %vm681_vm0, %v597_v57  ;;  %v529_v57 = vld [vmem:[%s14713_s22 + $0x1c0] sm:$0xff] }
  0x59   : > { %12789 = vmatmul.mubr.msk.f32.gmra.mrb[24].mxu0 %vm681_vm0, %v498_v56  ;;  %v627_v56 = vld [vmem:[%s14713_s22 + $0x4d0] sm:$0xff] }
  0x5a   : > { %12791 = vmatprep.mubr.msk.f32.mxu0 %vm681_vm0, %v499_v58  ;;  %v628_v58 = vld [vmem:[%s14713_s22 + $0x4d8] sm:$0xff] }
  0x5b   : > { %12939 = vmatmul.mubr.msk.f32.gmra.mrb[24].mxu1 %vm681_vm0, %v598_v60  ;;  %v629_v60 = vld [vmem:[%s14713_s22 + $0x4e0] sm:$0xff] }
  0x5c   : > { %12941 = vmatprep.mubr.msk.f32.mxu1 %vm681_vm0, %v599_v61  ;;  %v531_v61 = vld [vmem:[%s14713_s22 + $0x1d0] sm:$0xff] }
  0x5d   : > { %12792 = vmatmul.mubr.msk.f32.gmra.mrb[26].mxu0 %vm681_vm0, %v500_v59  ;;  %v530_v59 = vld [vmem:[%s14713_s22 + $0x1c8] sm:$0xff] }
  0x5e   : > { %12794 = vmatprep.mubr.msk.f32.mxu0 %vm681_vm0, %v501_v62  ;;  %v630_v62 = vld [vmem:[%s14713_s22 + $0x4e8] sm:$0xff] }
  0x5f   : > { %12942 = vmatmul.mubr.msk.f32.gmra.mrb[26].mxu1 %vm681_vm0, %v600_v0  ;;  %v631_v0 = vld [vmem:[%s14713_s22 + $0x4f0] sm:$0xff] }
  0x60   : > { %12944 = vmatprep.mubr.msk.f32.mxu1 %vm681_vm0, %v601_v2  ;;  %v632_v2 = vld [vmem:[%s14713_s22 + $0x4f8] sm:$0xff] }
  0x61   : > { %12795 = vmatmul.mubr.msk.f32.gmra.mrb[28].mxu0 %vm681_vm0, %v502_v1  ;;  %v533_v1 = vld [vmem:[%s14713_s22 + $0x1e0] sm:$0xff] }
  0x62   : > { %12797 = vmatprep.mubr.msk.f32.mxu0 %vm681_vm0, %v503_v3  ;;  %v534_v3 = vld [vmem:[%s14713_s22 + $0x1e8] sm:$0xff] }
  0x63   : > { %12945 = vmatmul.mubr.msk.f32.gmra.mrb[28].mxu1 %vm681_vm0, %v602_v4  ;;  %v633_v4 = vld [vmem:[%s14713_s22 + $0x500] sm:$0xff] }
  0x64   : > { %12947 = vmatprep.mubr.msk.f32.mxu1 %vm681_vm0, %v603_v6  ;;  %v13574_v6 = vld [vmem:[%s19179_s5] sm:$0xff]  }
  0x65   : > { %12798 = vmatmul.mubr.msk.f32.gmra.mrb[30].mxu0 %vm681_vm0, %v504_v5  ;;  %v535_v5 = vld [vmem:[%s14713_s22 + $0x1f0] sm:$0xff]  ;;  %13268 = vmatprep.subr.bf16.mxu0 %v13574_v6 }
  0x66   : > { %12800 = vmatprep.mubr.msk.f32.mxu0 %vm681_vm0, %v505_v7  ;;  %v634_v7 = vld [vmem:[%s14713_s22 + $0x508] sm:$0xff]  ;;  %13269 = vmatpush3.bf16.msra.mxu0 %v13574_v6 }
  0x67   : > { %12948 = vmatmul.mubr.msk.f32.gmra.mrb[30].mxu1 %vm681_vm0, %v604_v9  ;;  %v635_v9 = vld [vmem:[%s14713_s22 + $0x510] sm:$0xff]  ;;  %v566_v6 = vld [vmem:[%s14713_s22 + $0x2e8] sm:$0xff] }
  0x68   : > { %12950 = vmatprep.mubr.msk.f32.mxu1 %vm681_vm0, %v605_v11  ;;  %v636_v11 = vld [vmem:[%s14713_s22 + $0x518] sm:$0xff] }
  0x69   : > { %12801 = vmatmul.mubr.msk.f32.gmra.mrb[32].mxu0 %vm681_vm0, %v506_v10  ;;  %v537_v10 = vld [vmem:[%s14713_s22 + $0x200] sm:$0xff] }
  0x6a   : > { %12803 = vmatprep.mubr.msk.f32.mxu0 %vm681_vm0, %v507_v12  ;;  %v538_v12 = vld [vmem:[%s14713_s22 + $0x208] sm:$0xff] }
  0x6b   : > { %12951 = vmatmul.mubr.msk.f32.gmra.mrb[32].mxu1 %vm681_vm0, %v606_v13  ;;  %v637_v13 = vld [vmem:[%s14713_s22 + $0x520] sm:$0xff] }
  0x6c   : > { %12953 = vmatprep.mubr.msk.f32.mxu1 %vm681_vm0, %v607_v15  ;;  %v638_v15 = vld [vmem:[%s14713_s22 + $0x528] sm:$0xff] }
  0x6d   : > { %12804 = vmatmul.mubr.msk.f32.gmra.mrb[34].mxu0 %vm681_vm0, %v508_v14  ;;  %v539_v14 = vld [vmem:[%s14713_s22 + $0x210] sm:$0xff] }
  0x6e   : > { %12806 = vmatprep.mubr.msk.f32.mxu0 %vm681_vm0, %v509_v16  ;;  %v540_v16 = vld [vmem:[%s14713_s22 + $0x218] sm:$0xff] }
  0x6f   : > { %12954 = vmatmul.mubr.msk.f32.gmra.mrb[34].mxu1 %vm681_vm0, %v608_v17  ;;  %v639_v17 = vld [vmem:[%s14713_s22 + $0x530] sm:$0xff] }
  0x70   : > { %12956 = vmatprep.mubr.msk.f32.mxu1 %vm681_vm0, %v609_v20  ;;  %v542_v20 = vld [vmem:[%s14713_s22 + $0x228] sm:$0xff] }
  0x71   : > { %12807 = vmatmul.mubr.msk.f32.gmra.mrb[36].mxu0 %vm681_vm0, %v510_v19  ;;  %v640_v19 = vld [vmem:[%s14713_s22 + $0x538] sm:$0xff] }
  0x72   : > { %12809 = vmatprep.mubr.msk.f32.mxu0 %vm681_vm0, %v511_v21  ;;  %v641_v21 = vld [vmem:[%s14713_s22 + $0x540] sm:$0xff] }
  0x73   : > { %12957 = vmatmul.mubr.msk.f32.gmra.mrb[36].mxu1 %vm681_vm0, %v610_v22  ;;  %v543_v22 = vld [vmem:[%s14713_s22 + $0x230] sm:$0xff] }
  0x74   : > { %12959 = vmatprep.mubr.msk.f32.mxu1 %vm681_vm0, %v611_v24  ;;  %v544_v24 = vld [vmem:[%s14713_s22 + $0x238] sm:$0xff] }
  0x75   : > { %12810 = vmatmul.mubr.msk.f32.gmra.mrb[38].mxu0 %vm681_vm0, %v512_v23  ;;  %v642_v23 = vld [vmem:[%s14713_s22 + $0x548] sm:$0xff] }
  0x76   : > { %12812 = vmatprep.mubr.msk.f32.mxu0 %vm681_vm0, %v513_v25  ;;  %v643_v25 = vld [vmem:[%s14713_s22 + $0x550] sm:$0xff] }
  0x77   : > { %12960 = vmatmul.mubr.msk.f32.gmra.mrb[38].mxu1 %vm681_vm0, %v612_v26  ;;  %v545_v26 = vld [vmem:[%s14713_s22 + $0x240] sm:$0xff] }
  0x78   : > { %12962 = vmatprep.mubr.msk.f32.mxu1 %vm681_vm0, %v613_v28  ;;  %v546_v28 = vld [vmem:[%s14713_s22 + $0x248] sm:$0xff] }
  0x79   : > { %12813 = vmatmul.mubr.msk.f32.gmra.mrb[40].mxu0 %vm681_vm0, %v514_v27  ;;  %v644_v27 = vld [vmem:[%s14713_s22 + $0x558] sm:$0xff] }
  0x7a   : > { %12815 = vmatprep.mubr.msk.f32.mxu0 %vm681_vm0, %v515_v29  ;;  %v645_v29 = vld [vmem:[%s14713_s22 + $0x560] sm:$0xff] }
  0x7b   : > { %12963 = vmatmul.mubr.msk.f32.gmra.mrb[40].mxu1 %vm681_vm0, %v614_v30  ;;  %v547_v30 = vld [vmem:[%s14713_s22 + $0x250] sm:$0xff] }
  0x7c   : > { %12965 = vmatprep.mubr.msk.f32.mxu1 %vm681_vm0, %v615_v32  ;;  %v548_v32 = vld [vmem:[%s14713_s22 + $0x258] sm:$0xff] }
  0x7d   : > { %12816 = vmatmul.mubr.msk.f32.gmra.mrb[42].mxu0 %vm681_vm0, %v516_v31  ;;  %v646_v31 = vld [vmem:[%s14713_s22 + $0x568] sm:$0xff] }
  0x7e   : > { %12818 = vmatprep.mubr.msk.f32.mxu0 %vm681_vm0, %v517_v33  ;;  %v647_v33 = vld [vmem:[%s14713_s22 + $0x570] sm:$0xff] }
  0x7f   : > { %12966 = vmatmul.mubr.msk.f32.gmra.mrb[42].mxu1 %vm681_vm0, %v616_v34  ;;  %v549_v34 = vld [vmem:[%s14713_s22 + $0x260] sm:$0xff] }
  0x80   : > { %12968 = vmatprep.mubr.msk.f32.mxu1 %vm681_vm0, %v617_v36  ;;  %v648_v36 = vld [vmem:[%s14713_s22 + $0x578] sm:$0xff] }
  0x81   : > { %12819 = vmatmul.mubr.msk.f32.gmra.mrb[44].mxu0 %vm681_vm0, %v518_v35  ;;  %v13575_v35 = vld [vmem:[%s19179_s5 + $0x8] sm:$0xff]  }
  0x82   : > { %12821 = vmatprep.mubr.msk.f32.mxu0 %vm681_vm0, %v519_v37  ;;  %v550_v37 = vld [vmem:[%s14713_s22 + $0x268] sm:$0xff]  ;;  %13270 = vmatprep.subr.bf16.mxu0 %v13575_v35 }
  0x83   : > { %12969 = vmatmul.mubr.msk.f32.gmra.mrb[44].mxu1 %vm681_vm0, %v618_v38  ;;  %v649_v38 = vld [vmem:[%s14713_s22 + $0x580] sm:$0xff]  ;;  %13271 = vmatpush3.bf16.msra.mxu0 %v13575_v35 }
  0x84   : > { %12971 = vmatprep.mubr.msk.f32.mxu1 %vm681_vm0, %v619_v40  ;;  %v650_v40 = vld [vmem:[%s14713_s22 + $0x588] sm:$0xff] }
  0x85   : > { %12822 = vmatmul.mubr.msk.f32.gmra.mrb[46].mxu0 %vm681_vm0, %v520_v39  ;;  %v551_v39 = vld [vmem:[%s14713_s22 + $0x270] sm:$0xff] }
  0x86   : > { %12824 = vmatprep.mubr.msk.f32.mxu0 %vm681_vm0, %v521_v41  ;;  %v552_v41 = vld [vmem:[%s14713_s22 + $0x278] sm:$0xff] }
  0x87   : > { %12972 = vmatmul.mubr.msk.f32.gmra.mrb[46].mxu1 %vm681_vm0, %v620_v42  ;;  %v651_v42 = vld [vmem:[%s14713_s22 + $0x590] sm:$0xff] }
  0x88   : > { %12974 = vmatprep.mubr.msk.f32.mxu1 %vm681_vm0, %v621_v44  ;;  %v652_v44 = vld [vmem:[%s14713_s22 + $0x598] sm:$0xff] }
  0x89   : > { %12825 = vmatmul.mubr.msk.f32.gmra.mrb[48].mxu0 %vm681_vm0, %v522_v43  ;;  %v553_v43 = vld [vmem:[%s14713_s22 + $0x280] sm:$0xff] }
  0x8a   : > { %12827 = vmatprep.mubr.msk.f32.mxu0 %vm681_vm0, %v523_v45  ;;  %v554_v45 = vld [vmem:[%s14713_s22 + $0x288] sm:$0xff] }
  0x8b   : > { %12975 = vmatmul.mubr.msk.f32.gmra.mrb[48].mxu1 %vm681_vm0, %v622_v46  ;;  %v653_v46 = vld [vmem:[%s14713_s22 + $0x5a0] sm:$0xff] }
  0x8c   : > { %12977 = vmatprep.mubr.msk.f32.mxu1 %vm681_vm0, %v623_v48  ;;  %v654_v48 = vld [vmem:[%s14713_s22 + $0x5a8] sm:$0xff] }
  0x8d   : > { %12828 = vmatmul.mubr.msk.f32.gmra.mrb[50].mxu0 %vm681_vm0, %v524_v47  ;;  %v555_v47 = vld [vmem:[%s14713_s22 + $0x290] sm:$0xff] }
  0x8e   : > { %12830 = vmatprep.mubr.msk.f32.mxu0 %vm681_vm0, %v525_v49  ;;  %v556_v49 = vld [vmem:[%s14713_s22 + $0x298] sm:$0xff] }
  0x8f   : > { %12978 = vmatmul.mubr.msk.f32.gmra.mrb[50].mxu1 %vm681_vm0, %v624_v50  ;;  %v655_v50 = vld [vmem:[%s14713_s22 + $0x5b0] sm:$0xff] }
  0x90   : > { %12980 = vmatprep.mubr.msk.f32.mxu1 %vm681_vm0, %v625_v52  ;;  %v656_v52 = vld [vmem:[%s14713_s22 + $0x5b8] sm:$0xff] }
  0x91   : > { %12831 = vmatmul.mubr.msk.f32.gmra.mrb[52].mxu0 %vm681_vm0, %v526_v51  ;;  %v557_v51 = vld [vmem:[%s14713_s22 + $0x2a0] sm:$0xff] }
  0x92   : > { %12833 = vmatprep.mubr.msk.f32.mxu0 %vm681_vm0, %v527_v53  ;;  %v558_v53 = vld [vmem:[%s14713_s22 + $0x2a8] sm:$0xff] }
  0x93   : > { %12981 = vmatmul.mubr.msk.f32.gmra.mrb[52].mxu1 %vm681_vm0, %v626_v54  ;;  %v657_v54 = vld [vmem:[%s14713_s22 + $0x5c0] sm:$0xff] }
  0x94   : > { %12983 = vmatprep.mubr.msk.f32.mxu1 %vm681_vm0, %v627_v56  ;;  %v658_v56 = vld [vmem:[%s14713_s22 + $0x5c8] sm:$0xff] }
  0x95   : > { %12834 = vmatmul.mubr.msk.f32.gmra.mrb[54].mxu0 %vm681_vm0, %v528_v55  ;;  %v559_v55 = vld [vmem:[%s14713_s22 + $0x2b0] sm:$0xff] }
  0x96   : > { %12836 = vmatprep.mubr.msk.f32.mxu0 %vm681_vm0, %v529_v57  ;;  %v560_v57 = vld [vmem:[%s14713_s22 + $0x2b8] sm:$0xff] }
  0x97   : > { %12984 = vmatmul.mubr.msk.f32.gmra.mrb[54].mxu1 %vm681_vm0, %v628_v58  ;;  %v659_v58 = vld [vmem:[%s14713_s22 + $0x5d0] sm:$0xff] }
  0x98   : > { %12986 = vmatprep.mubr.msk.f32.mxu1 %vm681_vm0, %v629_v60  ;;  %v13576_v60 = vld [vmem:[%s19179_s5 + $0x10] sm:$0xff]  }
  0x99   : > { %12837 = vmatmul.mubr.msk.f32.gmra.mrb[56].mxu0 %vm681_vm0, %v530_v59  ;;  %v561_v59 = vld [vmem:[%s14713_s22 + $0x2c0] sm:$0xff]  ;;  %13272 = vmatprep.subr.bf16.mxu0 %v13576_v60 }
  0x9a   : > { %12839 = vmatprep.mubr.msk.f32.mxu0 %vm681_vm0, %v531_v61  ;;  %v660_v61 = vld [vmem:[%s14713_s22 + $0x5d8] sm:$0xff]  ;;  %13273 = vmatpush3.bf16.msra.mxu0 %v13576_v60 }
  0x9b   : > { %12987 = vmatmul.mubr.msk.f32.gmra.mrb[56].mxu1 %vm681_vm0, %v630_v62  ;;  %v562_v62 = vld [vmem:[%s14713_s22 + $0x2c8] sm:$0xff] }
  0x9c   : > { %12989 = vmatprep.mubr.msk.f32.mxu1 %vm681_vm0, %v631_v0  ;;  %v563_v0 = vld [vmem:[%s14713_s22 + $0x2d0] sm:$0xff] }
  0x9d   : > { %12840 = vmatmul.mubr.msk.f32.gmra.mrb[58].mxu0 %vm681_vm0, %v532_v63  ;;  %v661_v63 = vld [vmem:[%s14713_s22 + $0x5e0] sm:$0xff] }
  0x9e   : > { %12842 = vmatprep.mubr.msk.f32.mxu0 %vm681_vm0, %v533_v1  ;;  %v662_v1 = vld [vmem:[%s14713_s22 + $0x5e8] sm:$0xff] }
  0x9f   : > { %12990 = vmatmul.mubr.msk.f32.gmra.mrb[58].mxu1 %vm681_vm0, %v632_v2  ;;  %v564_v2 = vld [vmem:[%s14713_s22 + $0x2d8] sm:$0xff] }
  0xa0   : > { %12992 = vmatprep.mubr.msk.f32.mxu1 %vm681_vm0, %v633_v4  ;;  %v565_v4 = vld [vmem:[%s14713_s22 + $0x2e0] sm:$0xff] }
  0xa1   : > { %12843 = vmatmul.mubr.msk.f32.gmra.mrb[60].mxu0 %vm681_vm0, %v534_v3  ;;  %v663_v3 = vld [vmem:[%s14713_s22 + $0x5f0] sm:$0xff] }
  0xa2   : > { %12845 = vmatprep.mubr.msk.f32.mxu0 %vm681_vm0, %v535_v5  ;;  %v664_v5 = vld [vmem:[%s14713_s22 + $0x5f8] sm:$0xff] }
  0xa3   : > { %12993 = vmatmul.mubr.msk.f32.gmra.mrb[60].mxu1 %vm681_vm0, %v634_v7  ;;  %v665_v7 = vld [vmem:[%s14713_s22 + $0x600] sm:$0xff] }
  0xa4   : > { %12995 = vmatprep.mubr.msk.f32.mxu1 %vm681_vm0, %v635_v9  ;;  %v666_v9 = vld [vmem:[%s14713_s22 + $0x608] sm:$0xff] }
  0xa5   : > { %12846 = vmatmul.mubr.msk.f32.gmra.mrb[62].mxu0 %vm681_vm0, %v536_v8  ;;  %v567_v8 = vld [vmem:[%s14713_s22 + $0x2f0] sm:$0xff] }
  0xa6   : > { %12848 = vmatprep.mubr.msk.f32.mxu0 %vm681_vm0, %v537_v10  ;;  %v568_v10 = vld [vmem:[%s14713_s22 + $0x2f8] sm:$0xff] }
  0xa7   : > { %12996 = vmatmul.mubr.msk.f32.gmra.mrb[62].mxu1 %vm681_vm0, %v636_v11  ;;  %v667_v11 = vld [vmem:[%s14713_s22 + $0x610] sm:$0xff] }
  0xa8   : > { %12998 = vmatprep.mubr.msk.f32.mxu1 %vm681_vm0, %v637_v13  ;;  %v668_v13 = vld [vmem:[%s14713_s22 + $0x618] sm:$0xff] }
  0xa9   : > { %12849 = vmatmul.mubr.msk.f32.gmra.mrb[64].mxu0 %vm681_vm0, %v538_v12  ;;  %v569_v12 = vld [vmem:[%s14713_s22 + $0x300] sm:$0xff] }
  0xaa   : > { %12851 = vmatprep.mubr.msk.f32.mxu0 %vm681_vm0, %v539_v14  ;;  %v570_v14 = vld [vmem:[%s14713_s22 + $0x308] sm:$0xff] }
  0xab   : > { %12999 = vmatmul.mubr.msk.f32.gmra.mrb[64].mxu1 %vm681_vm0, %v638_v15  ;;  %v669_v15 = vld [vmem:[%s14713_s22 + $0x620] sm:$0xff] }
  0xac   : > { %13001 = vmatprep.mubr.msk.f32.mxu1 %vm681_vm0, %v639_v17  ;;  %v670_v17 = vld [vmem:[%s14713_s22 + $0x628] sm:$0xff] }
  0xad   : > { %12852 = vmatmul.mubr.msk.f32.gmra.mrb[66].mxu0 %vm681_vm0, %v540_v16  ;;  %v571_v16 = vld [vmem:[%s14713_s22 + $0x310] sm:$0xff] }
  0xae   : > { %12854 = vmatprep.mubr.msk.f32.mxu0 %vm681_vm0, %v541_v18  ;;  %v572_v18 = vld [vmem:[%s14713_s22 + $0x318] sm:$0xff] }
  0xaf   : > { %13002 = vmatmul.mubr.msk.f32.gmra.mrb[66].mxu1 %vm681_vm0, %v640_v19  ;;  %v671_v19 = vld [vmem:[%s14713_s22 + $0x630] sm:$0xff] }
  0xb0   : > { %13004 = vmatprep.mubr.msk.f32.mxu1 %vm681_vm0, %v641_v21  ;;  %v672_v21 = vld [vmem:[%s14713_s22 + $0x638] sm:$0xff] }
  0xb1   : > { %12855 = vmatmul.mubr.msk.f32.gmra.mrb[68].mxu0 %vm681_vm0, %v542_v20  ;;  %v13577_v20 = vld [vmem:[%s19179_s5 + $0x18] sm:$0xff]  }
  0xb2   : > { %12857 = vmatprep.mubr.msk.f32.mxu0 %vm681_vm0, %v543_v22  ;;  %13274 = vmatprep.subr.bf16.mxu0 %v13577_v20  ;;  %v15162_v22 = vld [vmem:[%s19176_s2] ss:$0 sm:$0xff] }
  0xb3   : > { %13005 = vmatmul.mubr.msk.f32.gmra.mrb[68].mxu1 %vm681_vm0, %v642_v23  ;;  %13275 = vmatpush3.bf16.msra.mxu0 %v13577_v20 }
  0xb4   : > { %13007 = vmatprep.mubr.msk.f32.mxu1 %vm681_vm0, %v643_v25 }
  0xb5   : > { %12858 = vmatmul.mubr.msk.f32.gmra.mrb[70].mxu0 %vm681_vm0, %v544_v24 }
  0xb6   : > { %12860 = vmatprep.mubr.msk.f32.mxu0 %vm681_vm0, %v545_v26 }
  0xb7   : > { %13008 = vmatmul.mubr.msk.f32.gmra.mrb[70].mxu1 %vm681_vm0, %v644_v27 }
  0xb8   : > { %13010 = vmatprep.mubr.msk.f32.mxu1 %vm681_vm0, %v645_v29 }
  0xb9   : > { %12861 = vmatmul.mubr.msk.f32.gmra.mrb[72].mxu0 %vm681_vm0, %v546_v28 }
  0xba   : > { %12863 = vmatprep.mubr.msk.f32.mxu0 %vm681_vm0, %v547_v30 }
  0xbb   : > { %13011 = vmatmul.mubr.msk.f32.gmra.mrb[72].mxu1 %vm681_vm0, %v646_v31 }
  0xbc   : > { %13013 = vmatprep.mubr.msk.f32.mxu1 %vm681_vm0, %v647_v33 }
  0xbd   : > { %12864 = vmatmul.mubr.msk.f32.gmra.mrb[74].mxu0 %vm681_vm0, %v548_v32 }
  0xbe   : > { %12866 = vmatprep.mubr.msk.f32.mxu0 %vm681_vm0, %v549_v34 }
  0xbf   : > { %13014 = vmatmul.mubr.msk.f32.gmra.mrb[74].mxu1 %vm681_vm0, %v648_v36 }
  0xc0   : > { %13016 = vmatprep.mubr.msk.f32.mxu1 %vm681_vm0, %v649_v38 }
  0xc1   : > { %12867 = vmatmul.mubr.msk.f32.gmra.mrb[76].mxu0 %vm681_vm0, %v550_v37 }
  0xc2   : > { %12869 = vmatprep.mubr.msk.f32.mxu0 %vm681_vm0, %v551_v39 }
  0xc3   : > { %13017 = vmatmul.mubr.msk.f32.gmra.mrb[76].mxu1 %vm681_vm0, %v650_v40 }
  0xc4   : > { %13019 = vmatprep.mubr.msk.f32.mxu1 %vm681_vm0, %v651_v42 }
  0xc5   : > { %12870 = vmatmul.mubr.msk.f32.gmra.mrb[78].mxu0 %vm681_vm0, %v552_v41 }
  0xc6   : > { %12872 = vmatprep.mubr.msk.f32.mxu0 %vm681_vm0, %v553_v43 }
  0xc7   : > { %13020 = vmatmul.mubr.msk.f32.gmra.mrb[78].mxu1 %vm681_vm0, %v652_v44 }
  0xc8   : > { %13022 = vmatprep.mubr.msk.f32.mxu1 %vm681_vm0, %v653_v46 }
  0xc9   : > { %12873 = vmatmul.mubr.msk.f32.gmra.mrb[80].mxu0 %vm681_vm0, %v554_v45 }
  0xca   : > { %12875 = vmatprep.mubr.msk.f32.mxu0 %vm681_vm0, %v555_v47 }
  0xcb   : > { %13023 = vmatmul.mubr.msk.f32.gmra.mrb[80].mxu1 %vm681_vm0, %v654_v48  ;;  %v13578_v48 = vld [vmem:[%s19179_s5 + $0x20] sm:$0xff]  }
  0xcc   : > { %13025 = vmatprep.mubr.msk.f32.mxu1 %vm681_vm0, %v655_v50  ;;  %13276 = vmatprep.subr.bf16.mxu0 %v13578_v48 }
  0xcd   : > { %12876 = vmatmul.mubr.msk.f32.gmra.mrb[82].mxu0 %vm681_vm0, %v556_v49 }
  0xce   : > { %12878 = vmatprep.mubr.msk.f32.mxu0 %vm681_vm0, %v557_v51  ;;  %13277 = vmatpush3.bf16.msra.mxu0 %v13578_v48 }
  0xcf   : > { %13026 = vmatmul.mubr.msk.f32.gmra.mrb[82].mxu1 %vm681_vm0, %v656_v52 }
  0xd0   : > { %13028 = vmatprep.mubr.msk.f32.mxu1 %vm681_vm0, %v657_v54 }
  0xd1   : > { %12879 = vmatmul.mubr.msk.f32.gmra.mrb[84].mxu0 %vm681_vm0, %v558_v53 }
  0xd2   : > { %12881 = vmatprep.mubr.msk.f32.mxu0 %vm681_vm0, %v559_v55 }
  0xd3   : > { %13029 = vmatmul.mubr.msk.f32.gmra.mrb[84].mxu1 %vm681_vm0, %v658_v56 }
  0xd4   : > { %13031 = vmatprep.mubr.msk.f32.mxu1 %vm681_vm0, %v659_v58 }
  0xd5   : > { %12882 = vmatmul.mubr.msk.f32.gmra.mrb[86].mxu0 %vm681_vm0, %v560_v57 }
  0xd6   : > { %12884 = vmatprep.mubr.msk.f32.mxu0 %vm681_vm0, %v561_v59 }
  0xd7   : > { %13032 = vmatmul.mubr.msk.f32.gmra.mrb[86].mxu1 %vm681_vm0, %v660_v61 }
  0xd8   : > { %13034 = vmatprep.mubr.msk.f32.mxu1 %vm681_vm0, %v661_v63 }
  0xd9   : > { %12885 = vmatmul.mubr.msk.f32.gmra.mrb[88].mxu0 %vm681_vm0, %v562_v62 }
  0xda   : > { %12887 = vmatprep.mubr.msk.f32.mxu0 %vm681_vm0, %v563_v0 }
  0xdb   : > { %13035 = vmatmul.mubr.msk.f32.gmra.mrb[88].mxu1 %vm681_vm0, %v662_v1 }
  0xdc   : > { %13037 = vmatprep.mubr.msk.f32.mxu1 %vm681_vm0, %v663_v3 }
  0xdd   : > { %12888 = vmatmul.mubr.msk.f32.gmra.mrb[90].mxu0 %vm681_vm0, %v564_v2 }
  0xde   : > { %12890 = vmatprep.mubr.msk.f32.mxu0 %vm681_vm0, %v565_v4 }
  0xdf   : > { %13038 = vmatmul.mubr.msk.f32.gmra.mrb[90].mxu1 %vm681_vm0, %v664_v5 }
  0xe0   : > { %13040 = vmatprep.mubr.msk.f32.mxu1 %vm681_vm0, %v665_v7 }
  0xe1   : > { %12891 = vmatmul.mubr.msk.f32.gmra.mrb[92].mxu0 %vm681_vm0, %v566_v6 }
  0xe2   : > { %12893 = vmatprep.mubr.msk.f32.mxu0 %vm681_vm0, %v567_v8 }
  0xe3   : > { %13041 = vmatmul.mubr.msk.f32.gmra.mrb[92].mxu1 %vm681_vm0, %v666_v9 }
  0xe4   : > { %13043 = vmatprep.mubr.msk.f32.mxu1 %vm681_vm0, %v667_v11 }
  0xe5   : > { %12894 = vmatmul.mubr.msk.f32.gmra.mrb[94].mxu0 %vm681_vm0, %v568_v10 }
  0xe6   : > { %12896 = vmatprep.mubr.msk.f32.mxu0 %vm681_vm0, %v569_v12 }
  0xe7   : > { %13044 = vmatmul.mubr.msk.f32.gmra.mrb[94].mxu1 %vm681_vm0, %v668_v13 }
  0xe8   : > { %13046 = vmatprep.mubr.msk.f32.mxu1 %vm681_vm0, %v669_v15 }
  0xe9   : > { %12897 = vmatmul.mubr.msk.f32.gmra.mrb[96].mxu0 %vm681_vm0, %v570_v14 }
  0xea   : > { %12899 = vmatprep.mubr.msk.f32.mxu0 %vm681_vm0, %v571_v16 }
  0xeb   : > { %13047 = vmatmul.mubr.msk.f32.gmra.mrb[96].mxu1 %vm681_vm0, %v670_v17 }
  0xec   : > { %13049 = vmatprep.mubr.msk.f32.mxu1 %vm681_vm0, %v671_v19 }
  0xed   : > { %12900 = vmatmul.mubr.msk.f32.gmra.mrb[98].mxu0 %vm681_vm0, %v572_v18 }
  0xef   : > { %13050 = vmatmul.mubr.msk.f32.gmra.mrb[98].mxu1 %vm681_vm0, %v672_v21 }
  0xfc   : > { %v12754_v23 = vpop.f32.mrb[0].mxu0 }
  0xfd   : > { %v1354_v24 = vadd.f32 %v12754_v23, %v15162_v22  ;;  %v1348_v25 = vpop.f32.mrb[1].mxu0 }
  0xfe   : > { %v1349_v26 = vadd.f32 %v15162_v22, %v1348_v25  ;;  %v12904_v28 = vpop.f32.mrb[0].mxu1 }
  0xff   : > { %v2548_v27 = vmul.f32 0.1, %v1354_v24  ;;  %vm2348_vm1 = vcmp.gt.f32.partialorder %v1354_v24, 0.0  ;;  %v1854_v31 = vadd.f32 %v12904_v28, %v15162_v22  ;;  %v1848_v32 = vpop.f32.mrb[1].mxu1 }
 0x100   : > { %v2547_v29 = vmul.f32 0.1, %v1349_v26  ;;  %v12757_v30 = vpop.f32.mrb[2].mxu0  ;;  %vm2347_vm2 = vcmp.gt.f32.partialorder %v1349_v26, 0.0  ;;  %v1849_v36 = vadd.f32 %v15162_v22, %v1848_v32 }
 0x101   : > { %v1364_v33 = vadd.f32 %v12757_v30, %v15162_v22  ;;  %v1358_v34 = vpop.f32.mrb[3].mxu0  ;;  %v2748_v35 = vsel %vm2348_vm1, %v1354_v24, %v2548_v27  ;;  %v2648_v39 = vmul.f32 0.1, %v1854_v31  ;;  %vm2448_vm3 = vcmp.gt.f32.partialorder %v1854_v31, 0.0 }
 0x102   : > { %v1359_v37 = vadd.f32 %v15162_v22, %v1358_v34  ;;  %v2747_v38 = vsel %vm2347_vm2, %v1349_v26, %v2547_v29  ;;  %v2647_v42 = vmul.f32 0.1, %v1849_v36  ;;  %v12907_v43 = vpop.f32.mrb[2].mxu1  ;;  %vm2447_vm6 = vcmp.gt.f32.partialorder %v1849_v36, 0.0 }
 0x103   : > { %vm2350_vm4 = vcmp.gt.f32.partialorder %v1364_v33, 0.0  ;;  %v2550_v40 = vmul.f32 0.1, %v1364_v33  ;;  %v2947_v41 = vpack.c.bf16 %v2748_v35, %v2747_v38  ;;  %v1864_v46 = vadd.f32 %v12907_v43, %v15162_v22  ;;  %v1858_v47 = vpop.f32.mrb[3].mxu1 }
 0x104   : > { %vm2349_vm5 = vcmp.gt.f32.partialorder %v1359_v37, 0.0  ;;  %v2549_v44 = vmul.f32 0.1, %v1359_v37  ;;  %v12760_v45 = vpop.f32.mrb[4].mxu0  ;;  %v15174_v49 = vsel %vm2448_vm3, %v1854_v31, %v2648_v39  ;;  %v1859_v53 = vadd.f32 %v15162_v22, %v1858_v47 }
 0x105   : > { %v2750_v50 = vsel %vm2350_vm4, %v1364_v33, %v2550_v40  ;;  %v1374_v51 = vadd.f32 %v12760_v45, %v15162_v22  ;;  %v1368_v52 = vpop.f32.mrb[5].mxu0  ;;  %13068 = vmatprep.mubr.bf16.mxu1 %v2947_v41  ;;  %v15179_v56 = vsel %vm2447_vm6, %v1849_v36, %v2647_v42  ;;  %v2650_v5 = vmul.f32 0.1, %v1864_v46 }
 0x106   : > { %v2749_v54 = vsel %vm2349_vm5, %v1359_v37, %v2549_v44  ;;  %v1369_v55 = vadd.f32 %v15162_v22, %v1368_v52  ;;  %v2649_v59 = vmul.f32 0.1, %v1859_v53  ;;  %v12910_v60 = vpop.f32.mrb[4].mxu1  ;;  %vm2449_vm9 = vcmp.gt.f32.partialorder %v1859_v53, 0.0 }
 0x107   : > { %v2948_v57 = vpack.c.bf16 %v2750_v50, %v2749_v54  ;;  %v2552_v58 = vmul.f32 0.1, %v1374_v51  ;;  %vm2352_vm7 = vcmp.gt.f32.partialorder %v1374_v51, 0.0  ;;  %v15182_v63 = vadd.f32 %v12910_v60, %v15162_v22  ;;  %v1868_v0 = vpop.f32.mrb[5].mxu1 }
 0x108   : > { %v2551_v61 = vmul.f32 0.1, %v1369_v55  ;;  %v12763_v62 = vpop.f32.mrb[6].mxu0  ;;  %vm2351_vm8 = vcmp.gt.f32.partialorder %v1369_v55, 0.0  ;;  %v1869_v8 = vadd.f32 %v15162_v22, %v1868_v0  ;;  %vm2450_vm10 = vcmp.gt.f32.partialorder %v1864_v46, 0.0 }
 0x109   : > { %v1384_v2 = vadd.f32 %v12763_v62, %v15162_v22  ;;  %v1378_v3 = vpop.f32.mrb[7].mxu0  ;;  %13069 = vmatmul.mubr.bf16.vlgmr.msra.gmra.mrb[100].mxu1 %v2948_v57  ;;  %v2752_v4 = vsel %vm2352_vm7, %v1374_v51, %v2552_v58  ;;  %v2652_v11 = vmul.f32 0.1, %v15182_v63  ;;  %v15190_v16 = vsel %vm2449_vm9, %v1859_v53, %v2649_v59 }
 0x10a   : > { %v1379_v6 = vadd.f32 %v15162_v22, %v1378_v3  ;;  %v2751_v7 = vsel %vm2351_vm8, %v1369_v55, %v2551_v61  ;;  %v12913_v12 = vpop.f32.mrb[6].mxu1  ;;  %19298 = vst [vmem:[#allocation14_spill] sm:$0xff] %v15190_v16  ;;  %v15197_v21 = vsel %vm2450_vm10, %v1864_v46, %v2650_v5  ;;  %v2651_v25 = vmul.f32 0.1, %v1869_v8 }
 0x10b   : > { %v2554_v9 = vmul.f32 0.1, %v1384_v2  ;;  %v2949_v10 = vpack.c.bf16 %v2752_v4, %v2751_v7  ;;  %vm2354_vm11 = vcmp.gt.f32.partialorder %v1384_v2, 0.0  ;;  %v1878_v15 = vpop.f32.mrb[7].mxu1  ;;  %v15194_v20 = vadd.f32 %v12913_v12, %v15162_v22  ;;  %19299 = vst [vmem:[#allocation15_spill] sm:$0xff] %v15197_v21 }
 0x10c   : > { %v2553_v13 = vmul.f32 0.1, %v1379_v6  ;;  %v12766_v14 = vpop.f32.mrb[8].mxu0  ;;  %vm2353_vm12 = vcmp.gt.f32.partialorder %v1379_v6, 0.0  ;;  %v1879_v29 = vadd.f32 %v15162_v22, %v1878_v15  ;;  %vm2451_vm15 = vcmp.gt.f32.partialorder %v1869_v8, 0.0 }
 0x10d   : > { %v1394_v17 = vadd.f32 %v12766_v14, %v15162_v22  ;;  %v1388_v18 = vpop.f32.mrb[9].mxu0  ;;  %13072 = vmatprep.mubr.bf16.mxu1 %v2949_v10  ;;  %v2754_v19 = vsel %vm2354_vm11, %v1384_v2, %v2554_v9  ;;  %v2654_v37 = vmul.f32 0.1, %v15194_v20  ;;  %vm2452_vm0 = vcmp.gt.f32.partialorder %v15182_v63, 0.0 }
 0x10e   : > { %v1389_v23 = vadd.f32 %v15162_v22, %v1388_v18  ;;  %v2753_v24 = vsel %vm2353_vm12, %v1379_v6, %v2553_v13  ;;  %v12916_v30 = vpop.f32.mrb[8].mxu1  ;;  %v15210_v41 = vsel %vm2451_vm15, %v1869_v8, %v2651_v25  ;;  %v2653_v44 = vmul.f32 0.1, %v1879_v29 }
 0x10f   : > { %v2556_v27 = vmul.f32 0.1, %v1394_v17  ;;  %v2950_v28 = vpack.c.bf16 %v2754_v19, %v2753_v24  ;;  %vm2356_vm13 = vcmp.gt.f32.partialorder %v1394_v17, 0.0  ;;  %v1888_v33 = vpop.f32.mrb[9].mxu1  ;;  %v15208_v40 = vadd.f32 %v12916_v30, %v15162_v22  ;;  %19300 = vst [vmem:[#allocation16_spill] sm:$0xff] %v15210_v41 }
 0x110   : > { %v2555_v31 = vmul.f32 0.1, %v1389_v23  ;;  %v12769_v32 = vpop.f32.mrb[10].mxu0  ;;  %vm2355_vm14 = vcmp.gt.f32.partialorder %v1389_v23, 0.0  ;;  %v15213_v50 = vsel %vm2452_vm0, %v15182_v63, %v2652_v11  ;;  %v1889_v54 = vadd.f32 %v15162_v22, %v1888_v33 }
 0x111   : > { %v1404_v34 = vadd.f32 %v12769_v32, %v15162_v22  ;;  %v1398_v35 = vpop.f32.mrb[11].mxu0  ;;  %13073 = vmatmul.mubr.bf16.gmra.mrb[104].mxu1 %v2950_v28  ;;  %v2756_v36 = vsel %vm2356_vm13, %v1394_v17, %v2556_v27  ;;  %19301 = vst [vmem:[#allocation17_spill] sm:$0xff] %v15213_v50  ;;  %v2656_v59 = vmul.f32 0.1, %v15208_v40  ;;  %vm2453_vm3 = vcmp.gt.f32.partialorder %v1879_v29, 0.0 }
 0x112   : > { %v1399_v38 = vadd.f32 %v15162_v22, %v1398_v35  ;;  %v2755_v39 = vsel %vm2355_vm14, %v1389_v23, %v2555_v31  ;;  %v12919_v45 = vpop.f32.mrb[10].mxu1  ;;  %vm2454_vm6 = vcmp.gt.f32.partialorder %v15194_v20, 0.0  ;;  %v2655_v7 = vmul.f32 0.1, %v1889_v54 }
 0x113   : > { %v2558_v42 = vmul.f32 0.1, %v1404_v34  ;;  %v2951_v43 = vpack.c.bf16 %v2756_v36, %v2755_v39  ;;  %vm2358_vm1 = vcmp.gt.f32.partialorder %v1404_v34, 0.0  ;;  %v1898_v48 = vpop.f32.mrb[11].mxu1  ;;  %v15222_v62 = vadd.f32 %v12919_v45, %v15162_v22  ;;  %v13579_v39 = vld [vmem:[%s19179_s5 + $0x28] sm:$0xff]  }
 0x114   : > { %v2557_v46 = vmul.f32 0.1, %v1399_v38  ;;  %v12772_v47 = vpop.f32.mrb[12].mxu0  ;;  %vm2357_vm2 = vcmp.gt.f32.partialorder %v1399_v38, 0.0  ;;  %v15227_v8 = vsel %vm2453_vm3, %v1879_v29, %v2653_v44  ;;  %v15231_v11 = vadd.f32 %v15162_v22, %v1898_v48  ;;  %13278 = vmatprep.subr.bf16.mxu0 %v13579_v39 }
 0x115   : > { %v1414_v51 = vadd.f32 %v12772_v47, %v15162_v22  ;;  %v1408_v52 = vpop.f32.mrb[13].mxu0  ;;  %13076 = vmatprep.mubr.bf16.mxu1 %v2951_v43  ;;  %v2758_v53 = vsel %vm2358_vm1, %v1404_v34, %v2558_v42  ;;  %19302 = vst [vmem:[#allocation18_spill] sm:$0xff] %v15227_v8  ;;  %v15234_v12 = vsel %vm2454_vm6, %v15194_v20, %v2654_v37  ;;  %v15237_v15 = vmul.f32 0.1, %v15222_v62 }
 0x116   : > { %v1409_v57 = vadd.f32 %v15162_v22, %v1408_v52  ;;  %v2757_v58 = vsel %vm2357_vm2, %v1399_v38, %v2557_v46  ;;  %v12922_v63 = vpop.f32.mrb[12].mxu1  ;;  %19303 = vst [vmem:[#allocation19_spill] sm:$0xff] %v15234_v12  ;;  %vm2455_vm9 = vcmp.gt.f32.partialorder %v1889_v54, 0.0  ;;  %v2657_v31 = vmul.f32 0.1, %v15231_v11  ;;  %13279 = vmatpush3.bf16.msra.mxu0 %v13579_v39 }
 0x117   : > { %v2560_v60 = vmul.f32 0.1, %v1414_v51  ;;  %v2952_v61 = vpack.c.bf16 %v2758_v53, %v2757_v58  ;;  %vm2360_vm4 = vcmp.gt.f32.partialorder %v1414_v51, 0.0  ;;  %v1908_v3 = vpop.f32.mrb[13].mxu1  ;;  %v15243_v28 = vadd.f32 %v12922_v63, %v15162_v22 }
 0x118   : > { %v2559_v0 = vmul.f32 0.1, %v1409_v57  ;;  %v12775_v2 = vpop.f32.mrb[14].mxu0  ;;  %vm2359_vm5 = vcmp.gt.f32.partialorder %v1409_v57, 0.0  ;;  %vm2456_vm10 = vcmp.gt.f32.partialorder %v15208_v40, 0.0  ;;  %v15249_v34 = vadd.f32 %v15162_v22, %v1908_v3 }
 0x119   : > { %v1424_v4 = vadd.f32 %v12775_v2, %v15162_v22  ;;  %v1418_v5 = vpop.f32.mrb[15].mxu0  ;;  %13077 = vmatmul.mubr.bf16.gmra.mrb[108].mxu1 %v2952_v61  ;;  %v2760_v6 = vsel %vm2360_vm4, %v1414_v51, %v2560_v60  ;;  %v15254_v42 = vsel %vm2455_vm9, %v1889_v54, %v2655_v7  ;;  %v15258_v46 = vmul.f32 0.1, %v15243_v28 }
 0x11a   : > { %v1419_v9 = vadd.f32 %v15162_v22, %v1418_v5  ;;  %v2759_v10 = vsel %vm2359_vm5, %v1409_v57, %v2559_v0  ;;  %v12925_v17 = vpop.f32.mrb[14].mxu1  ;;  %19304 = vst [vmem:[#allocation20_spill] sm:$0xff] %v15254_v42  ;;  %v15263_v47 = vsel %vm2456_vm10, %v15208_v40, %v2656_v59  ;;  %v2659_v58 = vmul.f32 0.1, %v15249_v34 }
 0x11b   : > { %v2562_v13 = vmul.f32 0.1, %v1424_v4  ;;  %v2953_v14 = vpack.c.bf16 %v2760_v6, %v2759_v10  ;;  %vm2362_vm7 = vcmp.gt.f32.partialorder %v1424_v4, 0.0  ;;  %v1918_v23 = vpop.f32.mrb[15].mxu1  ;;  %19305 = vst [vmem:[#allocation21_spill] sm:$0xff] %v15263_v47  ;;  %v15267_v52 = vadd.f32 %v12925_v17, %v15162_v22 }
 0x11c   : > { %v2561_v18 = vmul.f32 0.1, %v1419_v9  ;;  %v12778_v19 = vpop.f32.mrb[16].mxu0  ;;  %vm2361_vm8 = vcmp.gt.f32.partialorder %v1419_v9, 0.0  ;;  %vm2457_vm15 = vcmp.gt.f32.partialorder %v15231_v11, 0.0  ;;  %v15275_v3 = vadd.f32 %v15162_v22, %v1918_v23 }
 0x11d   : > { %v1434_v25 = vadd.f32 %v12778_v19, %v15162_v22  ;;  %v1428_v27 = vpop.f32.mrb[17].mxu0  ;;  %13080 = vmatprep.mubr.bf16.mxu1 %v2953_v14  ;;  %v2762_v20 = vsel %vm2362_vm7, %v1424_v4, %v2562_v13  ;;  %vm2458_vm0 = vcmp.gt.f32.partialorder %v15222_v62, 0.0  ;;  %v15280_v6 = vmul.f32 0.1, %v15267_v52 }
 0x11e   : > { %v1429_v29 = vadd.f32 %v15162_v22, %v1428_v27  ;;  %v2761_v30 = vsel %vm2361_vm8, %v1419_v9, %v2561_v18  ;;  %v12928_v35 = vpop.f32.mrb[16].mxu1  ;;  %v15283_v7 = vsel %vm2457_vm15, %v15231_v11, %v2657_v31  ;;  %v15292_v23 = vsel %vm2458_vm0, %v15222_v62, %v15237_v15 }
 0x11f   : > { %v2564_v32 = vmul.f32 0.1, %v1434_v25  ;;  %v2954_v33 = vpack.c.bf16 %v2762_v20, %v2761_v30  ;;  %vm2364_vm11 = vcmp.gt.f32.partialorder %v1434_v25, 0.0  ;;  %v1928_v38 = vpop.f32.mrb[17].mxu1  ;;  %19306 = vst [vmem:[#allocation22_spill] sm:$0xff] %v15283_v7  ;;  %v15286_v13 = vadd.f32 %v12928_v35, %v15162_v22  ;;  %19307 = vst [vmem:[#allocation23_spill] sm:$0xff] %v15292_v23 }
 0x120   : > { %v2563_v36 = vmul.f32 0.1, %v1429_v29  ;;  %v12781_v37 = vpop.f32.mrb[18].mxu0  ;;  %vm2363_vm12 = vcmp.gt.f32.partialorder %v1429_v29, 0.0  ;;  %v2661_v20 = vmul.f32 0.1, %v15275_v3 }
 0x121   : > { %v1444_v43 = vadd.f32 %v12781_v37, %v15162_v22  ;;  %v1438_v44 = vpop.f32.mrb[19].mxu0  ;;  %13081 = vmatmul.mubr.bf16.gmra.mrb[112].mxu1 %v2954_v33  ;;  %v2764_v45 = vsel %vm2364_vm11, %v1434_v25, %v2564_v32  ;;  %v15300_v32 = vadd.f32 %v15162_v22, %v1928_v38  ;;  %vm2459_vm3 = vcmp.gt.f32.partialorder %v15249_v34, 0.0 }
 0x122   : > { %v1439_v48 = vadd.f32 %v15162_v22, %v1438_v44  ;;  %v2763_v51 = vsel %vm2363_vm12, %v1429_v29, %v2563_v36  ;;  %v12931_v60 = vpop.f32.mrb[18].mxu1  ;;  %v15304_v33 = vmul.f32 0.1, %v15286_v13  ;;  %vm2460_vm6 = vcmp.gt.f32.partialorder %v15243_v28, 0.0 }
 0x123   : > { %v2566_v54 = vmul.f32 0.1, %v1444_v43  ;;  %v2955_v57 = vpack.c.bf16 %v2764_v45, %v2763_v51  ;;  %vm2366_vm13 = vcmp.gt.f32.partialorder %v1444_v43, 0.0  ;;  %v1938_v59 = vpop.f32.mrb[19].mxu1  ;;  %v15311_v45 = vadd.f32 %v12931_v60, %v15162_v22 }
 0x124   : > { %v2565_v61 = vmul.f32 0.1, %v1439_v48  ;;  %v12784_v40 = vpop.f32.mrb[20].mxu0  ;;  %vm2365_vm14 = vcmp.gt.f32.partialorder %v1439_v48, 0.0  ;;  %v15327_v60 = vadd.f32 %v15162_v22, %v1938_v59  ;;  %vm2461_vm9 = vcmp.gt.f32.partialorder %v15275_v3, 0.0 }
 0x125   : > { %v1454_v63 = vadd.f32 %v12784_v40, %v15162_v22  ;;  %v1448_v0 = vpop.f32.mrb[21].mxu0  ;;  %13084 = vmatprep.mubr.bf16.mxu1 %v2955_v57  ;;  %v2766_v2 = vsel %vm2366_vm13, %v1444_v43, %v2566_v54  ;;  %v15320_v57 = vmul.f32 0.1, %v15300_v32  ;;  %vm2462_vm10 = vcmp.gt.f32.partialorder %v15267_v52, 0.0 }
 0x126   : > { %v1449_v4 = vadd.f32 %v15162_v22, %v1448_v0  ;;  %v2765_v5 = vsel %vm2365_vm14, %v1439_v48, %v2565_v61  ;;  %v12934_v14 = vpop.f32.mrb[20].mxu1  ;;  %v15316_v48 = vsel %vm2459_vm3, %v15249_v34, %v2659_v58  ;;  %v15324_v61 = vsel %vm2460_vm6, %v15243_v28, %v15258_v46 }
 0x127   : > { %v2568_v9 = vmul.f32 0.1, %v1454_v63  ;;  %v2956_v10 = vpack.c.bf16 %v2766_v2, %v2765_v5  ;;  %vm2368_vm1 = vcmp.gt.f32.partialorder %v1454_v63, 0.0  ;;  %v15288_v19 = vpop.f32.mrb[21].mxu1  ;;  %19308 = vst [vmem:[#allocation24_spill] sm:$0xff] %v15316_v48  ;;  %19309 = vst [vmem:[#allocation25_spill] sm:$0xff] %v15324_v61 }
 0x128   : > { %v2567_v17 = vmul.f32 0.1, %v1449_v4  ;;  %v12787_v18 = vpop.f32.mrb[22].mxu0  ;;  %vm2367_vm2 = vcmp.gt.f32.partialorder %v1449_v4, 0.0  ;;  %v15337_v46 = vmul.f32 0.1, %v15311_v45 }
 0x129   : > { %v1464_v25 = vadd.f32 %v12787_v18, %v15162_v22  ;;  %v1458_v11 = vpop.f32.mrb[23].mxu0  ;;  %13085 = vmatmul.mubr.bf16.gmra.mrb[116].mxu1 %v2956_v10  ;;  %v2768_v27 = vsel %vm2368_vm1, %v1454_v63, %v2568_v9  ;;  %vm2463_vm15 = vcmp.gt.f32.partialorder %v15300_v32, 0.0  ;;  %vm2464_vm0 = vcmp.gt.f32.partialorder %v15286_v13, 0.0 }
 0x12a   : > { %v1459_v30 = vadd.f32 %v15162_v22, %v1458_v11  ;;  %v2767_v31 = vsel %vm2367_vm2, %v1449_v4, %v2567_v17  ;;  %v12937_v35 = vpop.f32.mrb[22].mxu1  ;;  %v15342_v17 = vadd.f32 %v12934_v14, %v15162_v22  ;;  %v15346_v11 = vmul.f32 0.1, %v15327_v60 }
 0x12b   : > { %v2570_v62 = vmul.f32 0.1, %v1464_v25  ;;  %v2957_v15 = vpack.c.bf16 %v2768_v27, %v2767_v31  ;;  %vm2370_vm4 = vcmp.gt.f32.partialorder %v1464_v25, 0.0  ;;  %v15306_v39 = vpop.f32.mrb[23].mxu1  ;;  %vm2466_vm6 = vcmp.gt.f32.partialorder %v15311_v45, 0.0 }
 0x12c   : > { %v2569_v36 = vmul.f32 0.1, %v1459_v30  ;;  %v12790_v37 = vpop.f32.mrb[24].mxu0  ;;  %vm2369_vm5 = vcmp.gt.f32.partialorder %v1459_v30, 0.0 }
 0x12d   : > { %v1474_v43 = vadd.f32 %v12790_v37, %v15162_v22  ;;  %v1468_v38 = vpop.f32.mrb[25].mxu0  ;;  %13088 = vmatprep.mubr.bf16.mxu1 %v2957_v15  ;;  %v2770_v44 = vsel %vm2370_vm4, %v1464_v25, %v2570_v62  ;;  %v15353_v15 = vsel %vm2461_vm9, %v15275_v3, %v2661_v20  ;;  %v15368_v3 = vmul.f32 0.1, %v15342_v17 }
 0x12e   : > { %v1469_v51 = vadd.f32 %v15162_v22, %v1468_v38  ;;  %v2769_v54 = vsel %vm2369_vm5, %v1459_v30, %v2569_v36  ;;  %v15329_v0 = vpop.f32.mrb[24].mxu1  ;;  %19310 = vst [vmem:[#allocation26_spill] sm:$0xff] %v15353_v15  ;;  %v15364_v38 = vsel %vm2462_vm10, %v15267_v52, %v15280_v6  ;;  %vm2465_vm5 = vcmp.gt.f32.partialorder %v15327_v60, 0.0 }
 0x12f   : > { %v2572_v40 = vmul.f32 0.1, %v1474_v43  ;;  %v2958_v63 = vpack.c.bf16 %v2770_v44, %v2769_v54  ;;  %vm2372_vm7 = vcmp.gt.f32.partialorder %v1474_v43, 0.0  ;;  %v15331_v2 = vpop.f32.mrb[25].mxu1  ;;  %19311 = vst [vmem:[#allocation27_spill] sm:$0xff] %v15364_v38 }
 0x130   : > { %v2571_v34 = vmul.f32 0.1, %v1469_v51  ;;  %v12793_v58 = vpop.f32.mrb[26].mxu0  ;;  %vm2371_vm8 = vcmp.gt.f32.partialorder %v1469_v51, 0.0 }
 0x131   : > { %v1484_v5 = vadd.f32 %v12793_v58, %v15162_v22  ;;  %v1478_v28 = vpop.f32.mrb[27].mxu0  ;;  %13089 = vmatmul.mubr.bf16.gmra.mrb[120].mxu1 %v2958_v63  ;;  %v2772_v9 = vsel %vm2372_vm7, %v1474_v43, %v2572_v40  ;;  %v15358_v43 = vadd.f32 %v15162_v22, %v15288_v19  ;;  %v15373_v19 = vadd.f32 %v12937_v35, %v15162_v22  ;;  %v13580_v58 = vld [vmem:[%s19179_s5 + $0x30] sm:$0xff]  }
 0x132   : > { %v1479_v59 = vadd.f32 %v15162_v22, %v1478_v28  ;;  %v2771_v10 = vsel %vm2371_vm8, %v1469_v51, %v2571_v34  ;;  %v15348_v27 = vpop.f32.mrb[26].mxu1  ;;  %13280 = vmatprep.subr.bf16.mxu0 %v13580_v58 }
 0x133   : > { %v2574_v18 = vmul.f32 0.1, %v1484_v5  ;;  %v2959_v25 = vpack.c.bf16 %v2772_v9, %v2771_v10  ;;  %vm2374_vm11 = vcmp.gt.f32.partialorder %v1484_v5, 0.0  ;;  %v15350_v62 = vpop.f32.mrb[27].mxu1  ;;  %v15384_v9 = vmul.f32 0.1, %v15358_v43  ;;  %13281 = vmatpush3.bf16.msra.mxu0 %v13580_v58 }
 0x134   : > { %v2573_v30 = vmul.f32 0.1, %v1479_v59  ;;  %v12796_v31 = vpop.f32.mrb[28].mxu0  ;;  %vm2373_vm12 = vcmp.gt.f32.partialorder %v1479_v59, 0.0  ;;  %vm2467_vm9 = vcmp.gt.f32.partialorder %v15358_v43, 0.0 }
 0x135   : > { %v1494_v14 = vadd.f32 %v12796_v31, %v15162_v22  ;;  %v1488_v36 = vpop.f32.mrb[29].mxu0  ;;  %13092 = vmatprep.mubr.bf16.mxu1 %v2959_v25  ;;  %v2774_v37 = vsel %vm2374_vm11, %v1484_v5, %v2574_v18  ;;  %v15390_v18 = vadd.f32 %v15162_v22, %v15306_v39  ;;  %v15404_v39 = vsel %vm2463_vm15, %v15300_v32, %v15320_v57 }
 0x136   : > { %v1489_v44 = vadd.f32 %v15162_v22, %v1488_v36  ;;  %v2773_v20 = vsel %vm2373_vm12, %v1479_v59, %v2573_v30  ;;  %v15375_v63 = vpop.f32.mrb[28].mxu1  ;;  %v15394_v30 = vmul.f32 0.1, %v15373_v19  ;;  %19312 = vst [vmem:[#allocation28_spill] sm:$0xff] %v15404_v39  ;;  %vm2468_vm12 = vcmp.gt.f32.partialorder %v15342_v17, 0.0 }
 0x137   : > { %v2576_v54 = vmul.f32 0.1, %v1494_v14  ;;  %v2960_v40 = vpack.c.bf16 %v2774_v37, %v2773_v20  ;;  %vm2376_vm13 = vcmp.gt.f32.partialorder %v1494_v14, 0.0  ;;  %v15377_v6 = vpop.f32.mrb[29].mxu1  ;;  %v15419_v32 = vmul.f32 0.1, %v15390_v18 }
 0x138   : > { %v2575_v34 = vmul.f32 0.1, %v1489_v44  ;;  %v12799_v52 = vpop.f32.mrb[30].mxu0  ;;  %vm2375_vm14 = vcmp.gt.f32.partialorder %v1489_v44, 0.0  ;;  %vm2469_vm15 = vcmp.gt.f32.partialorder %v15390_v18, 0.0 }
 0x139   : > { %v1504_v5 = vadd.f32 %v12799_v52, %v15162_v22  ;;  %v1498_v28 = vpop.f32.mrb[31].mxu0  ;;  %13093 = vmatmul.mubr.bf16.gmra.mrb[124].mxu1 %v2960_v40  ;;  %v2776_v35 = vsel %vm2376_vm13, %v1494_v14, %v2576_v54  ;;  %v15409_v40 = vadd.f32 %v15329_v0, %v15162_v22  ;;  %v15415_v52 = vsel %vm2464_vm0, %v15286_v13, %v15304_v33 }
 0x13a   : > { %v1499_v59 = vadd.f32 %v15162_v22, %v1498_v28  ;;  %v2775_v10 = vsel %vm2375_vm14, %v1489_v44, %v2575_v34  ;;  %v15396_v36 = vpop.f32.mrb[30].mxu1  ;;  %19313 = vst [vmem:[#allocation29_spill] sm:$0xff] %v15415_v52  ;;  %v15425_v0 = vadd.f32 %v15162_v22, %v15331_v2  ;;  %vm2470_vm0 = vcmp.gt.f32.partialorder %v15373_v19, 0.0 }
 0x13b   : > { %v2578_v25 = vmul.f32 0.1, %v1504_v5  ;;  %v2961_v31 = vpack.c.bf16 %v2776_v35, %v2775_v10  ;;  %vm2378_vm1 = vcmp.gt.f32.partialorder %v1504_v5, 0.0  ;;  %v15398_v44 = vpop.f32.mrb[31].mxu1  ;;  %v15512_v24 = vadd.f32 %v15396_v36, %v15162_v22 }
 0x13c   : > { %v2577_v14 = vmul.f32 0.1, %v1499_v59  ;;  %v12802_v37 = vpop.f32.mrb[32].mxu0  ;;  %vm2377_vm2 = vcmp.gt.f32.partialorder %v1499_v59, 0.0  ;;  %v15447_v28 = vmul.f32 0.1, %v15425_v0 }
 0x13d   : > { %v1514_v20 = vadd.f32 %v12802_v37, %v15162_v22  ;;  %v1508_v54 = vpop.f32.mrb[33].mxu0  ;;  %13096 = vmatprep.mubr.bf16.mxu1 %v2961_v31  ;;  %v2778_v34 = vsel %vm2378_vm1, %v1504_v5, %v2578_v25 }
 0x13e   : > { %v1509_v58 = vadd.f32 %v15162_v22, %v1508_v54  ;;  %v2777_v57 = vsel %vm2377_vm2, %v1499_v59, %v2577_v14  ;;  %v15427_v5 = vpop.f32.mrb[32].mxu1  ;;  %v15434_v14 = vmul.f32 0.1, %v15409_v40  ;;  %v15440_v54 = vadd.f32 %v15348_v27, %v15162_v22 }
 0x13f   : > { %v2580_v35 = vmul.f32 0.1, %v1514_v20  ;;  %v2962_v10 = vpack.c.bf16 %v2778_v34, %v2777_v57  ;;  %vm2380_vm3 = vcmp.gt.f32.partialorder %v1514_v20, 0.0  ;;  %v15429_v25 = vpop.f32.mrb[33].mxu1  ;;  %v15444_v57 = vsel %vm2465_vm5, %v15327_v60, %v15346_v11 }
 0x140   : > { %v2579_v13 = vmul.f32 0.1, %v1509_v58  ;;  %v12805_v33 = vpop.f32.mrb[34].mxu0  ;;  %vm2379_vm4 = vcmp.gt.f32.partialorder %v1509_v58, 0.0  ;;  %19314 = vst [vmem:[#allocation30_spill] sm:$0xff] %v15444_v57  ;;  %v15455_v27 = vsel %vm2466_vm6, %v15311_v45, %v15337_v46  ;;  %v15471_v46 = vadd.f32 %v15375_v63, %v15162_v22 }
 0x141   : > { %v1524_v59 = vadd.f32 %v12805_v33, %v15162_v22  ;;  %v1518_v31 = vpop.f32.mrb[35].mxu0  ;;  %13097 = vmatmul.mubr.bf16.gmra.mrb[128].mxu1 %v2962_v10  ;;  %v2780_v37 = vsel %vm2380_vm3, %v1514_v20, %v2580_v35  ;;  %19315 = vst [vmem:[#allocation31_spill] sm:$0xff] %v15455_v27  ;;  %v15466_v4 = vmul.f32 0.1, %v15440_v54  ;;  %vm2471_vm5 = vcmp.gt.f32.partialorder %v15425_v0, 0.0 }
 0x142   : > { %v1519_v2 = vadd.f32 %v15162_v22, %v1518_v31  ;;  %v2779_v34 = vsel %vm2379_vm4, %v1509_v58, %v2579_v13  ;;  %v15449_v20 = vpop.f32.mrb[34].mxu1  ;;  %v15460_v58 = vadd.f32 %v15162_v22, %v15350_v62  ;;  %vm2472_vm6 = vcmp.gt.f32.partialorder %v15409_v40, 0.0 }
 0x143   : > { %v2582_v33 = vmul.f32 0.1, %v1524_v59  ;;  %v2963_v51 = vpack.c.bf16 %v2780_v37, %v2779_v34  ;;  %vm2382_vm7 = vcmp.gt.f32.partialorder %v1524_v59, 0.0  ;;  %v15451_v31 = vpop.f32.mrb[35].mxu1  ;;  %v15491_v37 = vadd.f32 %v15162_v22, %v15377_v6 }
 0x144   : > { %v2581_v35 = vmul.f32 0.1, %v1519_v2  ;;  %v12808_v10 = vpop.f32.mrb[36].mxu0  ;;  %vm2381_vm8 = vcmp.gt.f32.partialorder %v1519_v2, 0.0 }
 0x145   : > { %v1534_v60 = vadd.f32 %v12808_v10, %v15162_v22  ;;  %v1528_v11 = vpop.f32.mrb[37].mxu0  ;;  %13100 = vmatprep.mubr.bf16.mxu1 %v2963_v51  ;;  %v2782_v13 = vsel %vm2382_vm7, %v1524_v59, %v2582_v33 }
 0x146   : > { %v1529_v34 = vadd.f32 %v15162_v22, %v1528_v11  ;;  %v2781_v29 = vsel %vm2381_vm8, %v1519_v2, %v2581_v35  ;;  %v15473_v62 = vpop.f32.mrb[36].mxu1  ;;  %v15479_v2 = vmul.f32 0.1, %v15460_v58 }
 0x147   : > { %v2584_v45 = vmul.f32 0.1, %v1534_v60  ;;  %v2964_v51 = vpack.c.bf16 %v2782_v13, %v2781_v29  ;;  %vm2384_vm10 = vcmp.gt.f32.partialorder %v1534_v60, 0.0  ;;  %v15475_v10 = vpop.f32.mrb[37].mxu1  ;;  %v15486_v29 = vsel %vm2467_vm9, %v15358_v43, %v15384_v9 }
 0x148   : > { %v2583_v59 = vmul.f32 0.1, %v1529_v34  ;;  %v12811_v33 = vpop.f32.mrb[38].mxu0  ;;  %vm2383_vm11 = vcmp.gt.f32.partialorder %v1529_v34, 0.0  ;;  %19316 = vst [vmem:[#allocation32_spill] sm:$0xff] %v15486_v29  ;;  %v15596_v57 = vadd.f32 %v15473_v62, %v15162_v22 }
 0x149   : > { %v1544_v35 = vadd.f32 %v12811_v33, %v15162_v22  ;;  %v1538_v11 = vpop.f32.mrb[39].mxu0  ;;  %13101 = vmatmul.mubr.bf16.gmra.mrb[132].mxu1 %v2964_v51  ;;  %v2784_v63 = vsel %vm2384_vm10, %v1534_v60, %v2584_v45  ;;  %v13581_v33 = vld [vmem:[%s19179_s5 + $0x38] sm:$0xff]   ;;  %v15498_v60 = vsel %vm2468_vm12, %v15342_v17, %v15368_v3  ;;  %v15501_v51 = vmul.f32 0.1, %v15471_v46 }
 0x14a   : > { %v1539_v13 = vadd.f32 %v15162_v22, %v1538_v11  ;;  %v2783_v53 = vsel %vm2383_vm11, %v1529_v34, %v2583_v59  ;;  %19317 = vst [vmem:[#allocation33_spill] sm:$0xff] %v15498_v60  ;;  %v15503_v9 = vpop.f32.mrb[38].mxu1  ;;  %13282 = vmatprep.subr.bf16.mxu0 %v13581_v33  ;;  %v15579_v60 = vadd.f32 %v15162_v22, %v15451_v31  ;;  %19322 = vst [vmem:[#allocation38_spill] sm:$0xff] %v15596_v57 }
 0x14b   : > { %v2586_v45 = vmul.f32 0.1, %v1544_v35  ;;  %v2965_v43 = vpack.c.bf16 %v2784_v63, %v2783_v53  ;;  %vm2386_vm13 = vcmp.gt.f32.partialorder %v1544_v35, 0.0  ;;  %v15505_v34 = vpop.f32.mrb[39].mxu1  ;;  %13283 = vmatpush3.bf16.msra.mxu0 %v13581_v33  ;;  %v15516_v63 = vmul.f32 0.1, %v15491_v37 }
 0x14c   : > { %v2585_v11 = vmul.f32 0.1, %v1539_v13  ;;  %v12814_v6 = vpop.f32.mrb[40].mxu0  ;;  %vm2385_vm14 = vcmp.gt.f32.partialorder %v1539_v13, 0.0 }
 0x14d   : > { %v1554_v17 = vadd.f32 %v12814_v6, %v15162_v22  ;;  %v1548_v3 = vpop.f32.mrb[41].mxu0  ;;  %13104 = vmatprep.mubr.bf16.mxu1 %v2965_v43  ;;  %v2786_v53 = vsel %vm2386_vm13, %v1544_v35, %v2586_v45  ;;  %v15522_v6 = vadd.f32 %v15162_v22, %v15398_v44  ;;  %vm2473_vm13 = vcmp.gt.f32.partialorder %v15460_v58, 0.0 }
 0x14e   : > { %v1549_v55 = vadd.f32 %v15162_v22, %v1548_v3  ;;  %v2785_v26 = vsel %vm2385_vm14, %v1539_v13, %v2585_v11  ;;  %v15524_v43 = vpop.f32.mrb[40].mxu1  ;;  %v15530_v3 = vsel %vm2469_vm15, %v15390_v18, %v15419_v32  ;;  %v15533_v13 = vmul.f32 0.1, %v15512_v24 }
 0x14f   : > { %v2588_v59 = vmul.f32 0.1, %v1554_v17  ;;  %v2966_v36 = vpack.c.bf16 %v2786_v53, %v2785_v26  ;;  %vm2388_vm1 = vcmp.gt.f32.partialorder %v1554_v17, 0.0  ;;  %v15526_v45 = vpop.f32.mrb[41].mxu1  ;;  %19318 = vst [vmem:[#allocation34_spill] sm:$0xff] %v15530_v3  ;;  %v15540_v53 = vsel %vm2470_vm0, %v15373_v19, %v15394_v30 }
 0x150   : > { %v2587_v35 = vmul.f32 0.1, %v1549_v55  ;;  %v12817_v33 = vpop.f32.mrb[42].mxu0  ;;  %vm2387_vm2 = vcmp.gt.f32.partialorder %v1549_v55, 0.0  ;;  %19319 = vst [vmem:[#allocation35_spill] sm:$0xff] %v15540_v53  ;;  %v15545_v18 = vadd.f32 %v15427_v5, %v15162_v22  ;;  %v15569_v53 = vsel %vm2471_vm5, %v15425_v0, %v15447_v28 }
 0x151   : > { %v1564_v11 = vadd.f32 %v12817_v33, %v15162_v22  ;;  %v1558_v44 = vpop.f32.mrb[43].mxu0  ;;  %13105 = vmatmul.mubr.bf16.gmra.mrb[136].mxu1 %v2966_v36  ;;  %v2788_v26 = vsel %vm2388_vm1, %v1554_v17, %v2588_v59  ;;  %v15550_v33 = vmul.f32 0.1, %v15522_v6  ;;  %19320 = vst [vmem:[#allocation36_spill] sm:$0xff] %v15569_v53  ;;  %v15585_v28 = vsel %vm2472_vm6, %v15409_v40, %v15434_v14 }
 0x152   : > { %v1559_v1 = vadd.f32 %v15162_v22, %v1558_v44  ;;  %v2787_v32 = vsel %vm2387_vm2, %v1549_v55, %v2587_v35  ;;  %v15552_v36 = vpop.f32.mrb[42].mxu1  ;;  %v15559_v55 = vadd.f32 %v15162_v22, %v15429_v25  ;;  %19321 = vst [vmem:[#allocation37_spill] sm:$0xff] %v15585_v28  ;;  %v15600_v40 = vadd.f32 %v15162_v22, %v15475_v10 }
 0x153   : > { %v2590_v59 = vmul.f32 0.1, %v1564_v11  ;;  %v2967_v17 = vpack.c.bf16 %v2788_v26, %v2787_v32  ;;  %vm2390_vm3 = vcmp.gt.f32.partialorder %v1564_v11, 0.0  ;;  %v15554_v44 = vpop.f32.mrb[43].mxu1  ;;  %v15564_v26 = vmul.f32 0.1, %v15545_v18 }
 0x154   : > { %v2589_v19 = vmul.f32 0.1, %v1559_v1  ;;  %v12820_v30 = vpop.f32.mrb[44].mxu0  ;;  %vm2389_vm4 = vcmp.gt.f32.partialorder %v1559_v1, 0.0  ;;  %v15588_v0 = vmul.f32 0.1, %v15559_v55  ;;  %v15613_v10 = vadd.f32 %v15503_v9, %v15162_v22 }
 0x155   : > { %v1574_v5 = vadd.f32 %v12820_v30, %v15162_v22  ;;  %v1568_v35 = vpop.f32.mrb[45].mxu0  ;;  %13108 = vmatprep.mubr.bf16.mxu1 %v2967_v17  ;;  %v2790_v29 = vsel %vm2390_vm3, %v1564_v11, %v2590_v59  ;;  %v15573_v30 = vadd.f32 %v15449_v20, %v15162_v22  ;;  %v15625_v28 = vmul.f32 0.1, %v15600_v40 }
 0x156   : > { %v1569_v32 = vadd.f32 %v15162_v22, %v1568_v35  ;;  %v2789_v3 = vsel %vm2389_vm4, %v1559_v1, %v2589_v19  ;;  %v15575_v11 = vpop.f32.mrb[44].mxu1  ;;  %19323 = vst [vmem:[#allocation39_spill] sm:$0xff] %v15613_v10  ;;  %v15637_v38 = vmul.f32 0.1, %v15613_v10  ;;  %vm2474_vm14 = vcmp.gt.f32.partialorder %v15440_v54, 0.0 }
 0x157   : > { %vm2392_vm7 = vcmp.gt.f32.partialorder %v1574_v5, 0.0  ;;  %v2592_v25 = vmul.f32 0.1, %v1574_v5  ;;  %v2968_v17 = vpack.c.bf16 %v2790_v29, %v2789_v3  ;;  %v15581_v19 = vpop.f32.mrb[45].mxu1  ;;  %v15603_v27 = vmul.f32 0.1, %v15573_v30 }
 0x158   : > { %vm2391_vm8 = vcmp.gt.f32.partialorder %v1569_v32, 0.0  ;;  %v2591_v59 = vmul.f32 0.1, %v1569_v32  ;;  %v12823_v1 = vpop.f32.mrb[46].mxu0  ;;  %19326 = vst [vmem:[#allocation42_spill] sm:$0xff] %v15625_v28  ;;  %19328 = vst [vmem:[#allocation44_spill] sm:$0xff] %v15637_v38 }
 0x159   : > { %v1584_v20 = vadd.f32 %v12823_v1, %v15162_v22  ;;  %v1578_v29 = vpop.f32.mrb[47].mxu0  ;;  %13109 = vmatmul.mubr.bf16.gmra.mrb[140].mxu1 %v2968_v17  ;;  %v2792_v3 = vsel %vm2392_vm7, %v1574_v5, %v2592_v25  ;;  %v15608_v1 = vmul.f32 0.1, %v15579_v60 }
 0x15a   : > { %v1579_v31 = vadd.f32 %v15162_v22, %v1578_v29  ;;  %v2791_v14 = vsel %vm2391_vm8, %v1569_v32, %v2591_v59  ;;  %v15605_v25 = vpop.f32.mrb[46].mxu1  ;;  %v15617_v32 = vadd.f32 %v15162_v22, %v15505_v34 }
 0x15b   : > { %vm2394_vm9 = vcmp.gt.f32.partialorder %v1584_v20, 0.0  ;;  %v2594_v17 = vmul.f32 0.1, %v1584_v20  ;;  %v2969_v5 = vpack.c.bf16 %v2792_v3, %v2791_v14  ;;  %v15619_v3 = vpop.f32.mrb[47].mxu1  ;;  %v15622_v14 = vmul.f32 0.1, %v15596_v57 }
 0x15c   : > { %vm2393_vm10 = vcmp.gt.f32.partialorder %v1579_v31, 0.0  ;;  %v2593_v29 = vmul.f32 0.1, %v1579_v31  ;;  %v12826_v62 = vpop.f32.mrb[48].mxu0  ;;  %19324 = vst [vmem:[#allocation40_spill] sm:$0xff] %v15617_v32 }
 0x15d   : > { %v1594_v35 = vadd.f32 %v12826_v62, %v15162_v22  ;;  %v1588_v53 = vpop.f32.mrb[49].mxu0  ;;  %13112 = vmatprep.mubr.bf16.mxu1 %v2969_v5  ;;  %v2794_v59 = vsel %vm2394_vm9, %v1584_v20, %v2594_v17  ;;  %19325 = vst [vmem:[#allocation41_spill] sm:$0xff] %v15622_v14  ;;  %v15630_v5 = vadd.f32 %v15524_v43, %v15162_v22 }
 0x15e   : > { %v1589_v62 = vadd.f32 %v15162_v22, %v1588_v53  ;;  %v2793_v39 = vsel %vm2393_vm10, %v1579_v31, %v2593_v29  ;;  %v15632_v52 = vpop.f32.mrb[48].mxu1  ;;  %v15640_v53 = vmul.f32 0.1, %v15617_v32 }
 0x15f   : > { %vm2396_vm11 = vcmp.gt.f32.partialorder %v1594_v35, 0.0  ;;  %v2596_v9 = vmul.f32 0.1, %v1594_v35  ;;  %19327 = vst [vmem:[#allocation43_spill] sm:$0xff] %v15630_v5  ;;  %v2970_v34 = vpack.c.bf16 %v2794_v59, %v2793_v39  ;;  %v15634_v15 = vpop.f32.mrb[49].mxu1 }
 0x160   : > { %vm2395_vm12 = vcmp.gt.f32.partialorder %v1589_v62, 0.0  ;;  %v2595_v20 = vmul.f32 0.1, %v1589_v62  ;;  %v12829_v17 = vpop.f32.mrb[50].mxu0  ;;  %19329 = vst [vmem:[#allocation45_spill] sm:$0xff] %v15640_v53 }
 0x161   : > { %v1604_v31 = vadd.f32 %v12829_v17, %v15162_v22  ;;  %v1598_v29 = vpop.f32.mrb[51].mxu0  ;;  %13113 = vmatmul.mubr.bf16.gmra.mrb[144].mxu1 %v2970_v34  ;;  %v2796_v43 = vsel %vm2396_vm11, %v1594_v35, %v2596_v9  ;;  %v15647_v61 = vmul.f32 0.1, %v15630_v5  ;;  %v15654_v35 = vld [vmem:[%s19176_s2] ss:$0 sm:$0xff] }
 0x162   : > { %v1599_v39 = vadd.f32 %v15162_v22, %v1598_v29  ;;  %v2795_v59 = vsel %vm2395_vm12, %v1589_v62, %v2595_v20  ;;  %v15649_v23 = vpop.f32.mrb[50].mxu1  ;;  %v15658_v22 = vadd.f32 %v15654_v35, %v15526_v45  ;;  %v15673_v45 = vsel %vm2474_vm14, %v15440_v54, %v15466_v4 }
 0x163   : > { %vm2398_vm15 = vcmp.gt.f32.partialorder %v1604_v31, 0.0  ;;  %v2598_v48 = vmul.f32 0.1, %v1604_v31  ;;  %19330 = vst [vmem:[#allocation46_spill] sm:$0xff] %v15647_v61  ;;  %v2971_v7 = vpack.c.bf16 %v2796_v43, %v2795_v59  ;;  %v15660_v9 = vpop.f32.mrb[51].mxu1  ;;  %v15667_v43 = vsel %vm2473_vm13, %v15460_v58, %v15479_v2  ;;  %19333 = vst [vmem:[#allocation49_spill] sm:$0xff] %v15673_v45 }
 0x164   : > { %vm2397_vm0 = vcmp.gt.f32.partialorder %v1599_v39, 0.0  ;;  %v2597_v17 = vmul.f32 0.1, %v1599_v39  ;;  %19331 = vst [vmem:[#allocation47_spill] sm:$0xff] %v15658_v22  ;;  %v12832_v62 = vpop.f32.mrb[52].mxu0  ;;  %19332 = vst [vmem:[#allocation48_spill] sm:$0xff] %v15667_v43  ;;  %v15686_v2 = vadd.f32 %v15654_v35, %v15575_v11  ;;  %v15700_v11 = vadd.f32 %v15654_v35, %v15581_v19 }
 0x165   : > { %v1614_v34 = vadd.f32 %v15654_v35, %v12832_v62  ;;  %v1608_v20 = vpop.f32.mrb[53].mxu0  ;;  %13116 = vmatprep.mubr.bf16.mxu1 %v2971_v7  ;;  %v2798_v29 = vsel %vm2398_vm15, %v1604_v31, %v2598_v48  ;;  %v15678_v62 = vadd.f32 %v15654_v35, %v15552_v36  ;;  %v15682_v7 = vadd.f32 %v15654_v35, %v15554_v44 }
 0x166   : > { %v1609_v59 = vadd.f32 %v15654_v35, %v1608_v20  ;;  %v2797_v48 = vsel %vm2397_vm0, %v1599_v39, %v2597_v17  ;;  %v15688_v4 = vpop.f32.mrb[52].mxu1  ;;  %v15695_v44 = vmul.f32 0.1, %v15658_v22  ;;  %v15717_v12 = vmul.f32 0.1, %v15700_v11 }
 0x167   : > { %19334 = vst [vmem:[#allocation50_spill] sm:$0xff] %v15678_v62  ;;  %19335 = vst [vmem:[#allocation51_spill] sm:$0xff] %v15682_v7  ;;  %vm2400_vm1 = vcmp.gt.f32.partialorder %v1614_v34, 0.0  ;;  %v2600_v58 = vmul.f32 0.1, %v1614_v34  ;;  %v2972_v31 = vpack.c.bf16 %v2798_v29, %v2797_v48  ;;  %v15690_v42 = vpop.f32.mrb[53].mxu1 }
 0x168   : > { %vm2399_vm2 = vcmp.gt.f32.partialorder %v1609_v59, 0.0  ;;  %v2599_v54 = vmul.f32 0.1, %v1609_v59  ;;  %v12835_v20 = vpop.f32.mrb[54].mxu0  ;;  %19336 = vst [vmem:[#allocation52_spill] sm:$0xff] %v15695_v44  ;;  %19340 = vst [vmem:[#allocation56_spill] sm:$0xff] %v15717_v12 }
 0x169   : > { %v1624_v39 = vadd.f32 %v15654_v35, %v12835_v20  ;;  %v1618_v17 = vpop.f32.mrb[55].mxu0  ;;  %13117 = vmatmul.mubr.bf16.gmra.mrb[148].mxu1 %v2972_v31  ;;  %v2800_v29 = vsel %vm2400_vm1, %v1614_v34, %v2600_v58  ;;  %v15703_v48 = vmul.f32 0.1, %v15678_v62  ;;  %v15706_v47 = vmul.f32 0.1, %v15682_v7 }
 0x16a   : > { %v1619_v36 = vadd.f32 %v15654_v35, %v1618_v17  ;;  %v2799_v43 = vsel %vm2399_vm2, %v1609_v59, %v2599_v54  ;;  %v15710_v20 = vmul.f32 0.1, %v15686_v2  ;;  %v15712_v8 = vpop.f32.mrb[54].mxu1  ;;  %v15722_v59 = vadd.f32 %v15654_v35, %v15605_v25 }
 0x16b   : > { %19337 = vst [vmem:[#allocation53_spill] sm:$0xff] %v15703_v48  ;;  %19338 = vst [vmem:[#allocation54_spill] sm:$0xff] %v15706_v47  ;;  %vm2402_vm3 = vcmp.gt.f32.partialorder %v1624_v39, 0.0  ;;  %v2602_v45 = vmul.f32 0.1, %v1624_v39  ;;  %v2973_v31 = vpack.c.bf16 %v2800_v29, %v2799_v43  ;;  %v15714_v58 = vpop.f32.mrb[55].mxu1  ;;  %v15727_v29 = vadd.f32 %v15654_v35, %v15619_v3 }
 0x16c   : > { %19339 = vst [vmem:[#allocation55_spill] sm:$0xff] %v15710_v20  ;;  %vm2401_vm4 = vcmp.gt.f32.partialorder %v1619_v36, 0.0  ;;  %v2601_v19 = vmul.f32 0.1, %v1619_v36  ;;  %v12838_v34 = vpop.f32.mrb[56].mxu0  ;;  %v15731_v20 = vadd.f32 %v15654_v35, %v15632_v52  ;;  %v15735_v25 = vadd.f32 %v15654_v35, %v15634_v15 }
 0x16d   : > { %v1634_v48 = vadd.f32 %v15654_v35, %v12838_v34  ;;  %v1628_v17 = vpop.f32.mrb[57].mxu0  ;;  %13120 = vmatprep.mubr.bf16.mxu1 %v2973_v31  ;;  %v2802_v54 = vsel %vm2402_vm3, %v1624_v39, %v2602_v45  ;;  %v15742_v3 = vmul.f32 0.1, %v15722_v59 }
 0x16e   : > { %v1629_v43 = vadd.f32 %v15654_v35, %v1628_v17  ;;  %v2801_v12 = vsel %vm2401_vm4, %v1619_v36, %v2601_v19  ;;  %v15737_v31 = vpop.f32.mrb[56].mxu1  ;;  %v15750_v19 = vmul.f32 0.1, %v15727_v29  ;;  %v15754_v62 = vmul.f32 0.1, %v15731_v20 }
 0x16f   : > { %vm2404_vm5 = vcmp.gt.f32.partialorder %v1634_v48, 0.0  ;;  %v2604_v34 = vmul.f32 0.1, %v1634_v48  ;;  %v2974_v47 = vpack.c.bf16 %v2802_v54, %v2801_v12  ;;  %v15739_v17 = vpop.f32.mrb[57].mxu1  ;;  %19341 = vst [vmem:[#allocation57_spill] sm:$0xff] %v15742_v3  ;;  %v15747_v12 = vadd.f32 %v15654_v35, %v15649_v23 }
 0x170   : > { %vm2403_vm6 = vcmp.gt.f32.partialorder %v1629_v43, 0.0  ;;  %v2603_v45 = vmul.f32 0.1, %v1629_v43  ;;  %v12841_v39 = vpop.f32.mrb[58].mxu0  ;;  %19342 = vst [vmem:[#allocation58_spill] sm:$0xff] %v15750_v19  ;;  %19343 = vst [vmem:[#allocation59_spill] sm:$0xff] %v15754_v62 }
 0x171   : > { %v1644_v52 = vadd.f32 %v15654_v35, %v12841_v39  ;;  %v1638_v36 = vpop.f32.mrb[59].mxu0  ;;  %13121 = vmatmul.mubr.bf16.gmra.mrb[152].mxu1 %v2974_v47  ;;  %v2804_v15 = vsel %vm2404_vm5, %v1634_v48, %v2604_v34  ;;  %v15757_v39 = vmul.f32 0.1, %v15735_v25  ;;  %v15762_v50 = vmul.f32 0.1, %v15747_v12 }
 0x172   : > { %v1639_v54 = vadd.f32 %v15654_v35, %v1638_v36  ;;  %v2803_v7 = vsel %vm2403_vm6, %v1629_v43, %v2603_v45  ;;  %v12991_v61 = vpop.f32.mrb[58].mxu1  ;;  %v15766_v43 = vadd.f32 %v15654_v35, %v15660_v9 }
 0x173   : > { %vm2406_vm7 = vcmp.gt.f32.partialorder %v1644_v52, 0.0  ;;  %v2606_v3 = vmul.f32 0.1, %v1644_v52  ;;  %19344 = vst [vmem:[#allocation60_spill] sm:$0xff] %v15757_v39  ;;  %v2975_v47 = vpack.c.bf16 %v2804_v15, %v2803_v7  ;;  %v2144_v48 = vadd.f32 %v15654_v35, %v12991_v61  ;;  %v2138_v34 = vpop.f32.mrb[59].mxu1  ;;  %19345 = vst [vmem:[#allocation61_spill] sm:$0xff] %v15762_v50 }
 0x174   : > { %vm2405_vm8 = vcmp.gt.f32.partialorder %v1639_v54, 0.0  ;;  %v2605_v23 = vmul.f32 0.1, %v1639_v54  ;;  %v12844_v41 = vpop.f32.mrb[60].mxu0 }
 0x175   : > { %v1654_v19 = vadd.f32 %v15654_v35, %v12844_v41  ;;  %v1648_v36 = vpop.f32.mrb[61].mxu0  ;;  %13124 = vmatprep.mubr.bf16.mxu1 %v2975_v47  ;;  %v2806_v45 = vsel %vm2406_vm7, %v1644_v52, %v2606_v3  ;;  %vm2506_vm9 = vcmp.gt.f32.partialorder %v2144_v48, 0.0  ;;  %v2706_v62 = vmul.f32 0.1, %v2144_v48 }
 0x176   : > { %v1649_v7 = vadd.f32 %v15654_v35, %v1648_v36  ;;  %v2805_v15 = vsel %vm2405_vm8, %v1639_v54, %v2605_v23  ;;  %v2139_v41 = vadd.f32 %v15654_v35, %v2138_v34  ;;  %v15770_v44 = vpop.f32.mrb[60].mxu1  ;;  %v15778_v36 = vmul.f32 0.1, %v15766_v43 }
 0x177   : > { %vm2408_vm10 = vcmp.gt.f32.partialorder %v1654_v19, 0.0  ;;  %v2608_v61 = vmul.f32 0.1, %v1654_v19  ;;  %v2976_v39 = vpack.c.bf16 %v2806_v45, %v2805_v15  ;;  %v15772_v5 = vsel %vm2506_vm9, %v2144_v48, %v2706_v62  ;;  %v15774_v9 = vpop.f32.mrb[61].mxu1 }
 0x178   : > { %vm2407_vm11 = vcmp.gt.f32.partialorder %v1649_v7, 0.0  ;;  %v2607_v50 = vmul.f32 0.1, %v1649_v7  ;;  %v12847_v47 = vpop.f32.mrb[62].mxu0  ;;  %19346 = vst [vmem:[#allocation62_spill] sm:$0xff] %v15772_v5  ;;  %vm2505_vm12 = vcmp.gt.f32.partialorder %v2139_v41, 0.0  ;;  %v15783_v45 = vadd.f32 %v15654_v35, %v15688_v4 }
 0x179   : > { %v1664_v3 = vadd.f32 %v15654_v35, %v12847_v47  ;;  %v1658_v52 = vpop.f32.mrb[63].mxu0  ;;  %13125 = vmatmul.mubr.bf16.gmra.mrb[156].mxu1 %v2976_v39  ;;  %v2808_v54 = vsel %vm2408_vm10, %v1654_v19, %v2608_v61  ;;  %v2705_v23 = vmul.f32 0.1, %v2139_v41  ;;  %19347 = vst [vmem:[#allocation63_spill] sm:$0xff] %v15778_v36 }
 0x17a   : > { %v1659_v34 = vadd.f32 %v15654_v35, %v1658_v52  ;;  %v2807_v62 = vsel %vm2407_vm11, %v1649_v7, %v2607_v50  ;;  %v12997_v47 = vpop.f32.mrb[62].mxu1 }
 0x17b   : > { %vm2410_vm13 = vcmp.gt.f32.partialorder %v1664_v3, 0.0  ;;  %v2610_v48 = vmul.f32 0.1, %v1664_v3  ;;  %v2977_v15 = vpack.c.bf16 %v2808_v54, %v2807_v62  ;;  %v15785_v38 = vsel %vm2505_vm12, %v2139_v41, %v2705_v23  ;;  %v2158_v36 = vpop.f32.mrb[63].mxu1 }
 0x17c   : > { %19348 = vst [vmem:[#allocation64_spill] sm:$0xff] %v15785_v38  ;;  %vm2409_vm14 = vcmp.gt.f32.partialorder %v1659_v34, 0.0  ;;  %v2609_v19 = vmul.f32 0.1, %v1659_v34  ;;  %v12850_v39 = vpop.f32.mrb[64].mxu0  ;;  %v2164_v50 = vadd.f32 %v15654_v35, %v12997_v47  ;;  %v2159_v7 = vadd.f32 %v15654_v35, %v2158_v36 }
 0x17d   : > { %v1674_v52 = vadd.f32 %v15654_v35, %v12850_v39  ;;  %v1668_v16 = vpop.f32.mrb[65].mxu0  ;;  %13128 = vmatprep.mubr.bf16.mxu1 %v2977_v15  ;;  %v2810_v4 = vsel %vm2410_vm13, %v1664_v3, %v2610_v48  ;;  %v15793_v41 = vmul.f32 0.1, %v15783_v45  ;;  %v15797_v54 = vadd.f32 %v15654_v35, %v15690_v42 }
 0x17e   : > { %v1669_v23 = vadd.f32 %v15654_v35, %v1668_v16  ;;  %v2809_v62 = vsel %vm2409_vm14, %v1659_v34, %v2609_v19  ;;  %vm2510_vm0 = vcmp.gt.f32.partialorder %v2164_v50, 0.0  ;;  %v15800_v15 = vpop.f32.mrb[64].mxu1  ;;  %v15804_v36 = vadd.f32 %v15654_v35, %v15712_v8 }
 0x17f   : > { %19349 = vst [vmem:[#allocation65_spill] sm:$0xff] %v15793_v41  ;;  %vm2412_vm15 = vcmp.gt.f32.partialorder %v1674_v52, 0.0  ;;  %v2612_v61 = vmul.f32 0.1, %v1674_v52  ;;  %v2978_v39 = vpack.c.bf16 %v2810_v4, %v2809_v62  ;;  %v2710_v47 = vmul.f32 0.1, %v2164_v50 }
 0x180   : > { %vm2411_vm1 = vcmp.gt.f32.partialorder %v1669_v23, 0.0  ;;  %v2611_v3 = vmul.f32 0.1, %v1669_v23  ;;  %v12853_v48 = vpop.f32.mrb[66].mxu0  ;;  %vm2509_vm2 = vcmp.gt.f32.partialorder %v2159_v7, 0.0  ;;  %v15807_v19 = vpop.f32.mrb[65].mxu1  ;;  %v15811_v4 = vadd.f32 %v15654_v35, %v15714_v58 }
 0x181   : > { %v1684_v42 = vadd.f32 %v15654_v35, %v12853_v48  ;;  %v1678_v38 = vpop.f32.mrb[67].mxu0  ;;  %13129 = vmatmul.mubr.bf16.gmra.mrb[160].mxu1 %v2978_v39  ;;  %v2812_v16 = vsel %vm2412_vm15, %v1674_v52, %v2612_v61  ;;  %v2709_v34 = vmul.f32 0.1, %v2159_v7  ;;  %v15815_v8 = vsel %vm2510_vm0, %v2164_v50, %v2710_v47 }
 0x182   : > { %v1679_v62 = vadd.f32 %v15654_v35, %v1678_v38  ;;  %v2811_v5 = vsel %vm2411_vm1, %v1669_v23, %v2611_v3  ;;  %19350 = vst [vmem:[#allocation66_spill] sm:$0xff] %v15815_v8  ;;  %v13003_v61 = vpop.f32.mrb[66].mxu1  ;;  %v15821_v39 = vadd.f32 %v15654_v35, %v15737_v31  ;;  %v15826_v23 = vmul.f32 0.1, %v15797_v54 }
 0x183   : > { %vm2414_vm3 = vcmp.gt.f32.partialorder %v1684_v42, 0.0  ;;  %v2614_v41 = vmul.f32 0.1, %v1684_v42  ;;  %v2979_v48 = vpack.c.bf16 %v2812_v16, %v2811_v5  ;;  %v15817_v21 = vsel %vm2509_vm2, %v2159_v7, %v2709_v34  ;;  %v2178_v47 = vpop.f32.mrb[67].mxu1 }
 0x184   : > { %19351 = vst [vmem:[#allocation67_spill] sm:$0xff] %v15817_v21  ;;  %vm2413_vm4 = vcmp.gt.f32.partialorder %v1679_v62, 0.0  ;;  %v2613_v52 = vmul.f32 0.1, %v1679_v62  ;;  %v12856_v58 = vpop.f32.mrb[68].mxu0  ;;  %19352 = vst [vmem:[#allocation68_spill] sm:$0xff] %v15826_v23  ;;  %v2184_v7 = vadd.f32 %v15654_v35, %v13003_v61  ;;  %v2179_v22 = vadd.f32 %v15654_v35, %v2178_v47 }
 0x185   : > { %v1694_v50 = vadd.f32 %v15654_v35, %v12856_v58  ;;  %v1688_v3 = vpop.f32.mrb[69].mxu0  ;;  %13132 = vmatprep.mubr.bf16.mxu1 %v2979_v48  ;;  %v2814_v5 = vsel %vm2414_vm3, %v1684_v42, %v2614_v41  ;;  %v15831_v16 = vmul.f32 0.1, %v15804_v36  ;;  %v15836_v38 = vmul.f32 0.1, %v15811_v4 }
 0x186   : > { %v1689_v31 = vadd.f32 %v15654_v35, %v1688_v3  ;;  %v2813_v34 = vsel %vm2413_vm4, %v1679_v62, %v2613_v52  ;;  %v15838_v8 = vpop.f32.mrb[68].mxu1  ;;  %v15841_v41 = vmul.f32 0.1, %v15821_v39  ;;  %v15845_v42 = vadd.f32 %v15654_v35, %v15739_v17 }
 0x187   : > { %19353 = vst [vmem:[#allocation69_spill] sm:$0xff] %v15831_v16  ;;  %19354 = vst [vmem:[#allocation70_spill] sm:$0xff] %v15836_v38  ;;  %vm2416_vm5 = vcmp.gt.f32.partialorder %v1694_v50, 0.0  ;;  %v2616_v21 = vmul.f32 0.1, %v1694_v50  ;;  %v2980_v58 = vpack.c.bf16 %v2814_v5, %v2813_v34  ;;  %vm2514_vm7 = vcmp.gt.f32.partialorder %v2184_v7, 0.0 }
 0x188   : > { %19355 = vst [vmem:[#allocation71_spill] sm:$0xff] %v15841_v41  ;;  %vm2415_vm6 = vcmp.gt.f32.partialorder %v1689_v31, 0.0  ;;  %v2615_v48 = vmul.f32 0.1, %v1689_v31  ;;  %v12859_v62 = vpop.f32.mrb[70].mxu0  ;;  %v15848_v5 = vpop.f32.mrb[69].mxu1 }
 0x189   : > { %v1704_v61 = vadd.f32 %v15654_v35, %v12859_v62  ;;  %v1698_v52 = vpop.f32.mrb[71].mxu0  ;;  %13133 = vmatmul.mubr.bf16.gmra.mrb[164].mxu1 %v2980_v58  ;;  %v2816_v3 = vsel %vm2416_vm5, %v1694_v50, %v2616_v21  ;;  %v2714_v47 = vmul.f32 0.1, %v2184_v7  ;;  %vm2513_vm8 = vcmp.gt.f32.partialorder %v2179_v22, 0.0 }
 0x18a   : > { %v1699_v34 = vadd.f32 %v15654_v35, %v1698_v52  ;;  %v2815_v16 = vsel %vm2415_vm6, %v1689_v31, %v2615_v48  ;;  %v2713_v41 = vmul.f32 0.1, %v2179_v22  ;;  %v13009_v53 = vpop.f32.mrb[70].mxu1  ;;  %v15856_v50 = vmul.f32 0.1, %v15845_v42 }
 0x18b   : > { %vm2418_vm9 = vcmp.gt.f32.partialorder %v1704_v61, 0.0  ;;  %v2618_v17 = vmul.f32 0.1, %v1704_v61  ;;  %v2981_v38 = vpack.c.bf16 %v2816_v3, %v2815_v16  ;;  %v15851_v23 = vsel %vm2514_vm7, %v2184_v7, %v2714_v47  ;;  %v2198_v21 = vpop.f32.mrb[71].mxu1 }
 0x18c   : > { %19356 = vst [vmem:[#allocation72_spill] sm:$0xff] %v15851_v23  ;;  %vm2417_vm10 = vcmp.gt.f32.partialorder %v1699_v34, 0.0  ;;  %v2617_v62 = vmul.f32 0.1, %v1699_v34  ;;  %v12862_v10 = vpop.f32.mrb[72].mxu0  ;;  %v15853_v58 = vsel %vm2513_vm8, %v2179_v22, %v2713_v41  ;;  %19358 = vst [vmem:[#allocation74_spill] sm:$0xff] %v15856_v50  ;;  %v15863_v7 = vadd.f32 %v15654_v35, %v15770_v44 }
 0x18d   : > { %19357 = vst [vmem:[#allocation73_spill] sm:$0xff] %v15853_v58  ;;  %v1714_v52 = vadd.f32 %v15654_v35, %v12862_v10  ;;  %v1708_v31 = vpop.f32.mrb[73].mxu0  ;;  %13136 = vmatprep.mubr.bf16.mxu1 %v2981_v38  ;;  %v2818_v48 = vsel %vm2418_vm9, %v1704_v61, %v2618_v17  ;;  %v2204_v41 = vadd.f32 %v15654_v35, %v13009_v53 }
 0x18e   : > { %v1709_v3 = vadd.f32 %v15654_v35, %v1708_v31  ;;  %v2817_v22 = vsel %vm2417_vm10, %v1699_v34, %v2617_v62  ;;  %v2199_v10 = vadd.f32 %v15654_v35, %v2198_v21  ;;  %v15868_v14 = vpop.f32.mrb[72].mxu1  ;;  %v15872_v38 = vadd.f32 %v15654_v35, %v15774_v9 }
 0x18f   : > { %vm2420_vm11 = vcmp.gt.f32.partialorder %v1714_v52, 0.0  ;;  %v2620_v47 = vmul.f32 0.1, %v1714_v52  ;;  %v2982_v50 = vpack.c.bf16 %v2818_v48, %v2817_v22  ;;  %vm2518_vm13 = vcmp.gt.f32.partialorder %v2204_v41, 0.0  ;;  %v15879_v31 = vpop.f32.mrb[73].mxu1 }
 0x190   : > { %vm2419_vm12 = vcmp.gt.f32.partialorder %v1709_v3, 0.0  ;;  %v2619_v61 = vmul.f32 0.1, %v1709_v3  ;;  %v12865_v44 = vpop.f32.mrb[74].mxu0  ;;  %v15877_v53 = vadd.f32 %v15654_v35, %v15800_v15  ;;  %v2718_v21 = vmul.f32 0.1, %v2204_v41 }
 0x191   : > { %v1724_v17 = vadd.f32 %v15654_v35, %v12865_v44  ;;  %v1718_v34 = vpop.f32.mrb[75].mxu0  ;;  %13137 = vmatmul.mubr.bf16.gmra.mrb[168].mxu1 %v2982_v50  ;;  %v2820_v62 = vsel %vm2420_vm11, %v1714_v52, %v2620_v47  ;;  %vm2517_vm14 = vcmp.gt.f32.partialorder %v2199_v10, 0.0  ;;  %v2717_v22 = vmul.f32 0.1, %v2199_v10 }
 0x192   : > { %19359 = vst [vmem:[#allocation75_spill] sm:$0xff] %v15877_v53  ;;  %v1719_v48 = vadd.f32 %v15654_v35, %v1718_v34  ;;  %v2819_v9 = vsel %vm2419_vm12, %v1709_v3, %v2619_v61  ;;  %v15882_v23 = vsel %vm2518_vm13, %v2204_v41, %v2718_v21  ;;  %v13015_v44 = vpop.f32.mrb[74].mxu1  ;;  %v15887_v52 = vmul.f32 0.1, %v15863_v7 }
 0x193   : > { %vm2422_vm15 = vcmp.gt.f32.partialorder %v1724_v17, 0.0  ;;  %v2622_v16 = vmul.f32 0.1, %v1724_v17  ;;  %v2983_v58 = vpack.c.bf16 %v2820_v62, %v2819_v9  ;;  %19360 = vst [vmem:[#allocation76_spill] sm:$0xff] %v15882_v23  ;;  %v15884_v28 = vsel %vm2517_vm14, %v2199_v10, %v2717_v22  ;;  %v2218_v50 = vpop.f32.mrb[75].mxu1 }
 0x194   : > { %vm2421_vm0 = vcmp.gt.f32.partialorder %v1719_v48, 0.0  ;;  %v2621_v32 = vmul.f32 0.1, %v1719_v48  ;;  %v12868_v15 = vpop.f32.mrb[76].mxu0  ;;  %19361 = vst [vmem:[#allocation77_spill] sm:$0xff] %v15884_v28  ;;  %19362 = vst [vmem:[#allocation78_spill] sm:$0xff] %v15887_v52  ;;  %v15901_v9 = vadd.f32 %v15654_v35, %v15807_v19  ;;  %v15907_v34 = vadd.f32 %v15654_v35, %v15838_v8 }
 0x195   : > { %v1734_v47 = vadd.f32 %v15654_v35, %v12868_v15  ;;  %v1728_v3 = vpop.f32.mrb[77].mxu0  ;;  %13140 = vmatprep.mubr.bf16.mxu1 %v2983_v58  ;;  %v2822_v61 = vsel %vm2422_vm15, %v1724_v17, %v2622_v16  ;;  %v15893_v41 = vmul.f32 0.1, %v15872_v38  ;;  %v15896_v62 = vmul.f32 0.1, %v15877_v53 }
 0x196   : > { %v1729_v10 = vadd.f32 %v15654_v35, %v1728_v3  ;;  %v2821_v21 = vsel %vm2421_vm0, %v1719_v48, %v2621_v32  ;;  %v15903_v16 = vpop.f32.mrb[76].mxu1  ;;  %v2224_v28 = vadd.f32 %v15654_v35, %v13015_v44  ;;  %v15913_v19 = vadd.f32 %v15654_v35, %v15848_v5 }
 0x197   : > { %19363 = vst [vmem:[#allocation79_spill] sm:$0xff] %v15893_v41  ;;  %19364 = vst [vmem:[#allocation80_spill] sm:$0xff] %v15896_v62  ;;  %vm2424_vm1 = vcmp.gt.f32.partialorder %v1734_v47, 0.0  ;;  %v2624_v22 = vmul.f32 0.1, %v1734_v47  ;;  %v2984_v58 = vpack.c.bf16 %v2822_v61, %v2821_v21  ;;  %v2219_v61 = vadd.f32 %v15654_v35, %v2218_v50  ;;  %v15916_v21 = vpop.f32.mrb[77].mxu1 }
 0x198   : > { %vm2423_vm2 = vcmp.gt.f32.partialorder %v1729_v10, 0.0  ;;  %v2623_v17 = vmul.f32 0.1, %v1729_v10  ;;  %v12871_v15 = vpop.f32.mrb[78].mxu0  ;;  %19365 = vst [vmem:[#allocation81_spill] sm:$0xff] %v15913_v19  ;;  %vm2522_vm3 = vcmp.gt.f32.partialorder %v2224_v28, 0.0 }
 0x199   : > { %v1744_v32 = vadd.f32 %v15654_v35, %v12871_v15  ;;  %v1738_v48 = vpop.f32.mrb[79].mxu0  ;;  %13141 = vmatmul.mubr.bf16.gmra.mrb[172].mxu1 %v2984_v58  ;;  %v2824_v3 = vsel %vm2424_vm1, %v1734_v47, %v2624_v22  ;;  %v2722_v8 = vmul.f32 0.1, %v2224_v28  ;;  %vm2521_vm5 = vcmp.gt.f32.partialorder %v2219_v61, 0.0 }
 0x19a   : > { %v1739_v23 = vadd.f32 %v15654_v35, %v1738_v48  ;;  %v2823_v62 = vsel %vm2423_vm2, %v1729_v10, %v2623_v17  ;;  %v13021_v15 = vpop.f32.mrb[78].mxu1  ;;  %v2721_v47 = vmul.f32 0.1, %v2219_v61  ;;  %v15922_v50 = vmul.f32 0.1, %v15901_v9 }
 0x19b   : > { %vm2426_vm4 = vcmp.gt.f32.partialorder %v1744_v32, 0.0  ;;  %v2626_v44 = vmul.f32 0.1, %v1744_v32  ;;  %v2985_v52 = vpack.c.bf16 %v2824_v3, %v2823_v62  ;;  %v15919_v5 = vsel %vm2522_vm3, %v2224_v28, %v2722_v8  ;;  %v2238_v62 = vpop.f32.mrb[79].mxu1 }
 0x19c   : > { %vm2425_vm6 = vcmp.gt.f32.partialorder %v1739_v23, 0.0  ;;  %v2625_v58 = vmul.f32 0.1, %v1739_v23  ;;  %v12874_v41 = vpop.f32.mrb[80].mxu0  ;;  %19366 = vst [vmem:[#allocation82_spill] sm:$0xff] %v15919_v5  ;;  %19367 = vst [vmem:[#allocation83_spill] sm:$0xff] %v15922_v50  ;;  %v15933_v8 = vsel %vm2521_vm5, %v2219_v61, %v2721_v47 }
 0x19d   : > { %v15925_v22 = vmul.f32 0.1, %v15907_v34  ;;  %v1754_v10 = vadd.f32 %v15654_v35, %v12874_v41  ;;  %v1748_v17 = vpop.f32.mrb[81].mxu0  ;;  %13144 = vmatprep.mubr.bf16.mxu1 %v2985_v52  ;;  %v2826_v48 = vsel %vm2426_vm4, %v1744_v32, %v2626_v44  ;;  %v15929_v3 = vmul.f32 0.1, %v15913_v19  ;;  %19370 = vst [vmem:[#allocation86_spill] sm:$0xff] %v15933_v8 }
 0x19e   : > { %v1749_v57 = vadd.f32 %v15654_v35, %v1748_v17  ;;  %v2825_v28 = vsel %vm2425_vm6, %v1739_v23, %v2625_v58  ;;  %v15937_v41 = vpop.f32.mrb[80].mxu1  ;;  %v15941_v44 = vadd.f32 %v15654_v35, %v15868_v14  ;;  %v2244_v23 = vadd.f32 %v15654_v35, %v13021_v15 }
 0x19f   : > { %19368 = vst [vmem:[#allocation84_spill] sm:$0xff] %v15925_v22  ;;  %19369 = vst [vmem:[#allocation85_spill] sm:$0xff] %v15929_v3  ;;  %vm2428_vm7 = vcmp.gt.f32.partialorder %v1754_v10, 0.0  ;;  %v2628_v50 = vmul.f32 0.1, %v1754_v10  ;;  %v2986_v53 = vpack.c.bf16 %v2826_v48, %v2825_v28  ;;  %v15944_v58 = vpop.f32.mrb[81].mxu1  ;;  %v15949_v17 = vadd.f32 %v15654_v35, %v15879_v31 }
 0x1a0   : > { %vm2427_vm8 = vcmp.gt.f32.partialorder %v1749_v57, 0.0  ;;  %v2627_v52 = vmul.f32 0.1, %v1749_v57  ;;  %v12877_v32 = vpop.f32.mrb[82].mxu0  ;;  %19371 = vst [vmem:[#allocation87_spill] sm:$0xff] %v15941_v44  ;;  %v2239_v28 = vadd.f32 %v15654_v35, %v2238_v62  ;;  %vm2526_vm9 = vcmp.gt.f32.partialorder %v2244_v23, 0.0 }
 0x1a1   : > { %v1764_v61 = vadd.f32 %v15654_v35, %v12877_v32  ;;  %v1758_v47 = vpop.f32.mrb[83].mxu0  ;;  %13145 = vmatmul.mubr.bf16.gmra.mrb[176].mxu1 %v2986_v53  ;;  %19372 = vst [vmem:[#allocation88_spill] sm:$0xff] %v15949_v17  ;;  %v2828_v48 = vsel %vm2428_vm7, %v1754_v10, %v2628_v50  ;;  %v2726_v14 = vmul.f32 0.1, %v2244_v23  ;;  %v15956_v50 = vmul.f32 0.1, %v15941_v44 }
 0x1a2   : > { %v1759_v22 = vadd.f32 %v15654_v35, %v1758_v47  ;;  %v2827_v8 = vsel %vm2427_vm8, %v1749_v57, %v2627_v52  ;;  %vm2525_vm11 = vcmp.gt.f32.partialorder %v2239_v28, 0.0  ;;  %v13027_v3 = vpop.f32.mrb[82].mxu1  ;;  %v2725_v31 = vmul.f32 0.1, %v2239_v28 }
 0x1a3   : > { %vm2430_vm10 = vcmp.gt.f32.partialorder %v1764_v61, 0.0  ;;  %v2630_v15 = vmul.f32 0.1, %v1764_v61  ;;  %v2987_v5 = vpack.c.bf16 %v2828_v48, %v2827_v8  ;;  %v15953_v19 = vsel %vm2526_vm9, %v2244_v23, %v2726_v14  ;;  %19374 = vst [vmem:[#allocation90_spill] sm:$0xff] %v15956_v50  ;;  %v2258_v52 = vpop.f32.mrb[83].mxu1 }
 0x1a4   : > { %vm2429_vm12 = vcmp.gt.f32.partialorder %v1759_v22, 0.0  ;;  %v2629_v32 = vmul.f32 0.1, %v1759_v22  ;;  %v12880_v53 = vpop.f32.mrb[84].mxu0  ;;  %19373 = vst [vmem:[#allocation89_spill] sm:$0xff] %v15953_v19  ;;  %v15961_v57 = vadd.f32 %v15654_v35, %v15903_v16  ;;  %v15965_v23 = vsel %vm2525_vm11, %v2239_v28, %v2725_v31 }
 0x1a5   : > { %v1774_v10 = vadd.f32 %v15654_v35, %v12880_v53  ;;  %v1768_v62 = vpop.f32.mrb[85].mxu0  ;;  %13148 = vmatprep.mubr.bf16.mxu1 %v2987_v5  ;;  %v2830_v8 = vsel %vm2430_vm10, %v1764_v61, %v2630_v15  ;;  %19376 = vst [vmem:[#allocation92_spill] sm:$0xff] %v15965_v23  ;;  %v2264_v14 = vadd.f32 %v15654_v35, %v13027_v3  ;;  %v15973_v16 = vmul.f32 0.1, %v15949_v17 }
 0x1a6   : > { %19375 = vst [vmem:[#allocation91_spill] sm:$0xff] %v15961_v57  ;;  %v1769_v47 = vadd.f32 %v15654_v35, %v1768_v62  ;;  %v2829_v48 = vsel %vm2429_vm12, %v1759_v22, %v2629_v32  ;;  %v15970_v53 = vpop.f32.mrb[84].mxu1  ;;  %v15977_v32 = vmul.f32 0.1, %v15961_v57  ;;  %v15981_v3 = vadd.f32 %v15654_v35, %v15916_v21 }
 0x1a7   : > { %vm2432_vm13 = vcmp.gt.f32.partialorder %v1774_v10, 0.0  ;;  %v2632_v50 = vmul.f32 0.1, %v1774_v10  ;;  %v2988_v44 = vpack.c.bf16 %v2830_v8, %v2829_v48  ;;  %19377 = vst [vmem:[#allocation93_spill] sm:$0xff] %v15973_v16  ;;  %v15983_v62 = vpop.f32.mrb[85].mxu1  ;;  %vm2530_vm15 = vcmp.gt.f32.partialorder %v2264_v14, 0.0 }
 0x1a8   : > { %vm2431_vm14 = vcmp.gt.f32.partialorder %v1769_v47, 0.0  ;;  %v2631_v61 = vmul.f32 0.1, %v1769_v47  ;;  %v12883_v15 = vpop.f32.mrb[86].mxu0  ;;  %19378 = vst [vmem:[#allocation94_spill] sm:$0xff] %v15977_v32  ;;  %v2259_v19 = vadd.f32 %v15654_v35, %v2258_v52  ;;  %vm2475_vm2 = vcmp.gt.f32.partialorder %v15491_v37, 0.0 }
 0x1a9   : > { %v1784_v22 = vadd.f32 %v15654_v35, %v12883_v15  ;;  %v1778_v28 = vpop.f32.mrb[87].mxu0  ;;  %13149 = vmatmul.mubr.bf16.gmra.mrb[180].mxu1 %v2988_v44  ;;  %v2832_v31 = vsel %vm2432_vm13, %v1774_v10, %v2632_v50  ;;  %v2730_v5 = vmul.f32 0.1, %v2264_v14  ;;  %vm2476_vm10 = vcmp.gt.f32.partialorder %v15471_v46, 0.0 }
 0x1aa   : > { %v1779_v8 = vadd.f32 %v15654_v35, %v1778_v28  ;;  %v2831_v48 = vsel %vm2431_vm14, %v1769_v47, %v2631_v61  ;;  %v13033_v16 = vpop.f32.mrb[86].mxu1  ;;  %vm2529_vm3 = vcmp.gt.f32.partialorder %v2259_v19, 0.0  ;;  %v2729_v61 = vmul.f32 0.1, %v2259_v19 }
 0x1ab   : > { %vm2434_vm0 = vcmp.gt.f32.partialorder %v1784_v22, 0.0  ;;  %v2634_v23 = vmul.f32 0.1, %v1784_v22  ;;  %v2989_v15 = vpack.c.bf16 %v2832_v31, %v2831_v48  ;;  %v15987_v57 = vsel %vm2530_vm15, %v2264_v14, %v2730_v5  ;;  %v2278_v21 = vpop.f32.mrb[87].mxu1 }
 0x1ac   : > { %vm2433_vm1 = vcmp.gt.f32.partialorder %v1779_v8, 0.0  ;;  %v2633_v44 = vmul.f32 0.1, %v1779_v8  ;;  %v12886_v32 = vpop.f32.mrb[88].mxu0  ;;  %19379 = vst [vmem:[#allocation95_spill] sm:$0xff] %v15987_v57  ;;  %v15997_v31 = vadd.f32 %v15654_v35, %v15937_v41  ;;  %v15999_v17 = vsel %vm2529_vm3, %v2259_v19, %v2729_v61 }
 0x1ad   : > { %v1794_v50 = vadd.f32 %v15654_v35, %v12886_v32  ;;  %v1788_v10 = vpop.f32.mrb[89].mxu0  ;;  %13152 = vmatprep.mubr.bf16.mxu1 %v2989_v15  ;;  %v2834_v47 = vsel %vm2434_vm0, %v1784_v22, %v2634_v23  ;;  %v15992_v28 = vmul.f32 0.1, %v15981_v3  ;;  %19382 = vst [vmem:[#allocation98_spill] sm:$0xff] %v15999_v17  ;;  %v16009_v41 = vsel %vm2475_vm2, %v15491_v37, %v15516_v63 }
 0x1ae   : > { %v1789_v52 = vadd.f32 %v15654_v35, %v1788_v10  ;;  %19381 = vst [vmem:[#allocation97_spill] sm:$0xff] %v15997_v31  ;;  %v2833_v14 = vsel %vm2433_vm1, %v1779_v8, %v2633_v44  ;;  %v13036_v32 = vpop.f32.mrb[88].mxu1  ;;  %v2284_v10 = vadd.f32 %v15654_v35, %v13033_v16  ;;  %v16020_v15 = vadd.f32 %v15654_v35, %v15944_v58 }
 0x1af   : > { %19380 = vst [vmem:[#allocation96_spill] sm:$0xff] %v15992_v28  ;;  %vm2436_vm4 = vcmp.gt.f32.partialorder %v1794_v50, 0.0  ;;  %v2636_v5 = vmul.f32 0.1, %v1794_v50  ;;  %v2990_v48 = vpack.c.bf16 %v2834_v47, %v2833_v14  ;;  %v16003_v28 = vpop.f32.mrb[89].mxu1  ;;  %v2279_v47 = vadd.f32 %v15654_v35, %v2278_v21 }
 0x1b0   : > { %vm2435_vm5 = vcmp.gt.f32.partialorder %v1789_v52, 0.0  ;;  %v2635_v23 = vmul.f32 0.1, %v1789_v52  ;;  %v12889_v22 = vpop.f32.mrb[90].mxu0  ;;  %v16016_v14 = vmul.f32 0.1, %v15997_v31  ;;  %v16024_v21 = vadd.f32 %v15654_v35, %v15970_v53 }
 0x1b1   : > { %v1804_v8 = vadd.f32 %v15654_v35, %v12889_v22  ;;  %v1798_v44 = vpop.f32.mrb[91].mxu0  ;;  %13153 = vmatmul.mubr.bf16.gmra.mrb[184].mxu1 %v2990_v48  ;;  %v2836_v19 = vsel %vm2436_vm4, %v1794_v50, %v2636_v5  ;;  %19384 = vst [vmem:[#allocation100_spill] sm:$0xff] %v16020_v15  ;;  %vm2534_vm7 = vcmp.gt.f32.partialorder %v2284_v10, 0.0  ;;  %v2734_v5 = vmul.f32 0.1, %v2284_v10 }
 0x1b2   : > { %v1799_v61 = vadd.f32 %v15654_v35, %v1798_v44  ;;  %19383 = vst [vmem:[#allocation99_spill] sm:$0xff] %v16016_v14  ;;  %v2835_v37 = vsel %vm2435_vm5, %v1789_v52, %v2635_v23  ;;  %v13039_v48 = vpop.f32.mrb[90].mxu1  ;;  %19385 = vst [vmem:[#allocation101_spill] sm:$0xff] %v16024_v21  ;;  %vm2533_vm9 = vcmp.gt.f32.partialorder %v2279_v47, 0.0  ;;  %v2733_v52 = vmul.f32 0.1, %v2279_v47 }
 0x1b3   : > { %vm2438_vm6 = vcmp.gt.f32.partialorder %v1804_v8, 0.0  ;;  %v2638_v63 = vmul.f32 0.1, %v1804_v8  ;;  %v2991_v22 = vpack.c.bf16 %v2836_v19, %v2835_v37  ;;  %v2298_v23 = vpop.f32.mrb[91].mxu1  ;;  %v16031_v57 = vadd.f32 %v15654_v35, %v15983_v62 }
 0x1b4   : > { %vm2437_vm8 = vcmp.gt.f32.partialorder %v1799_v61, 0.0  ;;  %v2637_v50 = vmul.f32 0.1, %v1799_v61  ;;  %v12892_v16 = vpop.f32.mrb[92].mxu0  ;;  %v16034_v53 = vsel %vm2534_vm7, %v2284_v10, %v2734_v5  ;;  %v16044_v62 = vmul.f32 0.1, %v16020_v15 }
 0x1b5   : > { %v1814_v44 = vadd.f32 %v15654_v35, %v12892_v16  ;;  %v1808_v17 = vpop.f32.mrb[93].mxu0  ;;  %13156 = vmatprep.mubr.bf16.mxu1 %v2991_v22  ;;  %v2838_v58 = vsel %vm2438_vm6, %v1804_v8, %v2638_v63  ;;  %19386 = vst [vmem:[#allocation102_spill] sm:$0xff] %v16031_v57  ;;  %19387 = vst [vmem:[#allocation103_spill] sm:$0xff] %v16034_v53  ;;  %v16036_v22 = vsel %vm2533_vm9, %v2279_v47, %v2733_v52 }
 0x1b6   : > { %v1809_v19 = vadd.f32 %v15654_v35, %v1808_v17  ;;  %v2837_v37 = vsel %vm2437_vm8, %v1799_v61, %v2637_v50  ;;  %19388 = vst [vmem:[#allocation104_spill] sm:$0xff] %v16036_v22  ;;  %v13042_v8 = vpop.f32.mrb[92].mxu1  ;;  %v16041_v61 = vadd.f32 %v15654_v35, %v13036_v32  ;;  %19390 = vst [vmem:[#allocation106_spill] sm:$0xff] %v16044_v62  ;;  %v16054_v53 = vmul.f32 0.1, %v16031_v57 }
 0x1b7   : > { %vm2440_vm11 = vcmp.gt.f32.partialorder %v1814_v44, 0.0  ;;  %v2640_v16 = vmul.f32 0.1, %v1814_v44  ;;  %v2992_v14 = vpack.c.bf16 %v2838_v58, %v2837_v37  ;;  %v2304_v47 = vadd.f32 %v15654_v35, %v13039_v48  ;;  %v2308_v58 = vpop.f32.mrb[93].mxu1 }
 0x1b8   : > { %vm2439_vm12 = vcmp.gt.f32.partialorder %v1809_v19, 0.0  ;;  %v2639_v63 = vmul.f32 0.1, %v1809_v19  ;;  %v12895_v31 = vpop.f32.mrb[94].mxu0  ;;  %19389 = vst [vmem:[#allocation105_spill] sm:$0xff] %v16041_v61  ;;  %v2299_v32 = vadd.f32 %v15654_v35, %v2298_v23  ;;  %19392 = vst [vmem:[#allocation108_spill] sm:$0xff] %v16054_v53 }
 0x1b9   : > { %v1824_v10 = vadd.f32 %v15654_v35, %v12895_v31  ;;  %v1818_v50 = vpop.f32.mrb[95].mxu0  ;;  %13157 = vmatmul.mubr.bf16.gmra.mrb[188].mxu1 %v2992_v14  ;;  %v2840_v5 = vsel %vm2440_vm11, %v1814_v44, %v2640_v16  ;;  %v16050_v37 = vmul.f32 0.1, %v16024_v21  ;;  %v16057_v48 = vmul.f32 0.1, %v16041_v61 }
 0x1ba   : > { %v1819_v52 = vadd.f32 %v15654_v35, %v1818_v50  ;;  %v2839_v17 = vsel %vm2439_vm12, %v1809_v19, %v2639_v63  ;;  %v13045_v62 = vpop.f32.mrb[94].mxu1  ;;  %v16061_v16 = vadd.f32 %v15654_v35, %v16003_v28  ;;  %vm2538_vm15 = vcmp.gt.f32.partialorder %v2304_v47, 0.0 }
 0x1bb   : > { %19391 = vst [vmem:[#allocation107_spill] sm:$0xff] %v16050_v37  ;;  %vm2442_vm13 = vcmp.gt.f32.partialorder %v1824_v10, 0.0  ;;  %v2642_v22 = vmul.f32 0.1, %v1824_v10  ;;  %v2993_v31 = vpack.c.bf16 %v2840_v5, %v2839_v17  ;;  %19393 = vst [vmem:[#allocation109_spill] sm:$0xff] %v16057_v48  ;;  %v2318_v37 = vpop.f32.mrb[95].mxu1 }
 0x1bc   : > { %vm2441_vm14 = vcmp.gt.f32.partialorder %v1819_v52, 0.0  ;;  %v2641_v14 = vmul.f32 0.1, %v1819_v52  ;;  %v12898_v44 = vpop.f32.mrb[96].mxu0  ;;  %v2738_v50 = vmul.f32 0.1, %v2304_v47 }
 0x1bd   : > { %v1834_v19 = vadd.f32 %v15654_v35, %v12898_v44  ;;  %v1828_v23 = vpop.f32.mrb[97].mxu0  ;;  %13160 = vmatprep.mubr.bf16.mxu1 %v2993_v31  ;;  %v2842_v63 = vsel %vm2442_vm13, %v1824_v10, %v2642_v22  ;;  %vm2537_vm0 = vcmp.gt.f32.partialorder %v2299_v32, 0.0  ;;  %v2737_v53 = vmul.f32 0.1, %v2299_v32 }
 0x1be   : > { %v1829_v17 = vadd.f32 %v15654_v35, %v1828_v23  ;;  %v2841_v5 = vsel %vm2441_vm14, %v1819_v52, %v2641_v14  ;;  %v16065_v21 = vsel %vm2538_vm15, %v2304_v47, %v2738_v50  ;;  %v13048_v28 = vpop.f32.mrb[96].mxu1  ;;  %v16073_v10 = vsel %vm2476_vm10, %v15471_v46, %v15501_v51  ;;  %v19415_v47 = vld [vmem:[#allocation14_spill] sm:$0xff] }
 0x1bf   : > { %vm2444_vm1 = vcmp.gt.f32.partialorder %v1834_v19, 0.0  ;;  %v2644_v61 = vmul.f32 0.1, %v1834_v19  ;;  %v2994_v48 = vpack.c.bf16 %v2842_v63, %v2841_v5  ;;  %19394 = vst [vmem:[#allocation110_spill] sm:$0xff] %v16065_v21  ;;  %v16067_v15 = vsel %vm2537_vm0, %v2299_v32, %v2737_v53  ;;  %v2328_v22 = vpop.f32.mrb[97].mxu1 }
 0x1c0   : > { %vm2443_vm2 = vcmp.gt.f32.partialorder %v1829_v17, 0.0  ;;  %v2643_v57 = vmul.f32 0.1, %v1829_v17  ;;  %v12901_v44 = vpop.f32.mrb[98].mxu0  ;;  %19395 = vst [vmem:[#allocation111_spill] sm:$0xff] %v16067_v15  ;;  %v16079_v23 = vadd.f32 %v15654_v35, %v13042_v8  ;;  %v16086_v46 = vadd.f32 %v15654_v35, %v2308_v58  ;;  %v19432_v15 = vld [vmem:[#allocation55_spill] sm:$0xff] }
 0x1c1   : > { %v1844_v52 = vadd.f32 %v15654_v35, %v12901_v44  ;;  %v1838_v31 = vpop.f32.mrb[99].mxu0  ;;  %13161 = vmatmul.mubr.bf16.gmra.mrb[192].mxu1 %v2994_v48  ;;  %v2844_v14 = vsel %vm2444_vm1, %v1834_v19, %v2644_v61  ;;  %v16083_v32 = vmul.f32 0.1, %v16061_v16  ;;  %v2324_v61 = vadd.f32 %v15654_v35, %v13045_v62 }
 0x1c2   : > { %v1839_v53 = vadd.f32 %v15654_v35, %v1838_v31  ;;  %v2843_v63 = vsel %vm2443_vm2, %v1829_v17, %v2643_v57  ;;  %v13051_v48 = vpop.f32.mrb[98].mxu1  ;;  %v2319_v8 = vadd.f32 %v15654_v35, %v2318_v37  ;;  %v16091_v5 = vadd.f32 %v15654_v35, %v13048_v28 }
 0x1c3   : > { %vm2446_vm3 = vcmp.gt.f32.partialorder %v1844_v52, 0.0  ;;  %v2646_v51 = vmul.f32 0.1, %v1844_v52  ;;  %v2995_v50 = vpack.c.bf16 %v2844_v14, %v2843_v63  ;;  %v2338_v44 = vpop.f32.mrb[99].mxu1  ;;  %vm2542_vm5 = vcmp.gt.f32.partialorder %v2324_v61, 0.0 }
 0x1c4   : > { %vm2445_vm4 = vcmp.gt.f32.partialorder %v1839_v53, 0.0  ;;  %v2645_v19 = vmul.f32 0.1, %v1839_v53  ;;  %v2742_v57 = vmul.f32 0.1, %v2324_v61  ;;  %v16094_v58 = vadd.f32 %v15654_v35, %v2328_v22 }
 0x1c5   : > { %13164 = vmatprep.mubr.bf16.mxu1 %v2995_v50  ;;  %v2846_v31 = vsel %vm2446_vm3, %v1844_v52, %v2646_v51  ;;  %v16097_v17 = vmul.f32 0.1, %v16079_v23  ;;  %vm2541_vm6 = vcmp.gt.f32.partialorder %v2319_v8, 0.0  ;;  %v2741_v14 = vmul.f32 0.1, %v2319_v8 }
 0x1c6   : > { %v2845_v62 = vsel %vm2445_vm4, %v1839_v53, %v2645_v19  ;;  %v16100_v37 = vmul.f32 0.1, %v16086_v46  ;;  %v16102_v28 = vsel %vm2542_vm5, %v2324_v61, %v2742_v57  ;;  %v16105_v50 = vmul.f32 0.1, %v16091_v5  ;;  %v13583_v22 = vld [vmem:[%s19176_s2] ss:$0 sm:$0xff] }
 0x1c7   : > { %v2996_v63 = vpack.c.bf16 %v2846_v31, %v2845_v62  ;;  %19396 = vst [vmem:[#allocation112_spill] sm:$0xff] %v16102_v28  ;;  %vm2491_vm7 = vcmp.gt.f32.partialorder %v15700_v11, 0.0  ;;  %v16108_v52 = vsel %vm2541_vm6, %v2319_v8, %v2741_v14  ;;  %v16111_v35 = vmul.f32 0.1, %v16094_v58  ;;  %v19402_v62 = vld [vmem:[#allocation81_spill] sm:$0xff]  ;;  %v19414_v61 = vld [vmem:[#allocation15_spill] sm:$0xff] }
 0x1c8   : > { %19397 = vst [vmem:[#allocation113_spill] sm:$0xff] %v16108_v52  ;;  %v2344_v53 = vadd.f32 %v13583_v22, %v13051_v48  ;;  %v2339_v51 = vadd.f32 %v13583_v22, %v2338_v44  ;;  %vm2492_vm8 = vcmp.gt.f32.partialorder %v15686_v2, 0.0  ;;  %vm2494_vm9 = vcmp.gt.f32.partialorder %v15722_v59, 0.0  ;;  %v19404_v22 = vld [vmem:[#allocation42_spill] sm:$0xff]  ;;  %v19420_v19 = vld [vmem:[#allocation97_spill] sm:$0xff]  ;;  %v19438_v28 = vld [vmem:[#allocation63_spill] sm:$0xff] }
 0x1c9   : > { %vm2493_vm10 = vcmp.gt.f32.partialorder %v15727_v29, 0.0  ;;  %13165 = vmatmul.mubr.bf16.gmra.mrb[196].mxu1 %v2996_v63  ;;  %vm2477_vm11 = vcmp.gt.f32.partialorder %v15522_v6, 0.0  ;;  %vm2478_vm12 = vcmp.gt.f32.partialorder %v15512_v24, 0.0  ;;  %vm2496_vm13 = vcmp.gt.f32.partialorder %v15731_v20, 0.0  ;;  %v19403_v63 = vld [vmem:[#allocation38_spill] sm:$0xff] }
 0x1ca   : > { %vm2495_vm14 = vcmp.gt.f32.partialorder %v15735_v25, 0.0  ;;  %v19398_v48 = vpack.c.bf16 %v15174_v49, %v15179_v56  ;;  %vm2546_vm15 = vcmp.gt.f32.partialorder %v2344_v53, 0.0  ;;  %v2746_v8 = vmul.f32 0.1, %v2344_v53  ;;  %v19427_v52 = vld [vmem:[#allocation50_spill] sm:$0xff] }
 0x1cb   : > { %vm2545_vm0 = vcmp.gt.f32.partialorder %v2339_v51, 0.0  ;;  %v2745_v44 = vmul.f32 0.1, %v2339_v51  ;;  %vm2499_vm3 = vcmp.gt.f32.partialorder %v15797_v54, 0.0  ;;  %v16135_v31 = vsel %vm2477_vm11, %v15522_v6, %v15550_v33 }
 0x1cc   : > { %13168 = vmatprep.mubr.bf16.mxu1 %v19398_v48  ;;  %v16139_v57 = vsel %vm2478_vm12, %v15512_v24, %v15533_v13  ;;  %vm2479_vm4 = vcmp.gt.f32.partialorder %v15559_v55, 0.0  ;;  %vm2480_vm5 = vcmp.gt.f32.partialorder %v15545_v18, 0.0  ;;  %vm2500_vm6 = vcmp.gt.f32.partialorder %v15783_v45, 0.0  ;;  %v19409_v48 = vld [vmem:[#allocation39_spill] sm:$0xff] }
 0x1cd   : > { %v16146_v49 = vsel %vm2546_vm15, %v2344_v53, %v2746_v8  ;;  %v16148_v56 = vsel %vm2545_vm0, %v2339_v51, %v2745_v44  ;;  %v16154_v24 = vsel %vm2479_vm4, %v15559_v55, %v15588_v0  ;;  %v16162_v33 = vsel %vm2480_vm5, %v15545_v18, %v15564_v26  ;;  %v19401_v26 = vld [vmem:[#allocation75_spill] sm:$0xff]  ;;  %v19408_v53 = vld [vmem:[#allocation41_spill] sm:$0xff] }
 0x1ce   : > { %19399 = vst [vmem:[#allocation114_spill] sm:$0xff] %v16146_v49  ;;  %19400 = vst [vmem:[#allocation115_spill] sm:$0xff] %v16148_v56  ;;  %vm2481_vm15 = vcmp.gt.f32.partialorder %v15579_v60, 0.0  ;;  %vm2482_vm0 = vcmp.gt.f32.partialorder %v15573_v30, 0.0  ;;  %vm2483_vm5 = vcmp.gt.f32.partialorder %v15600_v40, 0.0  ;;  %vm2484_vm2 = vcmp.gt.f32.partialorder %v19403_v63, 0.0 }
 0x1cf   : > { %v16173_v0 = vsel %vm2481_vm15, %v15579_v60, %v15608_v1  ;;  %v16177_v18 = vsel %vm2482_vm0, %v15573_v30, %v15603_v27  ;;  %v16188_v60 = vsel %vm2483_vm5, %v15600_v40, %v19404_v22  ;;  %v19405_v1 = vld [vmem:[#allocation40_spill] sm:$0xff]  ;;  %v19406_v27 = vld [vmem:[#allocation87_spill] sm:$0xff]  ;;  %v16195_v51 = vsel %vm2484_vm2, %v19403_v63, %v19408_v53  ;;  %v19410_v8 = vld [vmem:[#allocation45_spill] sm:$0xff] }
 0x1d0   : > { %vm2485_vm15 = vcmp.gt.f32.partialorder %v19405_v1, 0.0  ;;  %v19407_v30 = vld [vmem:[#allocation88_spill] sm:$0xff]  ;;  %vm2486_vm1 = vcmp.gt.f32.partialorder %v19409_v48, 0.0  ;;  %v19411_v13 = vld [vmem:[#allocation47_spill] sm:$0xff]  ;;  %vm2523_vm11 = vcmp.gt.f32.partialorder %v15981_v3, 0.0  ;;  %v19416_v14 = vpack.c.bf16 %v19414_v61, %v19415_v47  ;;  %v19421_v56 = vld [vmem:[#allocation102_spill] sm:$0xff] }
 0x1d1   : > { %vm2519_vm12 = vcmp.gt.f32.partialorder %v19407_v30, 0.0  ;;  %v16200_v44 = vsel %vm2485_vm15, %v19405_v1, %v19410_v8  ;;  %vm2487_vm4 = vcmp.gt.f32.partialorder %v19411_v13, 0.0  ;;  %v19412_v40 = vld [vmem:[#allocation91_spill] sm:$0xff]  ;;  %v19413_v22 = vld [vmem:[#allocation100_spill] sm:$0xff]  ;;  %vm2531_vm0 = vcmp.gt.f32.partialorder %v19421_v56, 0.0  ;;  %v19422_v49 = vld [vmem:[#allocation17_spill] sm:$0xff] }
 0x1d2   : > { %13169 = vmatmul.mubr.bf16.gmra.mrb[200].mxu1 %v19416_v14  ;;  %v19417_v53 = vld [vmem:[#allocation44_spill] sm:$0xff]  ;;  %v19418_v1 = vld [vmem:[#allocation43_spill] sm:$0xff]  ;;  %v19425_v63 = vld [vmem:[#allocation46_spill] sm:$0xff]  ;;  %vm2535_vm15 = vcmp.gt.f32.partialorder %v16061_v16, 0.0 }
 0x1d3   : > { %v16213_v55 = vsel %vm2486_vm1, %v19409_v48, %v19417_v53  ;;  %vm2488_vm2 = vcmp.gt.f32.partialorder %v19418_v1, 0.0  ;;  %v19419_v8 = vld [vmem:[#allocation52_spill] sm:$0xff]  ;;  %v19426_v53 = vld [vmem:[#allocation51_spill] sm:$0xff] }
 0x1d4   : > { %v16218_v6 = vsel %vm2487_vm4, %v19411_v13, %v19419_v8  ;;  %v19423_v47 = vld [vmem:[#allocation16_spill] sm:$0xff]  ;;  %v16229_v48 = vsel %vm2488_vm2, %v19418_v1, %v19425_v63  ;;  %vm2489_vm1 = vcmp.gt.f32.partialorder %v19426_v53, 0.0  ;;  %vm2490_vm4 = vcmp.gt.f32.partialorder %v19427_v52, 0.0  ;;  %v19428_v13 = vld [vmem:[#allocation101_spill] sm:$0xff] }
 0x1d5   : > { %v19424_v61 = vpack.c.bf16 %v19422_v49, %v19423_v47  ;;  %vm2532_vm5 = vcmp.gt.f32.partialorder %v19428_v13, 0.0  ;;  %v19429_v49 = vld [vmem:[#allocation54_spill] sm:$0xff]  ;;  %v19431_v63 = vld [vmem:[#allocation56_spill] sm:$0xff]  ;;  %v16257_v8 = vsel %vm2492_vm8, %v15686_v2, %v19432_v15  ;;  %vm19439_vm8 = vcmp.gt.f32.partialorder %v15766_v43, 0.0 }
 0x1d6   : > { %v16239_v47 = vsel %vm2489_vm1, %v19426_v53, %v19429_v49  ;;  %v16249_v1 = vsel %vm2491_vm7, %v15700_v11, %v19431_v63  ;;  %v19433_v53 = vld [vmem:[#allocation58_spill] sm:$0xff]  ;;  %v19434_v49 = vld [vmem:[#allocation57_spill] sm:$0xff]  ;;  %v19436_v15 = vld [vmem:[#allocation60_spill] sm:$0xff]  ;;  %v16294_v2 = vsel %vm19439_vm8, %v15766_v43, %v19438_v28  ;;  %vm2544_vm2 = vcmp.gt.f32.partialorder %v16091_v5, 0.0 }
 0x1d7   : > { %13172 = vmatprep.mubr.bf16.mxu1 %v19424_v61  ;;  %v19430_v61 = vld [vmem:[#allocation53_spill] sm:$0xff]  ;;  %v16269_v11 = vsel %vm2494_vm9, %v15722_v59, %v19434_v49  ;;  %vm19441_vm9 = vcmp.gt.f32.partialorder %v15747_v12, 0.0  ;;  %v19444_v28 = vld [vmem:[#allocation70_spill] sm:$0xff]  ;;  %vm2543_vm1 = vcmp.gt.f32.partialorder %v16094_v58, 0.0  ;;  %vm19457_vm8 = vcmp.gt.f32.partialorder %v15872_v38, 0.0 }
 0x1d8   : > { %v16243_v14 = vsel %vm2490_vm4, %v19427_v52, %v19430_v61  ;;  %v16263_v52 = vsel %vm2493_vm10, %v15727_v29, %v19433_v53  ;;  %v19435_v61 = vld [vmem:[#allocation105_spill] sm:$0xff]  ;;  %v16280_v29 = vsel %vm2495_vm14, %v15735_v25, %v19436_v15  ;;  %v19437_v53 = vld [vmem:[#allocation59_spill] sm:$0xff]  ;;  %v19442_v15 = vld [vmem:[#allocation68_spill] sm:$0xff]  ;;  %vm2539_vm10 = vcmp.gt.f32.partialorder %v16086_v46, 0.0 }
 0x1d9   : > { %vm2536_vm7 = vcmp.gt.f32.partialorder %v19435_v61, 0.0  ;;  %v16286_v59 = vsel %vm2496_vm13, %v15731_v20, %v19437_v53  ;;  %v19440_v63 = vld [vmem:[#allocation61_spill] sm:$0xff]  ;;  %v16306_v20 = vsel %vm2499_vm3, %v15797_v54, %v19442_v15  ;;  %vm19445_vm13 = vcmp.gt.f32.partialorder %v15811_v4, 0.0  ;;  %v19454_v53 = vld [vmem:[#allocation18_spill] sm:$0xff] }
 0x1da   : > { %v16300_v25 = vsel %vm19441_vm9, %v15747_v12, %v19440_v63  ;;  %v19443_v49 = vld [vmem:[#allocation65_spill] sm:$0xff]  ;;  %v16321_v12 = vsel %vm19445_vm13, %v15811_v4, %v19444_v28  ;;  %vm19448_vm14 = vcmp.gt.f32.partialorder %v15804_v36, 0.0  ;;  %vm2540_vm3 = vcmp.gt.f32.partialorder %v16079_v23, 0.0  ;;  %v19449_v4 = vld [vmem:[#allocation74_spill] sm:$0xff] }
 0x1db   : > { %v16315_v43 = vsel %vm2500_vm6, %v15783_v45, %v19443_v49  ;;  %19446 = vst [vmem:[#allocation75_spill] sm:$0xff] %v16321_v12  ;;  %v19447_v63 = vld [vmem:[#allocation69_spill] sm:$0xff]  ;;  %vm19450_vm6 = vcmp.gt.f32.partialorder %v15845_v42, 0.0  ;;  %vm19452_vm4 = vcmp.gt.f32.partialorder %v15821_v39, 0.0  ;;  %v19456_v49 = vld [vmem:[#allocation79_spill] sm:$0xff]  ;;  %vm19459_vm9 = vcmp.gt.f32.partialorder %v15863_v7, 0.0 }
 0x1dc   : > { %v16327_v54 = vsel %vm19448_vm14, %v15804_v36, %v19447_v63  ;;  %v16340_v15 = vsel %vm19450_vm6, %v15845_v42, %v19449_v4  ;;  %v19451_v36 = vld [vmem:[#allocation71_spill] sm:$0xff]  ;;  %v16357_v12 = vsel %vm19457_vm8, %v15872_v38, %v19456_v49  ;;  %v19458_v42 = vld [vmem:[#allocation78_spill] sm:$0xff]  ;;  %vm19461_vm13 = vcmp.gt.f32.partialorder %v15901_v9, 0.0 }
 0x1dd   : > { %v16346_v28 = vsel %vm19452_vm4, %v15821_v39, %v19451_v36  ;;  %v19453_v63 = vld [vmem:[#allocation19_spill] sm:$0xff]  ;;  %v16363_v4 = vsel %vm19459_vm9, %v15863_v7, %v19458_v42  ;;  %v19463_v36 = vld [vmem:[#allocation20_spill] sm:$0xff]  ;;  %vm19466_vm14 = vcmp.gt.f32.partialorder %v19401_v26, 0.0  ;;  %vm19468_vm6 = vcmp.gt.f32.partialorder %v19402_v62, 0.0  ;;  %v19479_v45 = vld [vmem:[#allocation94_spill] sm:$0xff] }
 0x1de   : > { %v19455_v21 = vpack.c.bf16 %v19453_v63, %v19454_v53  ;;  %v19460_v39 = vld [vmem:[#allocation83_spill] sm:$0xff]  ;;  %v19462_v53 = vld [vmem:[#allocation21_spill] sm:$0xff]  ;;  %v19465_v7 = vld [vmem:[#allocation80_spill] sm:$0xff]  ;;  %vm19471_vm4 = vcmp.gt.f32.partialorder %v15907_v34, 0.0  ;;  %vm19475_vm8 = vcmp.gt.f32.partialorder %v19406_v27, 0.0  ;;  %vm19483_vm9 = vcmp.gt.f32.partialorder %v19413_v22, 0.0 }
 0x1df   : > { %v19464_v63 = vpack.c.bf16 %v19462_v53, %v19463_v36  ;;  %v16377_v38 = vld [vmem:[%s19178_s4] ss:$0 sm:$0xff]  ;;  %v16385_v42 = vsel %vm19466_vm14, %v19401_v26, %v19465_v7  ;;  %v19470_v53 = vld [vmem:[#allocation84_spill] sm:$0xff]  ;;  %v19472_v26 = vld [vmem:[#allocation93_spill] sm:$0xff] }
 0x1e0   : > { %13173 = vmatmul.mubr.bf16.gmra.mrb[204].mxu1 %v19455_v21  ;;  %v16369_v21 = vsel %vm19461_vm13, %v15901_v9, %v19460_v39  ;;  %v19467_v9 = vld [vmem:[#allocation85_spill] sm:$0xff]  ;;  %v16397_v36 = vsel %vm19471_vm4, %v15907_v34, %v19470_v53  ;;  %v16407_v7 = vsel %vm2519_vm12, %v19407_v30, %v19472_v26  ;;  %v13070_v34 = vpop.f32.mrb[100].mxu1  ;;  %vm19480_vm12 = vcmp.gt.f32.partialorder %v19412_v40, 0.0  ;;  %v19482_v26 = vld [vmem:[#allocation106_spill] sm:$0xff] }
 0x1e1   : > { %13176 = vmatprep.mubr.bf16.mxu1 %v19464_v63  ;;  %v16391_v39 = vsel %vm19468_vm6, %v19402_v62, %v19467_v9  ;;  %19473 = vst [vmem:[#allocation38_spill] sm:$0xff] %v16407_v7  ;;  %v19474_v62 = vld [vmem:[#allocation90_spill] sm:$0xff]  ;;  %v19477_v63 = vld [vmem:[#allocation96_spill] sm:$0xff]  ;;  %v16427_v30 = vsel %vm19480_vm12, %v19412_v40, %v19479_v45  ;;  %v3152_v53 = vpop.f32.mrb[101].mxu1 }
 0x1e2   : > { %19469 = vst [vmem:[#allocation81_spill] sm:$0xff] %v16391_v39  ;;  %v16413_v9 = vsel %vm19475_vm8, %v19406_v27, %v19474_v62  ;;  %v16421_v49 = vsel %vm2523_vm11, %v15981_v3, %v19477_v63  ;;  %19481 = vst [vmem:[#allocation87_spill] sm:$0xff] %v16427_v30  ;;  %v16433_v27 = vsel %vm19483_vm9, %v19413_v22, %v19482_v26  ;;  %v19485_v3 = vld [vmem:[#allocation99_spill] sm:$0xff]  ;;  %vm19486_vm11 = vcmp.gt.f32.partialorder %v19420_v19, 0.0  ;;  %v19488_v40 = vld [vmem:[#allocation108_spill] sm:$0xff]  ;;  %v13071_v26 = vpop.f32.mrb[102].mxu1 }
 0x1e3   : > { %19476 = vst [vmem:[#allocation42_spill] sm:$0xff] %v16413_v9  ;;  %19478 = vst [vmem:[#allocation40_spill] sm:$0xff] %v16421_v49  ;;  %v3161_v62 = vadd.f32 %v13070_v34, %v16377_v38  ;;  %v16442_v63 = vsel %vm19486_vm11, %v19420_v19, %v19485_v3  ;;  %v16448_v45 = vsel %vm2531_vm0, %v19421_v56, %v19488_v40  ;;  %v19490_v9 = vld [vmem:[#allocation107_spill] sm:$0xff]  ;;  %v3155_v3 = vpop.f32.mrb[103].mxu1  ;;  %v19494_v49 = vld [vmem:[#allocation22_spill] sm:$0xff] }
 0x1e4   : > { %19484 = vst [vmem:[#allocation88_spill] sm:$0xff] %v16433_v27  ;;  %19487 = vst [vmem:[#allocation41_spill] sm:$0xff] %v16442_v63  ;;  %v3153_v22 = vadd.f32 %v16377_v38, %v3152_v53  ;;  %v16457_v7 = vsel %vm2532_vm5, %v19428_v13, %v19490_v9  ;;  %v16463_v19 = vsel %vm2535_vm15, %v16061_v16, %v16083_v32  ;;  %v19492_v13 = vld [vmem:[#allocation109_spill] sm:$0xff]  ;;  %v19493_v63 = vld [vmem:[#allocation23_spill] sm:$0xff] }
 0x1e5   : > { %19489 = vst [vmem:[#allocation39_spill] sm:$0xff] %v16448_v45  ;;  %19491 = vst [vmem:[#allocation45_spill] sm:$0xff] %v16457_v7  ;;  %vm3953_vm0 = vcmp.gt.f32.partialorder %v3161_v62, 0.0  ;;  %v4153_v56 = vmul.f32 0.1, %v3161_v62  ;;  %v3164_v53 = vadd.f32 %v13071_v26, %v16377_v38  ;;  %v3156_v27 = vadd.f32 %v16377_v38, %v3155_v3  ;;  %v19496_v7 = vld [vmem:[#allocation25_spill] sm:$0xff] }
 0x1e6   : > { %vm3951_vm13 = vcmp.gt.f32.partialorder %v3153_v22, 0.0  ;;  %v4151_v34 = vmul.f32 0.1, %v3153_v22  ;;  %v16473_v9 = vsel %vm2536_vm7, %v19435_v61, %v19492_v13  ;;  %v19495_v26 = vpack.c.bf16 %v19493_v63, %v19494_v49  ;;  %v19497_v3 = vld [vmem:[#allocation24_spill] sm:$0xff] }
 0x1e7   : > { %v4353_v16 = vsel %vm3953_vm0, %v3161_v62, %v4153_v56  ;;  %vm3954_vm5 = vcmp.gt.f32.partialorder %v3164_v53, 0.0  ;;  %v4154_v32 = vmul.f32 0.1, %v3164_v53  ;;  %vm3952_vm15 = vcmp.gt.f32.partialorder %v3156_v27, 0.0 }
 0x1e8   : > { %13177 = vmatmul.mubr.bf16.gmra.mrb[208].mxu1 %v19495_v26  ;;  %v4152_v45 = vmul.f32 0.1, %v3156_v27  ;;  %v19498_v30 = vpack.c.bf16 %v19496_v7, %v19497_v3  ;;  %v4351_v39 = vsel %vm3951_vm13, %v3153_v22, %v4151_v34  ;;  %v16487_v61 = vsel %vm2539_vm10, %v16086_v46, %v16100_v37  ;;  %v13074_v37 = vpop.f32.mrb[104].mxu1  ;;  %v19504_v3 = vld [vmem:[#allocation29_spill] sm:$0xff] }
 0x1e9   : > { %v4354_v62 = vsel %vm3954_vm5, %v3164_v53, %v4154_v32  ;;  %v16493_v49 = vsel %vm2540_vm3, %v16079_v23, %v16097_v17  ;;  %v16499_v7 = vsel %vm2543_vm1, %v16094_v58, %v16111_v35  ;;  %v3177_v17 = vadd.f32 %v13074_v37, %v16377_v38  ;;  %v3168_v34 = vpop.f32.mrb[105].mxu1  ;;  %v19502_v32 = vld [vmem:[#allocation26_spill] sm:$0xff] }
 0x1ea   : > { %13180 = vmatprep.mubr.bf16.mxu1 %v19498_v30  ;;  %19499 = vst [vmem:[#allocation47_spill] sm:$0xff] %v16499_v7  ;;  %v16505_v30 = vsel %vm2544_vm2, %v16091_v5, %v16105_v50  ;;  %v4552_v46 = vpack.c.bf16 %v4354_v62, %v4353_v16  ;;  %v4352_v63 = vsel %vm3952_vm15, %v3156_v27, %v4152_v45  ;;  %v13075_v56 = vpop.f32.mrb[106].mxu1  ;;  %v19501_v16 = vld [vmem:[#allocation27_spill] sm:$0xff]  ;;  %v19505_v62 = vld [vmem:[#allocation28_spill] sm:$0xff] }
 0x1eb   : > { %19500 = vst [vmem:[#allocation91_spill] sm:$0xff] %v16505_v30  ;;  %v4551_v58 = vpack.c.bf16 %v4352_v63, %v4351_v39  ;;  %v3169_v35 = vadd.f32 %v16377_v38, %v3168_v34  ;;  %v4157_v53 = vmul.f32 0.1, %v3177_v17  ;;  %v3180_v5 = vadd.f32 %v13075_v56, %v16377_v38  ;;  %v3171_v50 = vpop.f32.mrb[107].mxu1 }
 0x1ec   : > { %vm3957_vm7 = vcmp.gt.f32.partialorder %v3177_v17, 0.0  ;;  %v3172_v45 = vadd.f32 %v16377_v38, %v3171_v50  ;;  %v19503_v26 = vpack.c.bf16 %v19501_v16, %v19502_v32  ;;  %v19506_v37 = vpack.c.bf16 %v19504_v3, %v19505_v62 }
 0x1ed   : > { %13284 = vmatprep.mubr.bf16.mxu0 %v4551_v58  ;;  %v4155_v27 = vmul.f32 0.1, %v3169_v35  ;;  %vm3955_vm10 = vcmp.gt.f32.partialorder %v3169_v35, 0.0  ;;  %vm3958_vm3 = vcmp.gt.f32.partialorder %v3180_v5, 0.0  ;;  %v4158_v13 = vmul.f32 0.1, %v3180_v5 }
 0x1ee   : > { %13285 = vmatmul.mubr.bf16.vlgmr.msra.gmra.mrb[100].mxu0 %v4552_v46  ;;  %vm3956_vm2 = vcmp.gt.f32.partialorder %v3172_v45, 0.0  ;;  %v4156_v39 = vmul.f32 0.1, %v3172_v45  ;;  %v4357_v63 = vsel %vm3957_vm7, %v3177_v17, %v4157_v53  ;;  %v13078_v58 = vpop.f32.mrb[108].mxu1  ;;  %v19507_v53 = vld [vmem:[#allocation31_spill] sm:$0xff] }
 0x1ef   : > { %v4358_v34 = vsel %vm3958_vm3, %v3180_v5, %v4158_v13  ;;  %v4355_v56 = vsel %vm3955_vm10, %v3169_v35, %v4155_v27  ;;  %v3193_v46 = vadd.f32 %v13078_v58, %v16377_v38  ;;  %v3184_v22 = vpop.f32.mrb[109].mxu1  ;;  %v19508_v5 = vld [vmem:[#allocation30_spill] sm:$0xff] }
 0x1f0   : > { %13181 = vmatmul.mubr.bf16.gmra.mrb[212].mxu1 %v19503_v26  ;;  %v4356_v23 = vsel %vm3956_vm2, %v3172_v45, %v4156_v39  ;;  %v4554_v50 = vpack.c.bf16 %v4358_v34, %v4357_v63  ;;  %v3185_v7 = vadd.f32 %v16377_v38, %v3184_v22  ;;  %v13079_v16 = vpop.f32.mrb[110].mxu1  ;;  %v19509_v27 = vpack.c.bf16 %v19507_v53, %v19508_v5  ;;  %v19511_v45 = vld [vmem:[#allocation32_spill] sm:$0xff] }
 0x1f1   : > { %13184 = vmatprep.mubr.bf16.mxu1 %v19506_v37  ;;  %v4553_v40 = vpack.c.bf16 %v4356_v23, %v4355_v56  ;;  %v4161_v32 = vmul.f32 0.1, %v3193_v46  ;;  %v3196_v26 = vadd.f32 %v13079_v16, %v16377_v38  ;;  %v3187_v30 = vpop.f32.mrb[111].mxu1  ;;  %vm3961_vm1 = vcmp.gt.f32.partialorder %v3193_v46, 0.0  ;;  %v19510_v23 = vld [vmem:[#allocation33_spill] sm:$0xff] }
 0x1f2   : > { %v4159_v3 = vmul.f32 0.1, %v3185_v7  ;;  %v3188_v17 = vadd.f32 %v16377_v38, %v3187_v30  ;;  %vm3959_vm14 = vcmp.gt.f32.partialorder %v3185_v7, 0.0  ;;  %v19512_v13 = vpack.c.bf16 %v19510_v23, %v19511_v45 }
 0x1f3   : > { %13288 = vmatprep.mubr.bf16.mxu0 %v4553_v40  ;;  %vm3962_vm6 = vcmp.gt.f32.partialorder %v3196_v26, 0.0  ;;  %v4162_v35 = vmul.f32 0.1, %v3196_v26  ;;  %v4361_v39 = vsel %vm3961_vm1, %v3193_v46, %v4161_v32  ;;  %v19513_v32 = vld [vmem:[#allocation35_spill] sm:$0xff] }
 0x1f4   : > { %vm3960_vm4 = vcmp.gt.f32.partialorder %v3188_v17, 0.0  ;;  %v4160_v22 = vmul.f32 0.1, %v3188_v17  ;;  %v13082_v62 = vpop.f32.mrb[112].mxu1  ;;  %v4359_v37 = vsel %vm3959_vm14, %v3185_v7, %v4159_v3 }
 0x1f5   : > { %v4362_v40 = vsel %vm3962_vm6, %v3196_v26, %v4162_v35  ;;  %v3209_v34 = vadd.f32 %v13082_v62, %v16377_v38  ;;  %v3200_v58 = vpop.f32.mrb[113].mxu1  ;;  %v19514_v26 = vld [vmem:[#allocation34_spill] sm:$0xff]  ;;  %v19516_v35 = vld [vmem:[#allocation37_spill] sm:$0xff] }
 0x1f6   : > { %13289 = vmatmul.mubr.bf16.gmra.mrb[104].mxu0 %v4554_v50  ;;  %v4360_v63 = vsel %vm3960_vm4, %v3188_v17, %v4160_v22  ;;  %v4556_v30 = vpack.c.bf16 %v4362_v40, %v4361_v39  ;;  %v3201_v50 = vadd.f32 %v16377_v38, %v3200_v58  ;;  %v13083_v16 = vpop.f32.mrb[114].mxu1  ;;  %v19515_v3 = vpack.c.bf16 %v19513_v32, %v19514_v26  ;;  %v19517_v22 = vld [vmem:[#allocation36_spill] sm:$0xff] }
 0x1f7   : > { %v4555_v56 = vpack.c.bf16 %v4360_v63, %v4359_v37  ;;  %v4165_v53 = vmul.f32 0.1, %v3209_v34  ;;  %v3212_v5 = vadd.f32 %v13083_v16, %v16377_v38  ;;  %vm3965_vm8 = vcmp.gt.f32.partialorder %v3209_v34, 0.0 }
 0x1f8   : > { %13185 = vmatmul.mubr.bf16.gmra.mrb[216].mxu1 %v19509_v27  ;;  %v3203_v27 = vpop.f32.mrb[115].mxu1  ;;  %v4163_v23 = vmul.f32 0.1, %v3201_v50  ;;  %vm3963_vm12 = vcmp.gt.f32.partialorder %v3201_v50, 0.0  ;;  %v19518_v45 = vpack.c.bf16 %v19516_v35, %v19517_v22 }
 0x1f9   : > { %13188 = vmatprep.mubr.bf16.mxu1 %v19512_v13  ;;  %13292 = vmatprep.mubr.bf16.mxu0 %v4555_v56  ;;  %v3204_v46 = vadd.f32 %v16377_v38, %v3203_v27  ;;  %vm3966_vm9 = vcmp.gt.f32.partialorder %v3212_v5, 0.0  ;;  %v4166_v7 = vmul.f32 0.1, %v3212_v5  ;;  %v4365_v13 = vsel %vm3965_vm8, %v3209_v34, %v4165_v53  ;;  %v19519_v53 = vld [vmem:[#allocation49_spill] sm:$0xff] }
 0x1fa   : > { %v4363_v62 = vsel %vm3963_vm12, %v3201_v50, %v4163_v23 }
 0x1fb   : > { %vm3964_vm11 = vcmp.gt.f32.partialorder %v3204_v46, 0.0  ;;  %v4164_v17 = vmul.f32 0.1, %v3204_v46  ;;  %v4366_v39 = vsel %vm3966_vm9, %v3212_v5, %v4166_v7  ;;  %v19520_v5 = vld [vmem:[#allocation48_spill] sm:$0xff]  ;;  %v19522_v7 = vpack.c.bf16 %v16073_v10, %v16009_v41 }
 0x1fc   : > { %v13086_v40 = vpop.f32.mrb[116].mxu1  ;;  %v4558_v63 = vpack.c.bf16 %v4366_v39, %v4365_v13  ;;  %v19521_v23 = vpack.c.bf16 %v19519_v53, %v19520_v5 }
 0x1fd   : > { %v4364_v37 = vsel %vm3964_vm11, %v3204_v46, %v4164_v17  ;;  %v3216_v58 = vpop.f32.mrb[117].mxu1 }
 0x1fe   : > { %13293 = vmatmul.mubr.bf16.gmra.mrb[108].mxu0 %v4556_v30  ;;  %v3225_v30 = vadd.f32 %v13086_v40, %v16377_v38  ;;  %v4557_v56 = vpack.c.bf16 %v4364_v37, %v4363_v62  ;;  %v3217_v16 = vadd.f32 %v16377_v38, %v3216_v58  ;;  %v13087_v27 = vpop.f32.mrb[118].mxu1 }
 0x1ff   : > { %v3228_v26 = vadd.f32 %v13087_v27, %v16377_v38 }
 0x200   : > { %13189 = vmatmul.mubr.bf16.gmra.mrb[220].mxu1 %v19515_v3  ;;  %v4169_v32 = vmul.f32 0.1, %v3225_v30  ;;  %v3219_v3 = vpop.f32.mrb[119].mxu1  ;;  %13296 = vmatprep.mubr.bf16.mxu0 %v4557_v56  ;;  %vm3969_vm0 = vcmp.gt.f32.partialorder %v3225_v30, 0.0  ;;  %v4167_v35 = vmul.f32 0.1, %v3217_v16 }
 0x201   : > { %13192 = vmatprep.mubr.bf16.mxu1 %v19518_v45  ;;  %v3220_v34 = vadd.f32 %v16377_v38, %v3219_v3  ;;  %vm3967_vm13 = vcmp.gt.f32.partialorder %v3217_v16, 0.0  ;;  %vm3970_vm5 = vcmp.gt.f32.partialorder %v3228_v26, 0.0  ;;  %v4170_v50 = vmul.f32 0.1, %v3228_v26 }
 0x202   : > { %v4369_v17 = vsel %vm3969_vm0, %v3225_v30, %v4169_v32  ;;  %v4367_v13 = vsel %vm3967_vm13, %v3217_v16, %v4167_v35  ;;  %v19523_v16 = vpack.c.bf16 %v16139_v57, %v16135_v31 }
 0x203   : > { %vm3968_vm15 = vcmp.gt.f32.partialorder %v3220_v34, 0.0  ;;  %v4168_v46 = vmul.f32 0.1, %v3220_v34  ;;  %v4370_v22 = vsel %vm3970_vm5, %v3228_v26, %v4170_v50  ;;  %v19524_v26 = vpack.c.bf16 %v16162_v33, %v16154_v24 }
 0x204   : > { %v13090_v45 = vpop.f32.mrb[120].mxu1  ;;  %v4560_v40 = vpack.c.bf16 %v4370_v22, %v4369_v17 }
 0x205   : > { %v4368_v39 = vsel %vm3968_vm15, %v3220_v34, %v4168_v46  ;;  %v3241_v62 = vadd.f32 %v13090_v45, %v16377_v38  ;;  %v3232_v37 = vpop.f32.mrb[121].mxu1 }
 0x206   : > { %13297 = vmatmul.mubr.bf16.gmra.mrb[112].mxu0 %v4558_v63  ;;  %v4559_v63 = vpack.c.bf16 %v4368_v39, %v4367_v13  ;;  %v3233_v58 = vadd.f32 %v16377_v38, %v3232_v37  ;;  %v13091_v56 = vpop.f32.mrb[122].mxu1 }
 0x207   : > { %v4173_v27 = vmul.f32 0.1, %v3241_v62  ;;  %v3244_v3 = vadd.f32 %v13091_v56, %v16377_v38  ;;  %v3235_v53 = vpop.f32.mrb[123].mxu1  ;;  %vm3973_vm7 = vcmp.gt.f32.partialorder %v3241_v62, 0.0 }
 0x208   : > { %13193 = vmatmul.mubr.bf16.gmra.mrb[224].mxu1 %v19521_v23  ;;  %13300 = vmatprep.mubr.bf16.mxu0 %v4559_v63  ;;  %v4171_v41 = vmul.f32 0.1, %v3233_v58  ;;  %v3236_v10 = vadd.f32 %v16377_v38, %v3235_v53  ;;  %vm3971_vm10 = vcmp.gt.f32.partialorder %v3233_v58, 0.0  ;;  %v19526_v63 = vpack.c.bf16 %v16195_v51, %v16188_v60 }
 0x209   : > { %13196 = vmatprep.mubr.bf16.mxu1 %v19522_v7  ;;  %vm3974_vm3 = vcmp.gt.f32.partialorder %v3244_v3, 0.0  ;;  %v4174_v30 = vmul.f32 0.1, %v3244_v3  ;;  %v4373_v35 = vsel %vm3973_vm7, %v3241_v62, %v4173_v27  ;;  %v19525_v62 = vpack.c.bf16 %v16177_v18, %v16173_v0 }
 0x20a   : > { %vm3972_vm2 = vcmp.gt.f32.partialorder %v3236_v10, 0.0  ;;  %v4172_v32 = vmul.f32 0.1, %v3236_v10  ;;  %v4371_v5 = vsel %vm3971_vm10, %v3233_v58, %v4171_v41 }
 0x20b   : > { %v4374_v34 = vsel %vm3974_vm3, %v3244_v3, %v4174_v30 }
 0x20c   : > { %v13094_v50 = vpop.f32.mrb[124].mxu1  ;;  %v4372_v23 = vsel %vm3972_vm2, %v3236_v10, %v4172_v32  ;;  %v4562_v46 = vpack.c.bf16 %v4374_v34, %v4373_v35 }
 0x20d   : > { %v3257_v7 = vadd.f32 %v13094_v50, %v16377_v38  ;;  %v3248_v17 = vpop.f32.mrb[125].mxu1  ;;  %v4561_v22 = vpack.c.bf16 %v4372_v23, %v4371_v5  ;;  %v19527_v50 = vpack.c.bf16 %v16213_v55, %v16200_v44  ;;  %v19528_v23 = vpack.c.bf16 %v16229_v48, %v16218_v6 }
 0x20e   : > { %13301 = vmatmul.mubr.bf16.gmra.mrb[116].mxu0 %v4560_v40  ;;  %v3249_v45 = vadd.f32 %v16377_v38, %v3248_v17  ;;  %v13095_v31 = vpop.f32.mrb[126].mxu1 }
 0x20f   : > { %v4177_v57 = vmul.f32 0.1, %v3257_v7  ;;  %v3260_v13 = vadd.f32 %v13095_v31, %v16377_v38  ;;  %v3251_v39 = vpop.f32.mrb[127].mxu1  ;;  %13304 = vmatprep.mubr.bf16.mxu0 %v4561_v22  ;;  %vm3977_vm1 = vcmp.gt.f32.partialorder %v3257_v7, 0.0 }
 0x210   : > { %13197 = vmatmul.mubr.bf16.gmra.mrb[228].mxu1 %v19523_v16  ;;  %v4175_v24 = vmul.f32 0.1, %v3249_v45  ;;  %v3252_v33 = vadd.f32 %v16377_v38, %v3251_v39  ;;  %vm3975_vm14 = vcmp.gt.f32.partialorder %v3249_v45, 0.0 }
 0x211   : > { %13200 = vmatprep.mubr.bf16.mxu1 %v19524_v26  ;;  %vm3978_vm6 = vcmp.gt.f32.partialorder %v3260_v13, 0.0  ;;  %v4178_v40 = vmul.f32 0.1, %v3260_v13  ;;  %v4377_v58 = vsel %vm3977_vm1, %v3257_v7, %v4177_v57 }
 0x212   : > { %vm3976_vm4 = vcmp.gt.f32.partialorder %v3252_v33, 0.0  ;;  %v4176_v37 = vmul.f32 0.1, %v3252_v33  ;;  %v4375_v3 = vsel %vm3975_vm14, %v3249_v45, %v4175_v24 }
 0x213   : > { %v4378_v56 = vsel %vm3978_vm6, %v3260_v13, %v4178_v40 }
 0x214   : > { %v13098_v27 = vpop.f32.mrb[128].mxu1  ;;  %v4376_v53 = vsel %vm3976_vm4, %v3252_v33, %v4176_v37  ;;  %v4564_v41 = vpack.c.bf16 %v4378_v56, %v4377_v58  ;;  %v19529_v37 = vpack.c.bf16 %v16243_v14, %v16239_v47  ;;  %v19530_v58 = vpack.c.bf16 %v16257_v8, %v16249_v1 }
 0x215   : > { %v3273_v10 = vadd.f32 %v13098_v27, %v16377_v38  ;;  %v3264_v30 = vpop.f32.mrb[129].mxu1  ;;  %v4563_v16 = vpack.c.bf16 %v4376_v53, %v4375_v3 }
 0x216   : > { %13305 = vmatmul.mubr.bf16.gmra.mrb[120].mxu0 %v4562_v46  ;;  %v3265_v32 = vadd.f32 %v16377_v38, %v3264_v30  ;;  %v13099_v0 = vpop.f32.mrb[130].mxu1 }
 0x217   : > { %v4181_v18 = vmul.f32 0.1, %v3273_v10  ;;  %v3276_v26 = vadd.f32 %v13099_v0, %v16377_v38  ;;  %v3267_v35 = vpop.f32.mrb[131].mxu1  ;;  %13308 = vmatprep.mubr.bf16.mxu0 %v4563_v16  ;;  %vm3981_vm8 = vcmp.gt.f32.partialorder %v3273_v10, 0.0 }
 0x218   : > { %13201 = vmatmul.mubr.bf16.gmra.mrb[232].mxu1 %v19525_v62  ;;  %v4179_v60 = vmul.f32 0.1, %v3265_v32  ;;  %v3268_v51 = vadd.f32 %v16377_v38, %v3267_v35  ;;  %vm3979_vm12 = vcmp.gt.f32.partialorder %v3265_v32, 0.0 }
 0x219   : > { %13204 = vmatprep.mubr.bf16.mxu1 %v19526_v63  ;;  %vm3982_vm9 = vcmp.gt.f32.partialorder %v3276_v26, 0.0  ;;  %v4182_v34 = vmul.f32 0.1, %v3276_v26  ;;  %v4381_v46 = vsel %vm3981_vm8, %v3273_v10, %v4181_v18 }
 0x21a   : > { %vm3980_vm11 = vcmp.gt.f32.partialorder %v3268_v51, 0.0  ;;  %v4180_v5 = vmul.f32 0.1, %v3268_v51  ;;  %v4379_v22 = vsel %vm3979_vm12, %v3265_v32, %v4179_v60  ;;  %v19531_v60 = vpack.c.bf16 %v16269_v11, %v16263_v52 }
 0x21b   : > { %v4382_v7 = vsel %vm3982_vm9, %v3276_v26, %v4182_v34  ;;  %v19532_v34 = vpack.c.bf16 %v16286_v59, %v16280_v29 }
 0x21c   : > { %v13102_v17 = vpop.f32.mrb[132].mxu1  ;;  %v4380_v45 = vsel %vm3980_vm11, %v3268_v51, %v4180_v5  ;;  %v4566_v31 = vpack.c.bf16 %v4382_v7, %v4381_v46 }
 0x21d   : > { %v3289_v57 = vadd.f32 %v13102_v17, %v16377_v38  ;;  %v3280_v13 = vpop.f32.mrb[133].mxu1  ;;  %v4565_v39 = vpack.c.bf16 %v4380_v45, %v4379_v22 }
 0x21e   : > { %13309 = vmatmul.mubr.bf16.gmra.mrb[124].mxu0 %v4564_v41  ;;  %v3281_v24 = vadd.f32 %v16377_v38, %v3280_v13  ;;  %v13103_v55 = vpop.f32.mrb[134].mxu1 }
 0x21f   : > { %v4185_v44 = vmul.f32 0.1, %v3289_v57  ;;  %v3292_v33 = vadd.f32 %v13103_v55, %v16377_v38  ;;  %v3283_v40 = vpop.f32.mrb[135].mxu1  ;;  %13312 = vmatprep.mubr.bf16.mxu0 %v4565_v39  ;;  %vm3985_vm0 = vcmp.gt.f32.partialorder %v3289_v57, 0.0  ;;  %v19533_v55 = vpack.c.bf16 %v16300_v25, %v16294_v2 }
 0x220   : > { %13205 = vmatmul.mubr.bf16.gmra.mrb[236].mxu1 %v19527_v50  ;;  %v4183_v6 = vmul.f32 0.1, %v3281_v24  ;;  %v3284_v48 = vadd.f32 %v16377_v38, %v3283_v40  ;;  %vm3983_vm13 = vcmp.gt.f32.partialorder %v3281_v24, 0.0 }
 0x221   : > { %13208 = vmatprep.mubr.bf16.mxu1 %v19528_v23  ;;  %vm3986_vm5 = vcmp.gt.f32.partialorder %v3292_v33, 0.0  ;;  %v4186_v62 = vmul.f32 0.1, %v3292_v33  ;;  %v4385_v56 = vsel %vm3985_vm0, %v3289_v57, %v4185_v44 }
 0x222   : > { %vm3984_vm15 = vcmp.gt.f32.partialorder %v3284_v48, 0.0  ;;  %v4184_v63 = vmul.f32 0.1, %v3284_v48  ;;  %v4383_v53 = vsel %vm3983_vm13, %v3281_v24, %v4183_v6 }
 0x223   : > { %v4386_v27 = vsel %vm3986_vm5, %v3292_v33, %v4186_v62  ;;  %v19534_v33 = vpack.c.bf16 %v16315_v43, %v16306_v20 }
 0x224   : > { %v13106_v3 = vpop.f32.mrb[136].mxu1  ;;  %v4384_v41 = vsel %vm3984_vm15, %v3284_v48, %v4184_v63  ;;  %v4568_v10 = vpack.c.bf16 %v4386_v27, %v4385_v56 }
 0x225   : > { %v3305_v30 = vadd.f32 %v13106_v3, %v16377_v38  ;;  %v3296_v16 = vpop.f32.mrb[137].mxu1  ;;  %v4567_v32 = vpack.c.bf16 %v4384_v41, %v4383_v53 }
 0x226   : > { %13313 = vmatmul.mubr.bf16.gmra.mrb[128].mxu0 %v4566_v31  ;;  %v3297_v0 = vadd.f32 %v16377_v38, %v3296_v16  ;;  %v13107_v14 = vpop.f32.mrb[138].mxu1 }
 0x227   : > { %v4189_v47 = vmul.f32 0.1, %v3305_v30  ;;  %v3308_v18 = vadd.f32 %v13107_v14, %v16377_v38  ;;  %v3299_v26 = vpop.f32.mrb[139].mxu1  ;;  %13316 = vmatprep.mubr.bf16.mxu0 %v4567_v32  ;;  %vm3989_vm7 = vcmp.gt.f32.partialorder %v3305_v30, 0.0 }
 0x228   : > { %13209 = vmatmul.mubr.bf16.gmra.mrb[240].mxu1 %v19529_v37  ;;  %v4187_v8 = vmul.f32 0.1, %v3297_v0  ;;  %v3300_v1 = vadd.f32 %v16377_v38, %v3299_v26  ;;  %vm3987_vm10 = vcmp.gt.f32.partialorder %v3297_v0, 0.0 }
 0x229   : > { %13212 = vmatprep.mubr.bf16.mxu1 %v19530_v58  ;;  %vm3990_vm3 = vcmp.gt.f32.partialorder %v3308_v18, 0.0  ;;  %v4190_v35 = vmul.f32 0.1, %v3308_v18  ;;  %v4389_v50 = vsel %vm3989_vm7, %v3305_v30, %v4189_v47  ;;  %v19535_v30 = vld [vmem:[#allocation75_spill] sm:$0xff] }
 0x22a   : > { %vm3988_vm2 = vcmp.gt.f32.partialorder %v3300_v1, 0.0  ;;  %v4188_v51 = vmul.f32 0.1, %v3300_v1  ;;  %v4387_v46 = vsel %vm3987_vm10, %v3297_v0, %v4187_v8  ;;  %v19536_v16 = vpack.c.bf16 %v16327_v54, %v19535_v30 }
 0x22b   : > { %v4390_v5 = vsel %vm3990_vm3, %v3308_v18, %v4190_v35  ;;  %v19537_v0 = vpack.c.bf16 %v16346_v28, %v16340_v15 }
 0x22c   : > { %v13110_v23 = vpop.f32.mrb[140].mxu1  ;;  %v4388_v7 = vsel %vm3988_vm2, %v3300_v1, %v4188_v51  ;;  %v4570_v17 = vpack.c.bf16 %v4390_v5, %v4389_v50 }
 0x22d   : > { %v3321_v22 = vadd.f32 %v13110_v23, %v16377_v38  ;;  %v3312_v45 = vpop.f32.mrb[141].mxu1  ;;  %v4569_v31 = vpack.c.bf16 %v4388_v7, %v4387_v46  ;;  %v19538_v7 = vld [vmem:[#allocation62_spill] sm:$0xff] }
 0x22e   : > { %13317 = vmatmul.mubr.bf16.gmra.mrb[132].mxu0 %v4568_v10  ;;  %v3313_v57 = vadd.f32 %v16377_v38, %v3312_v45  ;;  %v13111_v52 = vpop.f32.mrb[142].mxu1 }
 0x22f   : > { %v4193_v11 = vmul.f32 0.1, %v3321_v22  ;;  %v3324_v13 = vadd.f32 %v13111_v52, %v16377_v38  ;;  %v3315_v39 = vpop.f32.mrb[143].mxu1  ;;  %13320 = vmatprep.mubr.bf16.mxu0 %v4569_v31  ;;  %vm3993_vm1 = vcmp.gt.f32.partialorder %v3321_v22, 0.0  ;;  %v19541_v31 = vpack.c.bf16 %v16363_v4, %v16357_v12 }
 0x230   : > { %13213 = vmatmul.mubr.bf16.gmra.mrb[244].mxu1 %v19531_v60  ;;  %v4191_v29 = vmul.f32 0.1, %v3313_v57  ;;  %v3316_v59 = vadd.f32 %v16377_v38, %v3315_v39  ;;  %vm3991_vm14 = vcmp.gt.f32.partialorder %v3313_v57, 0.0 }
 0x231   : > { %13216 = vmatprep.mubr.bf16.mxu1 %v19532_v34  ;;  %vm3994_vm6 = vcmp.gt.f32.partialorder %v3324_v13, 0.0  ;;  %v4194_v24 = vmul.f32 0.1, %v3324_v13  ;;  %v4393_v40 = vsel %vm3993_vm1, %v3321_v22, %v4193_v11 }
 0x232   : > { %vm3992_vm4 = vcmp.gt.f32.partialorder %v3316_v59, 0.0  ;;  %v4192_v44 = vmul.f32 0.1, %v3316_v59  ;;  %v4391_v62 = vsel %vm3991_vm14, %v3313_v57, %v4191_v29 }
 0x233   : > { %v4394_v6 = vsel %vm3994_vm6, %v3324_v13, %v4194_v24 }
 0x234   : > { %v13114_v48 = vpop.f32.mrb[144].mxu1  ;;  %v4392_v37 = vsel %vm3992_vm4, %v3316_v59, %v4192_v44  ;;  %v4572_v63 = vpack.c.bf16 %v4394_v6, %v4393_v40 }
 0x235   : > { %v3337_v58 = vadd.f32 %v13114_v48, %v16377_v38  ;;  %v3328_v56 = vpop.f32.mrb[145].mxu1  ;;  %v4571_v27 = vpack.c.bf16 %v4392_v37, %v4391_v62  ;;  %v19542_v37 = vld [vmem:[#allocation66_spill] sm:$0xff] }
 0x236   : > { %13321 = vmatmul.mubr.bf16.gmra.mrb[136].mxu0 %v4570_v17  ;;  %v3329_v3 = vadd.f32 %v16377_v38, %v3328_v56  ;;  %v13115_v2 = vpop.f32.mrb[146].mxu1  ;;  %v19539_v17 = vld [vmem:[#allocation64_spill] sm:$0xff] }
 0x237   : > { %v4197_v25 = vmul.f32 0.1, %v3337_v58  ;;  %v3340_v53 = vadd.f32 %v13115_v2, %v16377_v38  ;;  %v3331_v41 = vpop.f32.mrb[147].mxu1  ;;  %13324 = vmatprep.mubr.bf16.mxu0 %v4571_v27  ;;  %vm3997_vm8 = vcmp.gt.f32.partialorder %v3337_v58, 0.0  ;;  %v19540_v22 = vpack.c.bf16 %v19538_v7, %v19539_v17 }
 0x238   : > { %13217 = vmatmul.mubr.bf16.gmra.mrb[248].mxu1 %v19533_v55  ;;  %v4195_v20 = vmul.f32 0.1, %v3329_v3  ;;  %v3332_v43 = vadd.f32 %v16377_v38, %v3331_v41  ;;  %vm3995_vm12 = vcmp.gt.f32.partialorder %v3329_v3, 0.0  ;;  %v19545_v27 = vpack.c.bf16 %v16385_v42, %v16369_v21 }
 0x239   : > { %13220 = vmatprep.mubr.bf16.mxu1 %v19534_v33  ;;  %vm3998_vm9 = vcmp.gt.f32.partialorder %v3340_v53, 0.0  ;;  %v4198_v10 = vmul.f32 0.1, %v3340_v53  ;;  %v4397_v14 = vsel %vm3997_vm8, %v3337_v58, %v4197_v25 }
 0x23a   : > { %vm3996_vm11 = vcmp.gt.f32.partialorder %v3332_v43, 0.0  ;;  %v4196_v32 = vmul.f32 0.1, %v3332_v43  ;;  %v4395_v26 = vsel %vm3995_vm12, %v3329_v3, %v4195_v20 }
 0x23b   : > { %v4398_v47 = vsel %vm3998_vm9, %v3340_v53, %v4198_v10 }
 0x23c   : > { %v13118_v18 = vpop.f32.mrb[148].mxu1  ;;  %v4396_v8 = vsel %vm3996_vm11, %v3332_v43, %v4196_v32  ;;  %v4574_v1 = vpack.c.bf16 %v4398_v47, %v4397_v14 }
 0x23d   : > { %v3353_v35 = vadd.f32 %v13118_v18, %v16377_v38  ;;  %v3344_v60 = vpop.f32.mrb[149].mxu1  ;;  %v4573_v51 = vpack.c.bf16 %v4396_v8, %v4395_v26  ;;  %v19546_v26 = vld [vmem:[#allocation72_spill] sm:$0xff]  ;;  %v19547_v8 = vld [vmem:[#allocation73_spill] sm:$0xff] }
 0x23e   : > { %13325 = vmatmul.mubr.bf16.gmra.mrb[140].mxu0 %v4572_v63  ;;  %v3345_v34 = vadd.f32 %v16377_v38, %v3344_v60  ;;  %v13119_v54 = vpop.f32.mrb[150].mxu1  ;;  %v19543_v63 = vld [vmem:[#allocation67_spill] sm:$0xff]  ;;  %v19549_v60 = vld [vmem:[#allocation81_spill] sm:$0xff] }
 0x23f   : > { %v4201_v50 = vmul.f32 0.1, %v3353_v35  ;;  %v3356_v5 = vadd.f32 %v13119_v54, %v16377_v38  ;;  %v3347_v23 = vpop.f32.mrb[151].mxu1  ;;  %13328 = vmatprep.mubr.bf16.mxu0 %v4573_v51  ;;  %vm4001_vm0 = vcmp.gt.f32.partialorder %v3353_v35, 0.0  ;;  %v19544_v58 = vpack.c.bf16 %v19542_v37, %v19543_v63 }
 0x240   : > { %13221 = vmatmul.mubr.bf16.gmra.mrb[252].mxu1 %v19536_v16  ;;  %v4199_v15 = vmul.f32 0.1, %v3345_v34  ;;  %v3348_v28 = vadd.f32 %v16377_v38, %v3347_v23  ;;  %vm3999_vm13 = vcmp.gt.f32.partialorder %v3345_v34, 0.0  ;;  %v19550_v51 = vpack.c.bf16 %v16397_v36, %v19549_v60 }
 0x241   : > { %13224 = vmatprep.mubr.bf16.mxu1 %v19537_v0  ;;  %vm4002_vm5 = vcmp.gt.f32.partialorder %v3356_v5, 0.0  ;;  %v4202_v46 = vmul.f32 0.1, %v3356_v5  ;;  %v4401_v57 = vsel %vm4001_vm0, %v3353_v35, %v4201_v50 }
 0x242   : > { %vm4000_vm15 = vcmp.gt.f32.partialorder %v3348_v28, 0.0  ;;  %v4200_v45 = vmul.f32 0.1, %v3348_v28  ;;  %v4399_v13 = vsel %vm3999_vm13, %v3345_v34, %v4199_v15 }
 0x243   : > { %v4402_v52 = vsel %vm4002_vm5, %v3356_v5, %v4202_v46 }
 0x244   : > { %v13122_v11 = vpop.f32.mrb[152].mxu1  ;;  %v4400_v39 = vsel %vm4000_vm15, %v3348_v28, %v4200_v45  ;;  %v4576_v29 = vpack.c.bf16 %v4402_v52, %v4401_v57 }
 0x245   : > { %v3369_v59 = vadd.f32 %v13122_v11, %v16377_v38  ;;  %v3360_v24 = vpop.f32.mrb[153].mxu1  ;;  %v4575_v55 = vpack.c.bf16 %v4400_v39, %v4399_v13  ;;  %v19551_v13 = vld [vmem:[#allocation76_spill] sm:$0xff]  ;;  %v19552_v39 = vld [vmem:[#allocation77_spill] sm:$0xff] }
 0x246   : > { %13329 = vmatmul.mubr.bf16.gmra.mrb[144].mxu0 %v4574_v1  ;;  %v3361_v44 = vadd.f32 %v16377_v38, %v3360_v24  ;;  %v13123_v33 = vpop.f32.mrb[154].mxu1  ;;  %v19548_v1 = vpack.c.bf16 %v19546_v26, %v19547_v8  ;;  %v19554_v24 = vld [vmem:[#allocation42_spill] sm:$0xff] }
 0x247   : > { %v4205_v40 = vmul.f32 0.1, %v3369_v59  ;;  %v3372_v6 = vadd.f32 %v13123_v33, %v16377_v38  ;;  %v3363_v48 = vpop.f32.mrb[155].mxu1  ;;  %13332 = vmatprep.mubr.bf16.mxu0 %v4575_v55  ;;  %vm4005_vm7 = vcmp.gt.f32.partialorder %v3369_v59, 0.0  ;;  %v19555_v55 = vld [vmem:[#allocation38_spill] sm:$0xff] }
 0x248   : > { %13225 = vmatmul.mubr.bf16.gmra.mrb[0].mxu1 %v19540_v22  ;;  %v4203_v12 = vmul.f32 0.1, %v3361_v44  ;;  %v3364_v4 = vadd.f32 %v16377_v38, %v3363_v48  ;;  %vm4003_vm10 = vcmp.gt.f32.partialorder %v3361_v44, 0.0 }
 0x249   : > { %13228 = vmatprep.mubr.bf16.mxu1 %v19541_v31  ;;  %vm4006_vm3 = vcmp.gt.f32.partialorder %v3372_v6, 0.0  ;;  %v4206_v62 = vmul.f32 0.1, %v3372_v6  ;;  %v4405_v3 = vsel %vm4005_vm7, %v3369_v59, %v4205_v40 }
 0x24a   : > { %vm4004_vm2 = vcmp.gt.f32.partialorder %v3364_v4, 0.0  ;;  %v4204_v56 = vmul.f32 0.1, %v3364_v4  ;;  %v4403_v53 = vsel %vm4003_vm10, %v3361_v44, %v4203_v12  ;;  %v19556_v44 = vpack.c.bf16 %v19554_v24, %v19555_v55 }
 0x24b   : > { %v4406_v2 = vsel %vm4006_vm3, %v3372_v6, %v4206_v62 }
 0x24c   : > { %v13126_v25 = vpop.f32.mrb[156].mxu1  ;;  %v4404_v41 = vsel %vm4004_vm2, %v3364_v4, %v4204_v56  ;;  %v4578_v20 = vpack.c.bf16 %v4406_v2, %v4405_v3 }
 0x24d   : > { %v3385_v43 = vadd.f32 %v13126_v25, %v16377_v38  ;;  %v3376_v10 = vpop.f32.mrb[157].mxu1  ;;  %v4577_v30 = vpack.c.bf16 %v4404_v41, %v4403_v53 }
 0x24e   : > { %13333 = vmatmul.mubr.bf16.gmra.mrb[148].mxu0 %v4576_v29  ;;  %v3377_v16 = vadd.f32 %v16377_v38, %v3376_v10  ;;  %v13127_v32 = vpop.f32.mrb[158].mxu1  ;;  %v19553_v29 = vpack.c.bf16 %v19551_v13, %v19552_v39 }
 0x24f   : > { %v4209_v0 = vmul.f32 0.1, %v3385_v43  ;;  %v3388_v14 = vadd.f32 %v13127_v32, %v16377_v38  ;;  %v3379_v47 = vpop.f32.mrb[159].mxu1  ;;  %13336 = vmatprep.mubr.bf16.mxu0 %v4577_v30  ;;  %vm4009_vm1 = vcmp.gt.f32.partialorder %v3385_v43, 0.0  ;;  %v19561_v32 = vld [vmem:[#allocation40_spill] sm:$0xff] }
 0x250   : > { %13229 = vmatmul.mubr.bf16.gmra.mrb[4].mxu1 %v19544_v58  ;;  %v4207_v21 = vmul.f32 0.1, %v3377_v16  ;;  %v3380_v42 = vadd.f32 %v16377_v38, %v3379_v47  ;;  %vm4007_vm14 = vcmp.gt.f32.partialorder %v3377_v16, 0.0 }
 0x251   : > { %13232 = vmatprep.mubr.bf16.mxu1 %v19545_v27  ;;  %vm4010_vm6 = vcmp.gt.f32.partialorder %v3388_v14, 0.0  ;;  %v4210_v18 = vmul.f32 0.1, %v3388_v14  ;;  %v4409_v34 = vsel %vm4009_vm1, %v3385_v43, %v4209_v0  ;;  %v19558_v43 = vld [vmem:[#allocation86_spill] sm:$0xff] }
 0x252   : > { %vm4008_vm4 = vcmp.gt.f32.partialorder %v3380_v42, 0.0  ;;  %v4208_v35 = vmul.f32 0.1, %v3380_v42  ;;  %v4407_v5 = vsel %vm4007_vm14, %v3377_v16, %v4207_v21  ;;  %v19560_v16 = vld [vmem:[#allocation87_spill] sm:$0xff] }
 0x253   : > { %v4410_v54 = vsel %vm4010_vm6, %v3388_v14, %v4210_v18  ;;  %v19562_v0 = vpack.c.bf16 %v19560_v16, %v19561_v32 }
 0x254   : > { %v13130_v50 = vpop.f32.mrb[160].mxu1  ;;  %v4408_v23 = vsel %vm4008_vm4, %v3380_v42, %v4208_v35  ;;  %v4580_v15 = vpack.c.bf16 %v4410_v54, %v4409_v34 }
 0x255   : > { %v3401_v28 = vadd.f32 %v13130_v50, %v16377_v38  ;;  %v3392_v46 = vpop.f32.mrb[161].mxu1  ;;  %v4579_v7 = vpack.c.bf16 %v4408_v23, %v4407_v5 }
 0x256   : > { %13337 = vmatmul.mubr.bf16.gmra.mrb[152].mxu0 %v4578_v20  ;;  %v3393_v17 = vadd.f32 %v16377_v38, %v3392_v46  ;;  %v13131_v22 = vpop.f32.mrb[162].mxu1  ;;  %v19557_v20 = vld [vmem:[#allocation82_spill] sm:$0xff]  ;;  %v19564_v46 = vld [vmem:[#allocation92_spill] sm:$0xff] }
 0x257   : > { %v4213_v45 = vmul.f32 0.1, %v3401_v28  ;;  %v3404_v31 = vadd.f32 %v13131_v22, %v16377_v38  ;;  %v3395_v57 = vpop.f32.mrb[163].mxu1  ;;  %13340 = vmatprep.mubr.bf16.mxu0 %v4579_v7  ;;  %vm4013_vm8 = vcmp.gt.f32.partialorder %v3401_v28, 0.0  ;;  %v19559_v10 = vpack.c.bf16 %v19557_v20, %v19558_v43  ;;  %v19566_v22 = vld [vmem:[#allocation41_spill] sm:$0xff] }
 0x258   : > { %13233 = vmatmul.mubr.bf16.gmra.mrb[8].mxu1 %v19548_v1  ;;  %v4211_v36 = vmul.f32 0.1, %v3393_v17  ;;  %v3396_v52 = vadd.f32 %v16377_v38, %v3395_v57  ;;  %vm4011_vm12 = vcmp.gt.f32.partialorder %v3393_v17, 0.0  ;;  %v16694_v43 = vld [vmem:[%s19178_s4] ss:$0 sm:$0xff] }
 0x259   : > { %13236 = vmatprep.mubr.bf16.mxu1 %v19550_v51  ;;  %vm4014_vm9 = vcmp.gt.f32.partialorder %v3404_v31, 0.0  ;;  %v4214_v11 = vmul.f32 0.1, %v3404_v31  ;;  %v4413_v33 = vsel %vm4013_vm8, %v3401_v28, %v4213_v45  ;;  %v19563_v28 = vld [vmem:[#allocation89_spill] sm:$0xff]  ;;  %v19567_v45 = vld [vmem:[#allocation88_spill] sm:$0xff] }
 0x25a   : > { %vm4012_vm11 = vcmp.gt.f32.partialorder %v3396_v52, 0.0  ;;  %v4212_v59 = vmul.f32 0.1, %v3396_v52  ;;  %v4411_v48 = vsel %vm4011_vm12, %v3393_v17, %v4211_v36  ;;  %v19565_v7 = vpack.c.bf16 %v19563_v28, %v19564_v46 }
 0x25b   : > { %v4414_v40 = vsel %vm4014_vm9, %v3404_v31, %v4214_v11  ;;  %v19568_v31 = vpack.c.bf16 %v19566_v22, %v19567_v45 }
 0x25c   : > { %v13134_v6 = vpop.f32.mrb[164].mxu1  ;;  %v4412_v12 = vsel %vm4012_vm11, %v3396_v52, %v4212_v59  ;;  %v4582_v4 = vpack.c.bf16 %v4414_v40, %v4413_v33 }
 0x25d   : > { %v3417_v62 = vadd.f32 %v13134_v6, %v16377_v38  ;;  %v3408_v37 = vpop.f32.mrb[165].mxu1  ;;  %v4581_v63 = vpack.c.bf16 %v4412_v12, %v4411_v48 }
 0x25e   : > { %13341 = vmatmul.mubr.bf16.gmra.mrb[156].mxu0 %v4580_v15  ;;  %v3409_v58 = vadd.f32 %v16377_v38, %v3408_v37  ;;  %v13135_v56 = vpop.f32.mrb[166].mxu1  ;;  %v19570_v37 = vld [vmem:[#allocation98_spill] sm:$0xff] }
 0x25f   : > { %v4217_v27 = vmul.f32 0.1, %v3417_v62  ;;  %v3420_v3 = vadd.f32 %v13135_v56, %v16377_v38  ;;  %v3411_v2 = vpop.f32.mrb[167].mxu1  ;;  %13344 = vmatprep.mubr.bf16.mxu0 %v4581_v63  ;;  %vm4017_vm0 = vcmp.gt.f32.partialorder %v3417_v62, 0.0  ;;  %v19572_v56 = vld [vmem:[#allocation45_spill] sm:$0xff] }
 0x260   : > { %13237 = vmatmul.mubr.bf16.gmra.mrb[12].mxu1 %v19553_v29  ;;  %v4215_v25 = vmul.f32 0.1, %v3409_v58  ;;  %v3412_v53 = vadd.f32 %v16377_v38, %v3411_v2  ;;  %vm4015_vm13 = vcmp.gt.f32.partialorder %v3409_v58, 0.0 }
 0x261   : > { %13240 = vmatprep.mubr.bf16.mxu1 %v19556_v44  ;;  %vm4018_vm5 = vcmp.gt.f32.partialorder %v3420_v3, 0.0  ;;  %v4218_v41 = vmul.f32 0.1, %v3420_v3  ;;  %v4417_v14 = vsel %vm4017_vm0, %v3417_v62, %v4217_v27  ;;  %v19569_v62 = vld [vmem:[#allocation95_spill] sm:$0xff] }
 0x262   : > { %vm4016_vm15 = vcmp.gt.f32.partialorder %v3412_v53, 0.0  ;;  %v4216_v30 = vmul.f32 0.1, %v3412_v53  ;;  %v4415_v42 = vsel %vm4015_vm13, %v3409_v58, %v4215_v25  ;;  %v19571_v63 = vpack.c.bf16 %v19569_v62, %v19570_v37  ;;  %v19573_v27 = vld [vmem:[#allocation39_spill] sm:$0xff] }
 0x263   : > { %v4418_v47 = vsel %vm4018_vm5, %v3420_v3, %v4218_v41  ;;  %v19574_v3 = vpack.c.bf16 %v19572_v56, %v19573_v27  ;;  %v19583_v27 = vld [vmem:[#allocation112_spill] sm:$0xff] }
 0x264   : > { %v13138_v21 = vpop.f32.mrb[168].mxu1  ;;  %v4416_v18 = vsel %vm4016_vm15, %v3412_v53, %v4216_v30  ;;  %v4584_v26 = vpack.c.bf16 %v4418_v47, %v4417_v14 }
 0x265   : > { %v3433_v8 = vadd.f32 %v13138_v21, %v16377_v38  ;;  %v3424_v1 = vpop.f32.mrb[169].mxu1  ;;  %v4583_v35 = vpack.c.bf16 %v4416_v18, %v4415_v42 }
 0x266   : > { %13345 = vmatmul.mubr.bf16.gmra.mrb[160].mxu0 %v4582_v4  ;;  %v3425_v60 = vadd.f32 %v16377_v38, %v3424_v1  ;;  %v13139_v51 = vpop.f32.mrb[170].mxu1  ;;  %v19576_v1 = vld [vmem:[#allocation104_spill] sm:$0xff] }
 0x267   : > { %v4221_v34 = vmul.f32 0.1, %v3433_v8  ;;  %v3436_v54 = vadd.f32 %v13139_v51, %v16377_v38  ;;  %v3427_v50 = vpop.f32.mrb[171].mxu1  ;;  %13348 = vmatprep.mubr.bf16.mxu0 %v4583_v35  ;;  %vm4021_vm7 = vcmp.gt.f32.partialorder %v3433_v8, 0.0  ;;  %v19578_v51 = vpack.c.bf16 %v16473_v9, %v16463_v19 }
 0x268   : > { %13241 = vmatmul.mubr.bf16.gmra.mrb[16].mxu1 %v19559_v10  ;;  %v4219_v5 = vmul.f32 0.1, %v3425_v60  ;;  %v3428_v23 = vadd.f32 %v16377_v38, %v3427_v50  ;;  %vm4019_vm10 = vcmp.gt.f32.partialorder %v3425_v60, 0.0 }
 0x269   : > { %13244 = vmatprep.mubr.bf16.mxu1 %v19562_v0  ;;  %vm4022_vm3 = vcmp.gt.f32.partialorder %v3436_v54, 0.0  ;;  %v4222_v15 = vmul.f32 0.1, %v3436_v54  ;;  %v4421_v57 = vsel %vm4021_vm7, %v3433_v8, %v4221_v34  ;;  %v19575_v8 = vld [vmem:[#allocation103_spill] sm:$0xff] }
 0x26a   : > { %vm4020_vm2 = vcmp.gt.f32.partialorder %v3428_v23, 0.0  ;;  %v4220_v17 = vmul.f32 0.1, %v3428_v23  ;;  %v4419_v11 = vsel %vm4019_vm10, %v3425_v60, %v4219_v5  ;;  %v19577_v35 = vpack.c.bf16 %v19575_v8, %v19576_v1 }
 0x26b   : > { %v4422_v36 = vsel %vm4022_vm3, %v3436_v54, %v4222_v15 }
 0x26c   : > { %v13142_v52 = vpop.f32.mrb[172].mxu1  ;;  %v4420_v13 = vsel %vm4020_vm2, %v3428_v23, %v4220_v17  ;;  %v4586_v39 = vpack.c.bf16 %v4422_v36, %v4421_v57 }
 0x26d   : > { %v3449_v29 = vadd.f32 %v13142_v52, %v16377_v38  ;;  %v3440_v59 = vpop.f32.mrb[173].mxu1  ;;  %v4585_v24 = vpack.c.bf16 %v4420_v13, %v4419_v11  ;;  %v19579_v52 = vld [vmem:[#allocation110_spill] sm:$0xff]  ;;  %v19580_v11 = vld [vmem:[#allocation111_spill] sm:$0xff] }
 0x26e   : > { %13349 = vmatmul.mubr.bf16.gmra.mrb[164].mxu0 %v4584_v26  ;;  %v3441_v55 = vadd.f32 %v16377_v38, %v3440_v59  ;;  %v13143_v44 = vpop.f32.mrb[174].mxu1  ;;  %v19581_v13 = vpack.c.bf16 %v19579_v52, %v19580_v11 }
 0x26f   : > { %v4225_v33 = vmul.f32 0.1, %v3449_v29  ;;  %v3452_v40 = vadd.f32 %v13143_v44, %v16377_v38  ;;  %v3443_v6 = vpop.f32.mrb[175].mxu1  ;;  %13352 = vmatprep.mubr.bf16.mxu0 %v4585_v24  ;;  %vm4025_vm1 = vcmp.gt.f32.partialorder %v3449_v29, 0.0 }
 0x270   : > { %13245 = vmatmul.mubr.bf16.gmra.mrb[20].mxu1 %v19565_v7  ;;  %v4223_v48 = vmul.f32 0.1, %v3441_v55  ;;  %v3444_v12 = vadd.f32 %v16377_v38, %v3443_v6  ;;  %vm4023_vm14 = vcmp.gt.f32.partialorder %v3441_v55, 0.0 }
 0x271   : > { %13248 = vmatprep.mubr.bf16.mxu1 %v19568_v31  ;;  %vm4026_vm6 = vcmp.gt.f32.partialorder %v3452_v40, 0.0  ;;  %v4226_v4 = vmul.f32 0.1, %v3452_v40  ;;  %v4425_v2 = vsel %vm4025_vm1, %v3449_v29, %v4225_v33  ;;  %v19582_v29 = vpack.c.bf16 %v16493_v49, %v16487_v61 }
 0x272   : > { %vm4024_vm4 = vcmp.gt.f32.partialorder %v3444_v12, 0.0  ;;  %v4224_v58 = vmul.f32 0.1, %v3444_v12  ;;  %v4423_v41 = vsel %vm4023_vm14, %v3441_v55, %v4223_v48 }
 0x273   : > { %v4426_v25 = vsel %vm4026_vm6, %v3452_v40, %v4226_v4 }
 0x274   : > { %v13146_v53 = vpop.f32.mrb[176].mxu1  ;;  %v4424_v20 = vsel %vm4024_vm4, %v3444_v12, %v4224_v58  ;;  %v4588_v38 = vpack.c.bf16 %v4426_v25, %v4425_v2 }
 0x275   : > { %v3465_v10 = vadd.f32 %v16694_v43, %v13146_v53  ;;  %v3456_v30 = vpop.f32.mrb[177].mxu1  ;;  %v4587_v16 = vpack.c.bf16 %v4424_v20, %v4423_v41  ;;  %v19586_v53 = vld [vmem:[#allocation91_spill] sm:$0xff] }
 0x276   : > { %13353 = vmatmul.mubr.bf16.gmra.mrb[168].mxu0 %v4586_v39  ;;  %v3457_v32 = vadd.f32 %v16694_v43, %v3456_v30  ;;  %v13147_v0 = vpop.f32.mrb[178].mxu1  ;;  %v19587_v41 = vld [vmem:[#allocation47_spill] sm:$0xff] }
 0x277   : > { %v4229_v14 = vmul.f32 0.1, %v3465_v10  ;;  %v3468_v47 = vadd.f32 %v16694_v43, %v13147_v0  ;;  %v3459_v21 = vpop.f32.mrb[179].mxu1  ;;  %13356 = vmatprep.mubr.bf16.mxu0 %v4587_v16  ;;  %vm4029_vm8 = vcmp.gt.f32.partialorder %v3465_v10, 0.0  ;;  %v19588_v20 = vpack.c.bf16 %v19586_v53, %v19587_v41 }
 0x278   : > { %13249 = vmatmul.mubr.bf16.gmra.mrb[24].mxu1 %v19571_v63  ;;  %v4227_v42 = vmul.f32 0.1, %v3457_v32  ;;  %v3460_v18 = vadd.f32 %v16694_v43, %v3459_v21  ;;  %vm4027_vm12 = vcmp.gt.f32.partialorder %v3457_v32, 0.0 }
 0x279   : > { %13252 = vmatprep.mubr.bf16.mxu1 %v19574_v3  ;;  %vm4030_vm9 = vcmp.gt.f32.partialorder %v3468_v47, 0.0  ;;  %v4230_v26 = vmul.f32 0.1, %v3468_v47  ;;  %v4429_v34 = vsel %vm4029_vm8, %v3465_v10, %v4229_v14  ;;  %v19584_v3 = vld [vmem:[#allocation113_spill] sm:$0xff] }
 0x27a   : > { %vm4028_vm11 = vcmp.gt.f32.partialorder %v3460_v18, 0.0  ;;  %v4228_v60 = vmul.f32 0.1, %v3460_v18  ;;  %v4427_v5 = vsel %vm4027_vm12, %v3457_v32, %v4227_v42  ;;  %v19585_v2 = vpack.c.bf16 %v19583_v27, %v19584_v3 }
 0x27b   : > { %v4430_v54 = vsel %vm4030_vm9, %v3468_v47, %v4230_v26 }
 0x27c   : > { %v13150_v50 = vpop.f32.mrb[180].mxu1  ;;  %v4428_v23 = vsel %vm4028_vm11, %v3460_v18, %v4228_v60  ;;  %v4590_v15 = vpack.c.bf16 %v4430_v54, %v4429_v34  ;;  %v19589_v34 = vld [vmem:[#allocation114_spill] sm:$0xff]  ;;  %v19590_v54 = vld [vmem:[#allocation115_spill] sm:$0xff] }
 0x27d   : > { %v3481_v28 = vadd.f32 %v16694_v43, %v13150_v50  ;;  %v3472_v46 = vpop.f32.mrb[181].mxu1  ;;  %v4589_v7 = vpack.c.bf16 %v4428_v23, %v4427_v5  ;;  %v19591_v50 = vpack.c.bf16 %v19589_v34, %v19590_v54 }
 0x27e   : > { %13357 = vmatmul.mubr.bf16.gmra.mrb[172].mxu0 %v4588_v38  ;;  %v3473_v17 = vadd.f32 %v16694_v43, %v3472_v46  ;;  %v13151_v22 = vpop.f32.mrb[182].mxu1 }
 0x27f   : > { %v4233_v45 = vmul.f32 0.1, %v3481_v28  ;;  %v3484_v31 = vadd.f32 %v16694_v43, %v13151_v22  ;;  %v3475_v57 = vpop.f32.mrb[183].mxu1  ;;  %13360 = vmatprep.mubr.bf16.mxu0 %v4589_v7  ;;  %vm4033_vm0 = vcmp.gt.f32.partialorder %v3481_v28, 0.0 }
 0x280   : > { %13253 = vmatmul.mubr.bf16.gmra.mrb[28].mxu1 %v19577_v35  ;;  %v4231_v19 = vmul.f32 0.1, %v3473_v17  ;;  %v3476_v9 = vadd.f32 %v16694_v43, %v3475_v57  ;;  %vm4031_vm13 = vcmp.gt.f32.partialorder %v3473_v17, 0.0 }
 0x281   : > { %13256 = vmatprep.mubr.bf16.mxu1 %v19578_v51  ;;  %vm4034_vm5 = vcmp.gt.f32.partialorder %v3484_v31, 0.0  ;;  %v4234_v36 = vmul.f32 0.1, %v3484_v31  ;;  %v4433_v59 = vsel %vm4033_vm0, %v3481_v28, %v4233_v45 }
 0x282   : > { %vm4032_vm15 = vcmp.gt.f32.partialorder %v3476_v9, 0.0  ;;  %v4232_v39 = vmul.f32 0.1, %v3476_v9  ;;  %v4431_v44 = vsel %vm4031_vm13, %v3473_v17, %v4231_v19 }
 0x283   : > { %v4434_v24 = vsel %vm4034_vm5, %v3484_v31, %v4234_v36 }
 0x284   : > { %v13154_v55 = vpop.f32.mrb[184].mxu1  ;;  %v4432_v33 = vsel %vm4032_vm15, %v3476_v9, %v4232_v39  ;;  %v4592_v40 = vpack.c.bf16 %v4434_v24, %v4433_v59 }
 0x285   : > { %v3497_v6 = vadd.f32 %v16694_v43, %v13154_v55  ;;  %v3488_v48 = vpop.f32.mrb[185].mxu1  ;;  %v4591_v12 = vpack.c.bf16 %v4432_v33, %v4431_v44 }
 0x286   : > { %13361 = vmatmul.mubr.bf16.gmra.mrb[176].mxu0 %v4590_v15  ;;  %v3489_v4 = vadd.f32 %v16694_v43, %v3488_v48  ;;  %v13155_v62 = vpop.f32.mrb[186].mxu1 }
 0x287   : > { %v4237_v37 = vmul.f32 0.1, %v3497_v6  ;;  %v3500_v63 = vadd.f32 %v16694_v43, %v13155_v62  ;;  %v3491_v58 = vpop.f32.mrb[187].mxu1  ;;  %13364 = vmatprep.mubr.bf16.mxu0 %v4591_v12  ;;  %vm4037_vm7 = vcmp.gt.f32.partialorder %v3497_v6, 0.0 }
 0x288   : > { %13257 = vmatmul.mubr.bf16.gmra.mrb[32].mxu1 %v19581_v13  ;;  %v4235_v61 = vmul.f32 0.1, %v3489_v4  ;;  %v3492_v49 = vadd.f32 %v16694_v43, %v3491_v58  ;;  %vm4035_vm10 = vcmp.gt.f32.partialorder %v3489_v4, 0.0 }
 0x289   : > { %13260 = vmatprep.mubr.bf16.mxu1 %v19582_v29  ;;  %vm4038_vm3 = vcmp.gt.f32.partialorder %v3500_v63, 0.0  ;;  %v4238_v56 = vmul.f32 0.1, %v3500_v63  ;;  %v4437_v38 = vsel %vm4037_vm7, %v3497_v6, %v4237_v37 }
 0x28a   : > { %vm4036_vm2 = vcmp.gt.f32.partialorder %v3492_v49, 0.0  ;;  %v4236_v25 = vmul.f32 0.1, %v3492_v49  ;;  %v4435_v16 = vsel %vm4035_vm10, %v3489_v4, %v4235_v61 }
 0x28b   : > { %v4438_v10 = vsel %vm4038_vm3, %v3500_v63, %v4238_v56 }
 0x28c   : > { %v13158_v30 = vpop.f32.mrb[188].mxu1  ;;  %v4436_v32 = vsel %vm4036_vm2, %v3492_v49, %v4236_v25  ;;  %v4594_v0 = vpack.c.bf16 %v4438_v10, %v4437_v38 }
 0x28d   : > { %v3513_v14 = vadd.f32 %v16694_v43, %v13158_v30  ;;  %v3504_v47 = vpop.f32.mrb[189].mxu1  ;;  %v4593_v21 = vpack.c.bf16 %v4436_v32, %v4435_v16 }
 0x28e   : > { %13365 = vmatmul.mubr.bf16.gmra.mrb[180].mxu0 %v4592_v40  ;;  %v3505_v42 = vadd.f32 %v16694_v43, %v3504_v47  ;;  %v13159_v18 = vpop.f32.mrb[190].mxu1 }
 0x28f   : > { %v4241_v26 = vmul.f32 0.1, %v3513_v14  ;;  %v3516_v8 = vadd.f32 %v16694_v43, %v13159_v18  ;;  %v3507_v1 = vpop.f32.mrb[191].mxu1  ;;  %13368 = vmatprep.mubr.bf16.mxu0 %v4593_v21  ;;  %vm4041_vm1 = vcmp.gt.f32.partialorder %v3513_v14, 0.0 }
 0x290   : > { %13261 = vmatmul.mubr.bf16.gmra.mrb[36].mxu1 %v19585_v2  ;;  %v4239_v35 = vmul.f32 0.1, %v3505_v42  ;;  %v3508_v60 = vadd.f32 %v16694_v43, %v3507_v1  ;;  %vm4039_vm14 = vcmp.gt.f32.partialorder %v3505_v42, 0.0 }
 0x291   : > { %13264 = vmatprep.mubr.bf16.mxu1 %v19588_v20  ;;  %vm4042_vm6 = vcmp.gt.f32.partialorder %v3516_v8, 0.0  ;;  %v4242_v51 = vmul.f32 0.1, %v3516_v8  ;;  %v4441_v23 = vsel %vm4041_vm1, %v3513_v14, %v4241_v26 }
 0x292   : > { %vm4040_vm4 = vcmp.gt.f32.partialorder %v3508_v60, 0.0  ;;  %v4240_v5 = vmul.f32 0.1, %v3508_v60  ;;  %v4439_v46 = vsel %vm4039_vm14, %v3505_v42, %v4239_v35 }
 0x293   : > { %v4442_v15 = vsel %vm4042_vm6, %v3516_v8, %v4242_v51 }
 0x294   : > { %v13162_v28 = vpop.f32.mrb[192].mxu1  ;;  %v4440_v7 = vsel %vm4040_vm4, %v3508_v60, %v4240_v5  ;;  %v4596_v17 = vpack.c.bf16 %v4442_v15, %v4441_v23 }
 0x295   : > { %v3529_v22 = vadd.f32 %v16694_v43, %v13162_v28  ;;  %v3520_v45 = vpop.f32.mrb[193].mxu1  ;;  %v4595_v31 = vpack.c.bf16 %v4440_v7, %v4439_v46 }
 0x296   : > { %13369 = vmatmul.mubr.bf16.gmra.mrb[184].mxu0 %v4594_v0  ;;  %v3521_v57 = vadd.f32 %v16694_v43, %v3520_v45  ;;  %v13163_v19 = vpop.f32.mrb[194].mxu1 }
 0x297   : > { %v4245_v9 = vmul.f32 0.1, %v3529_v22  ;;  %v3532_v36 = vadd.f32 %v16694_v43, %v13163_v19  ;;  %v3523_v52 = vpop.f32.mrb[195].mxu1  ;;  %13372 = vmatprep.mubr.bf16.mxu0 %v4595_v31  ;;  %vm4045_vm8 = vcmp.gt.f32.partialorder %v3529_v22, 0.0 }
 0x298   : > { %13265 = vmatmul.mubr.bf16.gmra.mrb[40].mxu1 %v19591_v50  ;;  %v4243_v11 = vmul.f32 0.1, %v3521_v57  ;;  %v3524_v13 = vadd.f32 %v16694_v43, %v3523_v52  ;;  %vm4043_vm12 = vcmp.gt.f32.partialorder %v3521_v57, 0.0 }
 0x299   : > { %vm4046_vm9 = vcmp.gt.f32.partialorder %v3532_v36, 0.0  ;;  %v4246_v39 = vmul.f32 0.1, %v3532_v36  ;;  %v4445_v59 = vsel %vm4045_vm8, %v3529_v22, %v4245_v9 }
 0x29a   : > { %vm4044_vm11 = vcmp.gt.f32.partialorder %v3524_v13, 0.0  ;;  %v4244_v29 = vmul.f32 0.1, %v3524_v13  ;;  %v4443_v44 = vsel %vm4043_vm12, %v3521_v57, %v4243_v11 }
 0x29b   : > { %v4446_v24 = vsel %vm4046_vm9, %v3532_v36, %v4246_v39 }
 0x29c   : > { %v13166_v55 = vpop.f32.mrb[196].mxu1  ;;  %v4444_v33 = vsel %vm4044_vm11, %v3524_v13, %v4244_v29  ;;  %v4598_v40 = vpack.c.bf16 %v4446_v24, %v4445_v59 }
 0x29d   : > { %v3545_v6 = vadd.f32 %v16694_v43, %v13166_v55  ;;  %v3536_v48 = vpop.f32.mrb[197].mxu1  ;;  %v4597_v12 = vpack.c.bf16 %v4444_v33, %v4443_v44 }
 0x29e   : > { %13373 = vmatmul.mubr.bf16.gmra.mrb[188].mxu0 %v4596_v17  ;;  %v3537_v4 = vadd.f32 %v16694_v43, %v3536_v48  ;;  %v13167_v62 = vpop.f32.mrb[198].mxu1 }
 0x29f   : > { %v4249_v37 = vmul.f32 0.1, %v3545_v6  ;;  %v3548_v63 = vadd.f32 %v16694_v43, %v13167_v62  ;;  %v3539_v58 = vpop.f32.mrb[199].mxu1  ;;  %13376 = vmatprep.mubr.bf16.mxu0 %v4597_v12  ;;  %vm4049_vm0 = vcmp.gt.f32.partialorder %v3545_v6, 0.0 }
 0x2a0   : > { %v4247_v61 = vmul.f32 0.1, %v3537_v4  ;;  %v3540_v49 = vadd.f32 %v16694_v43, %v3539_v58  ;;  %vm4047_vm13 = vcmp.gt.f32.partialorder %v3537_v4, 0.0 }
 0x2a1   : > { %vm4050_vm5 = vcmp.gt.f32.partialorder %v3548_v63, 0.0  ;;  %v4250_v56 = vmul.f32 0.1, %v3548_v63  ;;  %v4449_v3 = vsel %vm4049_vm0, %v3545_v6, %v4249_v37 }
 0x2a2   : > { %vm4048_vm15 = vcmp.gt.f32.partialorder %v3540_v49, 0.0  ;;  %v4248_v27 = vmul.f32 0.1, %v3540_v49  ;;  %v4447_v53 = vsel %vm4047_vm13, %v3537_v4, %v4247_v61 }
 0x2a3   : > { %v4450_v2 = vsel %vm4050_vm5, %v3548_v63, %v4250_v56 }
 0x2a4   : > { %v4448_v41 = vsel %vm4048_vm15, %v3540_v49, %v4248_v27  ;;  %v4600_v20 = vpack.c.bf16 %v4450_v2, %v4449_v3  ;;  %v16758_v27 = vld [vmem:[%s19180_s6] ss:$0 sm:$0xff] }
 0x2a5   : > { %v13170_v25 = vpop.f32.mrb[200].mxu1  ;;  %v4599_v30 = vpack.c.bf16 %v4448_v41, %v4447_v53 }
 0x2a6   : > { %13377 = vmatmul.mubr.bf16.gmra.mrb[192].mxu0 %v4598_v40  ;;  %v3561_v38 = vadd.f32 %v16694_v43, %v13170_v25  ;;  %v3552_v10 = vpop.f32.mrb[201].mxu1 }
 0x2a7   : > { %v3553_v16 = vadd.f32 %v16694_v43, %v3552_v10  ;;  %v13171_v32 = vpop.f32.mrb[202].mxu1  ;;  %13380 = vmatprep.mubr.bf16.mxu0 %v4599_v30 }
 0x2a8   : > { %v4253_v0 = vmul.f32 0.1, %v3561_v38  ;;  %v3564_v14 = vadd.f32 %v16694_v43, %v13171_v32  ;;  %v3555_v47 = vpop.f32.mrb[203].mxu1  ;;  %vm4053_vm7 = vcmp.gt.f32.partialorder %v3561_v38, 0.0 }
 0x2a9   : > { %v4251_v21 = vmul.f32 0.1, %v3553_v16  ;;  %v3556_v42 = vadd.f32 %v16694_v43, %v3555_v47  ;;  %vm4051_vm10 = vcmp.gt.f32.partialorder %v3553_v16, 0.0 }
 0x2aa   : > { %vm4054_vm3 = vcmp.gt.f32.partialorder %v3564_v14, 0.0  ;;  %v4254_v18 = vmul.f32 0.1, %v3564_v14  ;;  %v4453_v8 = vsel %vm4053_vm7, %v3561_v38, %v4253_v0 }
 0x2ab   : > { %vm4052_vm2 = vcmp.gt.f32.partialorder %v3556_v42, 0.0  ;;  %v4252_v26 = vmul.f32 0.1, %v3556_v42  ;;  %v4451_v60 = vsel %vm4051_vm10, %v3553_v16, %v4251_v21 }
 0x2ac   : > { %v4454_v1 = vsel %vm4054_vm3, %v3564_v14, %v4254_v18 }
 0x2ad   : > { %v4452_v51 = vsel %vm4052_vm2, %v3556_v42, %v4252_v26  ;;  %v4602_v34 = vpack.c.bf16 %v4454_v1, %v4453_v8 }
 0x2ae   : > { %13381 = vmatmul.mubr.bf16.gmra.mrb[196].mxu0 %v4600_v20  ;;  %v4601_v5 = vpack.c.bf16 %v4452_v51, %v4451_v60 }
 0x2b0   : > { %13384 = vmatprep.mubr.bf16.mxu0 %v4601_v5 }
 0x2b3   : > { %v13174_v35 = vpop.f32.mrb[204].mxu1 }
 0x2b4   : > { %v3577_v54 = vadd.f32 %v16694_v43, %v13174_v35  ;;  %v3568_v50 = vpop.f32.mrb[205].mxu1 }
 0x2b5   : > { %v3569_v23 = vadd.f32 %v16694_v43, %v3568_v50  ;;  %v13175_v15 = vpop.f32.mrb[206].mxu1 }
 0x2b6   : > { %v4257_v28 = vmul.f32 0.1, %v3577_v54  ;;  %v3580_v46 = vadd.f32 %v16694_v43, %v13175_v15  ;;  %v3571_v7 = vpop.f32.mrb[207].mxu1  ;;  %vm4057_vm1 = vcmp.gt.f32.partialorder %v3577_v54, 0.0  ;;  %13385 = vmatmul.mubr.bf16.gmra.mrb[200].mxu0 %v4602_v34 }
 0x2b7   : > { %v4255_v17 = vmul.f32 0.1, %v3569_v23  ;;  %v3572_v22 = vadd.f32 %v16694_v43, %v3571_v7  ;;  %vm4055_vm14 = vcmp.gt.f32.partialorder %v3569_v23, 0.0 }
 0x2b8   : > { %vm4058_vm6 = vcmp.gt.f32.partialorder %v3580_v46, 0.0  ;;  %v4258_v45 = vmul.f32 0.1, %v3580_v46  ;;  %v4457_v57 = vsel %vm4057_vm1, %v3577_v54, %v4257_v28 }
 0x2b9   : > { %vm4056_vm4 = vcmp.gt.f32.partialorder %v3572_v22, 0.0  ;;  %v4256_v31 = vmul.f32 0.1, %v3572_v22  ;;  %v4455_v36 = vsel %vm4055_vm14, %v3569_v23, %v4255_v17 }
 0x2ba   : > { %v4458_v19 = vsel %vm4058_vm6, %v3580_v46, %v4258_v45 }
 0x2bb   : > { %v13178_v9 = vpop.f32.mrb[208].mxu1  ;;  %v4456_v52 = vsel %vm4056_vm4, %v3572_v22, %v4256_v31  ;;  %v4604_v11 = vpack.c.bf16 %v4458_v19, %v4457_v57 }
 0x2bc   : > { %v3593_v13 = vadd.f32 %v16694_v43, %v13178_v9  ;;  %v3584_v39 = vpop.f32.mrb[209].mxu1  ;;  %v4603_v29 = vpack.c.bf16 %v4456_v52, %v4455_v36 }
 0x2bd   : > { %v3585_v59 = vadd.f32 %v16694_v43, %v3584_v39  ;;  %v13179_v24 = vpop.f32.mrb[210].mxu1 }
 0x2be   : > { %v4261_v55 = vmul.f32 0.1, %v3593_v13  ;;  %v3596_v44 = vadd.f32 %v16694_v43, %v13179_v24  ;;  %v3587_v33 = vpop.f32.mrb[211].mxu1  ;;  %13388 = vmatprep.mubr.bf16.mxu0 %v4603_v29  ;;  %vm4061_vm8 = vcmp.gt.f32.partialorder %v3593_v13, 0.0 }
 0x2bf   : > { %v4259_v40 = vmul.f32 0.1, %v3585_v59  ;;  %v3588_v6 = vadd.f32 %v16694_v43, %v3587_v33  ;;  %13389 = vmatmul.mubr.bf16.gmra.mrb[204].mxu0 %v4604_v11  ;;  %vm4059_vm12 = vcmp.gt.f32.partialorder %v3585_v59, 0.0 }
 0x2c0   : > { %vm4062_vm9 = vcmp.gt.f32.partialorder %v3596_v44, 0.0  ;;  %v4262_v48 = vmul.f32 0.1, %v3596_v44  ;;  %v4461_v62 = vsel %vm4061_vm8, %v3593_v13, %v4261_v55 }
 0x2c1   : > { %vm4060_vm11 = vcmp.gt.f32.partialorder %v3588_v6, 0.0  ;;  %v4260_v12 = vmul.f32 0.1, %v3588_v6  ;;  %v16753_v4 = vpop.f32.mrb[100].mxu0  ;;  %v4459_v61 = vsel %vm4059_vm12, %v3585_v59, %v4259_v40 }
 0x2c2   : > { %v4462_v37 = vsel %vm4062_vm9, %v3596_v44, %v4262_v48  ;;  %v4756_v58 = vpop.f32.mrb[101].mxu0 }
 0x2c3   : > { %v13182_v63 = vpop.f32.mrb[212].mxu1  ;;  %v4460_v49 = vsel %vm4060_vm11, %v3588_v6, %v4260_v12  ;;  %v4606_v56 = vpack.c.bf16 %v4462_v37, %v4461_v62  ;;  %v13287_v25 = vpop.f32.mrb[102].mxu0  ;;  %v4757_v26 = vadd.f32 %v16758_v27, %v4756_v58  ;;  %v4765_v6 = vadd.f32 %v16753_v4, %v16758_v27 }
 0x2c4   : > { %v3609_v3 = vadd.f32 %v16694_v43, %v13182_v63  ;;  %v3600_v2 = vpop.f32.mrb[213].mxu1  ;;  %v4605_v53 = vpack.c.bf16 %v4460_v49, %v4459_v61  ;;  %v4768_v20 = vadd.f32 %v13287_v25, %v16758_v27  ;;  %v4759_v10 = vpop.f32.mrb[103].mxu0 }
 0x2c5   : > { %v3601_v41 = vadd.f32 %v16694_v43, %v3600_v2  ;;  %v13183_v38 = vpop.f32.mrb[214].mxu1  ;;  %v4760_v32 = vadd.f32 %v16758_v27, %v4759_v10 }
 0x2c6   : > { %v4265_v30 = vmul.f32 0.1, %v3609_v3  ;;  %v3612_v16 = vadd.f32 %v16694_v43, %v13183_v38  ;;  %v3603_v0 = vpop.f32.mrb[215].mxu1  ;;  %13392 = vmatprep.mubr.bf16.mxu0 %v4605_v53  ;;  %vm4065_vm0 = vcmp.gt.f32.partialorder %v3609_v3, 0.0 }
 0x2c7   : > { %v4263_v14 = vmul.f32 0.1, %v3601_v41  ;;  %v3604_v47 = vadd.f32 %v16694_v43, %v3603_v0  ;;  %13393 = vmatmul.mubr.bf16.gmra.mrb[208].mxu0 %v4606_v56  ;;  %vm4063_vm13 = vcmp.gt.f32.partialorder %v3601_v41, 0.0  ;;  %v5627_v42 = vmax.f32 %v4768_v20, %v4760_v32 }
 0x2c8   : > { %vm4066_vm5 = vcmp.gt.f32.partialorder %v3612_v16, 0.0  ;;  %v4266_v21 = vmul.f32 0.1, %v3612_v16  ;;  %v4465_v1 = vsel %vm4065_vm0, %v3609_v3, %v4265_v30 }
 0x2c9   : > { %vm4064_vm15 = vcmp.gt.f32.partialorder %v3604_v47, 0.0  ;;  %v4264_v18 = vmul.f32 0.1, %v3604_v47  ;;  %v13290_v8 = vpop.f32.mrb[104].mxu0  ;;  %v4463_v54 = vsel %vm4063_vm13, %v3601_v41, %v4263_v14 }
 0x2ca   : > { %v4466_v35 = vsel %vm4066_vm5, %v3612_v16, %v4266_v21  ;;  %v4781_v60 = vadd.f32 %v13290_v8, %v16758_v27  ;;  %v4772_v34 = vpop.f32.mrb[105].mxu0 }
 0x2cb   : > { %v13186_v51 = vpop.f32.mrb[216].mxu1  ;;  %v4464_v50 = vsel %vm4064_vm15, %v3604_v47, %v4264_v18  ;;  %v4608_v5 = vpack.c.bf16 %v4466_v35, %v4465_v1  ;;  %v4773_v15 = vadd.f32 %v16758_v27, %v4772_v34  ;;  %v13291_v46 = vpop.f32.mrb[106].mxu0 }
 0x2cc   : > { %v3625_v23 = vadd.f32 %v16694_v43, %v13186_v51  ;;  %v3616_v28 = vpop.f32.mrb[217].mxu1  ;;  %v4607_v7 = vpack.c.bf16 %v4464_v50, %v4463_v54  ;;  %v5555_v17 = vmax.f32 %v4757_v26, %v4781_v60  ;;  %v4784_v45 = vadd.f32 %v13291_v46, %v16758_v27  ;;  %v4775_v57 = vpop.f32.mrb[107].mxu0 }
 0x2cd   : > { %v3617_v22 = vadd.f32 %v16694_v43, %v3616_v28  ;;  %v13187_v31 = vpop.f32.mrb[218].mxu1  ;;  %v4776_v36 = vadd.f32 %v16758_v27, %v4775_v57 }
 0x2ce   : > { %v4269_v19 = vmul.f32 0.1, %v3625_v23  ;;  %v3628_v9 = vadd.f32 %v16694_v43, %v13187_v31  ;;  %v3619_v52 = vpop.f32.mrb[219].mxu1  ;;  %13396 = vmatprep.mubr.bf16.mxu0 %v4607_v7  ;;  %vm4069_vm7 = vcmp.gt.f32.partialorder %v3625_v23, 0.0  ;;  %v5699_v11 = vmax.f32 %v4773_v15, %v5555_v17 }
 0x2cf   : > { %v5579_v13 = vmax.f32 %v4784_v45, %v5627_v42  ;;  %13397 = vmatmul.mubr.bf16.gmra.mrb[212].mxu0 %v4608_v5  ;;  %v4267_v39 = vmul.f32 0.1, %v3617_v22  ;;  %v3620_v59 = vadd.f32 %v16694_v43, %v3619_v52  ;;  %vm4067_vm3 = vcmp.gt.f32.partialorder %v3617_v22, 0.0 }
 0x2d0   : > { %vm4070_vm10 = vcmp.gt.f32.partialorder %v3628_v9, 0.0  ;;  %v4270_v29 = vmul.f32 0.1, %v3628_v9  ;;  %v4469_v33 = vsel %vm4069_vm7, %v3625_v23, %v4269_v19 }
 0x2d1   : > { %v5723_v24 = vmax.f32 %v4776_v36, %v5579_v13  ;;  %vm4068_vm2 = vcmp.gt.f32.partialorder %v3620_v59, 0.0  ;;  %v4268_v55 = vmul.f32 0.1, %v3620_v59  ;;  %v13294_v44 = vpop.f32.mrb[108].mxu0  ;;  %v4467_v49 = vsel %vm4067_vm3, %v3617_v22, %v4267_v39 }
 0x2d2   : > { %v4470_v40 = vsel %vm4070_vm10, %v3628_v9, %v4270_v29  ;;  %v4797_v48 = vadd.f32 %v13294_v44, %v16758_v27  ;;  %v4788_v62 = vpop.f32.mrb[109].mxu0 }
 0x2d3   : > { %v13190_v12 = vpop.f32.mrb[220].mxu1  ;;  %v4610_v37 = vpack.c.bf16 %v4470_v40, %v4469_v33  ;;  %v13295_v61 = vpop.f32.mrb[110].mxu0  ;;  %v4468_v56 = vsel %vm4068_vm2, %v3620_v59, %v4268_v55  ;;  %v4789_v32 = vadd.f32 %v16758_v27, %v4788_v62 }
 0x2d4   : > { %v3641_v63 = vadd.f32 %v16694_v43, %v13190_v12  ;;  %v3632_v58 = vpop.f32.mrb[221].mxu1  ;;  %v5603_v3 = vmax.f32 %v4765_v6, %v4797_v48  ;;  %v4800_v25 = vadd.f32 %v13295_v61, %v16758_v27  ;;  %v4791_v41 = vpop.f32.mrb[111].mxu0  ;;  %v4609_v20 = vpack.c.bf16 %v4468_v56, %v4467_v49 }
 0x2d5   : > { %v3633_v2 = vadd.f32 %v16694_v43, %v3632_v58  ;;  %v13191_v53 = vpop.f32.mrb[222].mxu1  ;;  %v4792_v10 = vadd.f32 %v16758_v27, %v4791_v41 }
 0x2d6   : > { %v4273_v4 = vmul.f32 0.1, %v3641_v63  ;;  %v3644_v38 = vadd.f32 %v16694_v43, %v13191_v53  ;;  %v3635_v30 = vpop.f32.mrb[223].mxu1  ;;  %v5651_v16 = vmax.f32 %v5603_v3, %v5699_v11  ;;  %vm4073_vm1 = vcmp.gt.f32.partialorder %v3641_v63, 0.0  ;;  %13400 = vmatprep.mubr.bf16.mxu0 %v4609_v20 }
 0x2d7   : > { %v5675_v0 = vmax.f32 %v4800_v25, %v5723_v24  ;;  %v4271_v14 = vmul.f32 0.1, %v3633_v2  ;;  %v3636_v21 = vadd.f32 %v16694_v43, %v3635_v30  ;;  %13401 = vmatmul.mubr.bf16.gmra.mrb[216].mxu0 %v4610_v37  ;;  %vm4071_vm6 = vcmp.gt.f32.partialorder %v3633_v2, 0.0 }
 0x2d8   : > { %vm4074_vm14 = vcmp.gt.f32.partialorder %v3644_v38, 0.0  ;;  %v4274_v47 = vmul.f32 0.1, %v3644_v38  ;;  %v5604_v42 = vmax.f32 %v4789_v32, %v5651_v16  ;;  %v4473_v1 = vsel %vm4073_vm1, %v3641_v63, %v4273_v4 }
 0x2d9   : > { %v5628_v18 = vmax.f32 %v4792_v10, %v5675_v0  ;;  %vm4072_vm4 = vcmp.gt.f32.partialorder %v3636_v21, 0.0  ;;  %v4272_v26 = vmul.f32 0.1, %v3636_v21  ;;  %v13298_v8 = vpop.f32.mrb[112].mxu0  ;;  %v4471_v28 = vsel %vm4071_vm6, %v3633_v2, %v4271_v14 }
 0x2da   : > { %v4474_v35 = vsel %vm4074_vm14, %v3644_v38, %v4274_v47  ;;  %v4813_v60 = vadd.f32 %v13298_v8, %v16758_v27  ;;  %v4804_v34 = vpop.f32.mrb[113].mxu0 }
 0x2db   : > { %v13194_v51 = vpop.f32.mrb[224].mxu1  ;;  %v4612_v54 = vpack.c.bf16 %v4474_v35, %v4473_v1  ;;  %v4805_v5 = vadd.f32 %v16758_v27, %v4804_v34  ;;  %v13299_v15 = vpop.f32.mrb[114].mxu0  ;;  %v4472_v46 = vsel %vm4072_vm4, %v3636_v21, %v4272_v26 }
 0x2dc   : > { %v3657_v50 = vadd.f32 %v16694_v43, %v13194_v51  ;;  %v3648_v23 = vpop.f32.mrb[225].mxu1  ;;  %v5556_v7 = vmax.f32 %v4813_v60, %v5604_v42  ;;  %v4816_v22 = vadd.f32 %v13299_v15, %v16758_v27  ;;  %v4807_v31 = vpop.f32.mrb[115].mxu0  ;;  %v4611_v57 = vpack.c.bf16 %v4472_v46, %v4471_v28 }
 0x2dd   : > { %v3649_v17 = vadd.f32 %v16694_v43, %v3648_v23  ;;  %v13195_v45 = vpop.f32.mrb[226].mxu1  ;;  %v4808_v36 = vadd.f32 %v16758_v27, %v4807_v31 }
 0x2de   : > { %v4277_v19 = vmul.f32 0.1, %v3657_v50  ;;  %v3660_v9 = vadd.f32 %v16694_v43, %v13195_v45  ;;  %v3651_v52 = vpop.f32.mrb[227].mxu1  ;;  %vm4077_vm8 = vcmp.gt.f32.partialorder %v3657_v50, 0.0  ;;  %v5700_v11 = vmax.f32 %v4805_v5, %v5556_v7  ;;  %13404 = vmatprep.mubr.bf16.mxu0 %v4611_v57 }
 0x2df   : > { %v5580_v13 = vmax.f32 %v4816_v22, %v5628_v18  ;;  %v4275_v39 = vmul.f32 0.1, %v3649_v17  ;;  %v3652_v59 = vadd.f32 %v16694_v43, %v3651_v52  ;;  %13405 = vmatmul.mubr.bf16.gmra.mrb[220].mxu0 %v4612_v54  ;;  %vm4075_vm9 = vcmp.gt.f32.partialorder %v3649_v17, 0.0 }
 0x2e0   : > { %vm4078_vm12 = vcmp.gt.f32.partialorder %v3660_v9, 0.0  ;;  %v4278_v29 = vmul.f32 0.1, %v3660_v9  ;;  %v4477_v33 = vsel %vm4077_vm8, %v3657_v50, %v4277_v19 }
 0x2e1   : > { %v5724_v24 = vmax.f32 %v4808_v36, %v5580_v13  ;;  %vm4076_vm11 = vcmp.gt.f32.partialorder %v3652_v59, 0.0  ;;  %v4276_v55 = vmul.f32 0.1, %v3652_v59  ;;  %v13302_v44 = vpop.f32.mrb[116].mxu0  ;;  %v4475_v49 = vsel %vm4075_vm9, %v3649_v17, %v4275_v39 }
 0x2e2   : > { %v4478_v40 = vsel %vm4078_vm12, %v3660_v9, %v4278_v29  ;;  %v4829_v6 = vadd.f32 %v13302_v44, %v16758_v27  ;;  %v4820_v12 = vpop.f32.mrb[117].mxu0 }
 0x2e3   : > { %v13198_v48 = vpop.f32.mrb[228].mxu1  ;;  %v4614_v62 = vpack.c.bf16 %v4478_v40, %v4477_v33  ;;  %v4821_v63 = vadd.f32 %v16758_v27, %v4820_v12  ;;  %v13303_v61 = vpop.f32.mrb[118].mxu0  ;;  %v4476_v56 = vsel %vm4076_vm11, %v3652_v59, %v4276_v55 }
 0x2e4   : > { %v3673_v37 = vadd.f32 %v16694_v43, %v13198_v48  ;;  %v3664_v58 = vpop.f32.mrb[229].mxu1  ;;  %v5652_v3 = vmax.f32 %v4829_v6, %v5700_v11  ;;  %v4832_v25 = vadd.f32 %v13303_v61, %v16758_v27  ;;  %v4823_v41 = vpop.f32.mrb[119].mxu0  ;;  %v4613_v20 = vpack.c.bf16 %v4476_v56, %v4475_v49 }
 0x2e5   : > { %v3665_v2 = vadd.f32 %v16694_v43, %v3664_v58  ;;  %v13199_v53 = vpop.f32.mrb[230].mxu1  ;;  %v4824_v10 = vadd.f32 %v16758_v27, %v4823_v41 }
 0x2e6   : > { %v4281_v4 = vmul.f32 0.1, %v3673_v37  ;;  %v3676_v38 = vadd.f32 %v16694_v43, %v13199_v53  ;;  %v3667_v30 = vpop.f32.mrb[231].mxu1  ;;  %vm4081_vm0 = vcmp.gt.f32.partialorder %v3673_v37, 0.0  ;;  %v5605_v16 = vmax.f32 %v4821_v63, %v5652_v3  ;;  %13408 = vmatprep.mubr.bf16.mxu0 %v4613_v20 }
 0x2e7   : > { %v5676_v32 = vmax.f32 %v4832_v25, %v5724_v24  ;;  %v4279_v0 = vmul.f32 0.1, %v3665_v2  ;;  %v3668_v47 = vadd.f32 %v16694_v43, %v3667_v30  ;;  %13409 = vmatmul.mubr.bf16.gmra.mrb[224].mxu0 %v4614_v62  ;;  %vm4079_vm5 = vcmp.gt.f32.partialorder %v3665_v2, 0.0 }
 0x2e8   : > { %vm4082_vm13 = vcmp.gt.f32.partialorder %v3676_v38, 0.0  ;;  %v4282_v14 = vmul.f32 0.1, %v3676_v38  ;;  %v4481_v26 = vsel %vm4081_vm0, %v3673_v37, %v4281_v4 }
 0x2e9   : > { %v5629_v21 = vmax.f32 %v4824_v10, %v5676_v32  ;;  %vm4080_vm15 = vcmp.gt.f32.partialorder %v3668_v47, 0.0  ;;  %v4280_v42 = vmul.f32 0.1, %v3668_v47  ;;  %v13306_v18 = vpop.f32.mrb[120].mxu0  ;;  %v4479_v23 = vsel %vm4079_vm5, %v3665_v2, %v4279_v0 }
 0x2ea   : > { %v4482_v8 = vsel %vm4082_vm13, %v3676_v38, %v4282_v14  ;;  %v4845_v1 = vadd.f32 %v13306_v18, %v16758_v27  ;;  %v4836_v60 = vpop.f32.mrb[121].mxu0 }
 0x2eb   : > { %v13202_v35 = vpop.f32.mrb[232].mxu1  ;;  %v4616_v51 = vpack.c.bf16 %v4482_v8, %v4481_v26  ;;  %v4837_v54 = vadd.f32 %v16758_v27, %v4836_v60  ;;  %v13307_v5 = vpop.f32.mrb[122].mxu0  ;;  %v4480_v15 = vsel %vm4080_vm15, %v3668_v47, %v4280_v42 }
 0x2ec   : > { %v3689_v34 = vadd.f32 %v16694_v43, %v13202_v35  ;;  %v3680_v50 = vpop.f32.mrb[233].mxu1  ;;  %v5557_v28 = vmax.f32 %v4845_v1, %v5605_v16  ;;  %v4848_v7 = vadd.f32 %v13307_v5, %v16758_v27  ;;  %v4839_v22 = vpop.f32.mrb[123].mxu0  ;;  %v4615_v45 = vpack.c.bf16 %v4480_v15, %v4479_v23 }
 0x2ed   : > { %v3681_v46 = vadd.f32 %v16694_v43, %v3680_v50  ;;  %v13203_v17 = vpop.f32.mrb[234].mxu1  ;;  %v4840_v19 = vadd.f32 %v16758_v27, %v4839_v22 }
 0x2ee   : > { %v4285_v31 = vmul.f32 0.1, %v3689_v34  ;;  %v3692_v57 = vadd.f32 %v16694_v43, %v13203_v17  ;;  %v3683_v9 = vpop.f32.mrb[235].mxu1  ;;  %vm4085_vm7 = vcmp.gt.f32.partialorder %v3689_v34, 0.0  ;;  %v5701_v36 = vmax.f32 %v4837_v54, %v5557_v28  ;;  %13412 = vmatprep.mubr.bf16.mxu0 %v4615_v45 }
 0x2ef   : > { %v5581_v52 = vmax.f32 %v4848_v7, %v5629_v21  ;;  %v4283_v11 = vmul.f32 0.1, %v3681_v46  ;;  %v3684_v39 = vadd.f32 %v16694_v43, %v3683_v9  ;;  %13413 = vmatmul.mubr.bf16.gmra.mrb[228].mxu0 %v4616_v51  ;;  %vm4083_vm3 = vcmp.gt.f32.partialorder %v3681_v46, 0.0 }
 0x2f0   : > { %vm4086_vm10 = vcmp.gt.f32.partialorder %v3692_v57, 0.0  ;;  %v4286_v13 = vmul.f32 0.1, %v3692_v57  ;;  %v4485_v55 = vsel %vm4085_vm7, %v3689_v34, %v4285_v31 }
 0x2f1   : > { %v5725_v29 = vmax.f32 %v4840_v19, %v5581_v52  ;;  %vm4084_vm2 = vcmp.gt.f32.partialorder %v3684_v39, 0.0  ;;  %v4284_v59 = vmul.f32 0.1, %v3684_v39  ;;  %v13310_v24 = vpop.f32.mrb[124].mxu0  ;;  %v4483_v58 = vsel %vm4083_vm3, %v3681_v46, %v4283_v11 }
 0x2f2   : > { %v4486_v44 = vsel %vm4086_vm10, %v3692_v57, %v4286_v13  ;;  %v4861_v33 = vadd.f32 %v13310_v24, %v16758_v27  ;;  %v4852_v6 = vpop.f32.mrb[125].mxu0 }
 0x2f3   : > { %v13206_v40 = vpop.f32.mrb[236].mxu1  ;;  %v4618_v48 = vpack.c.bf16 %v4486_v44, %v4485_v55  ;;  %v4853_v62 = vadd.f32 %v16758_v27, %v4852_v6  ;;  %v13311_v63 = vpop.f32.mrb[126].mxu0  ;;  %v4484_v61 = vsel %vm4084_vm2, %v3684_v39, %v4284_v59 }
 0x2f4   : > { %v3705_v12 = vadd.f32 %v16694_v43, %v13206_v40  ;;  %v3696_v37 = vpop.f32.mrb[237].mxu1  ;;  %v5653_v49 = vmax.f32 %v4861_v33, %v5701_v36  ;;  %v4864_v3 = vadd.f32 %v13311_v63, %v16758_v27  ;;  %v4855_v25 = vpop.f32.mrb[127].mxu0  ;;  %v4617_v53 = vpack.c.bf16 %v4484_v61, %v4483_v58  ;;  %v16831_v61 = vld [vmem:[%s19178_s4] ss:$0 sm:$0xff] }
 0x2f5   : > { %v3697_v56 = vadd.f32 %v16694_v43, %v3696_v37  ;;  %v13207_v2 = vpop.f32.mrb[238].mxu1  ;;  %v4856_v4 = vadd.f32 %v16758_v27, %v4855_v25 }
 0x2f6   : > { %v4289_v41 = vmul.f32 0.1, %v3705_v12  ;;  %v3708_v20 = vadd.f32 %v16694_v43, %v13207_v2  ;;  %v3699_v38 = vpop.f32.mrb[239].mxu1  ;;  %vm4089_vm1 = vcmp.gt.f32.partialorder %v3705_v12, 0.0  ;;  %v5606_v10 = vmax.f32 %v4853_v62, %v5653_v49  ;;  %13416 = vmatprep.mubr.bf16.mxu0 %v4617_v53 }
 0x2f7   : > { %v5677_v30 = vmax.f32 %v4864_v3, %v5725_v29  ;;  %v4287_v16 = vmul.f32 0.1, %v3697_v56  ;;  %v3700_v0 = vadd.f32 %v16694_v43, %v3699_v38  ;;  %13417 = vmatmul.mubr.bf16.gmra.mrb[232].mxu0 %v4618_v48  ;;  %vm4087_vm6 = vcmp.gt.f32.partialorder %v3697_v56, 0.0 }
 0x2f8   : > { %vm4090_vm14 = vcmp.gt.f32.partialorder %v3708_v20, 0.0  ;;  %v4290_v32 = vmul.f32 0.1, %v3708_v20  ;;  %v4489_v42 = vsel %vm4089_vm1, %v3705_v12, %v4289_v41 }
 0x2f9   : > { %v5630_v14 = vmax.f32 %v4856_v4, %v5677_v30  ;;  %vm4088_vm4 = vcmp.gt.f32.partialorder %v3700_v0, 0.0  ;;  %v4288_v47 = vmul.f32 0.1, %v3700_v0  ;;  %v13314_v21 = vpop.f32.mrb[128].mxu0  ;;  %v4487_v50 = vsel %vm4087_vm6, %v3697_v56, %v4287_v16 }
 0x2fa   : > { %v4490_v18 = vsel %vm4090_vm14, %v3708_v20, %v4290_v32  ;;  %v4877_v26 = vadd.f32 %v13314_v21, %v16758_v27  ;;  %v4868_v1 = vpop.f32.mrb[129].mxu0 }
 0x2fb   : > { %v13210_v8 = vpop.f32.mrb[240].mxu1  ;;  %v4620_v35 = vpack.c.bf16 %v4490_v18, %v4489_v42  ;;  %v4869_v51 = vadd.f32 %v16758_v27, %v4868_v1  ;;  %v13315_v54 = vpop.f32.mrb[130].mxu0  ;;  %v4488_v5 = vsel %vm4088_vm4, %v3700_v0, %v4288_v47 }
 0x2fc   : > { %v3721_v60 = vadd.f32 %v16694_v43, %v13210_v8  ;;  %v3712_v34 = vpop.f32.mrb[241].mxu1  ;;  %v5558_v23 = vmax.f32 %v4877_v26, %v5606_v10  ;;  %v4880_v28 = vadd.f32 %v13315_v54, %v16758_v27  ;;  %v4871_v7 = vpop.f32.mrb[131].mxu0  ;;  %v4619_v17 = vpack.c.bf16 %v4488_v5, %v4487_v50 }
 0x2fd   : > { %v3713_v15 = vadd.f32 %v16694_v43, %v3712_v34  ;;  %v13211_v46 = vpop.f32.mrb[242].mxu1  ;;  %v4872_v31 = vadd.f32 %v16758_v27, %v4871_v7 }
 0x2fe   : > { %v4293_v22 = vmul.f32 0.1, %v3721_v60  ;;  %v3724_v45 = vadd.f32 %v16694_v43, %v13211_v46  ;;  %v3715_v57 = vpop.f32.mrb[243].mxu1  ;;  %vm4093_vm8 = vcmp.gt.f32.partialorder %v3721_v60, 0.0  ;;  %v5702_v19 = vmax.f32 %v4869_v51, %v5558_v23  ;;  %13420 = vmatprep.mubr.bf16.mxu0 %v4619_v17 }
 0x2ff   : > { %v5582_v9 = vmax.f32 %v4880_v28, %v5630_v14  ;;  %v4291_v36 = vmul.f32 0.1, %v3713_v15  ;;  %v3716_v11 = vadd.f32 %v16694_v43, %v3715_v57  ;;  %13421 = vmatmul.mubr.bf16.gmra.mrb[236].mxu0 %v4620_v35  ;;  %vm4091_vm9 = vcmp.gt.f32.partialorder %v3713_v15, 0.0 }
 0x300   : > { %vm4094_vm12 = vcmp.gt.f32.partialorder %v3724_v45, 0.0  ;;  %v4294_v52 = vmul.f32 0.1, %v3724_v45  ;;  %v4493_v59 = vsel %vm4093_vm8, %v3721_v60, %v4293_v22 }
 0x301   : > { %v5726_v13 = vmax.f32 %v4872_v31, %v5582_v9  ;;  %vm4092_vm11 = vcmp.gt.f32.partialorder %v3716_v11, 0.0  ;;  %v4292_v39 = vmul.f32 0.1, %v3716_v11  ;;  %v13318_v29 = vpop.f32.mrb[132].mxu0  ;;  %v4491_v37 = vsel %vm4091_vm9, %v3713_v15, %v4291_v36 }
 0x302   : > { %v4494_v24 = vsel %vm4094_vm12, %v3724_v45, %v4294_v52  ;;  %v4893_v55 = vadd.f32 %v13318_v29, %v16758_v27  ;;  %v4884_v33 = vpop.f32.mrb[133].mxu0 }
 0x303   : > { %v13214_v44 = vpop.f32.mrb[244].mxu1  ;;  %v4622_v40 = vpack.c.bf16 %v4494_v24, %v4493_v59  ;;  %v4885_v48 = vadd.f32 %v16758_v27, %v4884_v33  ;;  %v13319_v62 = vpop.f32.mrb[134].mxu0  ;;  %v4492_v63 = vsel %vm4092_vm11, %v3716_v11, %v4292_v39 }
 0x304   : > { %v3737_v6 = vadd.f32 %v16694_v43, %v13214_v44  ;;  %v3728_v12 = vpop.f32.mrb[245].mxu1  ;;  %v5654_v58 = vmax.f32 %v4893_v55, %v5702_v19  ;;  %v4896_v56 = vadd.f32 %v13319_v62, %v16758_v27  ;;  %v4887_v2 = vpop.f32.mrb[135].mxu0  ;;  %v4621_v25 = vpack.c.bf16 %v4492_v63, %v4491_v37 }
 0x305   : > { %v3729_v49 = vadd.f32 %v16831_v61, %v3728_v12  ;;  %v13215_v3 = vpop.f32.mrb[246].mxu1  ;;  %v4888_v41 = vadd.f32 %v16758_v27, %v4887_v2 }
 0x306   : > { %v4297_v43 = vmul.f32 0.1, %v3737_v6  ;;  %v3740_v53 = vadd.f32 %v16831_v61, %v13215_v3  ;;  %v3731_v20 = vpop.f32.mrb[247].mxu1  ;;  %vm4097_vm0 = vcmp.gt.f32.partialorder %v3737_v6, 0.0  ;;  %v5607_v4 = vmax.f32 %v4885_v48, %v5654_v58  ;;  %13424 = vmatprep.mubr.bf16.mxu0 %v4621_v25 }
 0x307   : > { %v5678_v38 = vmax.f32 %v4896_v56, %v5726_v13  ;;  %v4295_v10 = vmul.f32 0.1, %v3729_v49  ;;  %v3732_v16 = vadd.f32 %v16831_v61, %v3731_v20  ;;  %13425 = vmatmul.mubr.bf16.gmra.mrb[240].mxu0 %v4622_v40  ;;  %vm4095_vm5 = vcmp.gt.f32.partialorder %v3729_v49, 0.0 }
 0x308   : > { %vm4098_vm13 = vcmp.gt.f32.partialorder %v3740_v53, 0.0  ;;  %v4298_v30 = vmul.f32 0.1, %v3740_v53  ;;  %v4497_v47 = vsel %vm4097_vm0, %v3737_v6, %v4297_v43 }
 0x309   : > { %v5631_v32 = vmax.f32 %v4888_v41, %v5678_v38  ;;  %vm4096_vm15 = vcmp.gt.f32.partialorder %v3732_v16, 0.0  ;;  %v4296_v0 = vmul.f32 0.1, %v3732_v16  ;;  %v13322_v14 = vpop.f32.mrb[136].mxu0  ;;  %v4495_v34 = vsel %vm4095_vm5, %v3729_v49, %v4295_v10 }
 0x30a   : > { %v4498_v21 = vsel %vm4098_vm13, %v3740_v53, %v4298_v30  ;;  %v4909_v42 = vadd.f32 %v13322_v14, %v16758_v27  ;;  %v4900_v26 = vpop.f32.mrb[137].mxu0 }
 0x30b   : > { %v13218_v18 = vpop.f32.mrb[248].mxu1  ;;  %v4624_v8 = vpack.c.bf16 %v4498_v21, %v4497_v47  ;;  %v4901_v35 = vadd.f32 %v16758_v27, %v4900_v26  ;;  %v13323_v51 = vpop.f32.mrb[138].mxu0  ;;  %v4496_v54 = vsel %vm4096_vm15, %v3732_v16, %v4296_v0 }
 0x30c   : > { %v3753_v1 = vadd.f32 %v16831_v61, %v13218_v18  ;;  %v3744_v60 = vpop.f32.mrb[249].mxu1  ;;  %v5559_v50 = vmax.f32 %v4909_v42, %v5607_v4  ;;  %v4912_v23 = vadd.f32 %v13323_v51, %v16758_v27  ;;  %v4903_v28 = vpop.f32.mrb[139].mxu0  ;;  %v4623_v46 = vpack.c.bf16 %v4496_v54, %v4495_v34 }
 0x30d   : > { %v3745_v5 = vadd.f32 %v16831_v61, %v3744_v60  ;;  %v13219_v15 = vpop.f32.mrb[250].mxu1  ;;  %v4904_v22 = vadd.f32 %v16758_v27, %v4903_v28 }
 0x30e   : > { %v4301_v7 = vmul.f32 0.1, %v3753_v1  ;;  %v3756_v17 = vadd.f32 %v16831_v61, %v13219_v15  ;;  %v3747_v45 = vpop.f32.mrb[251].mxu1  ;;  %vm4101_vm7 = vcmp.gt.f32.partialorder %v3753_v1, 0.0  ;;  %v5703_v31 = vmax.f32 %v4901_v35, %v5559_v50  ;;  %13428 = vmatprep.mubr.bf16.mxu0 %v4623_v46 }
 0x30f   : > { %v5583_v57 = vmax.f32 %v4912_v23, %v5631_v32  ;;  %v4299_v19 = vmul.f32 0.1, %v3745_v5  ;;  %v3748_v36 = vadd.f32 %v16831_v61, %v3747_v45  ;;  %13429 = vmatmul.mubr.bf16.gmra.mrb[244].mxu0 %v4624_v8  ;;  %vm4099_vm3 = vcmp.gt.f32.partialorder %v3745_v5, 0.0 }
 0x310   : > { %vm4102_vm10 = vcmp.gt.f32.partialorder %v3756_v17, 0.0  ;;  %v4302_v9 = vmul.f32 0.1, %v3756_v17  ;;  %v4501_v39 = vsel %vm4101_vm7, %v3753_v1, %v4301_v7 }
 0x311   : > { %v5727_v52 = vmax.f32 %v4904_v22, %v5583_v57  ;;  %vm4100_vm2 = vcmp.gt.f32.partialorder %v3748_v36, 0.0  ;;  %v4300_v11 = vmul.f32 0.1, %v3748_v36  ;;  %v13326_v13 = vpop.f32.mrb[140].mxu0  ;;  %v4499_v12 = vsel %vm4099_vm3, %v3745_v5, %v4299_v19 }
 0x312   : > { %v4502_v29 = vsel %vm4102_vm10, %v3756_v17, %v4302_v9  ;;  %v4925_v59 = vadd.f32 %v13326_v13, %v16758_v27  ;;  %v4916_v55 = vpop.f32.mrb[141].mxu0 }
 0x313   : > { %v13222_v24 = vpop.f32.mrb[252].mxu1  ;;  %v4626_v44 = vpack.c.bf16 %v4502_v29, %v4501_v39  ;;  %v4917_v40 = vadd.f32 %v16758_v27, %v4916_v55  ;;  %v13327_v48 = vpop.f32.mrb[142].mxu0  ;;  %v4500_v62 = vsel %vm4100_vm2, %v3748_v36, %v4300_v11 }
 0x314   : > { %v3769_v33 = vadd.f32 %v16831_v61, %v13222_v24  ;;  %v3760_v6 = vpop.f32.mrb[253].mxu1  ;;  %v5655_v37 = vmax.f32 %v4925_v59, %v5703_v31  ;;  %v4928_v58 = vadd.f32 %v13327_v48, %v16758_v27  ;;  %v4919_v56 = vpop.f32.mrb[143].mxu0  ;;  %v4625_v3 = vpack.c.bf16 %v4500_v62, %v4499_v12 }
 0x315   : > { %v3761_v63 = vadd.f32 %v16831_v61, %v3760_v6  ;;  %v13223_v49 = vpop.f32.mrb[254].mxu1  ;;  %v4920_v43 = vadd.f32 %v16758_v27, %v4919_v56 }
 0x316   : > { %v4305_v2 = vmul.f32 0.1, %v3769_v33  ;;  %v3772_v25 = vadd.f32 %v16831_v61, %v13223_v49  ;;  %v3763_v53 = vpop.f32.mrb[255].mxu1  ;;  %vm4105_vm1 = vcmp.gt.f32.partialorder %v3769_v33, 0.0  ;;  %v5608_v41 = vmax.f32 %v4917_v40, %v5655_v37  ;;  %13432 = vmatprep.mubr.bf16.mxu0 %v4625_v3 }
 0x317   : > { %v5679_v20 = vmax.f32 %v4928_v58, %v5727_v52  ;;  %v4303_v4 = vmul.f32 0.1, %v3761_v63  ;;  %v3764_v10 = vadd.f32 %v16831_v61, %v3763_v53  ;;  %13433 = vmatmul.mubr.bf16.gmra.mrb[248].mxu0 %v4626_v44  ;;  %vm4103_vm6 = vcmp.gt.f32.partialorder %v3761_v63, 0.0 }
 0x318   : > { %vm4106_vm14 = vcmp.gt.f32.partialorder %v3772_v25, 0.0  ;;  %v4306_v38 = vmul.f32 0.1, %v3772_v25  ;;  %v4505_v0 = vsel %vm4105_vm1, %v3769_v33, %v4305_v2 }
 0x319   : > { %v5632_v30 = vmax.f32 %v4920_v43, %v5679_v20  ;;  %vm4104_vm4 = vcmp.gt.f32.partialorder %v3764_v10, 0.0  ;;  %v4304_v16 = vmul.f32 0.1, %v3764_v10  ;;  %v13330_v32 = vpop.f32.mrb[144].mxu0  ;;  %v4503_v60 = vsel %vm4103_vm6, %v3761_v63, %v4303_v4 }
 0x31a   : > { %v4506_v14 = vsel %vm4106_vm14, %v3772_v25, %v4306_v38  ;;  %v4941_v47 = vadd.f32 %v13330_v32, %v16758_v27  ;;  %v4932_v42 = vpop.f32.mrb[145].mxu0 }
 0x31b   : > { %v13226_v21 = vpop.f32.mrb[0].mxu1  ;;  %v4628_v18 = vpack.c.bf16 %v4506_v14, %v4505_v0  ;;  %v4933_v8 = vadd.f32 %v16758_v27, %v4932_v42  ;;  %v13331_v35 = vpop.f32.mrb[146].mxu0  ;;  %v4504_v51 = vsel %vm4104_vm4, %v3764_v10, %v4304_v16 }
 0x31c   : > { %v3785_v26 = vadd.f32 %v16831_v61, %v13226_v21  ;;  %v3776_v1 = vpop.f32.mrb[1].mxu1  ;;  %v5560_v34 = vmax.f32 %v4941_v47, %v5608_v41  ;;  %v4944_v50 = vadd.f32 %v13331_v35, %v16758_v27  ;;  %v4935_v23 = vpop.f32.mrb[147].mxu0  ;;  %v4627_v15 = vpack.c.bf16 %v4504_v51, %v4503_v60 }
 0x31d   : > { %v3777_v54 = vadd.f32 %v16831_v61, %v3776_v1  ;;  %v13227_v5 = vpop.f32.mrb[2].mxu1  ;;  %v4936_v7 = vadd.f32 %v16758_v27, %v4935_v23 }
 0x31e   : > { %v4309_v28 = vmul.f32 0.1, %v3785_v26  ;;  %v3788_v46 = vadd.f32 %v16831_v61, %v13227_v5  ;;  %v3779_v17 = vpop.f32.mrb[3].mxu1  ;;  %vm4109_vm8 = vcmp.gt.f32.partialorder %v3785_v26, 0.0  ;;  %v5704_v22 = vmax.f32 %v4933_v8, %v5560_v34  ;;  %13436 = vmatprep.mubr.bf16.mxu0 %v4627_v15 }
 0x31f   : > { %v5584_v45 = vmax.f32 %v4944_v50, %v5632_v30  ;;  %v4307_v31 = vmul.f32 0.1, %v3777_v54  ;;  %v3780_v19 = vadd.f32 %v16831_v61, %v3779_v17  ;;  %13437 = vmatmul.mubr.bf16.gmra.mrb[252].mxu0 %v4628_v18  ;;  %vm4107_vm9 = vcmp.gt.f32.partialorder %v3777_v54, 0.0 }
 0x320   : > { %vm4110_vm12 = vcmp.gt.f32.partialorder %v3788_v46, 0.0  ;;  %v4310_v57 = vmul.f32 0.1, %v3788_v46  ;;  %v4509_v36 = vsel %vm4109_vm8, %v3785_v26, %v4309_v28 }
 0x321   : > { %v5728_v9 = vmax.f32 %v4936_v7, %v5584_v45  ;;  %vm4108_vm11 = vcmp.gt.f32.partialorder %v3780_v19, 0.0  ;;  %v4308_v11 = vmul.f32 0.1, %v3780_v19  ;;  %v13334_v13 = vpop.f32.mrb[148].mxu0  ;;  %v4507_v6 = vsel %vm4107_vm9, %v3777_v54, %v4307_v31 }
 0x322   : > { %v4510_v52 = vsel %vm4110_vm12, %v3788_v46, %v4310_v57  ;;  %v4957_v29 = vadd.f32 %v13334_v13, %v16758_v27  ;;  %v4948_v24 = vpop.f32.mrb[149].mxu0 }
 0x323   : > { %v4630_v39 = vpack.c.bf16 %v4510_v52, %v4509_v36  ;;  %v13230_v59 = vpop.f32.mrb[4].mxu1  ;;  %v4949_v44 = vadd.f32 %v16758_v27, %v4948_v24  ;;  %v13335_v40 = vpop.f32.mrb[150].mxu0  ;;  %v4508_v48 = vsel %vm4108_vm11, %v3780_v19, %v4308_v11 }
 0x324   : > { %v3801_v55 = vadd.f32 %v16831_v61, %v13230_v59  ;;  %v3792_v33 = vpop.f32.mrb[5].mxu1  ;;  %v5656_v12 = vmax.f32 %v4957_v29, %v5704_v22  ;;  %v4960_v37 = vadd.f32 %v13335_v40, %v16758_v27  ;;  %v4951_v58 = vpop.f32.mrb[151].mxu0  ;;  %v4629_v49 = vpack.c.bf16 %v4508_v48, %v4507_v6 }
 0x325   : > { %v3793_v62 = vadd.f32 %v16831_v61, %v3792_v33  ;;  %v13231_v63 = vpop.f32.mrb[6].mxu1  ;;  %v4952_v2 = vadd.f32 %v16758_v27, %v4951_v58 }
 0x326   : > { %v4313_v56 = vmul.f32 0.1, %v3801_v55  ;;  %v3804_v3 = vadd.f32 %v16831_v61, %v13231_v63  ;;  %v3795_v25 = vpop.f32.mrb[7].mxu1  ;;  %vm4113_vm0 = vcmp.gt.f32.partialorder %v3801_v55, 0.0  ;;  %v5609_v43 = vmax.f32 %v4949_v44, %v5656_v12  ;;  %13440 = vmatprep.mubr.bf16.mxu0 %v4629_v49 }
 0x327   : > { %v5680_v53 = vmax.f32 %v4960_v37, %v5728_v9  ;;  %v4311_v41 = vmul.f32 0.1, %v3793_v62  ;;  %v3796_v4 = vadd.f32 %v16831_v61, %v3795_v25  ;;  %13441 = vmatmul.mubr.bf16.gmra.mrb[0].mxu0 %v4630_v39  ;;  %vm4111_vm5 = vcmp.gt.f32.partialorder %v3793_v62, 0.0 }
 0x328   : > { %vm4114_vm13 = vcmp.gt.f32.partialorder %v3804_v3, 0.0  ;;  %v4314_v20 = vmul.f32 0.1, %v3804_v3  ;;  %v4513_v10 = vsel %vm4113_vm0, %v3801_v55, %v4313_v56  ;;  %v16887_v56 = vld [vmem:[%s19180_s6] ss:$0 sm:$0xff] }
 0x329   : > { %v5633_v38 = vmax.f32 %v4952_v2, %v5680_v53  ;;  %vm4112_vm15 = vcmp.gt.f32.partialorder %v3796_v4, 0.0  ;;  %v4312_v16 = vmul.f32 0.1, %v3796_v4  ;;  %v13338_v32 = vpop.f32.mrb[152].mxu0  ;;  %v4511_v1 = vsel %vm4111_vm5, %v3793_v62, %v4311_v41 }
 0x32a   : > { %v4514_v30 = vsel %vm4114_vm13, %v3804_v3, %v4314_v20  ;;  %v4973_v14 = vadd.f32 %v13338_v32, %v16758_v27  ;;  %v4964_v21 = vpop.f32.mrb[153].mxu0 }
 0x32b   : > { %v4632_v0 = vpack.c.bf16 %v4514_v30, %v4513_v10  ;;  %v13234_v47 = vpop.f32.mrb[8].mxu1  ;;  %v4965_v18 = vadd.f32 %v16758_v27, %v4964_v21  ;;  %v13339_v8 = vpop.f32.mrb[154].mxu0  ;;  %v4512_v35 = vsel %vm4112_vm15, %v3796_v4, %v4312_v16 }
 0x32c   : > { %v3817_v42 = vadd.f32 %v16831_v61, %v13234_v47  ;;  %v3808_v26 = vpop.f32.mrb[9].mxu1  ;;  %v5561_v60 = vmax.f32 %v4973_v14, %v5609_v43  ;;  %v4976_v34 = vadd.f32 %v13339_v8, %v16758_v27  ;;  %v4967_v50 = vpop.f32.mrb[155].mxu0  ;;  %v4631_v5 = vpack.c.bf16 %v4512_v35, %v4511_v1 }
 0x32d   : > { %v3809_v51 = vadd.f32 %v16831_v61, %v3808_v26  ;;  %v13235_v54 = vpop.f32.mrb[10].mxu1  ;;  %v4968_v28 = vadd.f32 %v16758_v27, %v4967_v50 }
 0x32e   : > { %v4317_v23 = vmul.f32 0.1, %v3817_v42  ;;  %v3820_v15 = vadd.f32 %v16831_v61, %v13235_v54  ;;  %v3811_v46 = vpop.f32.mrb[11].mxu1  ;;  %vm4117_vm7 = vcmp.gt.f32.partialorder %v3817_v42, 0.0  ;;  %v5705_v7 = vmax.f32 %v4965_v18, %v5561_v60  ;;  %13444 = vmatprep.mubr.bf16.mxu0 %v4631_v5 }
 0x32f   : > { %v5585_v17 = vmax.f32 %v4976_v34, %v5633_v38  ;;  %v4315_v22 = vmul.f32 0.1, %v3809_v51  ;;  %v3812_v31 = vadd.f32 %v16831_v61, %v3811_v46  ;;  %13445 = vmatmul.mubr.bf16.gmra.mrb[4].mxu0 %v4632_v0  ;;  %vm4115_vm3 = vcmp.gt.f32.partialorder %v3809_v51, 0.0 }
 0x330   : > { %vm4118_vm10 = vcmp.gt.f32.partialorder %v3820_v15, 0.0  ;;  %v4318_v45 = vmul.f32 0.1, %v3820_v15  ;;  %v4517_v19 = vsel %vm4117_vm7, %v3817_v42, %v4317_v23 }
 0x331   : > { %v5729_v57 = vmax.f32 %v4968_v28, %v5585_v17  ;;  %vm4116_vm2 = vcmp.gt.f32.partialorder %v3812_v31, 0.0  ;;  %v4316_v36 = vmul.f32 0.1, %v3812_v31  ;;  %v13342_v52 = vpop.f32.mrb[156].mxu0  ;;  %v4515_v33 = vsel %vm4115_vm3, %v3809_v51, %v4315_v22 }
 0x332   : > { %v4518_v9 = vsel %vm4118_vm10, %v3820_v15, %v4318_v45  ;;  %v4989_v13 = vadd.f32 %v13342_v52, %v16758_v27  ;;  %v4980_v29 = vpop.f32.mrb[157].mxu0 }
 0x333   : > { %v4634_v11 = vpack.c.bf16 %v4518_v9, %v4517_v19  ;;  %v13238_v39 = vpop.f32.mrb[12].mxu1  ;;  %v4981_v24 = vadd.f32 %v16758_v27, %v4980_v29  ;;  %v13343_v44 = vpop.f32.mrb[158].mxu0  ;;  %v4516_v40 = vsel %vm4116_vm2, %v3812_v31, %v4316_v36 }
 0x334   : > { %v3833_v59 = vadd.f32 %v16831_v61, %v13238_v39  ;;  %v3824_v55 = vpop.f32.mrb[13].mxu1  ;;  %v5657_v6 = vmax.f32 %v4989_v13, %v5705_v7  ;;  %v4992_v12 = vadd.f32 %v13343_v44, %v16758_v27  ;;  %v4983_v37 = vpop.f32.mrb[159].mxu0  ;;  %v4633_v63 = vpack.c.bf16 %v4516_v40, %v4515_v33 }
 0x335   : > { %v3825_v48 = vadd.f32 %v16831_v61, %v3824_v55  ;;  %v13239_v62 = vpop.f32.mrb[14].mxu1  ;;  %v4984_v3 = vadd.f32 %v16887_v56, %v4983_v37 }
 0x336   : > { %v4321_v58 = vmul.f32 0.1, %v3833_v59  ;;  %v3836_v49 = vadd.f32 %v16831_v61, %v13239_v62  ;;  %v3827_v2 = vpop.f32.mrb[15].mxu1  ;;  %vm4121_vm1 = vcmp.gt.f32.partialorder %v3833_v59, 0.0  ;;  %v5610_v25 = vmax.f32 %v4981_v24, %v5657_v6  ;;  %13448 = vmatprep.mubr.bf16.mxu0 %v4633_v63 }
 0x337   : > { %v5681_v43 = vmax.f32 %v4992_v12, %v5729_v57  ;;  %v4319_v53 = vmul.f32 0.1, %v3825_v48  ;;  %v3828_v41 = vadd.f32 %v16831_v61, %v3827_v2  ;;  %13449 = vmatmul.mubr.bf16.gmra.mrb[8].mxu0 %v4634_v11  ;;  %vm4119_vm6 = vcmp.gt.f32.partialorder %v3825_v48, 0.0 }
 0x338   : > { %vm4122_vm14 = vcmp.gt.f32.partialorder %v3836_v49, 0.0  ;;  %v4322_v27 = vmul.f32 0.1, %v3836_v49  ;;  %v4521_v4 = vsel %vm4121_vm1, %v3833_v59, %v4321_v58 }
 0x339   : > { %v5634_v20 = vmax.f32 %v4984_v3, %v5681_v43  ;;  %vm4120_vm4 = vcmp.gt.f32.partialorder %v3828_v41, 0.0  ;;  %v4320_v10 = vmul.f32 0.1, %v3828_v41  ;;  %v13346_v30 = vpop.f32.mrb[160].mxu0  ;;  %v4519_v26 = vsel %vm4119_vm6, %v3825_v48, %v4319_v53 }
 0x33a   : > { %v4522_v38 = vsel %vm4122_vm14, %v3836_v49, %v4322_v27  ;;  %v5005_v32 = vadd.f32 %v16887_v56, %v13346_v30  ;;  %v4996_v14 = vpop.f32.mrb[161].mxu0 }
 0x33b   : > { %v4636_v16 = vpack.c.bf16 %v4522_v38, %v4521_v4  ;;  %v13242_v0 = vpop.f32.mrb[16].mxu1  ;;  %v4997_v21 = vadd.f32 %v16887_v56, %v4996_v14  ;;  %v13347_v18 = vpop.f32.mrb[162].mxu0  ;;  %v4520_v8 = vsel %vm4120_vm4, %v3828_v41, %v4320_v10 }
 0x33c   : > { %v3849_v47 = vadd.f32 %v16831_v61, %v13242_v0  ;;  %v3840_v42 = vpop.f32.mrb[17].mxu1  ;;  %v5562_v1 = vmax.f32 %v5005_v32, %v5610_v25  ;;  %v5008_v60 = vadd.f32 %v16887_v56, %v13347_v18  ;;  %v4999_v34 = vpop.f32.mrb[163].mxu0  ;;  %v4635_v54 = vpack.c.bf16 %v4520_v8, %v4519_v26 }
 0x33d   : > { %v3841_v35 = vadd.f32 %v16831_v61, %v3840_v42  ;;  %v13243_v51 = vpop.f32.mrb[18].mxu1  ;;  %v5000_v23 = vadd.f32 %v16887_v56, %v4999_v34 }
 0x33e   : > { %v4325_v50 = vmul.f32 0.1, %v3849_v47  ;;  %v3852_v5 = vadd.f32 %v16831_v61, %v13243_v51  ;;  %v3843_v15 = vpop.f32.mrb[19].mxu1  ;;  %vm4125_vm8 = vcmp.gt.f32.partialorder %v3849_v47, 0.0  ;;  %v5706_v28 = vmax.f32 %v4997_v21, %v5562_v1  ;;  %13452 = vmatprep.mubr.bf16.mxu0 %v4635_v54 }
 0x33f   : > { %v5586_v46 = vmax.f32 %v5008_v60, %v5634_v20  ;;  %v4323_v7 = vmul.f32 0.1, %v3841_v35  ;;  %v3844_v22 = vadd.f32 %v16831_v61, %v3843_v15  ;;  %13453 = vmatmul.mubr.bf16.gmra.mrb[12].mxu0 %v4636_v16  ;;  %vm4123_vm9 = vcmp.gt.f32.partialorder %v3841_v35, 0.0 }
 0x340   : > { %vm4126_vm12 = vcmp.gt.f32.partialorder %v3852_v5, 0.0  ;;  %v4326_v17 = vmul.f32 0.1, %v3852_v5  ;;  %v4525_v31 = vsel %vm4125_vm8, %v3849_v47, %v4325_v50 }
 0x341   : > { %v5730_v45 = vmax.f32 %v5000_v23, %v5586_v46  ;;  %vm4124_vm11 = vcmp.gt.f32.partialorder %v3844_v22, 0.0  ;;  %v4324_v19 = vmul.f32 0.1, %v3844_v22  ;;  %v13350_v9 = vpop.f32.mrb[164].mxu0  ;;  %v4523_v55 = vsel %vm4123_vm9, %v3841_v35, %v4323_v7 }
 0x342   : > { %v4526_v57 = vsel %vm4126_vm12, %v3852_v5, %v4326_v17  ;;  %v5021_v52 = vadd.f32 %v16887_v56, %v13350_v9  ;;  %v5012_v13 = vpop.f32.mrb[165].mxu0 }
 0x343   : > { %v4638_v36 = vpack.c.bf16 %v4526_v57, %v4525_v31  ;;  %v13246_v11 = vpop.f32.mrb[20].mxu1  ;;  %v5013_v29 = vadd.f32 %v16887_v56, %v5012_v13  ;;  %v13351_v24 = vpop.f32.mrb[166].mxu0  ;;  %v4524_v44 = vsel %vm4124_vm11, %v3844_v22, %v4324_v19 }
 0x344   : > { %v3865_v39 = vadd.f32 %v16831_v61, %v13246_v11  ;;  %v3856_v59 = vpop.f32.mrb[21].mxu1  ;;  %v5658_v33 = vmax.f32 %v5021_v52, %v5706_v28  ;;  %v5024_v6 = vadd.f32 %v16887_v56, %v13351_v24  ;;  %v5015_v12 = vpop.f32.mrb[167].mxu0  ;;  %v4637_v62 = vpack.c.bf16 %v4524_v44, %v4523_v55 }
 0x345   : > { %v3857_v40 = vadd.f32 %v16831_v61, %v3856_v59  ;;  %v13247_v48 = vpop.f32.mrb[22].mxu1  ;;  %v5016_v58 = vadd.f32 %v16887_v56, %v5015_v12 }
 0x346   : > { %v4329_v37 = vmul.f32 0.1, %v3865_v39  ;;  %v3868_v63 = vadd.f32 %v16831_v61, %v13247_v48  ;;  %v3859_v49 = vpop.f32.mrb[23].mxu1  ;;  %vm4129_vm0 = vcmp.gt.f32.partialorder %v3865_v39, 0.0  ;;  %v5611_v3 = vmax.f32 %v5013_v29, %v5658_v33  ;;  %13456 = vmatprep.mubr.bf16.mxu0 %v4637_v62 }
 0x347   : > { %v5682_v2 = vmax.f32 %v5024_v6, %v5730_v45  ;;  %v4327_v25 = vmul.f32 0.1, %v3857_v40  ;;  %v3860_v53 = vadd.f32 %v16831_v61, %v3859_v49  ;;  %13457 = vmatmul.mubr.bf16.gmra.mrb[16].mxu0 %v4638_v36  ;;  %vm4127_vm5 = vcmp.gt.f32.partialorder %v3857_v40, 0.0 }
 0x348   : > { %vm4130_vm13 = vcmp.gt.f32.partialorder %v3868_v63, 0.0  ;;  %v4330_v43 = vmul.f32 0.1, %v3868_v63  ;;  %v4529_v41 = vsel %vm4129_vm0, %v3865_v39, %v4329_v37 }
 0x349   : > { %v5635_v27 = vmax.f32 %v5016_v58, %v5682_v2  ;;  %vm4128_vm15 = vcmp.gt.f32.partialorder %v3860_v53, 0.0  ;;  %v4328_v4 = vmul.f32 0.1, %v3860_v53  ;;  %v13354_v38 = vpop.f32.mrb[168].mxu0  ;;  %v4527_v42 = vsel %vm4127_vm5, %v3857_v40, %v4327_v25 }
 0x34a   : > { %v4530_v20 = vsel %vm4130_vm13, %v3868_v63, %v4330_v43  ;;  %v5037_v30 = vadd.f32 %v16887_v56, %v13354_v38  ;;  %v5028_v32 = vpop.f32.mrb[169].mxu0 }
 0x34b   : > { %v4640_v10 = vpack.c.bf16 %v4530_v20, %v4529_v41  ;;  %v13250_v16 = vpop.f32.mrb[24].mxu1  ;;  %v5029_v14 = vadd.f32 %v16887_v56, %v5028_v32  ;;  %v13355_v21 = vpop.f32.mrb[170].mxu0  ;;  %v4528_v18 = vsel %vm4128_vm15, %v3860_v53, %v4328_v4 }
 0x34c   : > { %v3881_v0 = vadd.f32 %v16831_v61, %v13250_v16  ;;  %v3872_v47 = vpop.f32.mrb[25].mxu1  ;;  %v5563_v26 = vmax.f32 %v5037_v30, %v5611_v3  ;;  %v5040_v1 = vadd.f32 %v16887_v56, %v13355_v21  ;;  %v5031_v60 = vpop.f32.mrb[171].mxu0  ;;  %v4639_v51 = vpack.c.bf16 %v4528_v18, %v4527_v42 }
 0x34d   : > { %v3873_v8 = vadd.f32 %v16831_v61, %v3872_v47  ;;  %v13251_v35 = vpop.f32.mrb[26].mxu1  ;;  %v5032_v50 = vadd.f32 %v16887_v56, %v5031_v60 }
 0x34e   : > { %v4333_v34 = vmul.f32 0.1, %v3881_v0  ;;  %v3884_v54 = vadd.f32 %v16831_v61, %v13251_v35  ;;  %v3875_v5 = vpop.f32.mrb[27].mxu1  ;;  %vm4133_vm7 = vcmp.gt.f32.partialorder %v3881_v0, 0.0  ;;  %v5707_v23 = vmax.f32 %v5029_v14, %v5563_v26  ;;  %13460 = vmatprep.mubr.bf16.mxu0 %v4639_v51 }
 0x34f   : > { %v5587_v15 = vmax.f32 %v5040_v1, %v5635_v27  ;;  %v4331_v28 = vmul.f32 0.1, %v3873_v8  ;;  %v3876_v7 = vadd.f32 %v16831_v61, %v3875_v5  ;;  %13461 = vmatmul.mubr.bf16.gmra.mrb[20].mxu0 %v4640_v10  ;;  %vm4131_vm3 = vcmp.gt.f32.partialorder %v3873_v8, 0.0 }
 0x350   : > { %vm4134_vm10 = vcmp.gt.f32.partialorder %v3884_v54, 0.0  ;;  %v4334_v46 = vmul.f32 0.1, %v3884_v54  ;;  %v4533_v22 = vsel %vm4133_vm7, %v3881_v0, %v4333_v34 }
 0x351   : > { %v5731_v17 = vmax.f32 %v5032_v50, %v5587_v15  ;;  %vm4132_vm2 = vcmp.gt.f32.partialorder %v3876_v7, 0.0  ;;  %v4332_v31 = vmul.f32 0.1, %v3876_v7  ;;  %v13358_v57 = vpop.f32.mrb[172].mxu0  ;;  %v4531_v59 = vsel %vm4131_vm3, %v3873_v8, %v4331_v28 }
 0x352   : > { %v4534_v45 = vsel %vm4134_vm10, %v3884_v54, %v4334_v46  ;;  %v5053_v9 = vadd.f32 %v16887_v56, %v13358_v57  ;;  %v5044_v52 = vpop.f32.mrb[173].mxu0 }
 0x353   : > { %v4642_v19 = vpack.c.bf16 %v4534_v45, %v4533_v22  ;;  %v13254_v36 = vpop.f32.mrb[28].mxu1  ;;  %v5045_v13 = vadd.f32 %v16887_v56, %v5044_v52  ;;  %v13359_v29 = vpop.f32.mrb[174].mxu0  ;;  %v4532_v24 = vsel %vm4132_vm2, %v3876_v7, %v4332_v31 }
 0x354   : > { %v3897_v11 = vadd.f32 %v16831_v61, %v13254_v36  ;;  %v3888_v39 = vpop.f32.mrb[29].mxu1  ;;  %v5659_v55 = vmax.f32 %v5053_v9, %v5707_v23  ;;  %v5056_v33 = vadd.f32 %v16887_v56, %v13359_v29  ;;  %v5047_v6 = vpop.f32.mrb[175].mxu0  ;;  %v4641_v48 = vpack.c.bf16 %v4532_v24, %v4531_v59 }
 0x355   : > { %v3889_v44 = vadd.f32 %v16831_v61, %v3888_v39  ;;  %v13255_v40 = vpop.f32.mrb[30].mxu1  ;;  %v5048_v37 = vadd.f32 %v16887_v56, %v5047_v6 }
 0x356   : > { %v4337_v12 = vmul.f32 0.1, %v3897_v11  ;;  %v3900_v62 = vadd.f32 %v16831_v61, %v13255_v40  ;;  %v3891_v63 = vpop.f32.mrb[31].mxu1  ;;  %vm4137_vm1 = vcmp.gt.f32.partialorder %v3897_v11, 0.0  ;;  %v5612_v58 = vmax.f32 %v5045_v13, %v5659_v55  ;;  %13464 = vmatprep.mubr.bf16.mxu0 %v4641_v48 }
 0x357   : > { %v5683_v49 = vmax.f32 %v5056_v33, %v5731_v17  ;;  %v4335_v3 = vmul.f32 0.1, %v3889_v44  ;;  %v3892_v25 = vadd.f32 %v16831_v61, %v3891_v63  ;;  %13465 = vmatmul.mubr.bf16.gmra.mrb[24].mxu0 %v4642_v19  ;;  %vm4135_vm6 = vcmp.gt.f32.partialorder %v3889_v44, 0.0 }
 0x358   : > { %vm4138_vm14 = vcmp.gt.f32.partialorder %v3900_v62, 0.0  ;;  %v4338_v2 = vmul.f32 0.1, %v3900_v62  ;;  %v4537_v53 = vsel %vm4137_vm1, %v3897_v11, %v4337_v12 }
 0x359   : > { %v5636_v43 = vmax.f32 %v5048_v37, %v5683_v49  ;;  %vm4136_vm4 = vcmp.gt.f32.partialorder %v3892_v25, 0.0  ;;  %v4336_v41 = vmul.f32 0.1, %v3892_v25  ;;  %v13362_v20 = vpop.f32.mrb[176].mxu0  ;;  %v4535_v47 = vsel %vm4135_vm6, %v3889_v44, %v4335_v3 }
 0x35a   : > { %v4538_v27 = vsel %vm4138_vm14, %v3900_v62, %v4338_v2  ;;  %v5069_v38 = vadd.f32 %v16887_v56, %v13362_v20  ;;  %v5060_v30 = vpop.f32.mrb[177].mxu0 }
 0x35b   : > { %v4644_v4 = vpack.c.bf16 %v4538_v27, %v4537_v53  ;;  %v13258_v10 = vpop.f32.mrb[32].mxu1  ;;  %v5061_v32 = vadd.f32 %v16887_v56, %v5060_v30  ;;  %v13363_v14 = vpop.f32.mrb[178].mxu0  ;;  %v4536_v21 = vsel %vm4136_vm4, %v3892_v25, %v4336_v41 }
 0x35c   : > { %v3913_v16 = vadd.f32 %v16831_v61, %v13258_v10  ;;  %v3904_v0 = vpop.f32.mrb[33].mxu1  ;;  %v5564_v42 = vmax.f32 %v5069_v38, %v5612_v58  ;;  %v5072_v26 = vadd.f32 %v16887_v56, %v13363_v14  ;;  %v5063_v1 = vpop.f32.mrb[179].mxu0  ;;  %v4643_v35 = vpack.c.bf16 %v4536_v21, %v4535_v47 }
 0x35d   : > { %v3905_v18 = vadd.f32 %v16831_v61, %v3904_v0  ;;  %v13259_v8 = vpop.f32.mrb[34].mxu1  ;;  %v5064_v34 = vadd.f32 %v16887_v56, %v5063_v1 }
 0x35e   : > { %v4341_v60 = vmul.f32 0.1, %v3913_v16  ;;  %v3916_v51 = vadd.f32 %v16831_v61, %v13259_v8  ;;  %v3907_v54 = vpop.f32.mrb[35].mxu1  ;;  %vm4141_vm8 = vcmp.gt.f32.partialorder %v3913_v16, 0.0  ;;  %v5708_v50 = vmax.f32 %v5061_v32, %v5564_v42  ;;  %13468 = vmatprep.mubr.bf16.mxu0 %v4643_v35 }
 0x35f   : > { %v5588_v5 = vmax.f32 %v5072_v26, %v5636_v43  ;;  %v4339_v23 = vmul.f32 0.1, %v3905_v18  ;;  %v3908_v28 = vadd.f32 %v16831_v61, %v3907_v54  ;;  %13469 = vmatmul.mubr.bf16.gmra.mrb[28].mxu0 %v4644_v4  ;;  %vm4139_vm9 = vcmp.gt.f32.partialorder %v3905_v18, 0.0 }
 0x360   : > { %vm4142_vm12 = vcmp.gt.f32.partialorder %v3916_v51, 0.0  ;;  %v4342_v15 = vmul.f32 0.1, %v3916_v51  ;;  %v4541_v7 = vsel %vm4141_vm8, %v3913_v16, %v4341_v60 }
 0x361   : > { %v5732_v46 = vmax.f32 %v5064_v34, %v5588_v5  ;;  %vm4140_vm11 = vcmp.gt.f32.partialorder %v3908_v28, 0.0  ;;  %v4340_v22 = vmul.f32 0.1, %v3908_v28  ;;  %v13366_v45 = vpop.f32.mrb[180].mxu0  ;;  %v4539_v39 = vsel %vm4139_vm9, %v3905_v18, %v4339_v23 }
 0x362   : > { %v4542_v17 = vsel %vm4142_vm12, %v3916_v51, %v4342_v15  ;;  %v5085_v57 = vadd.f32 %v16887_v56, %v13366_v45  ;;  %v5076_v9 = vpop.f32.mrb[181].mxu0 }
 0x363   : > { %v4646_v31 = vpack.c.bf16 %v4542_v17, %v4541_v7  ;;  %v13262_v19 = vpop.f32.mrb[36].mxu1  ;;  %v5077_v52 = vadd.f32 %v16887_v56, %v5076_v9  ;;  %v13367_v13 = vpop.f32.mrb[182].mxu0  ;;  %v4540_v29 = vsel %vm4140_vm11, %v3908_v28, %v4340_v22 }
 0x364   : > { %v3929_v36 = vadd.f32 %v16831_v61, %v13262_v19  ;;  %v3920_v11 = vpop.f32.mrb[37].mxu1  ;;  %v5660_v59 = vmax.f32 %v5085_v57, %v5708_v50  ;;  %v5088_v55 = vadd.f32 %v16887_v56, %v13367_v13  ;;  %v5079_v33 = vpop.f32.mrb[183].mxu0  ;;  %v4645_v40 = vpack.c.bf16 %v4540_v29, %v4539_v39 }
 0x365   : > { %v3921_v24 = vadd.f32 %v16831_v61, %v3920_v11  ;;  %v13263_v44 = vpop.f32.mrb[38].mxu1  ;;  %v5080_v12 = vadd.f32 %v16887_v56, %v5079_v33 }
 0x366   : > { %v4345_v6 = vmul.f32 0.1, %v3929_v36  ;;  %v3932_v48 = vadd.f32 %v16831_v61, %v13263_v44  ;;  %v3923_v62 = vpop.f32.mrb[39].mxu1  ;;  %vm4145_vm0 = vcmp.gt.f32.partialorder %v3929_v36, 0.0  ;;  %v5613_v37 = vmax.f32 %v5077_v52, %v5660_v59  ;;  %13472 = vmatprep.mubr.bf16.mxu0 %v4645_v40 }
 0x367   : > { %v5684_v63 = vmax.f32 %v5088_v55, %v5732_v46  ;;  %v4343_v58 = vmul.f32 0.1, %v3921_v24  ;;  %v3924_v3 = vadd.f32 %v16831_v61, %v3923_v62  ;;  %13473 = vmatmul.mubr.bf16.gmra.mrb[32].mxu0 %v4646_v31  ;;  %vm4143_vm5 = vcmp.gt.f32.partialorder %v3921_v24, 0.0 }
 0x368   : > { %vm4146_vm13 = vcmp.gt.f32.partialorder %v3932_v48, 0.0  ;;  %v4346_v49 = vmul.f32 0.1, %v3932_v48  ;;  %v4545_v25 = vsel %vm4145_vm0, %v3929_v36, %v4345_v6 }
 0x369   : > { %v5637_v2 = vmax.f32 %v5080_v12, %v5684_v63  ;;  %vm4144_vm15 = vcmp.gt.f32.partialorder %v3924_v3, 0.0  ;;  %v4344_v53 = vmul.f32 0.1, %v3924_v3  ;;  %v13370_v27 = vpop.f32.mrb[184].mxu0  ;;  %v4543_v0 = vsel %vm4143_vm5, %v3921_v24, %v4343_v58 }
 0x36a   : > { %v4546_v43 = vsel %vm4146_vm13, %v3932_v48, %v4346_v49  ;;  %v5101_v20 = vadd.f32 %v16887_v56, %v13370_v27  ;;  %v5092_v38 = vpop.f32.mrb[185].mxu0 }
 0x36b   : > { %v4648_v41 = vpack.c.bf16 %v4546_v43, %v4545_v25  ;;  %v13266_v4 = vpop.f32.mrb[40].mxu1  ;;  %v5093_v30 = vadd.f32 %v16887_v56, %v5092_v38  ;;  %v13371_v32 = vpop.f32.mrb[186].mxu0  ;;  %v4544_v14 = vsel %vm4144_vm15, %v3924_v3, %v4344_v53 }
 0x36c   : > { %v3945_v10 = vadd.f32 %v16831_v61, %v13266_v4  ;;  %v3936_v16 = vpop.f32.mrb[41].mxu1  ;;  %v5565_v47 = vmax.f32 %v5101_v20, %v5613_v37  ;;  %v5104_v42 = vadd.f32 %v16887_v56, %v13371_v32  ;;  %v5095_v26 = vpop.f32.mrb[187].mxu0  ;;  %v4647_v8 = vpack.c.bf16 %v4544_v14, %v4543_v0 }
 0x36d   : > { %v3937_v21 = vadd.f32 %v16831_v61, %v3936_v16  ;;  %v13267_v18 = vpop.f32.mrb[42].mxu1  ;;  %v5096_v60 = vadd.f32 %v16887_v56, %v5095_v26 }
 0x36e   : > { %v4349_v1 = vmul.f32 0.1, %v3945_v10  ;;  %v3948_v35 = vadd.f32 %v16831_v61, %v13267_v18  ;;  %v3939_v51 = vpop.f32.mrb[43].mxu1  ;;  %vm4149_vm7 = vcmp.gt.f32.partialorder %v3945_v10, 0.0  ;;  %v5709_v34 = vmax.f32 %v5093_v30, %v5565_v47  ;;  %13476 = vmatprep.mubr.bf16.mxu0 %v4647_v8 }
 0x36f   : > { %v5589_v54 = vmax.f32 %v5104_v42, %v5637_v2  ;;  %v4347_v50 = vmul.f32 0.1, %v3937_v21  ;;  %v3940_v23 = vadd.f32 %v16831_v61, %v3939_v51  ;;  %13477 = vmatmul.mubr.bf16.gmra.mrb[36].mxu0 %v4648_v41  ;;  %vm4147_vm3 = vcmp.gt.f32.partialorder %v3937_v21, 0.0 }
 0x370   : > { %vm4150_vm10 = vcmp.gt.f32.partialorder %v3948_v35, 0.0  ;;  %v4350_v5 = vmul.f32 0.1, %v3948_v35  ;;  %v4549_v28 = vsel %vm4149_vm7, %v3945_v10, %v4349_v1 }
 0x371   : > { %v5733_v15 = vmax.f32 %v5096_v60, %v5589_v54  ;;  %vm4148_vm2 = vcmp.gt.f32.partialorder %v3940_v23, 0.0  ;;  %v4348_v7 = vmul.f32 0.1, %v3940_v23  ;;  %v13374_v17 = vpop.f32.mrb[188].mxu0  ;;  %v4547_v9 = vsel %vm4147_vm3, %v3937_v21, %v4347_v50 }
 0x372   : > { %v4550_v46 = vsel %vm4150_vm10, %v3948_v35, %v4350_v5  ;;  %v5117_v45 = vadd.f32 %v16887_v56, %v13374_v17  ;;  %v5108_v31 = vpop.f32.mrb[189].mxu0 }
 0x373   : > { %v4650_v22 = vpack.c.bf16 %v4550_v46, %v4549_v28  ;;  %v5109_v57 = vadd.f32 %v16887_v56, %v5108_v31  ;;  %v13375_v19 = vpop.f32.mrb[190].mxu0  ;;  %v4548_v36 = vsel %vm4148_vm2, %v3940_v23, %v4348_v7 }
 0x374   : > { %v5661_v52 = vmax.f32 %v5117_v45, %v5709_v34  ;;  %v5120_v61 = vadd.f32 %v16887_v56, %v13375_v19  ;;  %v5111_v11 = vpop.f32.mrb[191].mxu0  ;;  %v4649_v13 = vpack.c.bf16 %v4548_v36, %v4547_v9 }
 0x375   : > { %v5112_v39 = vadd.f32 %v16887_v56, %v5111_v11 }
 0x376   : > { %v5614_v29 = vmax.f32 %v5109_v57, %v5661_v52  ;;  %v5685_v59 = vmax.f32 %v5120_v61, %v5733_v15  ;;  %13480 = vmatprep.mubr.bf16.mxu0 %v4649_v13 }
 0x377   : > { %13481 = vmatmul.mubr.bf16.gmra.mrb[40].mxu0 %v4650_v22 }
 0x378   : > { %v5638_v24 = vmax.f32 %v5112_v39, %v5685_v59 }
 0x379   : > { %v13378_v55 = vpop.f32.mrb[192].mxu0 }
 0x37a   : > { %v5133_v44 = vadd.f32 %v16887_v56, %v13378_v55  ;;  %v5124_v33 = vpop.f32.mrb[193].mxu0 }
 0x37b   : > { %v5125_v40 = vadd.f32 %v16887_v56, %v5124_v33  ;;  %v13379_v6 = vpop.f32.mrb[194].mxu0 }
 0x37c   : > { %v5566_v48 = vmax.f32 %v5133_v44, %v5614_v29  ;;  %v5136_v12 = vadd.f32 %v16887_v56, %v13379_v6  ;;  %v5127_v62 = vpop.f32.mrb[195].mxu0 }
 0x37d   : > { %v5128_v37 = vadd.f32 %v16887_v56, %v5127_v62 }
 0x37e   : > { %v5710_v63 = vmax.f32 %v5125_v40, %v5566_v48  ;;  %v5590_v58 = vmax.f32 %v5136_v12, %v5638_v24 }
 0x380   : > { %v5734_v49 = vmax.f32 %v5128_v37, %v5590_v58 }
 0x381   : > { %v13382_v3 = vpop.f32.mrb[196].mxu0 }
 0x382   : > { %v5149_v2 = vadd.f32 %v16887_v56, %v13382_v3  ;;  %v5140_v25 = vpop.f32.mrb[197].mxu0 }
 0x383   : > { %v5141_v43 = vadd.f32 %v16887_v56, %v5140_v25  ;;  %v13383_v53 = vpop.f32.mrb[198].mxu0 }
 0x384   : > { %v5662_v27 = vmax.f32 %v5149_v2, %v5710_v63  ;;  %v5152_v41 = vadd.f32 %v16887_v56, %v13383_v53  ;;  %v5143_v20 = vpop.f32.mrb[199].mxu0 }
 0x385   : > { %v5144_v4 = vadd.f32 %v16887_v56, %v5143_v20 }
 0x386   : > { %v5615_v38 = vmax.f32 %v5141_v43, %v5662_v27  ;;  %v5686_v10 = vmax.f32 %v5152_v41, %v5734_v49 }
 0x388   : > { %v5639_v30 = vmax.f32 %v5144_v4, %v5686_v10 }
 0x389   : > { %v13386_v16 = vpop.f32.mrb[200].mxu0 }
 0x38a   : > { %v5165_v32 = vadd.f32 %v16887_v56, %v13386_v16  ;;  %v5156_v0 = vpop.f32.mrb[201].mxu0 }
 0x38b   : > { %v5157_v14 = vadd.f32 %v16887_v56, %v5156_v0  ;;  %v13387_v47 = vpop.f32.mrb[202].mxu0 }
 0x38c   : > { %v5567_v21 = vmax.f32 %v5165_v32, %v5615_v38  ;;  %v5168_v42 = vadd.f32 %v16887_v56, %v13387_v47  ;;  %v5159_v18 = vpop.f32.mrb[203].mxu0 }
 0x38d   : > { %v5160_v26 = vadd.f32 %v16887_v56, %v5159_v18 }
 0x38e   : > { %v5711_v8 = vmax.f32 %v5157_v14, %v5567_v21  ;;  %v5591_v1 = vmax.f32 %v5168_v42, %v5639_v30 }
 0x390   : > { %v5735_v35 = vmax.f32 %v5160_v26, %v5591_v1 }
 0x392   : > { %v13390_v60 = vpop.f32.mrb[204].mxu0 }
 0x393   : > { %v5181_v51 = vadd.f32 %v16887_v56, %v13390_v60  ;;  %v5172_v34 = vpop.f32.mrb[205].mxu0 }
 0x394   : > { %v5173_v54 = vadd.f32 %v16887_v56, %v5172_v34  ;;  %v13391_v50 = vpop.f32.mrb[206].mxu0 }
 0x395   : > { %v5663_v5 = vmax.f32 %v5181_v51, %v5711_v8  ;;  %v5184_v23 = vadd.f32 %v16887_v56, %v13391_v50  ;;  %v5175_v15 = vpop.f32.mrb[207].mxu0 }
 0x396   : > { %v5176_v28 = vadd.f32 %v16887_v56, %v5175_v15 }
 0x397   : > { %v5616_v46 = vmax.f32 %v5173_v54, %v5663_v5  ;;  %v5687_v7 = vmax.f32 %v5184_v23, %v5735_v35 }
 0x399   : > { %v5640_v17 = vmax.f32 %v5176_v28, %v5687_v7 }
 0x39a   : > { %v13394_v22 = vpop.f32.mrb[208].mxu0 }
 0x39b   : > { %v5197_v45 = vadd.f32 %v16887_v56, %v13394_v22  ;;  %v5188_v31 = vpop.f32.mrb[209].mxu0 }
 0x39c   : > { %v5189_v57 = vadd.f32 %v16887_v56, %v5188_v31  ;;  %v13395_v19 = vpop.f32.mrb[210].mxu0 }
 0x39d   : > { %v5568_v9 = vmax.f32 %v5197_v45, %v5616_v46  ;;  %v5200_v36 = vadd.f32 %v16887_v56, %v13395_v19  ;;  %v5191_v52 = vpop.f32.mrb[211].mxu0 }
 0x39e   : > { %v5192_v61 = vadd.f32 %v16887_v56, %v5191_v52 }
 0x39f   : > { %v5712_v11 = vmax.f32 %v5189_v57, %v5568_v9  ;;  %v5592_v13 = vmax.f32 %v5200_v36, %v5640_v17 }
 0x3a1   : > { %v5736_v39 = vmax.f32 %v5192_v61, %v5592_v13 }
 0x3a2   : > { %v13398_v29 = vpop.f32.mrb[212].mxu0 }
 0x3a3   : > { %v5213_v59 = vadd.f32 %v16887_v56, %v13398_v29  ;;  %v5204_v24 = vpop.f32.mrb[213].mxu0 }
 0x3a4   : > { %v5205_v55 = vadd.f32 %v16887_v56, %v5204_v24  ;;  %v13399_v44 = vpop.f32.mrb[214].mxu0 }
 0x3a5   : > { %v5664_v33 = vmax.f32 %v5213_v59, %v5712_v11  ;;  %v5216_v40 = vadd.f32 %v16887_v56, %v13399_v44  ;;  %v5207_v6 = vpop.f32.mrb[215].mxu0 }
 0x3a6   : > { %v5208_v48 = vadd.f32 %v16887_v56, %v5207_v6 }
 0x3a7   : > { %v5617_v12 = vmax.f32 %v5205_v55, %v5664_v33  ;;  %v5688_v62 = vmax.f32 %v5216_v40, %v5736_v39 }
 0x3a9   : > { %v5641_v37 = vmax.f32 %v5208_v48, %v5688_v62 }
 0x3aa   : > { %v13402_v63 = vpop.f32.mrb[216].mxu0 }
 0x3ab   : > { %v5229_v58 = vadd.f32 %v16887_v56, %v13402_v63  ;;  %v5220_v49 = vpop.f32.mrb[217].mxu0 }
 0x3ac   : > { %v5221_v3 = vadd.f32 %v16887_v56, %v5220_v49  ;;  %v13403_v2 = vpop.f32.mrb[218].mxu0 }
 0x3ad   : > { %v5569_v25 = vmax.f32 %v5229_v58, %v5617_v12  ;;  %v5232_v43 = vadd.f32 %v16887_v56, %v13403_v2  ;;  %v5223_v53 = vpop.f32.mrb[219].mxu0 }
 0x3ae   : > { %v5224_v27 = vadd.f32 %v16887_v56, %v5223_v53 }
 0x3af   : > { %v5713_v41 = vmax.f32 %v5221_v3, %v5569_v25  ;;  %v5593_v20 = vmax.f32 %v5232_v43, %v5641_v37 }
 0x3b1   : > { %v5737_v4 = vmax.f32 %v5224_v27, %v5593_v20 }
 0x3b2   : > { %v13406_v38 = vpop.f32.mrb[220].mxu0 }
 0x3b3   : > { %v5245_v10 = vadd.f32 %v16887_v56, %v13406_v38  ;;  %v5236_v30 = vpop.f32.mrb[221].mxu0 }
 0x3b4   : > { %v5237_v16 = vadd.f32 %v16887_v56, %v5236_v30  ;;  %v13407_v32 = vpop.f32.mrb[222].mxu0 }
 0x3b5   : > { %v5665_v0 = vmax.f32 %v5245_v10, %v5713_v41  ;;  %v5248_v14 = vadd.f32 %v16887_v56, %v13407_v32  ;;  %v5239_v47 = vpop.f32.mrb[223].mxu0 }
 0x3b6   : > { %v5240_v21 = vadd.f32 %v16887_v56, %v5239_v47 }
 0x3b7   : > { %v5618_v42 = vmax.f32 %v5237_v16, %v5665_v0  ;;  %v5689_v18 = vmax.f32 %v5248_v14, %v5737_v4 }
 0x3b9   : > { %v5642_v26 = vmax.f32 %v5240_v21, %v5689_v18 }
 0x3ba   : > { %v13410_v8 = vpop.f32.mrb[224].mxu0 }
 0x3bb   : > { %v5261_v1 = vadd.f32 %v16887_v56, %v13410_v8  ;;  %v5252_v35 = vpop.f32.mrb[225].mxu0 }
 0x3bc   : > { %v5253_v60 = vadd.f32 %v16887_v56, %v5252_v35  ;;  %v13411_v51 = vpop.f32.mrb[226].mxu0 }
 0x3bd   : > { %v5570_v34 = vmax.f32 %v5261_v1, %v5618_v42  ;;  %v5264_v54 = vadd.f32 %v16887_v56, %v13411_v51  ;;  %v5255_v50 = vpop.f32.mrb[227].mxu0 }
 0x3be   : > { %v5256_v5 = vadd.f32 %v16887_v56, %v5255_v50 }
 0x3bf   : > { %v5714_v23 = vmax.f32 %v5253_v60, %v5570_v34  ;;  %v5594_v15 = vmax.f32 %v5264_v54, %v5642_v26 }
 0x3c1   : > { %v5738_v28 = vmax.f32 %v5256_v5, %v5594_v15 }
 0x3c2   : > { %v13414_v46 = vpop.f32.mrb[228].mxu0 }
 0x3c3   : > { %v5277_v7 = vadd.f32 %v16887_v56, %v13414_v46  ;;  %v5268_v17 = vpop.f32.mrb[229].mxu0 }
 0x3c4   : > { %v5269_v22 = vadd.f32 %v16887_v56, %v5268_v17  ;;  %v13415_v45 = vpop.f32.mrb[230].mxu0 }
 0x3c5   : > { %v5666_v31 = vmax.f32 %v5277_v7, %v5714_v23  ;;  %v5280_v57 = vadd.f32 %v16887_v56, %v13415_v45  ;;  %v5271_v19 = vpop.f32.mrb[231].mxu0 }
 0x3c6   : > { %v5272_v9 = vadd.f32 %v16887_v56, %v5271_v19 }
 0x3c7   : > { %v5619_v36 = vmax.f32 %v5269_v22, %v5666_v31  ;;  %v5690_v52 = vmax.f32 %v5280_v57, %v5738_v28 }
 0x3c9   : > { %v5643_v61 = vmax.f32 %v5272_v9, %v5690_v52 }
 0x3ca   : > { %v13418_v11 = vpop.f32.mrb[232].mxu0 }
 0x3cb   : > { %v5293_v13 = vadd.f32 %v16887_v56, %v13418_v11  ;;  %v5284_v39 = vpop.f32.mrb[233].mxu0 }
 0x3cc   : > { %v5285_v29 = vadd.f32 %v16887_v56, %v5284_v39  ;;  %v13419_v59 = vpop.f32.mrb[234].mxu0 }
 0x3cd   : > { %v5571_v24 = vmax.f32 %v5293_v13, %v5619_v36  ;;  %v5296_v55 = vadd.f32 %v16887_v56, %v13419_v59  ;;  %v5287_v44 = vpop.f32.mrb[235].mxu0 }
 0x3ce   : > { %v5288_v33 = vadd.f32 %v16887_v56, %v5287_v44 }
 0x3cf   : > { %v5715_v40 = vmax.f32 %v5285_v29, %v5571_v24  ;;  %v5595_v6 = vmax.f32 %v5296_v55, %v5643_v61 }
 0x3d1   : > { %v5739_v48 = vmax.f32 %v5288_v33, %v5595_v6 }
 0x3d2   : > { %v13422_v12 = vpop.f32.mrb[236].mxu0 }
 0x3d3   : > { %v5309_v62 = vadd.f32 %v16887_v56, %v13422_v12  ;;  %v5300_v37 = vpop.f32.mrb[237].mxu0 }
 0x3d4   : > { %v5301_v63 = vadd.f32 %v16887_v56, %v5300_v37  ;;  %v13423_v58 = vpop.f32.mrb[238].mxu0 }
 0x3d5   : > { %v5667_v49 = vmax.f32 %v5309_v62, %v5715_v40  ;;  %v5312_v3 = vadd.f32 %v16887_v56, %v13423_v58  ;;  %v5303_v2 = vpop.f32.mrb[239].mxu0 }
 0x3d6   : > { %v5304_v25 = vadd.f32 %v16887_v56, %v5303_v2 }
 0x3d7   : > { %v5620_v43 = vmax.f32 %v5301_v63, %v5667_v49  ;;  %v5691_v53 = vmax.f32 %v5312_v3, %v5739_v48 }
 0x3d9   : > { %v5644_v27 = vmax.f32 %v5304_v25, %v5691_v53 }
 0x3da   : > { %v13426_v41 = vpop.f32.mrb[240].mxu0 }
 0x3db   : > { %v5325_v20 = vadd.f32 %v16887_v56, %v13426_v41  ;;  %v5316_v4 = vpop.f32.mrb[241].mxu0 }
 0x3dc   : > { %v5317_v38 = vadd.f32 %v16887_v56, %v5316_v4  ;;  %v13427_v10 = vpop.f32.mrb[242].mxu0 }
 0x3dd   : > { %v5572_v30 = vmax.f32 %v5325_v20, %v5620_v43  ;;  %v5328_v16 = vadd.f32 %v16887_v56, %v13427_v10  ;;  %v5319_v32 = vpop.f32.mrb[243].mxu0 }
 0x3de   : > { %v5320_v0 = vadd.f32 %v16887_v56, %v5319_v32 }
 0x3df   : > { %v5716_v14 = vmax.f32 %v5317_v38, %v5572_v30  ;;  %v5596_v47 = vmax.f32 %v5328_v16, %v5644_v27 }
 0x3e1   : > { %v5740_v21 = vmax.f32 %v5320_v0, %v5596_v47 }
 0x3e2   : > { %v13430_v42 = vpop.f32.mrb[244].mxu0 }
 0x3e3   : > { %v5341_v18 = vadd.f32 %v16887_v56, %v13430_v42  ;;  %v5332_v26 = vpop.f32.mrb[245].mxu0 }
 0x3e4   : > { %v5333_v8 = vadd.f32 %v16887_v56, %v5332_v26  ;;  %v13431_v1 = vpop.f32.mrb[246].mxu0 }
 0x3e5   : > { %v5668_v35 = vmax.f32 %v5341_v18, %v5716_v14  ;;  %v5344_v60 = vadd.f32 %v16887_v56, %v13431_v1  ;;  %v5335_v51 = vpop.f32.mrb[247].mxu0 }
 0x3e6   : > { %v5336_v34 = vadd.f32 %v16887_v56, %v5335_v51 }
 0x3e7   : > { %v5621_v54 = vmax.f32 %v5333_v8, %v5668_v35  ;;  %v5692_v50 = vmax.f32 %v5344_v60, %v5740_v21 }
 0x3e9   : > { %v5645_v5 = vmax.f32 %v5336_v34, %v5692_v50  ;;  %v17030_v50 = vld [vmem:[%s19180_s6] ss:$0 sm:$0xff] }
 0x3ea   : > { %v13434_v23 = vpop.f32.mrb[248].mxu0 }
 0x3eb   : > { %v5357_v15 = vadd.f32 %v16887_v56, %v13434_v23  ;;  %v5348_v28 = vpop.f32.mrb[249].mxu0 }
 0x3ec   : > { %v5349_v46 = vadd.f32 %v16887_v56, %v5348_v28  ;;  %v13435_v7 = vpop.f32.mrb[250].mxu0 }
 0x3ed   : > { %v5573_v17 = vmax.f32 %v5357_v15, %v5621_v54  ;;  %v5360_v22 = vadd.f32 %v16887_v56, %v13435_v7  ;;  %v5351_v45 = vpop.f32.mrb[251].mxu0 }
 0x3ee   : > { %v5352_v31 = vadd.f32 %v16887_v56, %v5351_v45 }
 0x3ef   : > { %v5717_v57 = vmax.f32 %v5349_v46, %v5573_v17  ;;  %v5597_v19 = vmax.f32 %v5360_v22, %v5645_v5 }
 0x3f1   : > { %v5741_v9 = vmax.f32 %v5352_v31, %v5597_v19 }
 0x3f2   : > { %v13438_v36 = vpop.f32.mrb[252].mxu0 }
 0x3f3   : > { %v5373_v52 = vadd.f32 %v16887_v56, %v13438_v36  ;;  %v5364_v61 = vpop.f32.mrb[253].mxu0 }
 0x3f4   : > { %v5365_v11 = vadd.f32 %v16887_v56, %v5364_v61  ;;  %v13439_v13 = vpop.f32.mrb[254].mxu0 }
 0x3f5   : > { %v5669_v39 = vmax.f32 %v5373_v52, %v5717_v57  ;;  %v5376_v29 = vadd.f32 %v16887_v56, %v13439_v13  ;;  %v5367_v59 = vpop.f32.mrb[255].mxu0 }
 0x3f6   : > { %v5368_v24 = vadd.f32 %v16887_v56, %v5367_v59 }
 0x3f7   : > { %v5622_v55 = vmax.f32 %v5365_v11, %v5669_v39  ;;  %v5693_v44 = vmax.f32 %v5376_v29, %v5741_v9 }
 0x3f9   : > { %v5646_v33 = vmax.f32 %v5368_v24, %v5693_v44 }
 0x3fa   : > { %v13442_v40 = vpop.f32.mrb[0].mxu0 }
 0x3fb   : > { %v5389_v6 = vadd.f32 %v16887_v56, %v13442_v40  ;;  %v5380_v48 = vpop.f32.mrb[1].mxu0 }
 0x3fc   : > { %v5381_v12 = vadd.f32 %v16887_v56, %v5380_v48  ;;  %v13443_v62 = vpop.f32.mrb[2].mxu0 }
 0x3fd   : > { %v5574_v37 = vmax.f32 %v5389_v6, %v5622_v55  ;;  %v5392_v63 = vadd.f32 %v16887_v56, %v13443_v62  ;;  %v5383_v58 = vpop.f32.mrb[3].mxu0 }
 0x3fe   : > { %v5384_v49 = vadd.f32 %v16887_v56, %v5383_v58 }
 0x3ff   : > { %v5718_v3 = vmax.f32 %v5381_v12, %v5574_v37  ;;  %v5598_v2 = vmax.f32 %v5392_v63, %v5646_v33 }
 0x401   : > { %v5742_v25 = vmax.f32 %v5384_v49, %v5598_v2 }
 0x402   : > { %v13446_v43 = vpop.f32.mrb[4].mxu0 }
 0x403   : > { %v5405_v53 = vadd.f32 %v16887_v56, %v13446_v43  ;;  %v5396_v27 = vpop.f32.mrb[5].mxu0 }
 0x404   : > { %v5397_v41 = vadd.f32 %v16887_v56, %v5396_v27  ;;  %v13447_v20 = vpop.f32.mrb[6].mxu0 }
 0x405   : > { %v5670_v4 = vmax.f32 %v5405_v53, %v5718_v3  ;;  %v5408_v38 = vadd.f32 %v16887_v56, %v13447_v20  ;;  %v5399_v10 = vpop.f32.mrb[7].mxu0 }
 0x406   : > { %v5400_v30 = vadd.f32 %v16887_v56, %v5399_v10 }
 0x407   : > { %v5623_v16 = vmax.f32 %v5397_v41, %v5670_v4  ;;  %v5694_v32 = vmax.f32 %v5408_v38, %v5742_v25 }
 0x409   : > { %v5647_v0 = vmax.f32 %v5400_v30, %v5694_v32 }
 0x40a   : > { %v13450_v14 = vpop.f32.mrb[8].mxu0 }
 0x40b   : > { %v5421_v47 = vadd.f32 %v16887_v56, %v13450_v14  ;;  %v5412_v21 = vpop.f32.mrb[9].mxu0 }
 0x40c   : > { %v5413_v42 = vadd.f32 %v16887_v56, %v5412_v21  ;;  %v13451_v18 = vpop.f32.mrb[10].mxu0 }
 0x40d   : > { %v5575_v26 = vmax.f32 %v5421_v47, %v5623_v16  ;;  %v5424_v8 = vadd.f32 %v16887_v56, %v13451_v18  ;;  %v5415_v1 = vpop.f32.mrb[11].mxu0 }
 0x40e   : > { %v5416_v35 = vadd.f32 %v16887_v56, %v5415_v1 }
 0x40f   : > { %v5719_v60 = vmax.f32 %v5413_v42, %v5575_v26  ;;  %v5599_v51 = vmax.f32 %v5424_v8, %v5647_v0 }
 0x411   : > { %v5743_v34 = vmax.f32 %v5416_v35, %v5599_v51 }
 0x412   : > { %v13454_v54 = vpop.f32.mrb[12].mxu0 }
 0x413   : > { %v5437_v5 = vadd.f32 %v17030_v50, %v13454_v54  ;;  %v5428_v23 = vpop.f32.mrb[13].mxu0 }
 0x414   : > { %v5429_v15 = vadd.f32 %v17030_v50, %v5428_v23  ;;  %v13455_v28 = vpop.f32.mrb[14].mxu0 }
 0x415   : > { %v5671_v46 = vmax.f32 %v5437_v5, %v5719_v60  ;;  %v5440_v7 = vadd.f32 %v17030_v50, %v13455_v28  ;;  %v5431_v17 = vpop.f32.mrb[15].mxu0 }
 0x416   : > { %v5432_v56 = vadd.f32 %v17030_v50, %v5431_v17 }
 0x417   : > { %v5624_v22 = vmax.f32 %v5429_v15, %v5671_v46  ;;  %v5695_v45 = vmax.f32 %v5440_v7, %v5743_v34 }
 0x419   : > { %v5648_v31 = vmax.f32 %v5432_v56, %v5695_v45 }
 0x41a   : > { %v13458_v57 = vpop.f32.mrb[16].mxu0 }
 0x41b   : > { %v5453_v19 = vadd.f32 %v17030_v50, %v13458_v57  ;;  %v5444_v9 = vpop.f32.mrb[17].mxu0 }
 0x41c   : > { %v5445_v36 = vadd.f32 %v17030_v50, %v5444_v9  ;;  %v13459_v52 = vpop.f32.mrb[18].mxu0 }
 0x41d   : > { %v5576_v61 = vmax.f32 %v5453_v19, %v5624_v22  ;;  %v5456_v11 = vadd.f32 %v17030_v50, %v13459_v52  ;;  %v5447_v13 = vpop.f32.mrb[19].mxu0 }
 0x41e   : > { %v5448_v39 = vadd.f32 %v17030_v50, %v5447_v13 }
 0x41f   : > { %v5720_v29 = vmax.f32 %v5445_v36, %v5576_v61  ;;  %v5600_v59 = vmax.f32 %v5456_v11, %v5648_v31 }
 0x421   : > { %v5744_v24 = vmax.f32 %v5448_v39, %v5600_v59 }
 0x422   : > { %v13462_v55 = vpop.f32.mrb[20].mxu0 }
 0x423   : > { %v5469_v44 = vadd.f32 %v17030_v50, %v13462_v55  ;;  %v5460_v33 = vpop.f32.mrb[21].mxu0 }
 0x424   : > { %v5461_v40 = vadd.f32 %v17030_v50, %v5460_v33  ;;  %v13463_v6 = vpop.f32.mrb[22].mxu0 }
 0x425   : > { %v5672_v48 = vmax.f32 %v5469_v44, %v5720_v29  ;;  %v5472_v12 = vadd.f32 %v17030_v50, %v13463_v6  ;;  %v5463_v62 = vpop.f32.mrb[23].mxu0 }
 0x426   : > { %v5464_v37 = vadd.f32 %v17030_v50, %v5463_v62 }
 0x427   : > { %v5625_v63 = vmax.f32 %v5461_v40, %v5672_v48  ;;  %v5696_v58 = vmax.f32 %v5472_v12, %v5744_v24  ;;  %v5753_v48 = vld [vmem:[#allocation2] sm:$0xff] }
 0x429   : > { %v5649_v49 = vmax.f32 %v5464_v37, %v5696_v58 }
 0x42a   : > { %v13466_v3 = vpop.f32.mrb[24].mxu0 }
 0x42b   : > { %v5485_v2 = vadd.f32 %v17030_v50, %v13466_v3  ;;  %v5476_v25 = vpop.f32.mrb[25].mxu0 }
 0x42c   : > { %v5477_v43 = vadd.f32 %v17030_v50, %v5476_v25  ;;  %v13467_v53 = vpop.f32.mrb[26].mxu0  ;;  %v13590_v25 = vld [vmem:[%s19181_s7 + $0x304] ss:$16 sps:$4 sm:$0xff] (!%p11235_p1)  }
 0x42d   : > { %v5577_v27 = vmax.f32 %v5485_v2, %v5625_v63  ;;  %v5488_v41 = vadd.f32 %v17030_v50, %v13467_v53  ;;  %v5479_v20 = vpop.f32.mrb[27].mxu0  ;;  %v5754_v63 = vld [vmem:[#allocation2 + $0x8] sm:$0xff]  ;;  %v13588_v2 = vld [vmem:[%s19181_s7 + $0x104] ss:$16 sps:$4 sm:$0xff] (!%p11235_p1)   ;;  %v13593_v53 = vld [vmem:[%s19181_s7 + $0x300] ss:$16 sps:$4 sm:$0xff] (!%p11235_p1)   ;;  %6305 = vmatprep.subr.bf16.mxu0 (!%p11235_p1), %v13590_v25 }
 0x42e   : > { %v5480_v4 = vadd.f32 %v17030_v50, %v5479_v20  ;;  %5995 = vmatprep.subr.bf16.mxu1 (!%p11235_p1), %v13588_v2  ;;  %6306 = vmatpush1.bf16.msra.mxu0 (!%p11235_p1), %v13593_v53  ;;  %v13598_v20 = vld [vmem:[%s19181_s7 + $0x120] ss:$16 sps:$4 sm:$0xff] (!%p11235_p1)   ;;  %v13672_v2 = vld [vmem:[%s19181_s7 + $0x1c8] ss:$16 sps:$4 sm:$0xff] (!%p11235_p1)   ;;  %v13683_v53 = vld [vmem:[%s19181_s7 + $0x5e4] ss:$16 sps:$4 sm:$0xff] (!%p11235_p1)  }
 0x42f   : > { %v5721_v38 = vmax.f32 %v5477_v43, %v5577_v27  ;;  %v5601_v10 = vmax.f32 %v5488_v41, %v5649_v49  ;;  %v13592_v43 = vld [vmem:[%s19181_s7 + $0x100] ss:$16 sps:$4 sm:$0xff] (!%p11235_p1)   ;;  %v13594_v27 = vld [vmem:[%s19181_s7 + $0x124] ss:$16 sps:$4 sm:$0xff] (!%p11235_p1)  }
 0x430   : > { %5996 = vmatpush1.bf16.msra.mxu1 (!%p11235_p1), %v13592_v43  ;;  %v13596_v41 = vld [vmem:[%s19181_s7 + $0x324] ss:$16 sps:$4 sm:$0xff] (!%p11235_p1)   ;;  %v13675_v25 = vld [vmem:[%s19181_s7 + $0x5c0] ss:$16 sps:$4 sm:$0xff] (!%p11235_p1)   ;;  %v13680_v43 = vld [vmem:[%s19181_s7 + $0x1ec] ss:$16 sps:$4 sm:$0xff] (!%p11235_p1)  }
 0x431   : > { %v5745_v30 = vmax.f32 %v5480_v4, %v5601_v10  ;;  %5997 = vmatprep.subr.bf16.mxu1 (!%p11235_p1), %v13594_v27  ;;  %v13599_v4 = vld [vmem:[%s19181_s7 + $0x320] ss:$16 sps:$4 sm:$0xff] (!%p11235_p1)   ;;  %6307 = vmatprep.subr.bf16.mxu0 (!%p11235_p1), %v13596_v41  ;;  %v13602_v10 = vld [vmem:[%s19181_s7 + $0x344] ss:$16 sps:$4 sm:$0xff] (!%p11235_p1)   ;;  %v13678_v27 = vld [vmem:[%s19181_s7 + $0x1e8] ss:$16 sps:$4 sm:$0xff] (!%p11235_p1)  }
 0x432   : > { %v13470_v16 = vpop.f32.mrb[28].mxu0  ;;  %6308 = vmatpush1.bf16.msra.mxu0 (!%p11235_p1), %v13599_v4  ;;  %v13681_v41 = vld [vmem:[%s19181_s7 + $0x5e0] ss:$16 sps:$4 sm:$0xff] (!%p11235_p1)   ;;  %v13689_v4 = vld [vmem:[%s19181_s7 + $0x704] ss:$16 sps:$4 sm:$0xff] (!%p11235_p1)  }
 0x433   : > { %v5501_v32 = vadd.f32 %v17030_v50, %v13470_v16  ;;  %v5492_v0 = vpop.f32.mrb[29].mxu0  ;;  %v13605_v16 = vld [vmem:[%s19181_s7 + $0x340] ss:$16 sps:$4 sm:$0xff] (!%p11235_p1)   ;;  %6309 = vmatprep.subr.bf16.mxu0 (!%p11235_p1), %v13602_v10  ;;  %v13684_v10 = vld [vmem:[%s19181_s7 + $0x308] ss:$16 sps:$4 sm:$0xff] (!%p11235_p1)  }
 0x434   : > { %v5493_v14 = vadd.f32 %v17030_v50, %v5492_v0  ;;  %v13471_v47 = vpop.f32.mrb[30].mxu0  ;;  %5998 = vmatpush1.bf16.msra.mxu1 (!%p11235_p1), %v13598_v20  ;;  %v13608_v0 = vld [vmem:[%s19181_s7 + $0x364] ss:$16 sps:$4 sm:$0xff] (!%p11235_p1)   ;;  %v13686_v20 = vld [vmem:[%s19181_s7 + $0x30c] ss:$16 sps:$4 sm:$0xff] (!%p11235_p1)  }
 0x435   : > { %v5673_v21 = vmax.f32 %v5501_v32, %v5721_v38  ;;  %v5504_v42 = vadd.f32 %v17030_v50, %v13471_v47  ;;  %v5495_v18 = vpop.f32.mrb[31].mxu0  ;;  %v13600_v38 = vld [vmem:[%s19181_s7 + $0x144] ss:$16 sps:$4 sm:$0xff] (!%p11235_p1)   ;;  %v13611_v47 = vld [vmem:[%s19181_s7 + $0x360] ss:$16 sps:$4 sm:$0xff] (!%p11235_p1)  }
 0x436   : > { %v5496_v26 = vadd.f32 %v17030_v50, %v5495_v18  ;;  %v13606_v32 = vld [vmem:[%s19181_s7 + $0x164] ss:$16 sps:$4 sm:$0xff] (!%p11235_p1)   ;;  %5999 = vmatprep.subr.bf16.mxu1 (!%p11235_p1), %v13600_v38  ;;  %6310 = vmatpush1.bf16.msra.mxu0 (!%p11235_p1), %v13605_v16  ;;  %v13616_v18 = vld [vmem:[%s19181_s7 + $0x180] ss:$16 sps:$4 sm:$0xff] (!%p11235_p1)   ;;  %v13692_v16 = vld [vmem:[%s19181_s7 + $0x32c] ss:$16 sps:$4 sm:$0xff] (!%p11235_p1)  }
 0x437   : > { %v5626_v8 = vmax.f32 %v5493_v14, %v5673_v21  ;;  %v5697_v1 = vmax.f32 %v5504_v42, %v5745_v30  ;;  %v13604_v30 = vld [vmem:[%s19181_s7 + $0x140] ss:$16 sps:$4 sm:$0xff] (!%p11235_p1)   ;;  %v13612_v21 = vld [vmem:[%s19181_s7 + $0x184] ss:$16 sps:$4 sm:$0xff] (!%p11235_p1)   ;;  %6311 = vmatprep.subr.bf16.mxu0 (!%p11235_p1), %v13608_v0  ;;  %v13690_v0 = vld [vmem:[%s19181_s7 + $0x328] ss:$16 sps:$4 sm:$0xff] (!%p11235_p1)  }
 0x438   : > { %v13610_v14 = vld [vmem:[%s19181_s7 + $0x160] ss:$16 sps:$4 sm:$0xff] (!%p11235_p1)   ;;  %6000 = vmatpush1.bf16.msra.mxu1 (!%p11235_p1), %v13604_v30  ;;  %v13614_v42 = vld [vmem:[%s19181_s7 + $0x384] ss:$16 sps:$4 sm:$0xff] (!%p11235_p1)  }
 0x439   : > { %v5650_v35 = vmax.f32 %v5496_v26, %v5697_v1  ;;  %6001 = vmatprep.subr.bf16.mxu1 (!%p11235_p1), %v13606_v32  ;;  %v13617_v26 = vld [vmem:[%s19181_s7 + $0x380] ss:$16 sps:$4 sm:$0xff] (!%p11235_p1)   ;;  %v13620_v1 = vld [vmem:[%s19181_s7 + $0x3a4] ss:$16 sps:$4 sm:$0xff] (!%p11235_p1)  }
 0x43a   : > { %v13474_v60 = vpop.f32.mrb[32].mxu0  ;;  %6312 = vmatpush1.bf16.msra.mxu0 (!%p11235_p1), %v13611_v47  ;;  %v13687_v30 = vld [vmem:[%s19181_s7 + $0x700] ss:$16 sps:$4 sm:$0xff] (!%p11235_p1)   ;;  %v13695_v32 = vld [vmem:[%s19181_s7 + $0x724] ss:$16 sps:$4 sm:$0xff] (!%p11235_p1)  }
 0x43b   : > { %v5517_v51 = vadd.f32 %v17030_v50, %v13474_v60  ;;  %v5508_v34 = vpop.f32.mrb[33].mxu0  ;;  %6313 = vmatprep.subr.bf16.mxu0 (!%p11235_p1), %v13614_v42  ;;  %v13623_v60 = vld [vmem:[%s19181_s7 + $0x3a0] ss:$16 sps:$4 sm:$0xff] (!%p11235_p1)   ;;  %v13698_v47 = vld [vmem:[%s19181_s7 + $0x34c] ss:$16 sps:$4 sm:$0xff] (!%p11235_p1)  }
 0x43c   : > { %v5509_v54 = vadd.f32 %v17030_v50, %v5508_v34  ;;  %v13475_v5 = vpop.f32.mrb[34].mxu0  ;;  %6002 = vmatpush1.bf16.msra.mxu1 (!%p11235_p1), %v13610_v14  ;;  %v13626_v34 = vld [vmem:[%s19181_s7 + $0x3c4] ss:$16 sps:$4 sm:$0xff] (!%p11235_p1)   ;;  %v13693_v14 = vld [vmem:[%s19181_s7 + $0x720] ss:$16 sps:$4 sm:$0xff] (!%p11235_p1)  }
 0x43d   : > { %v5578_v23 = vmax.f32 %v5517_v51, %v5626_v8  ;;  %v5520_v15 = vadd.f32 %v17030_v50, %v13475_v5  ;;  %v5511_v28 = vpop.f32.mrb[35].mxu0  ;;  %v13618_v8 = vld [vmem:[%s19181_s7 + $0x1a4] ss:$16 sps:$4 sm:$0xff] (!%p11235_p1)   ;;  %6003 = vmatprep.subr.bf16.mxu1 (!%p11235_p1), %v13612_v21  ;;  %v13696_v42 = vld [vmem:[%s19181_s7 + $0x348] ss:$16 sps:$4 sm:$0xff] (!%p11235_p1)  }
 0x43e   : > { %v5512_v46 = vadd.f32 %v17030_v50, %v5511_v28  ;;  %6314 = vmatpush1.bf16.msra.mxu0 (!%p11235_p1), %v13617_v26  ;;  %v13624_v51 = vld [vmem:[%s19181_s7 + $0x1c4] ss:$16 sps:$4 sm:$0xff] (!%p11235_p1)   ;;  %v13629_v28 = vld [vmem:[%s19181_s7 + $0x3c0] ss:$16 sps:$4 sm:$0xff] (!%p11235_p1)   ;;  %v13704_v26 = vld [vmem:[%s19181_s7 + $0x36c] ss:$16 sps:$4 sm:$0xff] (!%p11235_p1)  }
 0x43f   : > { %v5722_v7 = vmax.f32 %v5509_v54, %v5578_v23  ;;  %v5602_v17 = vmax.f32 %v5520_v15, %v5650_v35  ;;  %v13622_v35 = vld [vmem:[%s19181_s7 + $0x1a0] ss:$16 sps:$4 sm:$0xff] (!%p11235_p1)   ;;  %6315 = vmatprep.subr.bf16.mxu0 (!%p11235_p1), %v13620_v1  ;;  %v13701_v21 = vld [vmem:[%s19181_s7 + $0x744] ss:$16 sps:$4 sm:$0xff] (!%p11235_p1)   ;;  %v13702_v1 = vld [vmem:[%s19181_s7 + $0x368] ss:$16 sps:$4 sm:$0xff] (!%p11235_p1)  }
 0x440   : > { %6004 = vmatpush1.bf16.msra.mxu1 (!%p11235_p1), %v13616_v18  ;;  %v13628_v15 = vld [vmem:[%s19181_s7 + $0x1c0] ss:$16 sps:$4 sm:$0xff] (!%p11235_p1)  }
 0x441   : > { %v5746_v56 = vmax.f32 %v5512_v46, %v5602_v17  ;;  %6005 = vmatprep.subr.bf16.mxu1 (!%p11235_p1), %v13618_v8  ;;  %v13630_v46 = vld [vmem:[%s19181_s7 + $0x1e4] ss:$16 sps:$4 sm:$0xff] (!%p11235_p1)   ;;  %v13699_v18 = vld [vmem:[%s19181_s7 + $0x740] ss:$16 sps:$4 sm:$0xff] (!%p11235_p1)  }
 0x442   : > { %v13478_v22 = vpop.f32.mrb[36].mxu0  ;;  %6316 = vmatpush1.bf16.msra.mxu0 (!%p11235_p1), %v13623_v60  ;;  %v13707_v8 = vld [vmem:[%s19181_s7 + $0x764] ss:$16 sps:$4 sm:$0xff] (!%p11235_p1)   ;;  %v13710_v60 = vld [vmem:[%s19181_s7 + $0x38c] ss:$16 sps:$4 sm:$0xff] (!%p11235_p1)  }
 0x443   : > { %v5533_v45 = vadd.f32 %v17030_v50, %v13478_v22  ;;  %v5524_v31 = vpop.f32.mrb[37].mxu0  ;;  %6317 = vmatprep.subr.bf16.mxu0 (!%p11235_p1), %v13626_v34  ;;  %v13635_v22 = vld [vmem:[%s19181_s7 + $0x3e0] ss:$16 sps:$4 sm:$0xff] (!%p11235_p1)   ;;  %v13708_v34 = vld [vmem:[%s19181_s7 + $0x388] ss:$16 sps:$4 sm:$0xff] (!%p11235_p1)  }
 0x444   : > { %v5525_v57 = vadd.f32 %v17030_v50, %v5524_v31  ;;  %v13479_v19 = vpop.f32.mrb[38].mxu0  ;;  %6006 = vmatpush1.bf16.msra.mxu1 (!%p11235_p1), %v13622_v35  ;;  %v13641_v31 = vld [vmem:[%s19181_s7 + $0x504] ss:$16 sps:$4 sm:$0xff] (!%p11235_p1)   ;;  %v13705_v35 = vld [vmem:[%s19181_s7 + $0x760] ss:$16 sps:$4 sm:$0xff] (!%p11235_p1)  }
 0x445   : > { %v5748_v9 = vmax.f32 %v5533_v45, %v5722_v7  ;;  %v5536_v36 = vadd.f32 %v17030_v50, %v13479_v19  ;;  %v5527_v52 = vpop.f32.mrb[39].mxu0  ;;  %6007 = vmatprep.subr.bf16.mxu1 (!%p11235_p1), %v13624_v51  ;;  %v13632_v7 = vld [vmem:[%s19181_s7 + $0x3e4] ss:$16 sps:$4 sm:$0xff] (!%p11235_p1)   ;;  %v13638_v45 = vld [vmem:[%s19181_s7 + $0x10c] ss:$16 sps:$4 sm:$0xff] (!%p11235_p1)  }
 0x446   : > { %v5528_v61 = vadd.f32 %v17030_v50, %v5527_v52  ;;  %6318 = vmatpush1.bf16.msra.mxu0 (!%p11235_p1), %v13629_v28  ;;  %v13636_v19 = vld [vmem:[%s19181_s7 + $0x108] ss:$16 sps:$4 sm:$0xff] (!%p11235_p1)   ;;  %v13647_v52 = vld [vmem:[%s19181_s7 + $0x524] ss:$16 sps:$4 sm:$0xff] (!%p11235_p1)  }
 0x447   : > { %v5674_v11 = vmax.f32 %v5525_v57, %v5748_v9  ;;  %v5751_v13 = vmax.f32 %v5536_v36, %v5746_v56  ;;  %v13634_v56 = vld [vmem:[%s19181_s7 + $0x1e0] ss:$16 sps:$4 sm:$0xff] (!%p11235_p1)   ;;  %6319 = vmatprep.subr.bf16.mxu0 (!%p11235_p1), %v13632_v7  ;;  %v13644_v36 = vld [vmem:[%s19181_s7 + $0x12c] ss:$16 sps:$4 sm:$0xff] (!%p11235_p1)   ;;  %v13713_v51 = vld [vmem:[%s19181_s7 + $0x784] ss:$16 sps:$4 sm:$0xff] (!%p11235_p1)  }
 0x448   : > { %6008 = vmatpush1.bf16.msra.mxu1 (!%p11235_p1), %v13628_v15  ;;  %v13639_v9 = vld [vmem:[%s19181_s7 + $0x500] ss:$16 sps:$4 sm:$0xff] (!%p11235_p1)   ;;  %v13719_v15 = vld [vmem:[%s19181_s7 + $0x7a4] ss:$16 sps:$4 sm:$0xff] (!%p11235_p1)   ;;  %v13714_v28 = vld [vmem:[%s19181_s7 + $0x3a8] ss:$16 sps:$4 sm:$0xff] (!%p11235_p1)  }
 0x449   : > { %v5698_v39 = vmax.f32 %v5528_v61, %v5751_v13  ;;  %6009 = vmatprep.subr.bf16.mxu1 (!%p11235_p1), %v13630_v46  ;;  %v13642_v61 = vld [vmem:[%s19181_s7 + $0x128] ss:$16 sps:$4 sm:$0xff] (!%p11235_p1)   ;;  %v13650_v13 = vld [vmem:[%s19181_s7 + $0x14c] ss:$16 sps:$4 sm:$0xff] (!%p11235_p1)   ;;  %v13717_v46 = vld [vmem:[%s19181_s7 + $0x7a0] ss:$16 sps:$4 sm:$0xff] (!%p11235_p1)  }
 0x44a   : > { %v13482_v29 = vpop.f32.mrb[40].mxu0  ;;  %6320 = vmatpush1.bf16.msra.mxu0 (!%p11235_p1), %v13635_v22  ;;  %v13722_v7 = vld [vmem:[%s19181_s7 + $0x3cc] ss:$16 sps:$4 sm:$0xff] (!%p11235_p1)   ;;  %v13720_v22 = vld [vmem:[%s19181_s7 + $0x3c8] ss:$16 sps:$4 sm:$0xff] (!%p11235_p1)  }
 0x44b   : > { %v5549_v59 = vadd.f32 %v17030_v50, %v13482_v29  ;;  %v5540_v24 = vpop.f32.mrb[41].mxu0  ;;  %6615 = vmatprep.subr.bf16.mxu0 (!%p11235_p1), %v13641_v31  ;;  %v13648_v29 = vld [vmem:[%s19181_s7 + $0x148] ss:$16 sps:$4 sm:$0xff] (!%p11235_p1)   ;;  %v13728_v31 = vld [vmem:[%s19181_s7 + $0x3ec] ss:$16 sps:$4 sm:$0xff] (!%p11235_p1)  }
 0x44c   : > { %v5541_v55 = vadd.f32 %v17030_v50, %v5540_v24  ;;  %v13483_v44 = vpop.f32.mrb[42].mxu0  ;;  %6010 = vmatpush1.bf16.msra.mxu1 (!%p11235_p1), %v13634_v56  ;;  %v13656_v24 = vld [vmem:[%s19181_s7 + $0x16c] ss:$16 sps:$4 sm:$0xff] (!%p11235_p1)   ;;  %v13725_v56 = vld [vmem:[%s19181_s7 + $0x7c4] ss:$16 sps:$4 sm:$0xff] (!%p11235_p1)  }
 0x44d   : > { %v5747_v33 = vmax.f32 %v5549_v59, %v5674_v11  ;;  %v5552_v40 = vadd.f32 %v17030_v50, %v13483_v44  ;;  %v5543_v6 = vpop.f32.mrb[43].mxu0  ;;  %6036 = vmatprep.subr.bf16.mxu1 (!%p11235_p1), %v13638_v45  ;;  %v13645_v11 = vld [vmem:[%s19181_s7 + $0x520] ss:$16 sps:$4 sm:$0xff] (!%p11235_p1)   ;;  %v13654_v44 = vld [vmem:[%s19181_s7 + $0x168] ss:$16 sps:$4 sm:$0xff] (!%p11235_p1)  }
 0x44e   : > { %v5544_v12 = vadd.f32 %v17030_v50, %v5543_v6  ;;  %v14565_v50 = vmov (!%p11235_p1), 0   ;;  %v13651_v59 = vld [vmem:[%s19181_s7 + $0x540] ss:$16 sps:$4 sm:$0xff] (!%p11235_p1)   ;;  %v13665_v6 = vld [vmem:[%s19181_s7 + $0x584] ss:$16 sps:$4 sm:$0xff] (!%p11235_p1)  }
 0x44f   : > { %v5749_v62 = vmax.f32 %v5747_v33, %v5541_v55  ;;  %v5750_v37 = vmax.f32 %v5552_v40, %v5698_v39  ;;  %5762 = sbr.rel (%p11235_p1) target bundleno = 2303 (0x8ff), region = 80  ;;  %6027 = vmatprep.mubr.bf16.mxu1 (!%p11235_p1), %v14565_v50  ;;  %6337 = vmatprep.mubr.bf16.mxu0 (!%p11235_p1), %v14565_v50  ;;  %v13653_v39 = vld [vmem:[%s19181_s7 + $0x544] ss:$16 sps:$4 sm:$0xff] (!%p11235_p1)   ;;  %v13657_v33 = vld [vmem:[%s19181_s7 + $0x560] ss:$16 sps:$4 sm:$0xff] (!%p11235_p1)  }
 0x450   : > { %v13659_v55 = vld [vmem:[%s19181_s7 + $0x564] ss:$16 sps:$4 sm:$0xff] (!%p11235_p1)   ;;  %v13662_v40 = vld [vmem:[%s19181_s7 + $0x18c] ss:$16 sps:$4 sm:$0xff] (!%p11235_p1)   ;;  %v13723_v45 = vld [vmem:[%s19181_s7 + $0x7c0] ss:$16 sps:$4 sm:$0xff] (!%p11235_p1)  }
 0x451   : > { %v5755_v58 = vmax.f32 %v5753_v48, %v5749_v62  ;;  %v5752_v49 = vmax.f32 %v5750_v37, %v5544_v12  ;;  %v13660_v48 = vld [vmem:[%s19181_s7 + $0x188] ss:$16 sps:$4 sm:$0xff] (!%p11235_p1)   ;;  %v13663_v12 = vld [vmem:[%s19181_s7 + $0x580] ss:$16 sps:$4 sm:$0xff] (!%p11235_p1)   ;;  %v13668_v62 = vld [vmem:[%s19181_s7 + $0x1ac] ss:$16 sps:$4 sm:$0xff] (!%p11235_p1)  }
 0x452   : > { %v13671_v37 = vld [vmem:[%s19181_s7 + $0x5a4] ss:$16 sps:$4 sm:$0xff] (!%p11235_p1)  }
 0x453   : > { %5757 = vst [vmem:[#allocation2] sm:$0xff] %v5755_v58  ;;  %v5756_v3 = vmax.f32 %v5754_v63, %v5752_v49  ;;  %v13666_v63 = vld [vmem:[%s19181_s7 + $0x1a8] ss:$16 sps:$4 sm:$0xff] (!%p11235_p1)   ;;  %v13669_v58 = vld [vmem:[%s19181_s7 + $0x5a0] ss:$16 sps:$4 sm:$0xff] (!%p11235_p1)  }
 0x454   : > { %v13674_v49 = vld [vmem:[%s19181_s7 + $0x1cc] ss:$16 sps:$4 sm:$0xff] (!%p11235_p1)  }
 0x455   : > { %5758 = vst [vmem:[#allocation2 + $0x8] sm:$0xff] %v5756_v3  ;;  %v13677_v3 = vld [vmem:[%s19181_s7 + $0x5c4] ss:$16 sps:$4 sm:$0xff] (!%p11235_p1)  }
 0x45a   : > { %v5763_v54 = vld [vmem:[#allocation2] sm:$0xff] }
 0x45c   : > { %v5764_v5 = vld [vmem:[#allocation2 + $0x8] sm:$0xff] }
 0x45d   : > { %v17145_v23 = vpack.c.bf16 %v5764_v5, %v5763_v54  ;;  %v13711_v54 = vld [vmem:[%s19181_s7 + $0x780] ss:$16 sps:$4 sm:$0xff]   ;;  %v13716_v5 = vld [vmem:[%s19181_s7 + $0x3ac] ss:$16 sps:$4 sm:$0xff]  }
 0x45f   : > { %v17160_v17 = vshrl.u32 %v17145_v23, 16 }
 0x461   : > { %v6143_v57 = vrot.slane %v17160_v17, 1  ;;  %6028 = vmatmul.mubr.bf16.vlgmr.msra.gmra.mrb[0].mxu1 %v17160_v17  ;;  %v6453_v38 = vrot.slane %v17160_v17, 2 }
 0x462   : > { %6037 = vmatpush1.bf16.msra.mxu1 %v13636_v19  ;;  %6068 = vmatprep.mubr.bf16.mxu1 %v14565_v50  ;;  %v13731_v19 = vld [vmem:[%s19181_s7 + $0x7e4] ss:$16 sps:$4 sm:$0xff]  }
 0x463   : > { %6338 = vmatmul.mubr.bf16.vlgmr.msra.gmra.mrb[0].mxu0 %v6143_v57  ;;  %6038 = vmatprep.subr.bf16.mxu1 %v13644_v36  ;;  %v13729_v36 = vld [vmem:[%s19181_s7 + $0x7e0] ss:$16 sps:$4 sm:$0xff]  }
 0x464   : > { %6616 = vmatpush1.bf16.msra.mxu0 %v13639_v9  ;;  %6647 = vmatprep.mubr.bf16.mxu0 %v14565_v50  ;;  %v13726_v9 = vld [vmem:[%s19181_s7 + $0x3e8] ss:$16 sps:$4 sm:$0xff]  }
 0x465   : > { %6617 = vmatprep.subr.bf16.mxu0 %v13647_v52  ;;  %v13734_v52 = vld [vmem:[%s19181_s7 + $0x50c] ss:$16 sps:$4 sm:$0xff]  }
 0x466   : > { %6039 = vmatpush1.bf16.msra.mxu1 %v13642_v61  ;;  %v13737_v61 = vld [vmem:[%s19181_s7 + $0x904] ss:$16 sps:$4 sm:$0xff]  }
 0x467   : > { %6040 = vmatprep.subr.bf16.mxu1 %v13650_v13  ;;  %v13732_v13 = vld [vmem:[%s19181_s7 + $0x508] ss:$16 sps:$4 sm:$0xff]  }
 0x468   : > { %6618 = vmatpush1.bf16.msra.mxu0 %v13645_v11  ;;  %v6763_v11 = vrot.slane %v17160_v17, 3 }
 0x469   : > { %6619 = vmatprep.subr.bf16.mxu0 %v13653_v39  ;;  %v13735_v39 = vld [vmem:[%s19181_s7 + $0x900] ss:$16 sps:$4 sm:$0xff]  }
 0x46a   : > { %6041 = vmatpush1.bf16.msra.mxu1 %v13648_v29  ;;  %v13740_v29 = vld [vmem:[%s19181_s7 + $0x52c] ss:$16 sps:$4 sm:$0xff]  }
 0x46b   : > { %6042 = vmatprep.subr.bf16.mxu1 %v13656_v24  ;;  %v13738_v24 = vld [vmem:[%s19181_s7 + $0x528] ss:$16 sps:$4 sm:$0xff]  }
 0x46c   : > { %6620 = vmatpush1.bf16.msra.mxu0 %v13651_v59  ;;  %v13743_v59 = vld [vmem:[%s19181_s7 + $0x924] ss:$16 sps:$4 sm:$0xff]  }
 0x46d   : > { %6621 = vmatprep.subr.bf16.mxu0 %v13659_v55  ;;  %v13741_v55 = vld [vmem:[%s19181_s7 + $0x920] ss:$16 sps:$4 sm:$0xff]  }
 0x46e   : > { %6043 = vmatpush1.bf16.msra.mxu1 %v13654_v44  ;;  %v13746_v44 = vld [vmem:[%s19181_s7 + $0x54c] ss:$16 sps:$4 sm:$0xff]  }
 0x46f   : > { %6044 = vmatprep.subr.bf16.mxu1 %v13662_v40  ;;  %v13747_v40 = vld [vmem:[%s19181_s7 + $0x940] ss:$16 sps:$4 sm:$0xff]  }
 0x470   : > { %6622 = vmatpush1.bf16.msra.mxu0 %v13657_v33  ;;  %v13744_v33 = vld [vmem:[%s19181_s7 + $0x548] ss:$16 sps:$4 sm:$0xff]  }
 0x471   : > { %6623 = vmatprep.subr.bf16.mxu0 %v13665_v6  ;;  %v13752_v6 = vld [vmem:[%s19181_s7 + $0x56c] ss:$16 sps:$4 sm:$0xff]  }
 0x472   : > { %6045 = vmatpush1.bf16.msra.mxu1 %v13660_v48  ;;  %v13755_v48 = vld [vmem:[%s19181_s7 + $0x964] ss:$16 sps:$4 sm:$0xff]  }
 0x473   : > { %6046 = vmatprep.subr.bf16.mxu1 %v13668_v62  ;;  %v13753_v62 = vld [vmem:[%s19181_s7 + $0x960] ss:$16 sps:$4 sm:$0xff]  }
 0x474   : > { %6624 = vmatpush1.bf16.msra.mxu0 %v13663_v12  ;;  %v13750_v12 = vld [vmem:[%s19181_s7 + $0x568] ss:$16 sps:$4 sm:$0xff]  }
 0x475   : > { %6625 = vmatprep.subr.bf16.mxu0 %v13671_v37  ;;  %v13758_v37 = vld [vmem:[%s19181_s7 + $0x58c] ss:$16 sps:$4 sm:$0xff]  }
 0x476   : > { %6047 = vmatpush1.bf16.msra.mxu1 %v13666_v63  ;;  %v13761_v63 = vld [vmem:[%s19181_s7 + $0x984] ss:$16 sps:$4 sm:$0xff]  }
 0x477   : > { %6048 = vmatprep.subr.bf16.mxu1 %v13674_v49  ;;  %v13759_v49 = vld [vmem:[%s19181_s7 + $0x980] ss:$16 sps:$4 sm:$0xff]  }
 0x478   : > { %6626 = vmatpush1.bf16.msra.mxu0 %v13669_v58  ;;  %v13756_v58 = vld [vmem:[%s19181_s7 + $0x588] ss:$16 sps:$4 sm:$0xff]  }
 0x479   : > { %6627 = vmatprep.subr.bf16.mxu0 %v13677_v3  ;;  %v13764_v3 = vld [vmem:[%s19181_s7 + $0x5ac] ss:$16 sps:$4 sm:$0xff]  }
 0x47a   : > { %6049 = vmatpush1.bf16.msra.mxu1 %v13672_v2  ;;  %v13767_v2 = vld [vmem:[%s19181_s7 + $0x9a4] ss:$16 sps:$4 sm:$0xff]  }
 0x47b   : > { %6050 = vmatprep.subr.bf16.mxu1 %v13680_v43  ;;  %v13765_v43 = vld [vmem:[%s19181_s7 + $0x9a0] ss:$16 sps:$4 sm:$0xff]  }
 0x47c   : > { %6628 = vmatpush1.bf16.msra.mxu0 %v13675_v25  ;;  %v13762_v25 = vld [vmem:[%s19181_s7 + $0x5a8] ss:$16 sps:$4 sm:$0xff]  }
 0x47d   : > { %6629 = vmatprep.subr.bf16.mxu0 %v13683_v53  ;;  %v13770_v53 = vld [vmem:[%s19181_s7 + $0x5cc] ss:$16 sps:$4 sm:$0xff]  }
 0x47e   : > { %6051 = vmatpush1.bf16.msra.mxu1 %v13678_v27  ;;  %v13773_v27 = vld [vmem:[%s19181_s7 + $0x9c4] ss:$16 sps:$4 sm:$0xff]  }
 0x47f   : > { %6346 = vmatprep.subr.bf16.mxu1 %v13686_v20  ;;  %v13771_v20 = vld [vmem:[%s19181_s7 + $0x9c0] ss:$16 sps:$4 sm:$0xff]  }
 0x480   : > { %6630 = vmatpush1.bf16.msra.mxu0 %v13681_v41  ;;  %v13768_v41 = vld [vmem:[%s19181_s7 + $0x5c8] ss:$16 sps:$4 sm:$0xff]  }
 0x481   : > { %6925 = vmatprep.subr.bf16.mxu0 %v13689_v4  ;;  %6069 = vmatmul.mubr.bf16.vlgmr.msra.gmra.mrb[4].mxu1 %v17160_v17  ;;  %v13776_v4 = vld [vmem:[%s19181_s7 + $0x5ec] ss:$16 sps:$4 sm:$0xff]  }
 0x482   : > { %6347 = vmatpush1.bf16.msra.mxu1 %v13684_v10  ;;  %6378 = vmatprep.mubr.bf16.mxu1 %v14565_v50  ;;  %v13779_v10 = vld [vmem:[%s19181_s7 + $0x9e4] ss:$16 sps:$4 sm:$0xff]  }
 0x483   : > { %6648 = vmatmul.mubr.bf16.vlgmr.msra.gmra.mrb[4].mxu0 %v6453_v38  ;;  %6348 = vmatprep.subr.bf16.mxu1 %v13692_v16  ;;  %v13777_v16 = vld [vmem:[%s19181_s7 + $0x9e0] ss:$16 sps:$4 sm:$0xff]  }
 0x484   : > { %6926 = vmatpush1.bf16.msra.mxu0 %v13687_v30  ;;  %6957 = vmatprep.mubr.bf16.mxu0 %v14565_v50  ;;  %v13774_v30 = vld [vmem:[%s19181_s7 + $0x5e8] ss:$16 sps:$4 sm:$0xff]  }
 0x485   : > { %6927 = vmatprep.subr.bf16.mxu0 %v13695_v32  ;;  %v13782_v32 = vld [vmem:[%s19181_s7 + $0x70c] ss:$16 sps:$4 sm:$0xff]  }
 0x486   : > { %6349 = vmatpush1.bf16.msra.mxu1 %v13690_v0  ;;  %v13785_v0 = vld [vmem:[%s19181_s7 + $0xb04] ss:$16 sps:$4 sm:$0xff]  }
 0x487   : > { %6350 = vmatprep.subr.bf16.mxu1 %v13698_v47  ;;  %v13780_v47 = vld [vmem:[%s19181_s7 + $0x708] ss:$16 sps:$4 sm:$0xff]  }
 0x488   : > { %6928 = vmatpush1.bf16.msra.mxu0 %v13693_v14  ;;  %v7073_v14 = vrot.slane %v17160_v17, 4 }
 0x489   : > { %6929 = vmatprep.subr.bf16.mxu0 %v13701_v21  ;;  %v13783_v21 = vld [vmem:[%s19181_s7 + $0xb00] ss:$16 sps:$4 sm:$0xff]  }
 0x48a   : > { %6351 = vmatpush1.bf16.msra.mxu1 %v13696_v42  ;;  %v13788_v42 = vld [vmem:[%s19181_s7 + $0x72c] ss:$16 sps:$4 sm:$0xff]  }
 0x48b   : > { %6352 = vmatprep.subr.bf16.mxu1 %v13704_v26  ;;  %v13786_v26 = vld [vmem:[%s19181_s7 + $0x728] ss:$16 sps:$4 sm:$0xff]  }
 0x48c   : > { %6930 = vmatpush1.bf16.msra.mxu0 %v13699_v18  ;;  %v13791_v18 = vld [vmem:[%s19181_s7 + $0xb24] ss:$16 sps:$4 sm:$0xff]  }
 0x48d   : > { %6931 = vmatprep.subr.bf16.mxu0 %v13707_v8  ;;  %v13789_v8 = vld [vmem:[%s19181_s7 + $0xb20] ss:$16 sps:$4 sm:$0xff]  }
 0x48e   : > { %6353 = vmatpush1.bf16.msra.mxu1 %v13702_v1  ;;  %v13794_v1 = vld [vmem:[%s19181_s7 + $0x74c] ss:$16 sps:$4 sm:$0xff]  }
 0x48f   : > { %6354 = vmatprep.subr.bf16.mxu1 %v13710_v60  ;;  %v13795_v60 = vld [vmem:[%s19181_s7 + $0xb40] ss:$16 sps:$4 sm:$0xff]  }
 0x490   : > { %6932 = vmatpush1.bf16.msra.mxu0 %v13705_v35  ;;  %v13792_v35 = vld [vmem:[%s19181_s7 + $0x748] ss:$16 sps:$4 sm:$0xff]  }
 0x491   : > { %6933 = vmatprep.subr.bf16.mxu0 %v13713_v51  ;;  %v13800_v51 = vld [vmem:[%s19181_s7 + $0x76c] ss:$16 sps:$4 sm:$0xff]  }
 0x492   : > { %6355 = vmatpush1.bf16.msra.mxu1 %v13708_v34  ;;  %v13803_v34 = vld [vmem:[%s19181_s7 + $0xb64] ss:$16 sps:$4 sm:$0xff]  }
 0x493   : > { %6356 = vmatprep.subr.bf16.mxu1 %v13716_v5  ;;  %v13801_v5 = vld [vmem:[%s19181_s7 + $0xb60] ss:$16 sps:$4 sm:$0xff]  }
 0x494   : > { %6934 = vmatpush1.bf16.msra.mxu0 %v13711_v54  ;;  %v13798_v54 = vld [vmem:[%s19181_s7 + $0x768] ss:$16 sps:$4 sm:$0xff]  }
 0x495   : > { %6935 = vmatprep.subr.bf16.mxu0 %v13719_v15  ;;  %v13806_v15 = vld [vmem:[%s19181_s7 + $0x78c] ss:$16 sps:$4 sm:$0xff]  }
 0x496   : > { %6357 = vmatpush1.bf16.msra.mxu1 %v13714_v28  ;;  %v13809_v28 = vld [vmem:[%s19181_s7 + $0xb84] ss:$16 sps:$4 sm:$0xff]  }
 0x497   : > { %6358 = vmatprep.subr.bf16.mxu1 %v13722_v7  ;;  %v13807_v7 = vld [vmem:[%s19181_s7 + $0xb80] ss:$16 sps:$4 sm:$0xff]  }
 0x498   : > { %6936 = vmatpush1.bf16.msra.mxu0 %v13717_v46  ;;  %v13804_v46 = vld [vmem:[%s19181_s7 + $0x788] ss:$16 sps:$4 sm:$0xff]  }
 0x499   : > { %6937 = vmatprep.subr.bf16.mxu0 %v13725_v56  ;;  %v13812_v56 = vld [vmem:[%s19181_s7 + $0x7ac] ss:$16 sps:$4 sm:$0xff]  }
 0x49a   : > { %6359 = vmatpush1.bf16.msra.mxu1 %v13720_v22  ;;  %v13815_v22 = vld [vmem:[%s19181_s7 + $0xba4] ss:$16 sps:$4 sm:$0xff]  }
 0x49b   : > { %6360 = vmatprep.subr.bf16.mxu1 %v13728_v31  ;;  %v13813_v31 = vld [vmem:[%s19181_s7 + $0xba0] ss:$16 sps:$4 sm:$0xff]  }
 0x49c   : > { %6938 = vmatpush1.bf16.msra.mxu0 %v13723_v45  ;;  %v13810_v45 = vld [vmem:[%s19181_s7 + $0x7a8] ss:$16 sps:$4 sm:$0xff]  }
 0x49d   : > { %6939 = vmatprep.subr.bf16.mxu0 %v13731_v19  ;;  %v13818_v19 = vld [vmem:[%s19181_s7 + $0x7cc] ss:$16 sps:$4 sm:$0xff]  }
 0x49e   : > { %6361 = vmatpush1.bf16.msra.mxu1 %v13726_v9  ;;  %v13821_v9 = vld [vmem:[%s19181_s7 + $0xbc4] ss:$16 sps:$4 sm:$0xff]  }
 0x49f   : > { %6656 = vmatprep.subr.bf16.mxu1 %v13734_v52  ;;  %v13819_v52 = vld [vmem:[%s19181_s7 + $0xbc0] ss:$16 sps:$4 sm:$0xff]  }
 0x4a0   : > { %6940 = vmatpush1.bf16.msra.mxu0 %v13729_v36  ;;  %v13816_v36 = vld [vmem:[%s19181_s7 + $0x7c8] ss:$16 sps:$4 sm:$0xff]  }
 0x4a1   : > { %7235 = vmatprep.subr.bf16.mxu0 %v13737_v61  ;;  %6379 = vmatmul.mubr.bf16.vlgmr.msra.gmra.mrb[8].mxu1 %v6143_v57  ;;  %v13749_v57 = vld [vmem:[%s19181_s7 + $0x944] ss:$16 sps:$4 sm:$0xff]   ;;  %v13824_v61 = vld [vmem:[%s19181_s7 + $0x7ec] ss:$16 sps:$4 sm:$0xff]  }
 0x4a2   : > { %6657 = vmatpush1.bf16.msra.mxu1 %v13732_v13  ;;  %6688 = vmatprep.mubr.bf16.mxu1 %v14565_v50  ;;  %v13827_v13 = vld [vmem:[%s19181_s7 + $0xbe4] ss:$16 sps:$4 sm:$0xff]  }
 0x4a3   : > { %6958 = vmatmul.mubr.bf16.vlgmr.msra.gmra.mrb[8].mxu0 %v6763_v11  ;;  %6658 = vmatprep.subr.bf16.mxu1 %v13740_v29  ;;  %v13825_v29 = vld [vmem:[%s19181_s7 + $0xbe0] ss:$16 sps:$4 sm:$0xff]  }
 0x4a4   : > { %7236 = vmatpush1.bf16.msra.mxu0 %v13735_v39  ;;  %7267 = vmatprep.mubr.bf16.mxu0 %v14565_v50  ;;  %v13822_v39 = vld [vmem:[%s19181_s7 + $0x7e8] ss:$16 sps:$4 sm:$0xff]  }
 0x4a5   : > { %7237 = vmatprep.subr.bf16.mxu0 %v13743_v59  ;;  %v13830_v59 = vld [vmem:[%s19181_s7 + $0x90c] ss:$16 sps:$4 sm:$0xff]  }
 0x4a6   : > { %6659 = vmatpush1.bf16.msra.mxu1 %v13738_v24  ;;  %v13833_v24 = vld [vmem:[%s19181_s7 + $0xd04] ss:$16 sps:$4 sm:$0xff]  }
 0x4a7   : > { %6660 = vmatprep.subr.bf16.mxu1 %v13746_v44  ;;  %v13828_v44 = vld [vmem:[%s19181_s7 + $0x908] ss:$16 sps:$4 sm:$0xff]  }
 0x4a8   : > { %7238 = vmatpush1.bf16.msra.mxu0 %v13741_v55  ;;  %v7383_v55 = vrot.slane %v17160_v17, 5 }
 0x4a9   : > { %7239 = vmatprep.subr.bf16.mxu0 %v13749_v57  ;;  %v13831_v57 = vld [vmem:[%s19181_s7 + $0xd00] ss:$16 sps:$4 sm:$0xff]  }
 0x4aa   : > { %6661 = vmatpush1.bf16.msra.mxu1 %v13744_v33  ;;  %v13836_v33 = vld [vmem:[%s19181_s7 + $0x92c] ss:$16 sps:$4 sm:$0xff]  }
 0x4ab   : > { %6662 = vmatprep.subr.bf16.mxu1 %v13752_v6  ;;  %v13834_v6 = vld [vmem:[%s19181_s7 + $0x928] ss:$16 sps:$4 sm:$0xff]  }
 0x4ac   : > { %7240 = vmatpush1.bf16.msra.mxu0 %v13747_v40  ;;  %v13839_v40 = vld [vmem:[%s19181_s7 + $0xd24] ss:$16 sps:$4 sm:$0xff]  }
 0x4ad   : > { %7241 = vmatprep.subr.bf16.mxu0 %v13755_v48  ;;  %v13837_v48 = vld [vmem:[%s19181_s7 + $0xd20] ss:$16 sps:$4 sm:$0xff]  }
 0x4ae   : > { %6663 = vmatpush1.bf16.msra.mxu1 %v13750_v12  ;;  %v13842_v12 = vld [vmem:[%s19181_s7 + $0x94c] ss:$16 sps:$4 sm:$0xff]  }
 0x4af   : > { %6664 = vmatprep.subr.bf16.mxu1 %v13758_v37  ;;  %v13843_v37 = vld [vmem:[%s19181_s7 + $0xd40] ss:$16 sps:$4 sm:$0xff]  }
 0x4b0   : > { %7242 = vmatpush1.bf16.msra.mxu0 %v13753_v62  ;;  %v13840_v62 = vld [vmem:[%s19181_s7 + $0x948] ss:$16 sps:$4 sm:$0xff]  }
 0x4b1   : > { %7243 = vmatprep.subr.bf16.mxu0 %v13761_v63  ;;  %v13848_v63 = vld [vmem:[%s19181_s7 + $0x96c] ss:$16 sps:$4 sm:$0xff]  }
 0x4b2   : > { %6665 = vmatpush1.bf16.msra.mxu1 %v13756_v58  ;;  %v13851_v58 = vld [vmem:[%s19181_s7 + $0xd64] ss:$16 sps:$4 sm:$0xff]  }
 0x4b3   : > { %6666 = vmatprep.subr.bf16.mxu1 %v13764_v3  ;;  %v13849_v3 = vld [vmem:[%s19181_s7 + $0xd60] ss:$16 sps:$4 sm:$0xff]  }
 0x4b4   : > { %7244 = vmatpush1.bf16.msra.mxu0 %v13759_v49  ;;  %v13846_v49 = vld [vmem:[%s19181_s7 + $0x968] ss:$16 sps:$4 sm:$0xff]  }
 0x4b5   : > { %7245 = vmatprep.subr.bf16.mxu0 %v13767_v2  ;;  %v13854_v2 = vld [vmem:[%s19181_s7 + $0x98c] ss:$16 sps:$4 sm:$0xff]  }
 0x4b6   : > { %6667 = vmatpush1.bf16.msra.mxu1 %v13762_v25  ;;  %v13857_v25 = vld [vmem:[%s19181_s7 + $0xd84] ss:$16 sps:$4 sm:$0xff]  }
 0x4b7   : > { %6668 = vmatprep.subr.bf16.mxu1 %v13770_v53  ;;  %v13855_v53 = vld [vmem:[%s19181_s7 + $0xd80] ss:$16 sps:$4 sm:$0xff]  }
 0x4b8   : > { %7246 = vmatpush1.bf16.msra.mxu0 %v13765_v43  ;;  %v13852_v43 = vld [vmem:[%s19181_s7 + $0x988] ss:$16 sps:$4 sm:$0xff]  }
 0x4b9   : > { %7247 = vmatprep.subr.bf16.mxu0 %v13773_v27  ;;  %v13860_v27 = vld [vmem:[%s19181_s7 + $0x9ac] ss:$16 sps:$4 sm:$0xff]  }
 0x4ba   : > { %6669 = vmatpush1.bf16.msra.mxu1 %v13768_v41  ;;  %v13863_v41 = vld [vmem:[%s19181_s7 + $0xda4] ss:$16 sps:$4 sm:$0xff]  }
 0x4bb   : > { %6670 = vmatprep.subr.bf16.mxu1 %v13776_v4  ;;  %v13861_v4 = vld [vmem:[%s19181_s7 + $0xda0] ss:$16 sps:$4 sm:$0xff]  }
 0x4bc   : > { %7248 = vmatpush1.bf16.msra.mxu0 %v13771_v20  ;;  %v13858_v20 = vld [vmem:[%s19181_s7 + $0x9a8] ss:$16 sps:$4 sm:$0xff]  }
 0x4bd   : > { %7249 = vmatprep.subr.bf16.mxu0 %v13779_v10  ;;  %v13866_v10 = vld [vmem:[%s19181_s7 + $0x9cc] ss:$16 sps:$4 sm:$0xff]  }
 0x4be   : > { %6671 = vmatpush1.bf16.msra.mxu1 %v13774_v30  ;;  %v13869_v30 = vld [vmem:[%s19181_s7 + $0xdc4] ss:$16 sps:$4 sm:$0xff]  }
 0x4bf   : > { %6966 = vmatprep.subr.bf16.mxu1 %v13782_v32  ;;  %v13867_v32 = vld [vmem:[%s19181_s7 + $0xdc0] ss:$16 sps:$4 sm:$0xff]  }
 0x4c0   : > { %7250 = vmatpush1.bf16.msra.mxu0 %v13777_v16  ;;  %v13864_v16 = vld [vmem:[%s19181_s7 + $0x9c8] ss:$16 sps:$4 sm:$0xff]  }
 0x4c1   : > { %7545 = vmatprep.subr.bf16.mxu0 %v13785_v0  ;;  %6689 = vmatmul.mubr.bf16.vlgmr.msra.gmra.mrb[12].mxu1 %v6453_v38  ;;  %v13797_v38 = vld [vmem:[%s19181_s7 + $0xb44] ss:$16 sps:$4 sm:$0xff]   ;;  %v13872_v0 = vld [vmem:[%s19181_s7 + $0x9ec] ss:$16 sps:$4 sm:$0xff]  }
 0x4c2   : > { %6967 = vmatpush1.bf16.msra.mxu1 %v13780_v47  ;;  %6998 = vmatprep.mubr.bf16.mxu1 %v14565_v50  ;;  %v13875_v47 = vld [vmem:[%s19181_s7 + $0xde4] ss:$16 sps:$4 sm:$0xff]  }
 0x4c3   : > { %7268 = vmatmul.mubr.bf16.vlgmr.msra.gmra.mrb[12].mxu0 %v7073_v14  ;;  %6968 = vmatprep.subr.bf16.mxu1 %v13788_v42  ;;  %v13873_v42 = vld [vmem:[%s19181_s7 + $0xde0] ss:$16 sps:$4 sm:$0xff]  }
 0x4c4   : > { %7546 = vmatpush1.bf16.msra.mxu0 %v13783_v21  ;;  %7577 = vmatprep.mubr.bf16.mxu0 %v14565_v50  ;;  %v13870_v21 = vld [vmem:[%s19181_s7 + $0x9e8] ss:$16 sps:$4 sm:$0xff]  }
 0x4c5   : > { %7547 = vmatprep.subr.bf16.mxu0 %v13791_v18  ;;  %v13878_v18 = vld [vmem:[%s19181_s7 + $0xb0c] ss:$16 sps:$4 sm:$0xff]  }
 0x4c6   : > { %6969 = vmatpush1.bf16.msra.mxu1 %v13786_v26  ;;  %v13881_v26 = vld [vmem:[%s19181_s7 + $0xf04] ss:$16 sps:$4 sm:$0xff]  }
 0x4c7   : > { %6970 = vmatprep.subr.bf16.mxu1 %v13794_v1  ;;  %v13876_v1 = vld [vmem:[%s19181_s7 + $0xb08] ss:$16 sps:$4 sm:$0xff]  }
 0x4c8   : > { %7548 = vmatpush1.bf16.msra.mxu0 %v13789_v8  ;;  %v7693_v8 = vrot.slane %v17160_v17, 6 }
 0x4c9   : > { %7549 = vmatprep.subr.bf16.mxu0 %v13797_v38  ;;  %v13879_v38 = vld [vmem:[%s19181_s7 + $0xf00] ss:$16 sps:$4 sm:$0xff]  }
 0x4ca   : > { %6971 = vmatpush1.bf16.msra.mxu1 %v13792_v35  ;;  %v13884_v35 = vld [vmem:[%s19181_s7 + $0xb2c] ss:$16 sps:$4 sm:$0xff]  }
 0x4cb   : > { %6972 = vmatprep.subr.bf16.mxu1 %v13800_v51  ;;  %v13882_v51 = vld [vmem:[%s19181_s7 + $0xb28] ss:$16 sps:$4 sm:$0xff]  }
 0x4cc   : > { %7550 = vmatpush1.bf16.msra.mxu0 %v13795_v60  ;;  %v13887_v60 = vld [vmem:[%s19181_s7 + $0xf24] ss:$16 sps:$4 sm:$0xff]  }
 0x4cd   : > { %7551 = vmatprep.subr.bf16.mxu0 %v13803_v34  ;;  %v13885_v34 = vld [vmem:[%s19181_s7 + $0xf20] ss:$16 sps:$4 sm:$0xff]  }
 0x4ce   : > { %6973 = vmatpush1.bf16.msra.mxu1 %v13798_v54  ;;  %v13890_v54 = vld [vmem:[%s19181_s7 + $0xb4c] ss:$16 sps:$4 sm:$0xff]  }
 0x4cf   : > { %6974 = vmatprep.subr.bf16.mxu1 %v13806_v15  ;;  %v13891_v15 = vld [vmem:[%s19181_s7 + $0xf40] ss:$16 sps:$4 sm:$0xff]  }
 0x4d0   : > { %7552 = vmatpush1.bf16.msra.mxu0 %v13801_v5  ;;  %v13888_v5 = vld [vmem:[%s19181_s7 + $0xb48] ss:$16 sps:$4 sm:$0xff]  }
 0x4d1   : > { %7553 = vmatprep.subr.bf16.mxu0 %v13809_v28  ;;  %v13896_v28 = vld [vmem:[%s19181_s7 + $0xb6c] ss:$16 sps:$4 sm:$0xff]  }
 0x4d2   : > { %6975 = vmatpush1.bf16.msra.mxu1 %v13804_v46  ;;  %v13899_v46 = vld [vmem:[%s19181_s7 + $0xf64] ss:$16 sps:$4 sm:$0xff]  }
 0x4d3   : > { %6976 = vmatprep.subr.bf16.mxu1 %v13812_v56  ;;  %v13897_v56 = vld [vmem:[%s19181_s7 + $0xf60] ss:$16 sps:$4 sm:$0xff]  }
 0x4d4   : > { %7554 = vmatpush1.bf16.msra.mxu0 %v13807_v7  ;;  %v13894_v7 = vld [vmem:[%s19181_s7 + $0xb68] ss:$16 sps:$4 sm:$0xff]  }
 0x4d5   : > { %7555 = vmatprep.subr.bf16.mxu0 %v13815_v22  ;;  %v13902_v22 = vld [vmem:[%s19181_s7 + $0xb8c] ss:$16 sps:$4 sm:$0xff]  }
 0x4d6   : > { %6977 = vmatpush1.bf16.msra.mxu1 %v13810_v45  ;;  %v13905_v45 = vld [vmem:[%s19181_s7 + $0xf84] ss:$16 sps:$4 sm:$0xff]  }
 0x4d7   : > { %6978 = vmatprep.subr.bf16.mxu1 %v13818_v19  ;;  %v13903_v19 = vld [vmem:[%s19181_s7 + $0xf80] ss:$16 sps:$4 sm:$0xff]  }
 0x4d8   : > { %7556 = vmatpush1.bf16.msra.mxu0 %v13813_v31  ;;  %v13900_v31 = vld [vmem:[%s19181_s7 + $0xb88] ss:$16 sps:$4 sm:$0xff]  }
 0x4d9   : > { %7557 = vmatprep.subr.bf16.mxu0 %v13821_v9  ;;  %v13908_v9 = vld [vmem:[%s19181_s7 + $0xbac] ss:$16 sps:$4 sm:$0xff]  }
 0x4da   : > { %6979 = vmatpush1.bf16.msra.mxu1 %v13816_v36  ;;  %v13911_v36 = vld [vmem:[%s19181_s7 + $0xfa4] ss:$16 sps:$4 sm:$0xff]  }
 0x4db   : > { %6980 = vmatprep.subr.bf16.mxu1 %v13824_v61  ;;  %v13909_v61 = vld [vmem:[%s19181_s7 + $0xfa0] ss:$16 sps:$4 sm:$0xff]  }
 0x4dc   : > { %7558 = vmatpush1.bf16.msra.mxu0 %v13819_v52  ;;  %v13906_v52 = vld [vmem:[%s19181_s7 + $0xba8] ss:$16 sps:$4 sm:$0xff]  }
 0x4dd   : > { %7559 = vmatprep.subr.bf16.mxu0 %v13827_v13  ;;  %v13914_v13 = vld [vmem:[%s19181_s7 + $0xbcc] ss:$16 sps:$4 sm:$0xff]  }
 0x4de   : > { %6981 = vmatpush1.bf16.msra.mxu1 %v13822_v39  ;;  %v13917_v39 = vld [vmem:[%s19181_s7 + $0xfc4] ss:$16 sps:$4 sm:$0xff]  }
 0x4df   : > { %7276 = vmatprep.subr.bf16.mxu1 %v13830_v59  ;;  %v13915_v59 = vld [vmem:[%s19181_s7 + $0xfc0] ss:$16 sps:$4 sm:$0xff]  }
 0x4e0   : > { %7560 = vmatpush1.bf16.msra.mxu0 %v13825_v29  ;;  %v13912_v29 = vld [vmem:[%s19181_s7 + $0xbc8] ss:$16 sps:$4 sm:$0xff]  }
 0x4e1   : > { %7855 = vmatprep.subr.bf16.mxu0 %v13833_v24  ;;  %6999 = vmatmul.mubr.bf16.vlgmr.msra.gmra.mrb[16].mxu1 %v6763_v11  ;;  %v13845_v11 = vld [vmem:[%s19181_s7 + $0xd44] ss:$16 sps:$4 sm:$0xff]   ;;  %v13920_v24 = vld [vmem:[%s19181_s7 + $0xbec] ss:$16 sps:$4 sm:$0xff]  }
 0x4e2   : > { %7277 = vmatpush1.bf16.msra.mxu1 %v13828_v44  ;;  %7308 = vmatprep.mubr.bf16.mxu1 %v14565_v50  ;;  %v13923_v44 = vld [vmem:[%s19181_s7 + $0xfe4] ss:$16 sps:$4 sm:$0xff]  }
 0x4e3   : > { %7578 = vmatmul.mubr.bf16.vlgmr.msra.gmra.mrb[16].mxu0 %v7383_v55  ;;  %7278 = vmatprep.subr.bf16.mxu1 %v13836_v33  ;;  %v13921_v33 = vld [vmem:[%s19181_s7 + $0xfe0] ss:$16 sps:$4 sm:$0xff]  }
 0x4e4   : > { %7856 = vmatpush1.bf16.msra.mxu0 %v13831_v57  ;;  %7887 = vmatprep.mubr.bf16.mxu0 %v14565_v50  ;;  %v13918_v57 = vld [vmem:[%s19181_s7 + $0xbe8] ss:$16 sps:$4 sm:$0xff]  }
 0x4e5   : > { %7857 = vmatprep.subr.bf16.mxu0 %v13839_v40  ;;  %v13926_v40 = vld [vmem:[%s19181_s7 + $0xd0c] ss:$16 sps:$4 sm:$0xff]  }
 0x4e6   : > { %7279 = vmatpush1.bf16.msra.mxu1 %v13834_v6  ;;  %v13929_v6 = vld [vmem:[%s19181_s7 + $0x4] ss:$16 sps:$4 sm:$0xff]  }
 0x4e7   : > { %7280 = vmatprep.subr.bf16.mxu1 %v13842_v12  ;;  %v13924_v12 = vld [vmem:[%s19181_s7 + $0xd08] ss:$16 sps:$4 sm:$0xff]  }
 0x4e8   : > { %7858 = vmatpush1.bf16.msra.mxu0 %v13837_v48  ;;  %v8003_v48 = vrot.slane %v17160_v17, 7  ;;  %v14034_v17 = vld [vmem:[%s19181_s7 + $0x4c] ss:$16 sps:$4 sm:$0xff]  }
 0x4e9   : > { %7859 = vmatprep.subr.bf16.mxu0 %v13845_v11  ;;  %v13927_v11 = vld [vmem:[%s19181_s7] ss:$16 sps:$4 sm:$0xff]  }
 0x4ea   : > { %7281 = vmatpush1.bf16.msra.mxu1 %v13840_v62  ;;  %v13932_v62 = vld [vmem:[%s19181_s7 + $0xd2c] ss:$16 sps:$4 sm:$0xff]  }
 0x4eb   : > { %7282 = vmatprep.subr.bf16.mxu1 %v13848_v63  ;;  %v13930_v63 = vld [vmem:[%s19181_s7 + $0xd28] ss:$16 sps:$4 sm:$0xff]  }
 0x4ec   : > { %7860 = vmatpush1.bf16.msra.mxu0 %v13843_v37  ;;  %v13935_v37 = vld [vmem:[%s19181_s7 + $0x24] ss:$16 sps:$4 sm:$0xff]  }
 0x4ed   : > { %7861 = vmatprep.subr.bf16.mxu0 %v13851_v58  ;;  %v13933_v58 = vld [vmem:[%s19181_s7 + $0x20] ss:$16 sps:$4 sm:$0xff]  }
 0x4ee   : > { %7283 = vmatpush1.bf16.msra.mxu1 %v13846_v49  ;;  %v13938_v49 = vld [vmem:[%s19181_s7 + $0xd4c] ss:$16 sps:$4 sm:$0xff]  }
 0x4ef   : > { %7284 = vmatprep.subr.bf16.mxu1 %v13854_v2  ;;  %v13939_v2 = vld [vmem:[%s19181_s7 + $0x40] ss:$16 sps:$4 sm:$0xff]  }
 0x4f0   : > { %7862 = vmatpush1.bf16.msra.mxu0 %v13849_v3  ;;  %v13936_v3 = vld [vmem:[%s19181_s7 + $0xd48] ss:$16 sps:$4 sm:$0xff]  }
 0x4f1   : > { %7863 = vmatprep.subr.bf16.mxu0 %v13857_v25  ;;  %v13944_v25 = vld [vmem:[%s19181_s7 + $0xd6c] ss:$16 sps:$4 sm:$0xff]  }
 0x4f2   : > { %7285 = vmatpush1.bf16.msra.mxu1 %v13852_v43  ;;  %v13947_v43 = vld [vmem:[%s19181_s7 + $0x64] ss:$16 sps:$4 sm:$0xff]  }
 0x4f3   : > { %7286 = vmatprep.subr.bf16.mxu1 %v13860_v27  ;;  %v13945_v27 = vld [vmem:[%s19181_s7 + $0x60] ss:$16 sps:$4 sm:$0xff]  }
 0x4f4   : > { %7864 = vmatpush1.bf16.msra.mxu0 %v13855_v53  ;;  %v13942_v53 = vld [vmem:[%s19181_s7 + $0xd68] ss:$16 sps:$4 sm:$0xff]  }
 0x4f5   : > { %7865 = vmatprep.subr.bf16.mxu0 %v13863_v41  ;;  %v13950_v41 = vld [vmem:[%s19181_s7 + $0xd8c] ss:$16 sps:$4 sm:$0xff]  }
 0x4f6   : > { %7287 = vmatpush1.bf16.msra.mxu1 %v13858_v20  ;;  %v13953_v20 = vld [vmem:[%s19181_s7 + $0x84] ss:$16 sps:$4 sm:$0xff]  }
 0x4f7   : > { %7288 = vmatprep.subr.bf16.mxu1 %v13866_v10  ;;  %v13951_v10 = vld [vmem:[%s19181_s7 + $0x80] ss:$16 sps:$4 sm:$0xff]  }
 0x4f8   : > { %7866 = vmatpush1.bf16.msra.mxu0 %v13861_v4  ;;  %v13948_v4 = vld [vmem:[%s19181_s7 + $0xd88] ss:$16 sps:$4 sm:$0xff]  }
 0x4f9   : > { %7867 = vmatprep.subr.bf16.mxu0 %v13869_v30  ;;  %v13956_v30 = vld [vmem:[%s19181_s7 + $0xdac] ss:$16 sps:$4 sm:$0xff]  }
 0x4fa   : > { %7289 = vmatpush1.bf16.msra.mxu1 %v13864_v16  ;;  %v13959_v16 = vld [vmem:[%s19181_s7 + $0xa4] ss:$16 sps:$4 sm:$0xff]  }
 0x4fb   : > { %7290 = vmatprep.subr.bf16.mxu1 %v13872_v0  ;;  %v13957_v0 = vld [vmem:[%s19181_s7 + $0xa0] ss:$16 sps:$4 sm:$0xff]  }
 0x4fc   : > { %7868 = vmatpush1.bf16.msra.mxu0 %v13867_v32  ;;  %v13954_v32 = vld [vmem:[%s19181_s7 + $0xda8] ss:$16 sps:$4 sm:$0xff]  }
 0x4fd   : > { %7869 = vmatprep.subr.bf16.mxu0 %v13875_v47  ;;  %v13962_v47 = vld [vmem:[%s19181_s7 + $0xdcc] ss:$16 sps:$4 sm:$0xff]  }
 0x4fe   : > { %7291 = vmatpush1.bf16.msra.mxu1 %v13870_v21  ;;  %v13965_v21 = vld [vmem:[%s19181_s7 + $0xc4] ss:$16 sps:$4 sm:$0xff]  }
 0x4ff   : > { %7586 = vmatprep.subr.bf16.mxu1 %v13878_v18 }
 0x500   : > { %7870 = vmatpush1.bf16.msra.mxu0 %v13873_v42 }
 0x501   : > { %8165 = vmatprep.subr.bf16.mxu0 %v13881_v26  ;;  %7309 = vmatmul.mubr.bf16.vlgmr.msra.gmra.mrb[20].mxu1 %v7073_v14  ;;  %v13893_v14 = vld [vmem:[%s19181_s7 + $0xf44] ss:$16 sps:$4 sm:$0xff]  }
 0x502   : > { %7587 = vmatpush1.bf16.msra.mxu1 %v13876_v1  ;;  %7618 = vmatprep.mubr.bf16.mxu1 %v14565_v50 }
 0x503   : > { %7888 = vmatmul.mubr.bf16.vlgmr.msra.gmra.mrb[20].mxu0 %v7693_v8  ;;  %7588 = vmatprep.subr.bf16.mxu1 %v13884_v35 }
 0x504   : > { %8166 = vmatpush1.bf16.msra.mxu0 %v13879_v38  ;;  %8197 = vmatprep.mubr.bf16.mxu0 %v14565_v50  ;;  %v13960_v38 = vld [vmem:[%s19181_s7 + $0xdc8] ss:$16 sps:$4 sm:$0xff]  }
 0x505   : > { %8167 = vmatprep.subr.bf16.mxu0 %v13887_v60 }
 0x506   : > { %7589 = vmatpush1.bf16.msra.mxu1 %v13882_v51  ;;  %v13963_v51 = vld [vmem:[%s19181_s7 + $0xc0] ss:$16 sps:$4 sm:$0xff]  }
 0x507   : > { %7590 = vmatprep.subr.bf16.mxu1 %v13890_v54 }
 0x508   : > { %8168 = vmatpush1.bf16.msra.mxu0 %v13885_v34  ;;  %v13968_v34 = vld [vmem:[%s19181_s7 + $0xdec] ss:$16 sps:$4 sm:$0xff]  }
 0x509   : > { %8169 = vmatprep.subr.bf16.mxu0 %v13893_v14 }
 0x50a   : > { %7591 = vmatpush1.bf16.msra.mxu1 %v13888_v5  ;;  %v13971_v5 = vld [vmem:[%s19181_s7 + $0xe4] ss:$16 sps:$4 sm:$0xff]  }
 0x50b   : > { %7592 = vmatprep.subr.bf16.mxu1 %v13896_v28  ;;  %v13969_v28 = vld [vmem:[%s19181_s7 + $0xe0] ss:$16 sps:$4 sm:$0xff]  }
 0x50c   : > { %8170 = vmatpush1.bf16.msra.mxu0 %v13891_v15  ;;  %v13966_v15 = vld [vmem:[%s19181_s7 + $0xde8] ss:$16 sps:$4 sm:$0xff]  }
 0x50d   : > { %8171 = vmatprep.subr.bf16.mxu0 %v13899_v46  ;;  %v13974_v46 = vld [vmem:[%s19181_s7 + $0xf0c] ss:$16 sps:$4 sm:$0xff]  }
 0x50e   : > { %7593 = vmatpush1.bf16.msra.mxu1 %v13894_v7  ;;  %v13977_v7 = vld [vmem:[%s19181_s7 + $0x204] ss:$16 sps:$4 sm:$0xff]  }
 0x50f   : > { %7594 = vmatprep.subr.bf16.mxu1 %v13902_v22  ;;  %v13975_v22 = vld [vmem:[%s19181_s7 + $0x200] ss:$16 sps:$4 sm:$0xff]  }
 0x510   : > { %8172 = vmatpush1.bf16.msra.mxu0 %v13897_v56  ;;  %v13972_v56 = vld [vmem:[%s19181_s7 + $0xf08] ss:$16 sps:$4 sm:$0xff]  }
 0x511   : > { %8173 = vmatprep.subr.bf16.mxu0 %v13905_v45  ;;  %v13980_v45 = vld [vmem:[%s19181_s7 + $0xf2c] ss:$16 sps:$4 sm:$0xff]  }
 0x512   : > { %7595 = vmatpush1.bf16.msra.mxu1 %v13900_v31  ;;  %v13983_v31 = vld [vmem:[%s19181_s7 + $0x224] ss:$16 sps:$4 sm:$0xff]  }
 0x513   : > { %7596 = vmatprep.subr.bf16.mxu1 %v13908_v9  ;;  %v13981_v9 = vld [vmem:[%s19181_s7 + $0x220] ss:$16 sps:$4 sm:$0xff]  }
 0x514   : > { %8174 = vmatpush1.bf16.msra.mxu0 %v13903_v19  ;;  %v13978_v19 = vld [vmem:[%s19181_s7 + $0xf28] ss:$16 sps:$4 sm:$0xff]  }
 0x515   : > { %8175 = vmatprep.subr.bf16.mxu0 %v13911_v36  ;;  %v13986_v36 = vld [vmem:[%s19181_s7 + $0xf4c] ss:$16 sps:$4 sm:$0xff]  }
 0x516   : > { %7597 = vmatpush1.bf16.msra.mxu1 %v13906_v52  ;;  %v13984_v52 = vld [vmem:[%s19181_s7 + $0xf48] ss:$16 sps:$4 sm:$0xff]  }
 0x517   : > { %7598 = vmatprep.subr.bf16.mxu1 %v13914_v13  ;;  %v13992_v13 = vld [vmem:[%s19181_s7 + $0xf6c] ss:$16 sps:$4 sm:$0xff]  }
 0x518   : > { %8176 = vmatpush1.bf16.msra.mxu0 %v13909_v61  ;;  %v13987_v61 = vld [vmem:[%s19181_s7 + $0x240] ss:$16 sps:$4 sm:$0xff]  }
 0x519   : > { %8177 = vmatprep.subr.bf16.mxu0 %v13917_v39  ;;  %v13995_v39 = vld [vmem:[%s19181_s7 + $0x264] ss:$16 sps:$4 sm:$0xff]  }
 0x51a   : > { %7599 = vmatpush1.bf16.msra.mxu1 %v13912_v29  ;;  %v13990_v29 = vld [vmem:[%s19181_s7 + $0xf68] ss:$16 sps:$4 sm:$0xff]  }
 0x51b   : > { %7600 = vmatprep.subr.bf16.mxu1 %v13920_v24  ;;  %v13998_v24 = vld [vmem:[%s19181_s7 + $0xf8c] ss:$16 sps:$4 sm:$0xff]  }
 0x51c   : > { %8178 = vmatpush1.bf16.msra.mxu0 %v13915_v59  ;;  %v13993_v59 = vld [vmem:[%s19181_s7 + $0x260] ss:$16 sps:$4 sm:$0xff]  }
 0x51d   : > { %8179 = vmatprep.subr.bf16.mxu0 %v13923_v44  ;;  %v14001_v44 = vld [vmem:[%s19181_s7 + $0x284] ss:$16 sps:$4 sm:$0xff]  }
 0x51e   : > { %7601 = vmatpush1.bf16.msra.mxu1 %v13918_v57  ;;  %v13996_v57 = vld [vmem:[%s19181_s7 + $0xf88] ss:$16 sps:$4 sm:$0xff]  }
 0x51f   : > { %7896 = vmatprep.subr.bf16.mxu1 %v13926_v40  ;;  %v14004_v40 = vld [vmem:[%s19181_s7 + $0xfac] ss:$16 sps:$4 sm:$0xff]  }
 0x520   : > { %8180 = vmatpush1.bf16.msra.mxu0 %v13921_v33  ;;  %v13999_v33 = vld [vmem:[%s19181_s7 + $0x280] ss:$16 sps:$4 sm:$0xff]  }
 0x521   : > { %8407 = vmatprep.subr.bf16.mxu0 %v13929_v6  ;;  %7619 = vmatmul.mubr.bf16.vlgmr.msra.gmra.mrb[24].mxu1 %v7383_v55  ;;  %v13941_v55 = vld [vmem:[%s19181_s7 + $0x44] ss:$16 sps:$4 sm:$0xff]  }
 0x522   : > { %7897 = vmatpush1.bf16.msra.mxu1 %v13924_v12  ;;  %7928 = vmatprep.mubr.bf16.mxu1 %v14565_v50  ;;  %v14007_v6 = vld [vmem:[%s19181_s7 + $0x2a4] ss:$16 sps:$4 sm:$0xff]   ;;  %v14002_v12 = vld [vmem:[%s19181_s7 + $0xfa8] ss:$16 sps:$4 sm:$0xff]  }
 0x523   : > { %8198 = vmatmul.mubr.bf16.vlgmr.msra.gmra.mrb[24].mxu0 %v8003_v48  ;;  %7898 = vmatprep.subr.bf16.mxu1 %v13932_v62  ;;  %v14010_v62 = vld [vmem:[%s19181_s7 + $0xfcc] ss:$16 sps:$4 sm:$0xff]  }
 0x524   : > { %8408 = vmatpush1.bf16.msra.mxu0 %v13927_v11  ;;  %8439 = vmatprep.mubr.bf16.mxu0 %v14565_v50  ;;  %v14005_v11 = vld [vmem:[%s19181_s7 + $0x2a0] ss:$16 sps:$4 sm:$0xff]  }
 0x525   : > { %8409 = vmatprep.subr.bf16.mxu0 %v13935_v37  ;;  %v14013_v37 = vld [vmem:[%s19181_s7 + $0x2c4] ss:$16 sps:$4 sm:$0xff]  }
 0x526   : > { %7899 = vmatpush1.bf16.msra.mxu1 %v13930_v63 }
 0x527   : > { %7900 = vmatprep.subr.bf16.mxu1 %v13938_v49  ;;  %v14008_v49 = vld [vmem:[%s19181_s7 + $0xfc8] ss:$16 sps:$4 sm:$0xff]  }
 0x528   : > { %8410 = vmatpush1.bf16.msra.mxu0 %v13933_v58 }
 0x529   : > { %8411 = vmatprep.subr.bf16.mxu0 %v13941_v55  ;;  %v14011_v55 = vld [vmem:[%s19181_s7 + $0x2c0] ss:$16 sps:$4 sm:$0xff]  }
 0x52a   : > { %7901 = vmatpush1.bf16.msra.mxu1 %v13936_v3 }
 0x52b   : > { %7902 = vmatprep.subr.bf16.mxu1 %v13944_v25 }
 0x52c   : > { %8412 = vmatpush1.bf16.msra.mxu0 %v13939_v2 }
 0x52d   : > { %8413 = vmatprep.subr.bf16.mxu0 %v13947_v43 }
 0x52e   : > { %7903 = vmatpush1.bf16.msra.mxu1 %v13942_v53 }
 0x52f   : > { %7904 = vmatprep.subr.bf16.mxu1 %v13950_v41  ;;  %v14016_v41 = vld [vmem:[%s19181_s7 + $0xfec] ss:$16 sps:$4 sm:$0xff]  }
 0x530   : > { %8414 = vmatpush1.bf16.msra.mxu0 %v13945_v27 }
 0x531   : > { %8415 = vmatprep.subr.bf16.mxu0 %v13953_v20  ;;  %v14019_v20 = vld [vmem:[%s19181_s7 + $0x2e4] ss:$16 sps:$4 sm:$0xff]  }
 0x532   : > { %7905 = vmatpush1.bf16.msra.mxu1 %v13948_v4  ;;  %v14014_v4 = vld [vmem:[%s19181_s7 + $0xfe8] ss:$16 sps:$4 sm:$0xff]  }
 0x533   : > { %7906 = vmatprep.subr.bf16.mxu1 %v13956_v30  ;;  %v14022_v30 = vld [vmem:[%s19181_s7 + $0xc] ss:$16 sps:$4 sm:$0xff]  }
 0x534   : > { %8416 = vmatpush1.bf16.msra.mxu0 %v13951_v10  ;;  %v17869_v42 = vpop.f32.mrb[0].mxu1  ;;  %v14017_v10 = vld [vmem:[%s19181_s7 + $0x2e0] ss:$16 sps:$4 sm:$0xff]  }
 0x535   : > { %8417 = vmatprep.subr.bf16.mxu0 %v13959_v16  ;;  %v17873_v26 = vpop.f32.mrb[1].mxu1  ;;  %v14025_v16 = vld [vmem:[%s19181_s7 + $0x404] ss:$16 sps:$4 sm:$0xff]  }
 0x536   : > { %v17871_v18 = vpop.f32.mrb[0].mxu0  ;;  %v6033_v35 = vpop.f32.mrb[2].mxu1  ;;  %7907 = vmatpush1.bf16.msra.mxu1 %v13954_v32  ;;  %v14020_v32 = vld [vmem:[%s19181_s7 + $0x8] ss:$16 sps:$4 sm:$0xff]  }
 0x537   : > { %v17875_v1 = vpop.f32.mrb[1].mxu0  ;;  %v6034_v54 = vpop.f32.mrb[3].mxu1  ;;  %7908 = vmatprep.subr.bf16.mxu1 %v13962_v47  ;;  %v8490_v47 = vrot.slane %v17145_v23, 1  ;;  %v14026_v35 = vld [vmem:[%s19181_s7 + $0x28] ss:$16 sps:$4 sm:$0xff]  }
 0x538   : > { %v6343_v60 = vpop.f32.mrb[2].mxu0  ;;  %8418 = vmatpush1.bf16.msra.mxu0 %v13957_v0  ;;  %v14023_v0 = vld [vmem:[%s19181_s7 + $0x400] ss:$16 sps:$4 sm:$0xff]   ;;  %v14040_v54 = vld [vmem:[%s19181_s7 + $0x6c] ss:$16 sps:$4 sm:$0xff]  }
 0x539   : > { %v6344_v14 = vpop.f32.mrb[3].mxu0  ;;  %8419 = vmatprep.subr.bf16.mxu0 %v13965_v21  ;;  %v14028_v21 = vld [vmem:[%s19181_s7 + $0x2c] ss:$16 sps:$4 sm:$0xff]   ;;  %v14029_v60 = vld [vmem:[%s19181_s7 + $0x420] ss:$16 sps:$4 sm:$0xff]  }
 0x53a   : > { %7909 = vmatpush1.bf16.msra.mxu1 %v13960_v38  ;;  %v14031_v38 = vld [vmem:[%s19181_s7 + $0x424] ss:$16 sps:$4 sm:$0xff]  }
 0x53b   : > { %7910 = vmatprep.subr.bf16.mxu1 %v13968_v34  ;;  %v14035_v34 = vld [vmem:[%s19181_s7 + $0x440] ss:$16 sps:$4 sm:$0xff]   ;;  %v14043_v14 = vld [vmem:[%s19181_s7 + $0x464] ss:$16 sps:$4 sm:$0xff]  }
 0x53c   : > { %8420 = vmatpush1.bf16.msra.mxu0 %v13963_v51  ;;  %v14032_v51 = vld [vmem:[%s19181_s7 + $0x48] ss:$16 sps:$4 sm:$0xff]  }
 0x53d   : > { %8421 = vmatprep.subr.bf16.mxu0 %v13971_v5  ;;  %v14038_v5 = vld [vmem:[%s19181_s7 + $0x68] ss:$16 sps:$4 sm:$0xff]  }
 0x53e   : > { %7911 = vmatpush1.bf16.msra.mxu1 %v13966_v15  ;;  %v14041_v15 = vld [vmem:[%s19181_s7 + $0x460] ss:$16 sps:$4 sm:$0xff]  }
 0x53f   : > { %8206 = vmatprep.subr.bf16.mxu1 %v13974_v46  ;;  %v14049_v46 = vld [vmem:[%s19181_s7 + $0x484] ss:$16 sps:$4 sm:$0xff]  }
 0x540   : > { %8422 = vmatpush1.bf16.msra.mxu0 %v13969_v28  ;;  %v14046_v28 = vld [vmem:[%s19181_s7 + $0x8c] ss:$16 sps:$4 sm:$0xff]  }
 0x541   : > { %8652 = vmatprep.subr.bf16.mxu0 %v13977_v7  ;;  %7929 = vmatmul.mubr.bf16.vlgmr.msra.gmra.mrb[28].mxu1 %v7693_v8  ;;  %v13989_v8 = vld [vmem:[%s19181_s7 + $0x244] ss:$16 sps:$4 sm:$0xff]   ;;  %v14044_v7 = vld [vmem:[%s19181_s7 + $0x88] ss:$16 sps:$4 sm:$0xff]  }
 0x542   : > { %8207 = vmatpush1.bf16.msra.mxu1 %v13972_v56  ;;  %8238 = vmatprep.mubr.bf16.mxu1 %v14565_v50  ;;  %v14047_v56 = vld [vmem:[%s19181_s7 + $0x480] ss:$16 sps:$4 sm:$0xff]  }
 0x543   : > { %8440 = vmatmul.mubr.bf16.vlgmr.msra.gmra.mrb[28].mxu0 %v17145_v23  ;;  %8208 = vmatprep.subr.bf16.mxu1 %v13980_v45  ;;  %v14055_v45 = vld [vmem:[%s19181_s7 + $0x4a4] ss:$16 sps:$4 sm:$0xff]  }
 0x544   : > { %8653 = vmatpush1.bf16.msra.mxu0 %v13975_v22  ;;  %8684 = vmatprep.mubr.bf16.mxu0 %v14565_v50  ;;  %v14052_v22 = vld [vmem:[%s19181_s7 + $0xac] ss:$16 sps:$4 sm:$0xff]  }
 0x545   : > { %8654 = vmatprep.subr.bf16.mxu0 %v13983_v31  ;;  %v14050_v31 = vld [vmem:[%s19181_s7 + $0xa8] ss:$16 sps:$4 sm:$0xff]  }
 0x546   : > { %8209 = vmatpush1.bf16.msra.mxu1 %v13978_v19  ;;  %v14053_v19 = vld [vmem:[%s19181_s7 + $0x4a0] ss:$16 sps:$4 sm:$0xff]  }
 0x547   : > { %8210 = vmatprep.subr.bf16.mxu1 %v13986_v36  ;;  %v14061_v36 = vld [vmem:[%s19181_s7 + $0x4c4] ss:$16 sps:$4 sm:$0xff]  }
 0x548   : > { %8655 = vmatpush1.bf16.msra.mxu0 %v13981_v9  ;;  %v14058_v9 = vld [vmem:[%s19181_s7 + $0xcc] ss:$16 sps:$4 sm:$0xff]  }
 0x549   : > { %8656 = vmatprep.subr.bf16.mxu0 %v13989_v8 }
 0x54a   : > { %8211 = vmatpush1.bf16.msra.mxu1 %v13984_v52 }
 0x54b   : > { %8212 = vmatprep.subr.bf16.mxu1 %v13992_v13  ;;  %v14059_v13 = vld [vmem:[%s19181_s7 + $0x4c0] ss:$16 sps:$4 sm:$0xff]  }
 0x54c   : > { %8657 = vmatpush1.bf16.msra.mxu0 %v13987_v61  ;;  %v14056_v61 = vld [vmem:[%s19181_s7 + $0xc8] ss:$16 sps:$4 sm:$0xff]  }
 0x54d   : > { %8658 = vmatprep.subr.bf16.mxu0 %v13995_v39 }
 0x54e   : > { %8213 = vmatpush1.bf16.msra.mxu1 %v13990_v29 }
 0x54f   : > { %8214 = vmatprep.subr.bf16.mxu1 %v13998_v24 }
 0x550   : > { %8659 = vmatpush1.bf16.msra.mxu0 %v13993_v59 }
 0x551   : > { %8660 = vmatprep.subr.bf16.mxu0 %v14001_v44 }
 0x552   : > { %8215 = vmatpush1.bf16.msra.mxu1 %v13996_v57 }
 0x553   : > { %8216 = vmatprep.subr.bf16.mxu1 %v14004_v40  ;;  %v14067_v40 = vld [vmem:[%s19181_s7 + $0x4e4] ss:$16 sps:$4 sm:$0xff]  }
 0x554   : > { %8661 = vmatpush1.bf16.msra.mxu0 %v13999_v33  ;;  %v17978_v63 = vpop.f32.mrb[4].mxu1  ;;  %v14064_v33 = vld [vmem:[%s19181_s7 + $0xec] ss:$16 sps:$4 sm:$0xff]  }
 0x555   : > { %8662 = vmatprep.subr.bf16.mxu0 %v14007_v6  ;;  %v17988_v3 = vpop.f32.mrb[5].mxu1  ;;  %v14062_v6 = vld [vmem:[%s19181_s7 + $0xe8] ss:$16 sps:$4 sm:$0xff]  }
 0x556   : > { %v17980_v58 = vpop.f32.mrb[4].mxu0  ;;  %v6074_v25 = vpop.f32.mrb[6].mxu1  ;;  %8217 = vmatpush1.bf16.msra.mxu1 %v14002_v12  ;;  %v14065_v12 = vld [vmem:[%s19181_s7 + $0x4e0] ss:$16 sps:$4 sm:$0xff]  }
 0x557   : > { %v17990_v2 = vpop.f32.mrb[5].mxu0  ;;  %v6075_v53 = vpop.f32.mrb[7].mxu1  ;;  %8218 = vmatprep.subr.bf16.mxu1 %v14010_v62  ;;  %v14073_v62 = vld [vmem:[%s19181_s7 + $0x604] ss:$16 sps:$4 sm:$0xff]   ;;  %v14076_v25 = vld [vmem:[%s19181_s7 + $0x22c] ss:$16 sps:$4 sm:$0xff]  }
 0x558   : > { %v6653_v43 = vpop.f32.mrb[6].mxu0  ;;  %8663 = vmatpush1.bf16.msra.mxu0 %v14005_v11  ;;  %v14070_v11 = vld [vmem:[%s19181_s7 + $0x20c] ss:$16 sps:$4 sm:$0xff]   ;;  %v14074_v53 = vld [vmem:[%s19181_s7 + $0x228] ss:$16 sps:$4 sm:$0xff]  }
 0x559   : > { %v6654_v27 = vpop.f32.mrb[7].mxu0  ;;  %8664 = vmatprep.subr.bf16.mxu0 %v14013_v37  ;;  %v14068_v37 = vld [vmem:[%s19181_s7 + $0x208] ss:$16 sps:$4 sm:$0xff]   ;;  %v14079_v43 = vld [vmem:[%s19181_s7 + $0x624] ss:$16 sps:$4 sm:$0xff]  }
 0x55a   : > { %8219 = vmatpush1.bf16.msra.mxu1 %v14008_v49  ;;  %v14071_v49 = vld [vmem:[%s19181_s7 + $0x600] ss:$16 sps:$4 sm:$0xff]  }
 0x55b   : > { %8220 = vmatprep.subr.bf16.mxu1 %v14016_v41  ;;  %v14077_v27 = vld [vmem:[%s19181_s7 + $0x620] ss:$16 sps:$4 sm:$0xff]   ;;  %v14082_v41 = vld [vmem:[%s19181_s7 + $0x24c] ss:$16 sps:$4 sm:$0xff]  }
 0x55c   : > { %8665 = vmatpush1.bf16.msra.mxu0 %v14011_v55  ;;  %v8734_v55 = vrot.slane %v17145_v23, 2 }
 0x55d   : > { %8666 = vmatprep.subr.bf16.mxu0 %v14019_v20  ;;  %v14085_v20 = vld [vmem:[%s19181_s7 + $0x644] ss:$16 sps:$4 sm:$0xff]  }
 0x55e   : > { %8221 = vmatpush1.bf16.msra.mxu1 %v14014_v4  ;;  %v14080_v4 = vld [vmem:[%s19181_s7 + $0x248] ss:$16 sps:$4 sm:$0xff]  }
 0x55f   : > { %8448 = vmatprep.subr.bf16.mxu1 %v14022_v30  ;;  %v14088_v30 = vld [vmem:[%s19181_s7 + $0x26c] ss:$16 sps:$4 sm:$0xff]  }
 0x560   : > { %8667 = vmatpush1.bf16.msra.mxu0 %v14017_v10  ;;  %v14083_v10 = vld [vmem:[%s19181_s7 + $0x640] ss:$16 sps:$4 sm:$0xff]  }
 0x561   : > { %8896 = vmatprep.subr.bf16.mxu0 %v14025_v16  ;;  %8239 = vmatmul.mubr.bf16.vlgmr.msra.gmra.mrb[32].mxu1 %v8003_v48  ;;  %v14037_v48 = vld [vmem:[%s19181_s7 + $0x444] ss:$16 sps:$4 sm:$0xff]  }
 0x562   : > { %8449 = vmatpush1.bf16.msra.mxu1 %v14020_v32  ;;  %8480 = vmatprep.mubr.bf16.mxu1 %v14565_v50  ;;  %v14091_v16 = vld [vmem:[%s19181_s7 + $0x664] ss:$16 sps:$4 sm:$0xff]   ;;  %v14086_v32 = vld [vmem:[%s19181_s7 + $0x268] ss:$16 sps:$4 sm:$0xff]  }
 0x563   : > { %8685 = vmatmul.mubr.bf16.vlgmr.msra.gmra.mrb[32].mxu0 %v8490_v47  ;;  %8450 = vmatprep.subr.bf16.mxu1 %v14028_v21  ;;  %v14094_v21 = vld [vmem:[%s19181_s7 + $0x28c] ss:$16 sps:$4 sm:$0xff]  }
 0x564   : > { %8897 = vmatpush1.bf16.msra.mxu0 %v14023_v0  ;;  %8928 = vmatprep.mubr.bf16.mxu0 %v14565_v50  ;;  %v14089_v0 = vld [vmem:[%s19181_s7 + $0x660] ss:$16 sps:$4 sm:$0xff]  }
 0x565   : > { %8898 = vmatprep.subr.bf16.mxu0 %v14031_v38  ;;  %v14097_v38 = vld [vmem:[%s19181_s7 + $0x684] ss:$16 sps:$4 sm:$0xff]  }
 0x566   : > { %8451 = vmatpush1.bf16.msra.mxu1 %v14026_v35  ;;  %v14092_v35 = vld [vmem:[%s19181_s7 + $0x288] ss:$16 sps:$4 sm:$0xff]  }
 0x567   : > { %8452 = vmatprep.subr.bf16.mxu1 %v14034_v17  ;;  %v14100_v17 = vld [vmem:[%s19181_s7 + $0x2ac] ss:$16 sps:$4 sm:$0xff]  }
 0x568   : > { %8899 = vmatpush1.bf16.msra.mxu0 %v14029_v60  ;;  %v14095_v60 = vld [vmem:[%s19181_s7 + $0x680] ss:$16 sps:$4 sm:$0xff]  }
 0x569   : > { %8900 = vmatprep.subr.bf16.mxu0 %v14037_v48  ;;  %v14103_v48 = vld [vmem:[%s19181_s7 + $0x6a4] ss:$16 sps:$4 sm:$0xff]  }
 0x56a   : > { %8453 = vmatpush1.bf16.msra.mxu1 %v14032_v51  ;;  %v14098_v51 = vld [vmem:[%s19181_s7 + $0x2a8] ss:$16 sps:$4 sm:$0xff]  }
 0x56b   : > { %8454 = vmatprep.subr.bf16.mxu1 %v14040_v54  ;;  %v14106_v54 = vld [vmem:[%s19181_s7 + $0x2cc] ss:$16 sps:$4 sm:$0xff]  }
 0x56c   : > { %8901 = vmatpush1.bf16.msra.mxu0 %v14035_v34  ;;  %v14101_v34 = vld [vmem:[%s19181_s7 + $0x6a0] ss:$16 sps:$4 sm:$0xff]  }
 0x56d   : > { %8902 = vmatprep.subr.bf16.mxu0 %v14043_v14  ;;  %v14109_v14 = vld [vmem:[%s19181_s7 + $0x6c4] ss:$16 sps:$4 sm:$0xff]  }
 0x56e   : > { %8455 = vmatpush1.bf16.msra.mxu1 %v14038_v5 }
 0x56f   : > { %8456 = vmatprep.subr.bf16.mxu1 %v14046_v28  ;;  %v14104_v28 = vld [vmem:[%s19181_s7 + $0x2c8] ss:$16 sps:$4 sm:$0xff]  }
 0x570   : > { %8903 = vmatpush1.bf16.msra.mxu0 %v14041_v15 }
 0x571   : > { %8904 = vmatprep.subr.bf16.mxu0 %v14049_v46  ;;  %v14107_v46 = vld [vmem:[%s19181_s7 + $0x6c0] ss:$16 sps:$4 sm:$0xff]  }
 0x572   : > { %8457 = vmatpush1.bf16.msra.mxu1 %v14044_v7 }
 0x573   : > { %8458 = vmatprep.subr.bf16.mxu1 %v14052_v22 }
 0x574   : > { %8905 = vmatpush1.bf16.msra.mxu0 %v14047_v56  ;;  %v18089_v8 = vpop.f32.mrb[8].mxu1 }
 0x575   : > { %8906 = vmatprep.subr.bf16.mxu0 %v14055_v45  ;;  %v18099_v39 = vpop.f32.mrb[9].mxu1 }
 0x576   : > { %v18091_v52 = vpop.f32.mrb[8].mxu0  ;;  %v6384_v59 = vpop.f32.mrb[10].mxu1  ;;  %8459 = vmatpush1.bf16.msra.mxu1 %v14050_v31 }
 0x577   : > { %v18101_v29 = vpop.f32.mrb[9].mxu0  ;;  %v6385_v44 = vpop.f32.mrb[11].mxu1  ;;  %8460 = vmatprep.subr.bf16.mxu1 %v14058_v9  ;;  %v14112_v9 = vld [vmem:[%s19181_s7 + $0x2ec] ss:$16 sps:$4 sm:$0xff]  }
 0x578   : > { %v6963_v24 = vpop.f32.mrb[10].mxu0  ;;  %8907 = vmatpush1.bf16.msra.mxu0 %v14053_v19  ;;  %v14118_v59 = vld [vmem:[%s19181_s7 + $0x40c] ss:$16 sps:$4 sm:$0xff]   ;;  %v14116_v44 = vld [vmem:[%s19181_s7 + $0x408] ss:$16 sps:$4 sm:$0xff]  }
 0x579   : > { %v6964_v57 = vpop.f32.mrb[11].mxu0  ;;  %8908 = vmatprep.subr.bf16.mxu0 %v14061_v36  ;;  %v14115_v36 = vld [vmem:[%s19181_s7 + $0x6e4] ss:$16 sps:$4 sm:$0xff]  }
 0x57a   : > { %8461 = vmatpush1.bf16.msra.mxu1 %v14056_v61  ;;  %v14110_v61 = vld [vmem:[%s19181_s7 + $0x2e8] ss:$16 sps:$4 sm:$0xff]   ;;  %v14121_v24 = vld [vmem:[%s19181_s7 + $0x804] ss:$16 sps:$4 sm:$0xff]   ;;  %v14119_v57 = vld [vmem:[%s19181_s7 + $0x800] ss:$16 sps:$4 sm:$0xff]  }
 0x57b   : > { %8462 = vmatprep.subr.bf16.mxu1 %v14064_v33  ;;  %v8978_v33 = vrot.slane %v17145_v23, 3 }
 0x57c   : > { %8909 = vmatpush1.bf16.msra.mxu0 %v14059_v13  ;;  %v14113_v13 = vld [vmem:[%s19181_s7 + $0x6e0] ss:$16 sps:$4 sm:$0xff]  }
 0x57d   : > { %8910 = vmatprep.subr.bf16.mxu0 %v14067_v40  ;;  %v14124_v40 = vld [vmem:[%s19181_s7 + $0x42c] ss:$16 sps:$4 sm:$0xff]  }
 0x57e   : > { %8463 = vmatpush1.bf16.msra.mxu1 %v14062_v6  ;;  %v14127_v6 = vld [vmem:[%s19181_s7 + $0x824] ss:$16 sps:$4 sm:$0xff]  }
 0x57f   : > { %8693 = vmatprep.subr.bf16.mxu1 %v14070_v11  ;;  %v14125_v11 = vld [vmem:[%s19181_s7 + $0x820] ss:$16 sps:$4 sm:$0xff]  }
 0x580   : > { %8911 = vmatpush1.bf16.msra.mxu0 %v14065_v12  ;;  %v14122_v12 = vld [vmem:[%s19181_s7 + $0x428] ss:$16 sps:$4 sm:$0xff]  }
 0x581   : > { %9140 = vmatprep.subr.bf16.mxu0 %v14073_v62  ;;  %8481 = vmatmul.mubr.bf16.vlgmr.msra.gmra.mrb[36].mxu1 %v17145_v23  ;;  %v14130_v62 = vld [vmem:[%s19181_s7 + $0x44c] ss:$16 sps:$4 sm:$0xff]  }
 0x582   : > { %8694 = vmatpush1.bf16.msra.mxu1 %v14068_v37  ;;  %8725 = vmatprep.mubr.bf16.mxu1 %v14565_v50  ;;  %v14133_v37 = vld [vmem:[%s19181_s7 + $0x844] ss:$16 sps:$4 sm:$0xff]  }
 0x583   : > { %8929 = vmatmul.mubr.bf16.vlgmr.msra.gmra.mrb[36].mxu0 %v8734_v55  ;;  %8695 = vmatprep.subr.bf16.mxu1 %v14076_v25  ;;  %v14136_v25 = vld [vmem:[%s19181_s7 + $0x46c] ss:$16 sps:$4 sm:$0xff]  }
 0x584   : > { %9141 = vmatpush1.bf16.msra.mxu0 %v14071_v49  ;;  %9172 = vmatprep.mubr.bf16.mxu0 %v14565_v50  ;;  %v14128_v49 = vld [vmem:[%s19181_s7 + $0x448] ss:$16 sps:$4 sm:$0xff]  }
 0x585   : > { %9142 = vmatprep.subr.bf16.mxu0 %v14079_v43  ;;  %v14139_v43 = vld [vmem:[%s19181_s7 + $0x864] ss:$16 sps:$4 sm:$0xff]  }
 0x586   : > { %8696 = vmatpush1.bf16.msra.mxu1 %v14074_v53  ;;  %v14134_v53 = vld [vmem:[%s19181_s7 + $0x468] ss:$16 sps:$4 sm:$0xff]  }
 0x587   : > { %8697 = vmatprep.subr.bf16.mxu1 %v14082_v41  ;;  %v14142_v41 = vld [vmem:[%s19181_s7 + $0x48c] ss:$16 sps:$4 sm:$0xff]  }
 0x588   : > { %9143 = vmatpush1.bf16.msra.mxu0 %v14077_v27  ;;  %v14137_v27 = vld [vmem:[%s19181_s7 + $0x860] ss:$16 sps:$4 sm:$0xff]  }
 0x589   : > { %9144 = vmatprep.subr.bf16.mxu0 %v14085_v20  ;;  %v14145_v20 = vld [vmem:[%s19181_s7 + $0x884] ss:$16 sps:$4 sm:$0xff]  }
 0x58a   : > { %8698 = vmatpush1.bf16.msra.mxu1 %v14080_v4  ;;  %v14140_v4 = vld [vmem:[%s19181_s7 + $0x488] ss:$16 sps:$4 sm:$0xff]  }
 0x58b   : > { %8699 = vmatprep.subr.bf16.mxu1 %v14088_v30  ;;  %v14148_v30 = vld [vmem:[%s19181_s7 + $0x4ac] ss:$16 sps:$4 sm:$0xff]  }
 0x58c   : > { %9145 = vmatpush1.bf16.msra.mxu0 %v14083_v10  ;;  %v14143_v10 = vld [vmem:[%s19181_s7 + $0x880] ss:$16 sps:$4 sm:$0xff]  }
 0x58d   : > { %9146 = vmatprep.subr.bf16.mxu0 %v14091_v16  ;;  %v14151_v16 = vld [vmem:[%s19181_s7 + $0x8a4] ss:$16 sps:$4 sm:$0xff]  }
 0x58e   : > { %8700 = vmatpush1.bf16.msra.mxu1 %v14086_v32  ;;  %v14146_v32 = vld [vmem:[%s19181_s7 + $0x4a8] ss:$16 sps:$4 sm:$0xff]  }
 0x58f   : > { %8701 = vmatprep.subr.bf16.mxu1 %v14094_v21  ;;  %v14154_v21 = vld [vmem:[%s19181_s7 + $0x4cc] ss:$16 sps:$4 sm:$0xff]  }
 0x590   : > { %9147 = vmatpush1.bf16.msra.mxu0 %v14089_v0  ;;  %v14149_v0 = vld [vmem:[%s19181_s7 + $0x8a0] ss:$16 sps:$4 sm:$0xff]  }
 0x591   : > { %9148 = vmatprep.subr.bf16.mxu0 %v14097_v38  ;;  %v14157_v38 = vld [vmem:[%s19181_s7 + $0x8c4] ss:$16 sps:$4 sm:$0xff]  }
 0x592   : > { %8702 = vmatpush1.bf16.msra.mxu1 %v14092_v35 }
 0x593   : > { %8703 = vmatprep.subr.bf16.mxu1 %v14100_v17 }
 0x594   : > { %9149 = vmatpush1.bf16.msra.mxu0 %v14095_v60  ;;  %v18199_v5 = vpop.f32.mrb[12].mxu1 }
 0x595   : > { %9150 = vmatprep.subr.bf16.mxu0 %v14103_v48  ;;  %v18209_v7 = vpop.f32.mrb[13].mxu1 }
 0x596   : > { %v18201_v15 = vpop.f32.mrb[12].mxu0  ;;  %v6694_v22 = vpop.f32.mrb[14].mxu1  ;;  %8704 = vmatpush1.bf16.msra.mxu1 %v14098_v51 }
 0x597   : > { %v18211_v56 = vpop.f32.mrb[13].mxu0  ;;  %v6695_v31 = vpop.f32.mrb[15].mxu1  ;;  %8705 = vmatprep.subr.bf16.mxu1 %v14106_v54  ;;  %v14152_v54 = vld [vmem:[%s19181_s7 + $0x4c8] ss:$16 sps:$4 sm:$0xff]   ;;  %v14160_v22 = vld [vmem:[%s19181_s7 + $0x4ec] ss:$16 sps:$4 sm:$0xff]  }
 0x598   : > { %v7273_v45 = vpop.f32.mrb[14].mxu0  ;;  %9151 = vmatpush1.bf16.msra.mxu0 %v14101_v34  ;;  %v14158_v31 = vld [vmem:[%s19181_s7 + $0x4e8] ss:$16 sps:$4 sm:$0xff]  }
 0x599   : > { %v7274_v19 = vpop.f32.mrb[15].mxu0  ;;  %9152 = vmatprep.subr.bf16.mxu0 %v14109_v14  ;;  %v14155_v14 = vld [vmem:[%s19181_s7 + $0x8c0] ss:$16 sps:$4 sm:$0xff]   ;;  %v14163_v45 = vld [vmem:[%s19181_s7 + $0x8e4] ss:$16 sps:$4 sm:$0xff]  }
 0x59a   : > { %8706 = vmatpush1.bf16.msra.mxu1 %v14104_v28  ;;  %v14161_v19 = vld [vmem:[%s19181_s7 + $0x8e0] ss:$16 sps:$4 sm:$0xff]  }
 0x59b   : > { %8707 = vmatprep.subr.bf16.mxu1 %v14112_v9  ;;  %v14166_v9 = vld [vmem:[%s19181_s7 + $0x60c] ss:$16 sps:$4 sm:$0xff]  }
 0x59c   : > { %9153 = vmatpush1.bf16.msra.mxu0 %v14107_v46 }
 0x59d   : > { %9154 = vmatprep.subr.bf16.mxu0 %v14115_v36  ;;  %v14169_v36 = vld [vmem:[%s19181_s7 + $0xa04] ss:$16 sps:$4 sm:$0xff]  }
 0x59e   : > { %8708 = vmatpush1.bf16.msra.mxu1 %v14110_v61  ;;  %v9222_v61 = vrot.slane %v17145_v23, 4 }
 0x59f   : > { %8937 = vmatprep.subr.bf16.mxu1 %v14118_v59  ;;  %v14167_v59 = vld [vmem:[%s19181_s7 + $0xa00] ss:$16 sps:$4 sm:$0xff]  }
 0x5a0   : > { %9155 = vmatpush1.bf16.msra.mxu0 %v14113_v13  ;;  %v14164_v13 = vld [vmem:[%s19181_s7 + $0x608] ss:$16 sps:$4 sm:$0xff]  }
 0x5a1   : > { %9384 = vmatprep.subr.bf16.mxu0 %v14121_v24  ;;  %8726 = vmatmul.mubr.bf16.vlgmr.msra.gmra.mrb[40].mxu1 %v8490_v47  ;;  %v14131_v47 = vld [vmem:[%s19181_s7 + $0x840] ss:$16 sps:$4 sm:$0xff]   ;;  %v14172_v24 = vld [vmem:[%s19181_s7 + $0x62c] ss:$16 sps:$4 sm:$0xff]  }
 0x5a2   : > { %8938 = vmatpush1.bf16.msra.mxu1 %v14116_v44  ;;  %8969 = vmatprep.mubr.bf16.mxu1 %v14565_v50  ;;  %v14175_v44 = vld [vmem:[%s19181_s7 + $0xa24] ss:$16 sps:$4 sm:$0xff]  }
 0x5a3   : > { %9173 = vmatmul.mubr.bf16.vlgmr.msra.gmra.mrb[40].mxu0 %v8978_v33  ;;  %8939 = vmatprep.subr.bf16.mxu1 %v14124_v40  ;;  %v14173_v40 = vld [vmem:[%s19181_s7 + $0xa20] ss:$16 sps:$4 sm:$0xff]  }
 0x5a4   : > { %9385 = vmatpush1.bf16.msra.mxu0 %v14119_v57  ;;  %9416 = vmatprep.mubr.bf16.mxu0 %v14565_v50  ;;  %v14170_v57 = vld [vmem:[%s19181_s7 + $0x628] ss:$16 sps:$4 sm:$0xff]  }
 0x5a5   : > { %9386 = vmatprep.subr.bf16.mxu0 %v14127_v6  ;;  %v14178_v6 = vld [vmem:[%s19181_s7 + $0x64c] ss:$16 sps:$4 sm:$0xff]  }
 0x5a6   : > { %8940 = vmatpush1.bf16.msra.mxu1 %v14122_v12  ;;  %v14176_v12 = vld [vmem:[%s19181_s7 + $0x648] ss:$16 sps:$4 sm:$0xff]  }
 0x5a7   : > { %8941 = vmatprep.subr.bf16.mxu1 %v14130_v62  ;;  %v14184_v62 = vld [vmem:[%s19181_s7 + $0x66c] ss:$16 sps:$4 sm:$0xff]  }
 0x5a8   : > { %9387 = vmatpush1.bf16.msra.mxu0 %v14125_v11  ;;  %v14179_v11 = vld [vmem:[%s19181_s7 + $0xa40] ss:$16 sps:$4 sm:$0xff]  }
 0x5a9   : > { %9388 = vmatprep.subr.bf16.mxu0 %v14133_v37  ;;  %v14187_v37 = vld [vmem:[%s19181_s7 + $0xa64] ss:$16 sps:$4 sm:$0xff]  }
 0x5aa   : > { %8942 = vmatpush1.bf16.msra.mxu1 %v14128_v49  ;;  %v14182_v49 = vld [vmem:[%s19181_s7 + $0x668] ss:$16 sps:$4 sm:$0xff]  }
 0x5ab   : > { %8943 = vmatprep.subr.bf16.mxu1 %v14136_v25  ;;  %v14190_v25 = vld [vmem:[%s19181_s7 + $0x68c] ss:$16 sps:$4 sm:$0xff]  }
 0x5ac   : > { %9389 = vmatpush1.bf16.msra.mxu0 %v14131_v47  ;;  %v14185_v47 = vld [vmem:[%s19181_s7 + $0xa60] ss:$16 sps:$4 sm:$0xff]  }
 0x5ad   : > { %9390 = vmatprep.subr.bf16.mxu0 %v14139_v43  ;;  %v14193_v43 = vld [vmem:[%s19181_s7 + $0xa84] ss:$16 sps:$4 sm:$0xff]  }
 0x5ae   : > { %8944 = vmatpush1.bf16.msra.mxu1 %v14134_v53  ;;  %v14188_v53 = vld [vmem:[%s19181_s7 + $0x688] ss:$16 sps:$4 sm:$0xff]  }
 0x5af   : > { %8945 = vmatprep.subr.bf16.mxu1 %v14142_v41  ;;  %v14196_v41 = vld [vmem:[%s19181_s7 + $0x6ac] ss:$16 sps:$4 sm:$0xff]  }
 0x5b0   : > { %9391 = vmatpush1.bf16.msra.mxu0 %v14137_v27  ;;  %v14191_v27 = vld [vmem:[%s19181_s7 + $0xa80] ss:$16 sps:$4 sm:$0xff]  }
 0x5b1   : > { %9392 = vmatprep.subr.bf16.mxu0 %v14145_v20  ;;  %v14199_v20 = vld [vmem:[%s19181_s7 + $0xaa4] ss:$16 sps:$4 sm:$0xff]  }
 0x5b2   : > { %8946 = vmatpush1.bf16.msra.mxu1 %v14140_v4  ;;  %v14194_v4 = vld [vmem:[%s19181_s7 + $0x6a8] ss:$16 sps:$4 sm:$0xff]  }
 0x5b3   : > { %8947 = vmatprep.subr.bf16.mxu1 %v14148_v30  ;;  %v14202_v30 = vld [vmem:[%s19181_s7 + $0x6cc] ss:$16 sps:$4 sm:$0xff]  }
 0x5b4   : > { %9393 = vmatpush1.bf16.msra.mxu0 %v14143_v10  ;;  %v18310_v35 = vpop.f32.mrb[16].mxu1  ;;  %v14197_v10 = vld [vmem:[%s19181_s7 + $0xaa0] ss:$16 sps:$4 sm:$0xff]  }
 0x5b5   : > { %9394 = vmatprep.subr.bf16.mxu0 %v14151_v16  ;;  %v18314_v17 = vpop.f32.mrb[17].mxu1  ;;  %v14205_v16 = vld [vmem:[%s19181_s7 + $0xac4] ss:$16 sps:$4 sm:$0xff]  }
 0x5b6   : > { %v18312_v60 = vpop.f32.mrb[16].mxu0  ;;  %v7004_v51 = vpop.f32.mrb[18].mxu1  ;;  %8948 = vmatpush1.bf16.msra.mxu1 %v14146_v32 }
 0x5b7   : > { %v18316_v48 = vpop.f32.mrb[17].mxu0  ;;  %v7005_v28 = vpop.f32.mrb[19].mxu1  ;;  %8949 = vmatprep.subr.bf16.mxu1 %v14154_v21 }
 0x5b8   : > { %v7583_v34 = vpop.f32.mrb[18].mxu0  ;;  %9395 = vmatpush1.bf16.msra.mxu0 %v14149_v0 }
 0x5b9   : > { %v7584_v46 = vpop.f32.mrb[19].mxu0  ;;  %9396 = vmatprep.subr.bf16.mxu0 %v14157_v38 }
 0x5ba   : > { %8950 = vmatpush1.bf16.msra.mxu1 %v14152_v54  ;;  %v14200_v54 = vld [vmem:[%s19181_s7 + $0x6c8] ss:$16 sps:$4 sm:$0xff]  }
 0x5bb   : > { %8951 = vmatprep.subr.bf16.mxu1 %v14160_v22  ;;  %v14208_v22 = vld [vmem:[%s19181_s7 + $0x6ec] ss:$16 sps:$4 sm:$0xff]  }
 0x5bc   : > { %9397 = vmatpush1.bf16.msra.mxu0 %v14155_v14  ;;  %v14203_v14 = vld [vmem:[%s19181_s7 + $0xac0] ss:$16 sps:$4 sm:$0xff]  }
 0x5bd   : > { %9398 = vmatprep.subr.bf16.mxu0 %v14163_v45  ;;  %v14211_v45 = vld [vmem:[%s19181_s7 + $0xae4] ss:$16 sps:$4 sm:$0xff]  }
 0x5be   : > { %8952 = vmatpush1.bf16.msra.mxu1 %v14158_v31  ;;  %v14206_v31 = vld [vmem:[%s19181_s7 + $0x6e8] ss:$16 sps:$4 sm:$0xff]  }
 0x5bf   : > { %9181 = vmatprep.subr.bf16.mxu1 %v14166_v9  ;;  %v14214_v9 = vld [vmem:[%s19181_s7 + $0x80c] ss:$16 sps:$4 sm:$0xff]  }
 0x5c0   : > { %9399 = vmatpush1.bf16.msra.mxu0 %v14161_v19  ;;  %v14209_v19 = vld [vmem:[%s19181_s7 + $0xae0] ss:$16 sps:$4 sm:$0xff]  }
 0x5c1   : > { %9628 = vmatprep.subr.bf16.mxu0 %v14169_v36  ;;  %8970 = vmatmul.mubr.bf16.vlgmr.msra.gmra.mrb[44].mxu1 %v8734_v55  ;;  %v14181_v55 = vld [vmem:[%s19181_s7 + $0xa44] ss:$16 sps:$4 sm:$0xff]  }
 0x5c2   : > { %9182 = vmatpush1.bf16.msra.mxu1 %v14164_v13  ;;  %9213 = vmatprep.mubr.bf16.mxu1 %v14565_v50  ;;  %v14217_v36 = vld [vmem:[%s19181_s7 + $0xc04] ss:$16 sps:$4 sm:$0xff]   ;;  %v9466_v13 = vrot.slane %v17145_v23, 5 }
 0x5c3   : > { %9417 = vmatmul.mubr.bf16.vlgmr.msra.gmra.mrb[44].mxu0 %v9222_v61  ;;  %9183 = vmatprep.subr.bf16.mxu1 %v14172_v24  ;;  %v14215_v24 = vld [vmem:[%s19181_s7 + $0xc00] ss:$16 sps:$4 sm:$0xff]  }
 0x5c4   : > { %9629 = vmatpush1.bf16.msra.mxu0 %v14167_v59  ;;  %9660 = vmatprep.mubr.bf16.mxu0 %v14565_v50  ;;  %v14212_v59 = vld [vmem:[%s19181_s7 + $0x808] ss:$16 sps:$4 sm:$0xff]  }
 0x5c5   : > { %9630 = vmatprep.subr.bf16.mxu0 %v14175_v44  ;;  %v14220_v44 = vld [vmem:[%s19181_s7 + $0x82c] ss:$16 sps:$4 sm:$0xff]  }
 0x5c6   : > { %9184 = vmatpush1.bf16.msra.mxu1 %v14170_v57  ;;  %v14223_v57 = vld [vmem:[%s19181_s7 + $0xc24] ss:$16 sps:$4 sm:$0xff]  }
 0x5c7   : > { %9185 = vmatprep.subr.bf16.mxu1 %v14178_v6  ;;  %v14221_v6 = vld [vmem:[%s19181_s7 + $0xc20] ss:$16 sps:$4 sm:$0xff]  }
 0x5c8   : > { %9631 = vmatpush1.bf16.msra.mxu0 %v14173_v40  ;;  %v14218_v40 = vld [vmem:[%s19181_s7 + $0x828] ss:$16 sps:$4 sm:$0xff]  }
 0x5c9   : > { %9632 = vmatprep.subr.bf16.mxu0 %v14181_v55  ;;  %v14226_v55 = vld [vmem:[%s19181_s7 + $0x84c] ss:$16 sps:$4 sm:$0xff]  }
 0x5ca   : > { %9186 = vmatpush1.bf16.msra.mxu1 %v14176_v12  ;;  %v14224_v12 = vld [vmem:[%s19181_s7 + $0x848] ss:$16 sps:$4 sm:$0xff]  }
 0x5cb   : > { %9187 = vmatprep.subr.bf16.mxu1 %v14184_v62  ;;  %v14232_v62 = vld [vmem:[%s19181_s7 + $0x86c] ss:$16 sps:$4 sm:$0xff]  }
 0x5cc   : > { %9633 = vmatpush1.bf16.msra.mxu0 %v14179_v11  ;;  %v14227_v11 = vld [vmem:[%s19181_s7 + $0xc40] ss:$16 sps:$4 sm:$0xff]  }
 0x5cd   : > { %9634 = vmatprep.subr.bf16.mxu0 %v14187_v37  ;;  %v14235_v37 = vld [vmem:[%s19181_s7 + $0xc64] ss:$16 sps:$4 sm:$0xff]  }
 0x5ce   : > { %9188 = vmatpush1.bf16.msra.mxu1 %v14182_v49  ;;  %v14230_v49 = vld [vmem:[%s19181_s7 + $0x868] ss:$16 sps:$4 sm:$0xff]  }
 0x5cf   : > { %9189 = vmatprep.subr.bf16.mxu1 %v14190_v25  ;;  %v14238_v25 = vld [vmem:[%s19181_s7 + $0x88c] ss:$16 sps:$4 sm:$0xff]  }
 0x5d0   : > { %9635 = vmatpush1.bf16.msra.mxu0 %v14185_v47  ;;  %v14233_v47 = vld [vmem:[%s19181_s7 + $0xc60] ss:$16 sps:$4 sm:$0xff]  }
 0x5d1   : > { %9636 = vmatprep.subr.bf16.mxu0 %v14193_v43  ;;  %v14241_v43 = vld [vmem:[%s19181_s7 + $0xc84] ss:$16 sps:$4 sm:$0xff]  }
 0x5d2   : > { %9190 = vmatpush1.bf16.msra.mxu1 %v14188_v53  ;;  %v14236_v53 = vld [vmem:[%s19181_s7 + $0x888] ss:$16 sps:$4 sm:$0xff]  }
 0x5d3   : > { %9191 = vmatprep.subr.bf16.mxu1 %v14196_v41  ;;  %v14244_v41 = vld [vmem:[%s19181_s7 + $0x8ac] ss:$16 sps:$4 sm:$0xff]  }
 0x5d4   : > { %9637 = vmatpush1.bf16.msra.mxu0 %v14191_v27  ;;  %v18421_v32 = vpop.f32.mrb[20].mxu1  ;;  %v14239_v27 = vld [vmem:[%s19181_s7 + $0xc80] ss:$16 sps:$4 sm:$0xff]  }
 0x5d5   : > { %9638 = vmatprep.subr.bf16.mxu0 %v14199_v20  ;;  %v18425_v21 = vpop.f32.mrb[21].mxu1  ;;  %v14247_v20 = vld [vmem:[%s19181_s7 + $0xca4] ss:$16 sps:$4 sm:$0xff]  }
 0x5d6   : > { %v18423_v0 = vpop.f32.mrb[20].mxu0  ;;  %v7314_v51 = vpop.f32.mrb[22].mxu1  ;;  %9192 = vmatpush1.bf16.msra.mxu1 %v14194_v4  ;;  %v14242_v4 = vld [vmem:[%s19181_s7 + $0x8a8] ss:$16 sps:$4 sm:$0xff]  }
 0x5d7   : > { %v18427_v38 = vpop.f32.mrb[21].mxu0  ;;  %v7315_v28 = vpop.f32.mrb[23].mxu1  ;;  %9193 = vmatprep.subr.bf16.mxu1 %v14202_v30  ;;  %v14250_v30 = vld [vmem:[%s19181_s7 + $0x8cc] ss:$16 sps:$4 sm:$0xff]  }
 0x5d8   : > { %v7893_v34 = vpop.f32.mrb[22].mxu0  ;;  %9639 = vmatpush1.bf16.msra.mxu0 %v14197_v10  ;;  %v14245_v10 = vld [vmem:[%s19181_s7 + $0xca0] ss:$16 sps:$4 sm:$0xff]  }
 0x5d9   : > { %v7894_v46 = vpop.f32.mrb[23].mxu0  ;;  %9640 = vmatprep.subr.bf16.mxu0 %v14205_v16  ;;  %v14253_v16 = vld [vmem:[%s19181_s7 + $0xcc4] ss:$16 sps:$4 sm:$0xff]  }
 0x5da   : > { %9194 = vmatpush1.bf16.msra.mxu1 %v14200_v54 }
 0x5db   : > { %9195 = vmatprep.subr.bf16.mxu1 %v14208_v22  ;;  %v14248_v22 = vld [vmem:[%s19181_s7 + $0x8c8] ss:$16 sps:$4 sm:$0xff]  }
 0x5dc   : > { %9641 = vmatpush1.bf16.msra.mxu0 %v14203_v14 }
 0x5dd   : > { %9642 = vmatprep.subr.bf16.mxu0 %v14211_v45  ;;  %v14251_v45 = vld [vmem:[%s19181_s7 + $0xcc0] ss:$16 sps:$4 sm:$0xff]  }
 0x5de   : > { %9196 = vmatpush1.bf16.msra.mxu1 %v14206_v31 }
 0x5df   : > { %9425 = vmatprep.subr.bf16.mxu1 %v14214_v9  ;;  %v14256_v9 = vld [vmem:[%s19181_s7 + $0x8ec] ss:$16 sps:$4 sm:$0xff]  }
 0x5e0   : > { %9643 = vmatpush1.bf16.msra.mxu0 %v14209_v19 }
 0x5e1   : > { %9872 = vmatprep.subr.bf16.mxu0 %v14217_v36  ;;  %9214 = vmatmul.mubr.bf16.vlgmr.msra.gmra.mrb[48].mxu1 %v8978_v33  ;;  %v14229_v33 = vld [vmem:[%s19181_s7 + $0xc44] ss:$16 sps:$4 sm:$0xff]  }
 0x5e2   : > { %9426 = vmatpush1.bf16.msra.mxu1 %v14212_v59  ;;  %9457 = vmatprep.mubr.bf16.mxu1 %v14565_v50  ;;  %v14259_v36 = vld [vmem:[%s19181_s7 + $0xce4] ss:$16 sps:$4 sm:$0xff]   ;;  %v14254_v59 = vld [vmem:[%s19181_s7 + $0x8e8] ss:$16 sps:$4 sm:$0xff]  }
 0x5e3   : > { %9661 = vmatmul.mubr.bf16.vlgmr.msra.gmra.mrb[48].mxu0 %v9466_v13  ;;  %9427 = vmatprep.subr.bf16.mxu1 %v14220_v44  ;;  %v14262_v44 = vld [vmem:[%s19181_s7 + $0xa0c] ss:$16 sps:$4 sm:$0xff]  }
 0x5e4   : > { %9873 = vmatpush1.bf16.msra.mxu0 %v14215_v24  ;;  %9904 = vmatprep.mubr.bf16.mxu0 %v14565_v50  ;;  %v14257_v24 = vld [vmem:[%s19181_s7 + $0xce0] ss:$16 sps:$4 sm:$0xff]  }
 0x5e5   : > { %9874 = vmatprep.subr.bf16.mxu0 %v14223_v57  ;;  %v14265_v57 = vld [vmem:[%s19181_s7 + $0xe04] ss:$16 sps:$4 sm:$0xff]  }
 0x5e6   : > { %9428 = vmatpush1.bf16.msra.mxu1 %v14218_v40  ;;  %v9710_v40 = vrot.slane %v17145_v23, 6 }
 0x5e7   : > { %9429 = vmatprep.subr.bf16.mxu1 %v14226_v55  ;;  %v14263_v55 = vld [vmem:[%s19181_s7 + $0xe00] ss:$16 sps:$4 sm:$0xff]  }
 0x5e8   : > { %9875 = vmatpush1.bf16.msra.mxu0 %v14221_v6  ;;  %v14260_v6 = vld [vmem:[%s19181_s7 + $0xa08] ss:$16 sps:$4 sm:$0xff]  }
 0x5e9   : > { %9876 = vmatprep.subr.bf16.mxu0 %v14229_v33  ;;  %v14268_v33 = vld [vmem:[%s19181_s7 + $0xa2c] ss:$16 sps:$4 sm:$0xff]  }
 0x5ea   : > { %9430 = vmatpush1.bf16.msra.mxu1 %v14224_v12  ;;  %v14271_v12 = vld [vmem:[%s19181_s7 + $0xe24] ss:$16 sps:$4 sm:$0xff]  }
 0x5eb   : > { %9431 = vmatprep.subr.bf16.mxu1 %v14232_v62  ;;  %v14269_v62 = vld [vmem:[%s19181_s7 + $0xe20] ss:$16 sps:$4 sm:$0xff]  }
 0x5ec   : > { %9877 = vmatpush1.bf16.msra.mxu0 %v14227_v11  ;;  %v14266_v11 = vld [vmem:[%s19181_s7 + $0xa28] ss:$16 sps:$4 sm:$0xff]  }
 0x5ed   : > { %9878 = vmatprep.subr.bf16.mxu0 %v14235_v37  ;;  %v14274_v37 = vld [vmem:[%s19181_s7 + $0xa4c] ss:$16 sps:$4 sm:$0xff]  }
 0x5ee   : > { %9432 = vmatpush1.bf16.msra.mxu1 %v14230_v49  ;;  %v14272_v49 = vld [vmem:[%s19181_s7 + $0xa48] ss:$16 sps:$4 sm:$0xff]  }
 0x5ef   : > { %9433 = vmatprep.subr.bf16.mxu1 %v14238_v25  ;;  %v14280_v25 = vld [vmem:[%s19181_s7 + $0xa6c] ss:$16 sps:$4 sm:$0xff]  }
 0x5f0   : > { %9879 = vmatpush1.bf16.msra.mxu0 %v14233_v47  ;;  %v14275_v47 = vld [vmem:[%s19181_s7 + $0xe40] ss:$16 sps:$4 sm:$0xff]  }
 0x5f1   : > { %9880 = vmatprep.subr.bf16.mxu0 %v14241_v43  ;;  %v14283_v43 = vld [vmem:[%s19181_s7 + $0xe64] ss:$16 sps:$4 sm:$0xff]  }
 0x5f2   : > { %9434 = vmatpush1.bf16.msra.mxu1 %v14236_v53  ;;  %v14278_v53 = vld [vmem:[%s19181_s7 + $0xa68] ss:$16 sps:$4 sm:$0xff]  }
 0x5f3   : > { %9435 = vmatprep.subr.bf16.mxu1 %v14244_v41  ;;  %v14286_v41 = vld [vmem:[%s19181_s7 + $0xa8c] ss:$16 sps:$4 sm:$0xff]  }
 0x5f4   : > { %9881 = vmatpush1.bf16.msra.mxu0 %v14239_v27  ;;  %v18532_v51 = vpop.f32.mrb[24].mxu1  ;;  %v14281_v27 = vld [vmem:[%s19181_s7 + $0xe60] ss:$16 sps:$4 sm:$0xff]  }
 0x5f5   : > { %9882 = vmatprep.subr.bf16.mxu0 %v14247_v20  ;;  %v18536_v54 = vpop.f32.mrb[25].mxu1  ;;  %v14289_v20 = vld [vmem:[%s19181_s7 + $0xe84] ss:$16 sps:$4 sm:$0xff]  }
 0x5f6   : > { %v18534_v34 = vpop.f32.mrb[24].mxu0  ;;  %v7624_v28 = vpop.f32.mrb[26].mxu1  ;;  %9436 = vmatpush1.bf16.msra.mxu1 %v14242_v4  ;;  %v14284_v4 = vld [vmem:[%s19181_s7 + $0xa88] ss:$16 sps:$4 sm:$0xff]  }
 0x5f7   : > { %v18538_v14 = vpop.f32.mrb[25].mxu0  ;;  %v7625_v31 = vpop.f32.mrb[27].mxu1  ;;  %9437 = vmatprep.subr.bf16.mxu1 %v14250_v30  ;;  %v14292_v30 = vld [vmem:[%s19181_s7 + $0xaac] ss:$16 sps:$4 sm:$0xff]   ;;  %v14290_v28 = vld [vmem:[%s19181_s7 + $0xaa8] ss:$16 sps:$4 sm:$0xff]  }
 0x5f8   : > { %v8203_v46 = vpop.f32.mrb[26].mxu0  ;;  %9883 = vmatpush1.bf16.msra.mxu0 %v14245_v10  ;;  %v14287_v10 = vld [vmem:[%s19181_s7 + $0xe80] ss:$16 sps:$4 sm:$0xff]  }
 0x5f9   : > { %v8204_v19 = vpop.f32.mrb[27].mxu0  ;;  %9884 = vmatprep.subr.bf16.mxu0 %v14253_v16  ;;  %v14295_v16 = vld [vmem:[%s19181_s7 + $0xea4] ss:$16 sps:$4 sm:$0xff]   ;;  %v14293_v46 = vld [vmem:[%s19181_s7 + $0xea0] ss:$16 sps:$4 sm:$0xff]  }
 0x5fa   : > { %9438 = vmatpush1.bf16.msra.mxu1 %v14248_v22  ;;  %v14298_v22 = vld [vmem:[%s19181_s7 + $0xacc] ss:$16 sps:$4 sm:$0xff]  }
 0x5fb   : > { %9439 = vmatprep.subr.bf16.mxu1 %v14256_v9 }
 0x5fc   : > { %9885 = vmatpush1.bf16.msra.mxu0 %v14251_v45  ;;  %v14301_v45 = vld [vmem:[%s19181_s7 + $0xec4] ss:$16 sps:$4 sm:$0xff]  }
 0x5fd   : > { %9886 = vmatprep.subr.bf16.mxu0 %v14259_v36 }
 0x5fe   : > { %9440 = vmatpush1.bf16.msra.mxu1 %v14254_v59 }
 0x5ff   : > { %9669 = vmatprep.subr.bf16.mxu1 %v14262_v44 }
 0x600   : > { %9887 = vmatpush1.bf16.msra.mxu0 %v14257_v24 }
 0x601   : > { %10116 = vmatprep.subr.bf16.mxu0 %v14265_v57  ;;  %9458 = vmatmul.mubr.bf16.vlgmr.msra.gmra.mrb[52].mxu1 %v9222_v61  ;;  %v14277_v61 = vld [vmem:[%s19181_s7 + $0xe44] ss:$16 sps:$4 sm:$0xff]  }
 0x602   : > { %9670 = vmatpush1.bf16.msra.mxu1 %v14260_v6  ;;  %9701 = vmatprep.mubr.bf16.mxu1 %v14565_v50  ;;  %v14296_v6 = vld [vmem:[%s19181_s7 + $0xac8] ss:$16 sps:$4 sm:$0xff]  }
 0x603   : > { %9905 = vmatmul.mubr.bf16.vlgmr.msra.gmra.mrb[52].mxu0 %v9710_v40  ;;  %9671 = vmatprep.subr.bf16.mxu1 %v14268_v33 }
 0x604   : > { %10117 = vmatpush1.bf16.msra.mxu0 %v14263_v55  ;;  %10148 = vmatprep.mubr.bf16.mxu0 %v14565_v50  ;;  %v14299_v55 = vld [vmem:[%s19181_s7 + $0xec0] ss:$16 sps:$4 sm:$0xff]  }
 0x605   : > { %10118 = vmatprep.subr.bf16.mxu0 %v14271_v12  ;;  %v14307_v12 = vld [vmem:[%s19181_s7 + $0xee4] ss:$16 sps:$4 sm:$0xff]  }
 0x606   : > { %9672 = vmatpush1.bf16.msra.mxu1 %v14266_v11  ;;  %v14302_v11 = vld [vmem:[%s19181_s7 + $0xae8] ss:$16 sps:$4 sm:$0xff]  }
 0x607   : > { %9673 = vmatprep.subr.bf16.mxu1 %v14274_v37  ;;  %v14310_v37 = vld [vmem:[%s19181_s7 + $0xc0c] ss:$16 sps:$4 sm:$0xff]  }
 0x608   : > { %10119 = vmatpush1.bf16.msra.mxu0 %v14269_v62  ;;  %v14305_v62 = vld [vmem:[%s19181_s7 + $0xee0] ss:$16 sps:$4 sm:$0xff]  }
 0x609   : > { %10120 = vmatprep.subr.bf16.mxu0 %v14277_v61  ;;  %v9954_v61 = vrot.slane %v17145_v23, 7  ;;  %v14388_v23 = vld [vmem:[%s19183_s9 + $0xa4] ss:$8 sps:$4 sm:$0xff]  }
 0x60a   : > { %9674 = vmatpush1.bf16.msra.mxu1 %v14272_v49  ;;  %v14308_v49 = vld [vmem:[%s19181_s7 + $0xc08] ss:$16 sps:$4 sm:$0xff]  }
 0x60b   : > { %9675 = vmatprep.subr.bf16.mxu1 %v14280_v25  ;;  %v14311_v25 = vld [vmem:[%s19181_s7 + $0xc28] ss:$16 sps:$4 sm:$0xff]  }
 0x60c   : > { %10121 = vmatpush1.bf16.msra.mxu0 %v14275_v47  ;;  %v14313_v47 = vld [vmem:[%s19181_s7 + $0xc2c] ss:$16 sps:$4 sm:$0xff]  }
 0x60d   : > { %10122 = vmatprep.subr.bf16.mxu0 %v14283_v43  ;;  %v14316_v43 = vld [vmem:[%s19181_s7 + $0xc4c] ss:$16 sps:$4 sm:$0xff]  }
 0x60e   : > { %9676 = vmatpush1.bf16.msra.mxu1 %v14278_v53  ;;  %v14319_v53 = vld [vmem:[%s19181_s7 + $0xc6c] ss:$16 sps:$4 sm:$0xff]  }
 0x60f   : > { %9677 = vmatprep.subr.bf16.mxu1 %v14286_v41  ;;  %v14322_v41 = vld [vmem:[%s19181_s7 + $0xc8c] ss:$16 sps:$4 sm:$0xff]  }
 0x610   : > { %10123 = vmatpush1.bf16.msra.mxu0 %v14281_v27  ;;  %v14317_v27 = vld [vmem:[%s19181_s7 + $0xc68] ss:$16 sps:$4 sm:$0xff]  }
 0x611   : > { %10124 = vmatprep.subr.bf16.mxu0 %v14289_v20  ;;  %v14320_v20 = vld [vmem:[%s19181_s7 + $0xc88] ss:$16 sps:$4 sm:$0xff]  }
 0x612   : > { %9678 = vmatpush1.bf16.msra.mxu1 %v14284_v4  ;;  %v14325_v4 = vld [vmem:[%s19181_s7 + $0xcac] ss:$16 sps:$4 sm:$0xff]  }
 0x613   : > { %9679 = vmatprep.subr.bf16.mxu1 %v14292_v30  ;;  %v14328_v30 = vld [vmem:[%s19181_s7 + $0xccc] ss:$16 sps:$4 sm:$0xff]  }
 0x614   : > { %10125 = vmatpush1.bf16.msra.mxu0 %v14287_v10  ;;  %v18643_v31 = vpop.f32.mrb[28].mxu1  ;;  %v14323_v10 = vld [vmem:[%s19181_s7 + $0xca8] ss:$16 sps:$4 sm:$0xff]  }
 0x615   : > { %10126 = vmatprep.subr.bf16.mxu0 %v14295_v16  ;;  %v18646_v36 = vpop.f32.mrb[29].mxu1 }
 0x616   : > { %v8441_v19 = vpop.f32.mrb[28].mxu0  ;;  %v7934_v44 = vpop.f32.mrb[30].mxu1  ;;  %9680 = vmatpush1.bf16.msra.mxu1 %v14290_v28 }
 0x617   : > { %v8442_v9 = vadd.f32 %v8441_v19, %v17869_v42  ;;  %v8443_v59 = vpop.f32.mrb[29].mxu0  ;;  %v7935_v33 = vpop.f32.mrb[31].mxu1  ;;  %9681 = vmatprep.subr.bf16.mxu1 %v14298_v22 }
 0x618   : > { %v18649_v24 = vadd.f32 %v8443_v59, %v17873_v26  ;;  %v8445_v57 = vpop.f32.mrb[30].mxu0  ;;  %10127 = vmatpush1.bf16.msra.mxu0 %v14293_v46  ;;  %v14304_v26 = vld [vmem:[%s19181_s7 + $0xaec] ss:$16 sps:$4 sm:$0xff]  }
 0x619   : > { %v8446_v42 = vpop.f32.mrb[31].mxu0  ;;  %10128 = vmatprep.subr.bf16.mxu0 %v14301_v45  ;;  %v14326_v57 = vld [vmem:[%s19181_s7 + $0xcc8] ss:$16 sps:$4 sm:$0xff]  }
 0x61a   : > { %9682 = vmatpush1.bf16.msra.mxu1 %v14296_v6 }
 0x61b   : > { %9683 = vmatprep.subr.bf16.mxu1 %v14304_v26  ;;  %v14358_v26 = vld [vmem:[%s19183_s9 + $0x4] ss:$8 sps:$4 sm:$0xff]  }
 0x61c   : > { %10129 = vmatpush1.bf16.msra.mxu0 %v14299_v55 }
 0x61d   : > { %10130 = vmatprep.subr.bf16.mxu0 %v14307_v12  ;;  %v14334_v12 = vld [vmem:[%s19181_s7 + $0xe0c] ss:$16 sps:$4 sm:$0xff]  }
 0x61e   : > { %9684 = vmatpush1.bf16.msra.mxu1 %v14302_v11  ;;  %v14359_v11 = vld [vmem:[%s19183_s9 + $0x10] ss:$8 sps:$4 sm:$0xff]  }
 0x61f   : > { %9913 = vmatprep.subr.bf16.mxu1 %v14310_v37  ;;  %v14337_v37 = vld [vmem:[%s19181_s7 + $0xe2c] ss:$16 sps:$4 sm:$0xff]  }
 0x620   : > { %10131 = vmatpush1.bf16.msra.mxu0 %v14305_v62  ;;  %v14332_v62 = vld [vmem:[%s19181_s7 + $0xe08] ss:$16 sps:$4 sm:$0xff]  }
 0x621   : > { %9702 = vmatmul.mubr.bf16.vlgmr.msra.gmra.mrb[56].mxu1 %v9466_v13  ;;  %v14314_v13 = vld [vmem:[%s19181_s7 + $0xc48] ss:$16 sps:$4 sm:$0xff]   ;;  %10664 = vmatprep.subr.bf16.mxu0 %v14358_v26 }
 0x622   : > { %9914 = vmatpush1.bf16.msra.mxu1 %v14308_v49  ;;  %9945 = vmatprep.mubr.bf16.mxu1 %v14565_v50  ;;  %v14364_v49 = vld [vmem:[%s19183_s9 + $0x24] ss:$8 sps:$4 sm:$0xff]  }
 0x623   : > { %10149 = vmatmul.mubr.bf16.vlgmr.msra.gmra.mrb[56].mxu0 %v9954_v61  ;;  %9915 = vmatprep.subr.bf16.mxu1 %v14313_v47  ;;  %v14362_v47 = vld [vmem:[%s19183_s9 + $0x20] ss:$8 sps:$4 sm:$0xff]  }
 0x626   : > { %9916 = vmatpush1.bf16.msra.mxu1 %v14311_v25  ;;  %v14335_v25 = vld [vmem:[%s19181_s7 + $0xe28] ss:$16 sps:$4 sm:$0xff]  }
 0x627   : > { %9917 = vmatprep.subr.bf16.mxu1 %v14316_v43  ;;  %v14367_v43 = vld [vmem:[%s19183_s9 + $0x34] ss:$8 sps:$4 sm:$0xff]  }
 0x62a   : > { %9918 = vmatpush1.bf16.msra.mxu1 %v14314_v13  ;;  %v14365_v13 = vld [vmem:[%s19183_s9 + $0x30] ss:$8 sps:$4 sm:$0xff]  }
 0x62b   : > { %9919 = vmatprep.subr.bf16.mxu1 %v14319_v53  ;;  %v14343_v53 = vld [vmem:[%s19181_s7 + $0xe6c] ss:$16 sps:$4 sm:$0xff]  }
 0x62e   : > { %9920 = vmatpush1.bf16.msra.mxu1 %v14317_v27  ;;  %v14341_v27 = vld [vmem:[%s19181_s7 + $0xe68] ss:$16 sps:$4 sm:$0xff]  }
 0x62f   : > { %9921 = vmatprep.subr.bf16.mxu1 %v14322_v41  ;;  %v14346_v41 = vld [vmem:[%s19181_s7 + $0xe8c] ss:$16 sps:$4 sm:$0xff]  }
 0x632   : > { %9922 = vmatpush1.bf16.msra.mxu1 %v14320_v20  ;;  %v14344_v20 = vld [vmem:[%s19181_s7 + $0xe88] ss:$16 sps:$4 sm:$0xff]  }
 0x633   : > { %9923 = vmatprep.subr.bf16.mxu1 %v14325_v4  ;;  %v14349_v4 = vld [vmem:[%s19181_s7 + $0xeac] ss:$16 sps:$4 sm:$0xff]  }
 0x634   : > { %v18714_v16 = vpop.f32.mrb[32].mxu1 }
 0x635   : > { %v18717_v22 = vpop.f32.mrb[33].mxu1 }
 0x636   : > { %v8686_v28 = vpop.f32.mrb[32].mxu0  ;;  %v8244_v59 = vpop.f32.mrb[34].mxu1  ;;  %9924 = vmatpush1.bf16.msra.mxu1 %v14323_v10  ;;  %v14347_v10 = vld [vmem:[%s19181_s7 + $0xea8] ss:$16 sps:$4 sm:$0xff]  }
 0x637   : > { %v8687_v46 = vadd.f32 %v8686_v28, %v17871_v18  ;;  %v8688_v45 = vpop.f32.mrb[33].mxu0  ;;  %v8245_v55 = vpop.f32.mrb[35].mxu1  ;;  %9925 = vmatprep.subr.bf16.mxu1 %v14328_v30  ;;  %v14331_v18 = vld [vmem:[%s19181_s7 + $0xcec] ss:$16 sps:$4 sm:$0xff]  }
 0x638   : > { %v8689_v19 = vadd.f32 %v8688_v45, %v17875_v1  ;;  %v8690_v44 = vpop.f32.mrb[34].mxu0  ;;  %v14329_v1 = vld [vmem:[%s19181_s7 + $0xce8] ss:$16 sps:$4 sm:$0xff]   ;;  %v14352_v30 = vld [vmem:[%s19181_s7 + $0xecc] ss:$16 sps:$4 sm:$0xff]  }
 0x639   : > { %v18723_v6 = vadd.f32 %v8687_v46, %v8442_v9  ;;  %v8691_v33 = vpop.f32.mrb[35].mxu0  ;;  %v14356_v9 = vld [vmem:[%s19183_s9] ss:$8 sps:$4 sm:$0xff]   ;;  %v14370_v45 = vld [vmem:[%s19183_s9 + $0x44] ss:$8 sps:$4 sm:$0xff]  }
 0x63a   : > { %v18729_v42 = vadd.f32 %v8689_v19, %v18649_v24  ;;  %9926 = vmatpush1.bf16.msra.mxu1 %v14326_v57  ;;  %v14361_v24 = vld [vmem:[%s19183_s9 + $0x14] ss:$8 sps:$4 sm:$0xff]   ;;  %10665 = vmatpush1.bf16.msra.mxu0 %v14356_v9  ;;  %v14368_v55 = vld [vmem:[%s19183_s9 + $0x40] ss:$8 sps:$4 sm:$0xff]  }
 0x63b   : > { %9927 = vmatprep.subr.bf16.mxu1 %v14331_v18  ;;  %10666 = vmatprep.subr.bf16.mxu0 %v14361_v24  ;;  %v14376_v24 = vld [vmem:[%s19183_s9 + $0x64] ss:$8 sps:$4 sm:$0xff]  }
 0x63e   : > { %9928 = vmatpush1.bf16.msra.mxu1 %v14329_v1  ;;  %10667 = vmatpush1.bf16.msra.mxu0 %v14359_v11  ;;  %v14353_v11 = vld [vmem:[%s19181_s7 + $0xee8] ss:$16 sps:$4 sm:$0xff]  }
 0x63f   : > { %10157 = vmatprep.subr.bf16.mxu1 %v14334_v12  ;;  %10668 = vmatprep.subr.bf16.mxu0 %v14364_v49  ;;  %v14377_v49 = vld [vmem:[%s19183_s9 + $0x70] ss:$8 sps:$4 sm:$0xff]  }
 0x641   : > { %9946 = vmatmul.mubr.bf16.vlgmr.msra.gmra.mrb[60].mxu1 %v9710_v40  ;;  %v14340_v40 = vld [vmem:[%s19181_s7 + $0xe4c] ss:$16 sps:$4 sm:$0xff]  }
 0x642   : > { %10158 = vmatpush1.bf16.msra.mxu1 %v14332_v62  ;;  %10189 = vmatprep.mubr.bf16.mxu1 %v14565_v50  ;;  %v14338_v50 = vld [vmem:[%s19181_s7 + $0xe48] ss:$16 sps:$4 sm:$0xff]  }
 0x643   : > { %10159 = vmatprep.subr.bf16.mxu1 %v14337_v37  ;;  %10669 = vmatpush1.bf16.msra.mxu0 %v14362_v47  ;;  %v14374_v62 = vld [vmem:[%s19183_s9 + $0x60] ss:$8 sps:$4 sm:$0xff]   ;;  %v14379_v37 = vld [vmem:[%s19183_s9 + $0x74] ss:$8 sps:$4 sm:$0xff]   ;;  %v14382_v47 = vld [vmem:[%s19183_s9 + $0x84] ss:$8 sps:$4 sm:$0xff]  }
 0x644   : > { %10670 = vmatprep.subr.bf16.mxu0 %v14367_v43  ;;  %v14385_v43 = vld [vmem:[%s19183_s9 + $0x94] ss:$8 sps:$4 sm:$0xff]  }
 0x646   : > { %10160 = vmatpush1.bf16.msra.mxu1 %v14335_v25  ;;  %v14380_v25 = vld [vmem:[%s19183_s9 + $0x80] ss:$8 sps:$4 sm:$0xff]  }
 0x647   : > { %10161 = vmatprep.subr.bf16.mxu1 %v14340_v40  ;;  %10671 = vmatpush1.bf16.msra.mxu0 %v14365_v13  ;;  %v14383_v40 = vld [vmem:[%s19183_s9 + $0x90] ss:$8 sps:$4 sm:$0xff]   ;;  %v14391_v13 = vld [vmem:[%s19183_s9 + $0xb4] ss:$8 sps:$4 sm:$0xff]  }
 0x648   : > { %10672 = vmatprep.subr.bf16.mxu0 %v14370_v45 }
 0x64a   : > { %10162 = vmatpush1.bf16.msra.mxu1 %v14338_v50  ;;  %v14389_v50 = vld [vmem:[%s19183_s9 + $0xb0] ss:$8 sps:$4 sm:$0xff]  }
 0x64b   : > { %10163 = vmatprep.subr.bf16.mxu1 %v14343_v53  ;;  %10673 = vmatpush1.bf16.msra.mxu0 %v14368_v55 }
 0x64e   : > { %10164 = vmatpush1.bf16.msra.mxu1 %v14341_v27 }
 0x64f   : > { %10165 = vmatprep.subr.bf16.mxu1 %v14346_v41  ;;  %v14394_v41 = vld [vmem:[%s19183_s9 + $0xc4] ss:$8 sps:$4 sm:$0xff]  }
 0x652   : > { %10166 = vmatpush1.bf16.msra.mxu1 %v14344_v20 }
 0x653   : > { %10167 = vmatprep.subr.bf16.mxu1 %v14349_v4 }
 0x654   : > { %v8482_v28 = vpop.f32.mrb[36].mxu1 }
 0x655   : > { %v18804_v19 = vadd.f32 %v8482_v28, %v17978_v63  ;;  %v8484_v44 = vpop.f32.mrb[37].mxu1  ;;  %v14350_v63 = vld [vmem:[%s19181_s7 + $0xec8] ss:$16 sps:$4 sm:$0xff]  }
 0x656   : > { %v8930_v46 = vpop.f32.mrb[36].mxu0  ;;  %v18813_v33 = vadd.f32 %v8484_v44, %v17988_v3  ;;  %v8486_v1 = vpop.f32.mrb[38].mxu1  ;;  %10168 = vmatpush1.bf16.msra.mxu1 %v14347_v10  ;;  %v14371_v3 = vld [vmem:[%s19183_s9 + $0x50] ss:$8 sps:$4 sm:$0xff]   ;;  %v14392_v28 = vld [vmem:[%s19183_s9 + $0xc0] ss:$8 sps:$4 sm:$0xff]  }
 0x657   : > { %v18807_v59 = vadd.f32 %v8930_v46, %v17980_v58  ;;  %v8932_v57 = vpop.f32.mrb[37].mxu0  ;;  %v14355_v58 = vld [vmem:[%s19181_s7 + $0xeec] ss:$16 sps:$4 sm:$0xff]   ;;  %v8487_v26 = vpop.f32.mrb[39].mxu1  ;;  %10169 = vmatprep.subr.bf16.mxu1 %v14352_v30 }
 0x658   : > { %v18816_v18 = vadd.f32 %v8932_v57, %v17990_v2  ;;  %v8934_v9 = vpop.f32.mrb[38].mxu0  ;;  %v14373_v2 = vld [vmem:[%s19183_s9 + $0x54] ss:$8 sps:$4 sm:$0xff]  }
 0x659   : > { %v8935_v12 = vpop.f32.mrb[39].mxu0  ;;  %10674 = vmatprep.subr.bf16.mxu0 %v14373_v2 }
 0x65a   : > { %10170 = vmatpush1.bf16.msra.mxu1 %v14350_v63  ;;  %10675 = vmatpush1.bf16.msra.mxu0 %v14371_v3 }
 0x65b   : > { %10171 = vmatprep.subr.bf16.mxu1 %v14355_v58  ;;  %10676 = vmatprep.subr.bf16.mxu0 %v14376_v24  ;;  %v14406_v58 = vld [vmem:[%s19183_s9 + $0x104] ss:$8 sps:$4 sm:$0xff]  }
 0x65e   : > { %10172 = vmatpush1.bf16.msra.mxu1 %v14353_v11  ;;  %10677 = vmatpush1.bf16.msra.mxu0 %v14374_v62 }
 0x65f   : > { %10678 = vmatprep.subr.bf16.mxu0 %v14379_v37 }
 0x661   : > { %10190 = vmatmul.mubr.bf16.vlgmr.msra.gmra.mrb[64].mxu1 %v9954_v61  ;;  %v14386_v61 = vld [vmem:[%s19183_s9 + $0xa0] ss:$8 sps:$4 sm:$0xff]  }
 0x662   : > { %10679 = vmatpush1.bf16.msra.mxu0 %v14377_v49 }
 0x663   : > { %10680 = vmatprep.subr.bf16.mxu0 %v14382_v47 }
 0x666   : > { %10681 = vmatpush1.bf16.msra.mxu0 %v14380_v25 }
 0x667   : > { %10682 = vmatprep.subr.bf16.mxu0 %v14385_v43 }
 0x66a   : > { %10683 = vmatpush1.bf16.msra.mxu0 %v14383_v40 }
 0x66b   : > { %10684 = vmatprep.subr.bf16.mxu0 %v14388_v23 }
 0x66e   : > { %10685 = vmatpush1.bf16.msra.mxu0 %v14386_v61 }
 0x66f   : > { %10686 = vmatprep.subr.bf16.mxu0 %v14391_v13 }
 0x672   : > { %10687 = vmatpush1.bf16.msra.mxu0 %v14389_v50 }
 0x673   : > { %10688 = vmatprep.subr.bf16.mxu0 %v14394_v41 }
 0x674   : > { %v8727_v53 = vpop.f32.mrb[40].mxu1 }
 0x675   : > { %v8728_v20 = vadd.f32 %v8727_v53, %v18089_v8  ;;  %v8729_v10 = vpop.f32.mrb[41].mxu1 }
 0x676   : > { %v9174_v27 = vpop.f32.mrb[40].mxu0  ;;  %v8730_v46 = vadd.f32 %v8729_v10, %v18099_v39  ;;  %v8731_v44 = vpop.f32.mrb[42].mxu1  ;;  %10689 = vmatpush1.bf16.msra.mxu0 %v14392_v28  ;;  %v14397_v39 = vld [vmem:[%s19183_s9 + $0xd4] ss:$8 sps:$4 sm:$0xff]  }
 0x677   : > { %v9175_v4 = vadd.f32 %v9174_v27, %v18091_v52  ;;  %v9176_v30 = vpop.f32.mrb[41].mxu0  ;;  %v10200_v55 = vadd.f32 %v8728_v20, %v18804_v19  ;;  %v8732_v8 = vpop.f32.mrb[43].mxu1  ;;  %v14395_v19 = vld [vmem:[%s19183_s9 + $0xd0] ss:$8 sps:$4 sm:$0xff]   ;;  %10690 = vmatprep.subr.bf16.mxu0 %v14397_v39 }
 0x678   : > { %v9177_v45 = vadd.f32 %v9176_v30, %v18101_v29  ;;  %v9178_v57 = vpop.f32.mrb[42].mxu0  ;;  %v10201_v52 = vadd.f32 %v8730_v46, %v18813_v33  ;;  %v14400_v33 = vld [vmem:[%s19183_s9 + $0xe4] ss:$8 sps:$4 sm:$0xff]   ;;  %v14457_v44 = vld [vmem:[%s19185_s11 + $0x10] sm:$0xff]  }
 0x679   : > { %v10202_v1 = vadd.f32 %v9175_v4, %v18807_v59  ;;  %v9179_v9 = vpop.f32.mrb[43].mxu0  ;;  %v14455_v46 = vld [vmem:[%s19185_s11 + $0x8] sm:$0xff]   ;;  %v14458_v57 = vld [vmem:[%s19185_s11 + $0x58] sm:$0xff]  }
 0x67a   : > { %v10203_v63 = vadd.f32 %v9177_v45, %v18816_v18  ;;  %10691 = vmatpush1.bf16.msra.mxu0 %v14395_v19  ;;  %v14398_v18 = vld [vmem:[%s19183_s9 + $0xe0] ss:$8 sps:$4 sm:$0xff]   ;;  %v14456_v45 = vld [vmem:[%s19185_s11 + $0x50] sm:$0xff]  }
 0x67b   : > { %v18889_v29 = vadd.f32 %v10202_v1, %v18723_v6  ;;  %10692 = vmatprep.subr.bf16.mxu0 %v14400_v33  ;;  %v14403_v6 = vld [vmem:[%s19183_s9 + $0xf4] ss:$8 sps:$4 sm:$0xff]   ;;  %v14460_v1 = vld [vmem:[%s19185_s11 + $0x60] sm:$0xff]  }
 0x67c   : > { %v18895_v59 = vadd.f32 %v10203_v63, %v18729_v42  ;;  %v14401_v42 = vld [vmem:[%s19183_s9 + $0xf0] ss:$8 sps:$4 sm:$0xff]   ;;  %v14461_v33 = vld [vmem:[%s19185_s11 + $0x20] sm:$0xff]  }
 0x67e   : > { %10693 = vmatpush1.bf16.msra.mxu0 %v14398_v18 }
 0x67f   : > { %10694 = vmatprep.subr.bf16.mxu0 %v14403_v6 }
 0x682   : > { %10695 = vmatpush1.bf16.msra.mxu0 %v14401_v42 }
 0x683   : > { %10705 = vmatprep.subr.bf16.mxu0 %v14406_v58 }
 0x694   : > { %v8971_v26 = vpop.f32.mrb[44].mxu1 }
 0x695   : > { %v8972_v3 = vadd.f32 %v8971_v26, %v18199_v5  ;;  %v8973_v24 = vpop.f32.mrb[45].mxu1 }
 0x696   : > { %v9418_v12 = vpop.f32.mrb[44].mxu0  ;;  %v8974_v62 = vadd.f32 %v8973_v24, %v18209_v7  ;;  %v8975_v49 = vpop.f32.mrb[46].mxu1 }
 0x697   : > { %v9419_v2 = vadd.f32 %v9418_v12, %v18201_v15  ;;  %v9420_v11 = vpop.f32.mrb[45].mxu0  ;;  %v8976_v25 = vpop.f32.mrb[47].mxu1  ;;  %v14463_v12 = vld [vmem:[%s19185_s11 + $0x28] sm:$0xff]  }
 0x698   : > { %v9421_v37 = vadd.f32 %v9420_v11, %v18211_v56  ;;  %v9422_v47 = vpop.f32.mrb[46].mxu0 }
 0x699   : > { %v9423_v43 = vpop.f32.mrb[47].mxu0  ;;  %v18974_v47 = vld [vmem:[%s19182_s8] sm:$0xf] }
 0x6b4   : > { %v9215_v40 = vpop.f32.mrb[48].mxu1 }
 0x6b5   : > { %v9216_v61 = vadd.f32 %v9215_v40, %v18310_v35  ;;  %v9217_v50 = vpop.f32.mrb[49].mxu1 }
 0x6b6   : > { %v9662_v23 = vpop.f32.mrb[48].mxu0  ;;  %v9218_v15 = vadd.f32 %v9217_v50, %v18314_v17  ;;  %v9219_v27 = vpop.f32.mrb[50].mxu1  ;;  %v14453_v17 = vld [vmem:[%s19185_s11] sm:$0xff]  }
 0x6b7   : > { %v9663_v13 = vadd.f32 %v9662_v23, %v18312_v60  ;;  %v9664_v5 = vpop.f32.mrb[49].mxu0  ;;  %v10204_v41 = vadd.f32 %v9216_v61, %v8972_v3  ;;  %v9220_v20 = vpop.f32.mrb[51].mxu1  ;;  %v14452_v60 = vld [vmem:[%s19185_s11 + $0x40] sm:$0xff]   ;;  %v10228_v3 = vlaneseq }
 0x6b8   : > { %v9665_v53 = vadd.f32 %v9664_v5, %v18316_v48  ;;  %v9666_v7 = vpop.f32.mrb[50].mxu0  ;;  %v10205_v10 = vadd.f32 %v9218_v15, %v8974_v62  ;;  %v14454_v48 = vld [vmem:[%s19185_s11 + $0x48] sm:$0xff]   ;;  %12728 = vmatprep.subr.bf16.mxu1 %v14452_v60 }
 0x6b9   : > { %v18920_v56 = vadd.f32 %v9663_v13, %v9419_v2  ;;  %v9667_v4 = vpop.f32.mrb[51].mxu0  ;;  %v18922_v28 = vadd.f32 %v10204_v41, %v10200_v55  ;;  %12729 = vmatpush3.bf16.msra.mxu1 %v14453_v17  ;;  %v14459_v55 = vld [vmem:[%s19185_s11 + $0x18] sm:$0xff]  }
 0x6ba   : > { %v10207_v30 = vadd.f32 %v9665_v53, %v9421_v37  ;;  %v18924_v35 = vadd.f32 %v10205_v10, %v10201_v52  ;;  %12730 = vmatprep.subr.bf16.mxu1 %v14454_v48 }
 0x6bd   : > { %12731 = vmatpush3.bf16.msra.mxu1 %v14455_v46 }
 0x6be   : > { %12732 = vmatprep.subr.bf16.mxu1 %v14456_v45  ;;  %v14412_v45 = vld [vmem:[%s19183_s9 + $0x124] ss:$8 sps:$4 sm:$0xff]  }
 0x6c1   : > { %12733 = vmatpush3.bf16.msra.mxu1 %v14457_v44  ;;  %v14410_v44 = vld [vmem:[%s19183_s9 + $0x120] ss:$8 sps:$4 sm:$0xff]  }
 0x6c2   : > { %12734 = vmatprep.subr.bf16.mxu1 %v14458_v57  ;;  %v14415_v57 = vld [vmem:[%s19183_s9 + $0x134] ss:$8 sps:$4 sm:$0xff]  }
 0x6c5   : > { %12735 = vmatpush3.bf16.msra.mxu1 %v14459_v55  ;;  %v14413_v55 = vld [vmem:[%s19183_s9 + $0x130] ss:$8 sps:$4 sm:$0xff]  }
 0x6c6   : > { %12736 = vmatprep.subr.bf16.mxu1 %v14460_v1  ;;  %v14418_v1 = vld [vmem:[%s19183_s9 + $0x144] ss:$8 sps:$4 sm:$0xff]  }
 0x6c9   : > { %12737 = vmatpush3.bf16.msra.mxu1 %v14461_v33 }
 0x6d4   : > { %v9459_v8 = vpop.f32.mrb[52].mxu1 }
 0x6d5   : > { %v9460_v52 = vadd.f32 %v9459_v8, %v18421_v32  ;;  %v9461_v39 = vpop.f32.mrb[53].mxu1  ;;  %v14462_v32 = vld [vmem:[%s19185_s11 + $0x68] sm:$0xff]  }
 0x6d6   : > { %v9906_v9 = vpop.f32.mrb[52].mxu0  ;;  %v9462_v18 = vadd.f32 %v9461_v39, %v18425_v21  ;;  %v9463_v42 = vpop.f32.mrb[54].mxu1  ;;  %12738 = vmatprep.subr.bf16.mxu1 %v14462_v32  ;;  %v18966_v21 = vshrl.u32 %v10228_v3, 7  ;;  %v14416_v8 = vld [vmem:[%s19183_s9 + $0x140] ss:$8 sps:$4 sm:$0xff]  }
 0x6d7   : > { %v9907_v63 = vadd.f32 %v9906_v9, %v18423_v0  ;;  %v9908_v19 = vpop.f32.mrb[53].mxu0  ;;  %v9464_v26 = vpop.f32.mrb[55].mxu1  ;;  %12739 = vmatpush3.bf16.msra.mxu1 %v14463_v12  ;;  %v14424_v42 = vld [vmem:[%s19183_s9 + $0x164] ss:$8 sps:$4 sm:$0xff]   ;;  %v14431_v12 = vld [vmem:[%s19183_s9 + $0x190] ss:$8 sps:$4 sm:$0xff]  }
 0x6d8   : > { %v9909_v6 = vadd.f32 %v9908_v19, %v18427_v38  ;;  %v9910_v58 = vpop.f32.mrb[54].mxu0  ;;  %v10230_v62 = vsub.s32 0, %v18966_v21  ;;  %v10234_v40 = vsub.s32 1, %v18966_v21  ;;  %v14430_v32 = vld [vmem:[%s19183_s9 + $0x184] ss:$8 sps:$4 sm:$0xff]  }
 0x6d9   : > { %v9911_v0 = vpop.f32.mrb[55].mxu0  ;;  %v14425_v58 = vld [vmem:[%s19183_s9 + $0x170] ss:$8 sps:$4 sm:$0xff]   ;;  %v14428_v26 = vld [vmem:[%s19183_s9 + $0x180] ss:$8 sps:$4 sm:$0xff]  }
 0x6da   : > { %v14433_v0 = vld [vmem:[%s19183_s9 + $0x194] ss:$8 sps:$4 sm:$0xff]   ;;  %v14436_v3 = vld [vmem:[%s19183_s9 + $0x1a4] ss:$8 sps:$4 sm:$0xff]  }
 0x6f4   : > { %v9703_v38 = vpop.f32.mrb[56].mxu1 }
 0x6f5   : > { %v9704_v24 = vadd.f32 %v9703_v38, %v18532_v51  ;;  %v9705_v37 = vpop.f32.mrb[57].mxu1  ;;  %v14434_v38 = vld [vmem:[%s19183_s9 + $0x1a0] ss:$8 sps:$4 sm:$0xff]  }
 0x6f6   : > { %v10150_v2 = vpop.f32.mrb[56].mxu0  ;;  %v9706_v25 = vadd.f32 %v9705_v37, %v18536_v54  ;;  %v9707_v23 = vpop.f32.mrb[58].mxu1  ;;  %v10231_v54 = vrot.slane %v18974_v47, %v10230_v62  ;;  %v14440_v37 = vld [vmem:[%s19183_s9 + $0x1c0] ss:$8 sps:$4 sm:$0xff]  }
 0x6f7   : > { %v10151_v11 = vadd.f32 %v10150_v2, %v18534_v34  ;;  %v10152_v49 = vpop.f32.mrb[57].mxu0  ;;  %v18979_v51 = vadd.f32 %v9704_v24, %v9460_v52  ;;  %v9708_v13 = vpop.f32.mrb[59].mxu1  ;;  %v14421_v52 = vld [vmem:[%s19183_s9 + $0x154] ss:$8 sps:$4 sm:$0xff]   ;;  %v14437_v24 = vld [vmem:[%s19183_s9 + $0x1b0] ss:$8 sps:$4 sm:$0xff]  }
 0x6f8   : > { %v10153_v43 = vadd.f32 %v10152_v49, %v18538_v14  ;;  %v10154_v61 = vpop.f32.mrb[58].mxu0  ;;  %v18981_v5 = vadd.f32 %v9706_v25, %v9462_v18  ;;  %v10235_v14 = vrot.slane %v18974_v47, %v10234_v40  ;;  %v14439_v2 = vld [vmem:[%s19183_s9 + $0x1b4] ss:$8 sps:$4 sm:$0xff]   ;;  %v10238_v23 = vsub.s32 2, %v18966_v21 }
 0x6f9   : > { %v10210_v34 = vadd.f32 %v10151_v11, %v9907_v63  ;;  %v10155_v50 = vpop.f32.mrb[59].mxu0  ;;  %v14442_v11 = vld [vmem:[%s19183_s9 + $0x1c4] ss:$8 sps:$4 sm:$0xff]   ;;  %v14445_v25 = vld [vmem:[%s19183_s9 + $0x1d4] ss:$8 sps:$4 sm:$0xff]   ;;  %v10242_v13 = vsub.s32 3, %v18966_v21 }
 0x6fa   : > { %v10211_v15 = vadd.f32 %v10153_v43, %v9909_v6  ;;  %v14419_v6 = vld [vmem:[%s19183_s9 + $0x150] ss:$8 sps:$4 sm:$0xff]   ;;  %v10786_v21 = vld [vmem:[%s19186_s12] sm:$0x1] }
 0x6fb   : > { %v10218_v53 = vadd.f32 %v10210_v34, %v18920_v56 }
 0x6fc   : > { %v10219_v27 = vadd.f32 %v10211_v15, %v10207_v30  ;;  %v14404_v30 = vld [vmem:[%s19183_s9 + $0x100] ss:$8 sps:$4 sm:$0xff]  }
 0x6fd   : > { %v10222_v7 = vadd.f32 %v10218_v53, %v18889_v29  ;;  %v14409_v29 = vld [vmem:[%s19183_s9 + $0x114] ss:$8 sps:$4 sm:$0xff]  }
 0x6fe   : > { %v10223_v41 = vadd.f32 %v10219_v27, %v18895_v59  ;;  %v14407_v59 = vld [vmem:[%s19183_s9 + $0x110] ss:$8 sps:$4 sm:$0xff]  }
 0x6ff   : > { %v10248_v20 = vadd.f32 %v10231_v54, %v10222_v7  ;;  %v14443_v54 = vld [vmem:[%s19183_s9 + $0x1d0] ss:$8 sps:$4 sm:$0xff]  }
 0x700   : > { %v10249_v4 = vadd.f32 %v10235_v14, %v10223_v41  ;;  %v10243_v41 = vrot.slane %v18974_v47, %v10242_v13 }
 0x701   : > { %vm10252_vm1 = vcmp.gt.f32.partialorder %v10248_v20, 0.0  ;;  %v10256_v10 = vmul.f32 0.1, %v10248_v20 }
 0x702   : > { %vm10253_vm14 = vcmp.gt.f32.partialorder %v10249_v4, 0.0  ;;  %v10257_v60 = vmul.f32 0.1, %v10249_v4 }
 0x703   : > { %v10260_v56 = vsel %vm10252_vm1, %v10248_v20, %v10256_v10 }
 0x704   : > { %v10261_v17 = vsel %vm10253_vm14, %v10249_v4, %v10257_v60  ;;  %v10264_v46 = vpack.c.bf16 %v10260_v56, %v10260_v56  ;;  %v14446_v4 = vld [vmem:[%s19183_s9 + $0x1e0] ss:$8 sps:$4 sm:$0xff]  }
 0x705   : > { %v10265_v48 = vpack.c.bf16 %v10261_v17, %v10261_v17 }
 0x707   : > { %10696 = vmatprep.mubr.bf16.mxu0 %v10265_v48 }
 0x708   : > { %10697 = vmatmul.mubr.bf16.vlgmr.msra.gmra.mrb[60].mxu0 %v10264_v46  ;;  %v14464_v46 = vld [vmem:[%s19185_s11 + $0x70] sm:$0xff]  }
 0x709   : > { %10706 = vmatpush1.bf16.msra.mxu0 %v14404_v30  ;;  %12740 = vmatprep.subr.bf16.mxu1 %v14464_v46 }
 0x70a   : > { %10707 = vmatprep.subr.bf16.mxu0 %v14409_v29  ;;  %v14465_v29 = vld [vmem:[%s19185_s11 + $0x30] sm:$0xff]  }
 0x70b   : > { %12741 = vmatpush3.bf16.msra.mxu1 %v14465_v29 }
 0x70d   : > { %10708 = vmatpush1.bf16.msra.mxu0 %v14407_v59  ;;  %v14466_v59 = vld [vmem:[%s19185_s11 + $0x78] sm:$0xff]  }
 0x70e   : > { %10709 = vmatprep.subr.bf16.mxu0 %v14412_v45  ;;  %v14467_v45 = vld [vmem:[%s19185_s11 + $0x38] sm:$0xff]   ;;  %12742 = vmatprep.subr.bf16.mxu1 %v14466_v59 }
 0x70f   : > { %12743 = vmatpush3.bf16.msra.mxu1 %v14467_v45 }
 0x711   : > { %10710 = vmatpush1.bf16.msra.mxu0 %v14410_v44  ;;  %v10332_v44 = vld [vmem:[%s19184_s10] sm:$0x3] }
 0x712   : > { %10711 = vmatprep.subr.bf16.mxu0 %v14415_v57  ;;  %v10657_v57 = vrot.slane %v10332_v44, %v10230_v62 }
 0x714   : > { %v9947_v9 = vpop.f32.mrb[60].mxu1 }
 0x715   : > { %10712 = vmatpush1.bf16.msra.mxu0 %v14413_v55  ;;  %v9948_v63 = vadd.f32 %v9947_v9, %v18643_v31  ;;  %v9949_v39 = vpop.f32.mrb[61].mxu1  ;;  %v14422_v31 = vld [vmem:[%s19183_s9 + $0x160] ss:$8 sps:$4 sm:$0xff]   ;;  %v10661_v55 = vrot.slane %v10332_v44, %v10234_v40 }
 0x716   : > { %10713 = vmatprep.subr.bf16.mxu0 %v14418_v1  ;;  %v9950_v19 = vadd.f32 %v9949_v39, %v18646_v36  ;;  %v9951_v33 = vpop.f32.mrb[62].mxu1  ;;  %v14427_v36 = vld [vmem:[%s19183_s9 + $0x174] ss:$8 sps:$4 sm:$0xff]  }
 0x717   : > { %v9952_v18 = vpop.f32.mrb[63].mxu1 }
 0x719   : > { %10714 = vmatpush1.bf16.msra.mxu0 %v14416_v8 }
 0x71a   : > { %10715 = vmatprep.subr.bf16.mxu0 %v14421_v52 }
 0x71d   : > { %10716 = vmatpush1.bf16.msra.mxu0 %v14419_v6 }
 0x71e   : > { %10717 = vmatprep.subr.bf16.mxu0 %v14424_v42 }
 0x721   : > { %10718 = vmatpush1.bf16.msra.mxu0 %v14422_v31 }
 0x722   : > { %10719 = vmatprep.subr.bf16.mxu0 %v14427_v36 }
 0x725   : > { %10720 = vmatpush1.bf16.msra.mxu0 %v14425_v58 }
 0x726   : > { %10721 = vmatprep.subr.bf16.mxu0 %v14430_v32 }
 0x729   : > { %10722 = vmatpush1.bf16.msra.mxu0 %v14428_v26 }
 0x72a   : > { %10723 = vmatprep.subr.bf16.mxu0 %v14433_v0 }
 0x72d   : > { %10724 = vmatpush1.bf16.msra.mxu0 %v14431_v12 }
 0x72e   : > { %10725 = vmatprep.subr.bf16.mxu0 %v14436_v3 }
 0x731   : > { %10726 = vmatpush1.bf16.msra.mxu0 %v14434_v38 }
 0x732   : > { %10727 = vmatprep.subr.bf16.mxu0 %v14439_v2 }
 0x734   : > { %v10191_v49 = vpop.f32.mrb[64].mxu1 }
 0x735   : > { %10728 = vmatpush1.bf16.msra.mxu0 %v14437_v24  ;;  %v10192_v43 = vadd.f32 %v10191_v49, %v18714_v16  ;;  %v10193_v61 = vpop.f32.mrb[65].mxu1  ;;  %v14448_v16 = vld [vmem:[%s19183_s9 + $0x1e4] ss:$8 sps:$4 sm:$0xff]  }
 0x736   : > { %10729 = vmatprep.subr.bf16.mxu0 %v14442_v11  ;;  %v10194_v34 = vadd.f32 %v10193_v61, %v18717_v22  ;;  %v10195_v50 = vpop.f32.mrb[66].mxu1  ;;  %v10239_v22 = vrot.slane %v18974_v47, %v10238_v23  ;;  %v14449_v47 = vld [vmem:[%s19183_s9 + $0x1f0] ss:$8 sps:$4 sm:$0xff]  }
 0x737   : > { %v10212_v15 = vadd.f32 %v10192_v43, %v9948_v63  ;;  %v10196_v53 = vpop.f32.mrb[67].mxu1 }
 0x738   : > { %v10213_v27 = vadd.f32 %v10194_v34, %v9950_v19 }
 0x739   : > { %10730 = vmatpush1.bf16.msra.mxu0 %v14440_v37  ;;  %v10220_v14 = vadd.f32 %v10212_v15, %v18979_v51  ;;  %v14451_v51 = vld [vmem:[%s19183_s9 + $0x1f4] ss:$8 sps:$4 sm:$0xff]  }
 0x73a   : > { %10731 = vmatprep.subr.bf16.mxu0 %v14445_v25  ;;  %v10221_v7 = vadd.f32 %v10213_v27, %v18981_v5 }
 0x73b   : > { %v10224_v20 = vadd.f32 %v10220_v14, %v18922_v28 }
 0x73c   : > { %v10225_v10 = vadd.f32 %v10221_v7, %v18924_v35 }
 0x73d   : > { %10732 = vmatpush1.bf16.msra.mxu0 %v14443_v54  ;;  %v10250_v60 = vadd.f32 %v10239_v22, %v10224_v20 }
 0x73e   : > { %10733 = vmatprep.subr.bf16.mxu0 %v14448_v16  ;;  %v10251_v56 = vadd.f32 %v10243_v41, %v10225_v10 }
 0x73f   : > { %vm10254_vm6 = vcmp.gt.f32.partialorder %v10250_v60, 0.0  ;;  %v10258_v28 = vmul.f32 0.1, %v10250_v60 }
 0x740   : > { %vm10255_vm4 = vcmp.gt.f32.partialorder %v10251_v56, 0.0  ;;  %v10259_v5 = vmul.f32 0.1, %v10251_v56 }
 0x741   : > { %10734 = vmatpush1.bf16.msra.mxu0 %v14446_v4  ;;  %v10262_v17 = vsel %vm10254_vm6, %v10250_v60, %v10258_v28 }
 0x742   : > { %10735 = vmatprep.subr.bf16.mxu0 %v14451_v51  ;;  %v10263_v48 = vsel %vm10255_vm4, %v10251_v56, %v10259_v5  ;;  %v10266_v30 = vpack.c.bf16 %v10262_v17, %v10262_v17 }
 0x743   : > { %v10267_v35 = vpack.c.bf16 %v10263_v48, %v10263_v48 }
 0x745   : > { %10736 = vmatpush1.bf16.msra.mxu0 %v14449_v47  ;;  %10737 = vmatprep.mubr.bf16.mxu0 %v10267_v35 }
 0x748   : > { %10738 = vmatmul.mubr.bf16.vlgmr.msra.gmra.mrb[60].mxu0 %v10266_v30 }
 0x81b   : > { %v10739_v1 = vpop.f32.mrb[60].mxu0 }
 0x81c   : > { %v13486_v8 = vadd.f32 %v10739_v1, %v10657_v57  ;;  %v10741_v9 = vpop.f32.mrb[61].mxu0 }
 0x81d   : > { %v13487_v52 = vadd.f32 %v10741_v9, %v10661_v55  ;;  %v10743_v63 = vpop.f32.mrb[62].mxu0 }
 0x81e   : > { %vm10746_vm8 = vcmp.gt.f32.partialorder %v13486_v8, 0.0  ;;  %v10748_v39 = vmul.f32 0.1, %v13486_v8  ;;  %v10744_v19 = vpop.f32.mrb[63].mxu0 }
 0x81f   : > { %vm10747_vm12 = vcmp.gt.f32.partialorder %v13487_v52, 0.0  ;;  %v10749_v33 = vmul.f32 0.1, %v13487_v52 }
 0x820   : > { %v10750_v18 = vsel %vm10746_vm8, %v13486_v8, %v10748_v39 }
 0x821   : > { %v10751_v6 = vsel %vm10747_vm12, %v13487_v52, %v10749_v33  ;;  %v10752_v31 = vpack.c.bf16 %v10750_v18, %v10750_v18 }
 0x822   : > { %v10753_v42 = vpack.c.bf16 %v10751_v6, %v10751_v6 }
 0x824   : > { %10915 = vmatprep.mubr.bf16.mxu1 %v10753_v42 }
 0x825   : > { %10916 = vmatmul.mubr.bf16.vlgmr.msra.gmra.mrb[68].mxu1 %v10752_v31 }
 0x8f8   : > { %v12744_v62 = vpop.f32.mrb[68].mxu1 }
 0x8f9   : > { %v12745_v40 = vpop.f32.mrb[69].mxu1 }
 0x8fa   : > { %v12746_v36 = vadd.f32 %v12745_v40, %v12744_v62  ;;  %v12747_v58 = vpop.f32.mrb[70].mxu1 }
 0x8fb   : > { %v12748_v32 = vpop.f32.mrb[71].mxu1 }
 0x8fc   : > { %v10918_v26 = vadd.f32 %v12746_v36, %v10786_v21 }
 0x8fe   : > { %10923 = vst [vmem:[%s14717_s23] sm:$0x1] %v10918_v26 }
 0x8ff PF: > { %s12308_s18 = sshll.u32 %s14550_s29, 4  ;;  %s10937_s28 = sshll.u32 %s14717_s23, 4  ;;  %s10938_s28 = int_to_ptr.vmem [resolvable:$true] %s10937_s28 }
 0x900   : > { %s19124_s24 = scalar_lea.hbm %s19187_s13, %s12308_s18  ;;  %s10925_s22 = scalar_lea.sflag [#allocation4], %s454_s16 }
 0x901   : > { %s14468_s17 = scalar_lea.vmem %s10938_s28, 16  ;;  %s14566_s25 = smov [#allocation3]  }
 0x902   : > { %p14469_p2 = scmp.ne.s32.totalorder %s10938_s28, %s14468_s17  ;;  %s14472_s27 = sshll.u32 %s14566_s25, 4  ;;  %s14473_s27 = int_to_ptr.vmem [resolvable:$false] %s14472_s27 }
 0x903   : > { %s14474_s30 = scalar_lea.vmem %s14473_s27, 32  ;;  %p14475_p6 = scmp.lt.s32.totalorder %s10938_s28, %s14473_s27 }
 0x904   : > { %p14470_p4 = pnand %p14469_p2, %p14686_p3  ;;  %p14476_p7 = scmp.lt.s32.totalorder %s14474_s30, %s14468_s17 }
 0x906   : > { %p14471_p5 = pneg %p14470_p4  ;;  %p14477_p8 = por %p14476_p7, %p14475_p6 }
 0x908   : > { %p14478_p10 = pnand %p14477_p8, %p14471_p5 }
 0x90a   : > { %14481 = shalt.err (!%p14478_p10)
}
 0x90b   : > { %s14482_s29 = scalar_lea.hbm %s19124_s24, 16  ;;  %s14486_s14 = scalar_lea.hbm %s19187_s13, 32 }
 0x90c   : > { %p14483_p11 = scmp.ne.s32.totalorder %s19124_s24, %s14482_s29  ;;  %p14487_p0 = scmp.lt.u32.totalorder %s19124_s24, %s19187_s13 }
 0x90d   : > { %p14488_p1 = scmp.lt.u32.totalorder %s14486_s14, %s14482_s29  ;;  %p14490_p4 = scmp.lt.u32.totalorder %s14482_s29, %s19124_s24 }
 0x90e   : > { %p14484_p12 = pnand %p14483_p11, %p14686_p3 }
 0x90f   : > { %p14489_p2 = por %p14488_p1, %p14487_p0 }
 0x910   : > { %p14485_p13 = pneg %p14484_p12 }
 0x911   : > { %p14491_p5 = por %p14490_p4, %p14489_p2 }
 0x913   : > { %p14492_p6 = pnand %p14491_p5, %p14485_p13 }
 0x915   : > { %14495 = shalt.err (!%p14492_p6)
}
 0x916   : > { %13493 = dma.vmem_to_hbm [thread:$0]  (%p14686_p3), %s10938_s28, 16, %s19124_s24, %s10925_s22  }
 0x917 PF: > { %s19592_s21 = sld [smem:[#allocation6_spill]]  ;;  %p13499_p7 = scmp.ge.s32.totalorder %s14562_s15, 2 }
 0x919   : > { %p13496_p8 = pnand %p13499_p7, %p14696_p9 }
 0x91d   : > { %s10949_s25 = sand.u32 1, %s19592_s21  }
 0x91e   : > { %s10950_s27 = scalar_lea.sflag [#allocation4], %s10949_s25 }
 0x91f   : > { %14529 = dma.done.wait (!%p13496_p8), %s10950_s27, 16  }
 0x920   : > { %14531 = vsyncadd (!%p13496_p8), %s10950_s27, 4294967280  ;;  %s26_s15 = sadd.s32 1, %s14562_s15   ;;  %s19594_s30 = sld [smem:[#allocation7_spill]] }
 0x921   : > { %p23_p10 = scmp.ge.s32.totalorder %s26_s15, 8   ;;  %s19595_s27 = sld [smem:[#allocation13_spill]] }
 0x922   : > { %s19596_s28 = sld [smem:[#allocation8_spill]]  ;;  %s19597_s29 = sld [smem:[#allocation9_spill]] }
 0x923   : > { %s19598_s20 = sld [smem:[#allocation10_spill]]  ;;  %s19599_s14 = sld [smem:[#allocation11_spill]] }
 0x924   : > { %s19600_s25 = smov %s14538_s26  ;;  %25 = sbr.rel (!%p23_p10) target bundleno = 5 (0x5), region = 130 }
 0x926   : > { %s19601_s26 = smov %s19594_s30 }
 0x929   : > { %s19602_s30 = smov %s19598_s20 }
 0x92b   :  { %10954 = vsyncpa [#allocation4], 1 }
 0x92c   :  { %10956 = vsyncpa [#allocation4 + $0x1], 1 }

</bundles_post_ra>
